<compile_context>
chip_gen: v5e
topology: v5e:2x2
jax: 0.10.0
libtpu: 0.0.40
codegen_flags: <defaults>
</compile_context>

<pallas_src>
import functools

import jax
import jax.numpy as jnp
from jax.experimental import pallas as pl
from jax.experimental.pallas import tpu as pltpu

BN_EPS = 1e-5
_F32 = jnp.float32
_BF16 = jnp.bfloat16


def _compiler_params():
    return pltpu.CompilerParams(
        dimension_semantics=("parallel",),
        vmem_limit_bytes=64 * 1024 * 1024)


def _pick_tm(m, target=512):
    """Pick an M tile: multiple of 8, divides M if possible, >= 2 grid blocks."""
    if m < 16:
        return m
    cap = min(target, max(8, (m // 2) // 8 * 8))
    for cand in range(cap, 7, -8):
        if m % cand == 0:
            return cand
    return cap  # ragged tail block; Pallas masks OOB reads/writes


def _row_spec(tm, k):
    return pl.BlockSpec((tm, k), lambda i: (i, 0))


def _const_spec(shape):
    return pl.BlockSpec(shape, lambda i: (0, 0))


# ----------------------------------------------------------------------------
# Pallas kernels
# ----------------------------------------------------------------------------
def _mm_bias_kernel(x_ref, w_ref, b_ref, o_ref, *, relu):
    acc = jnp.dot(x_ref[...], w_ref[...], preferred_element_type=_F32) + b_ref[...]
    if relu:
        acc = jnp.maximum(acc, 0.0)
    o_ref[...] = acc.astype(o_ref.dtype)


def _dual_mm_kernel(xa_ref, xb_ref, wa_ref, wb_ref, b_ref, o_ref, *, relu):
    """Two independent dots sharing one row tiling; outputs go to column blocks."""
    na = wa_ref.shape[1]
    oa = jnp.dot(xa_ref[...], wa_ref[...], preferred_element_type=_F32) + b_ref[:, :na]
    ob = jnp.dot(xb_ref[...], wb_ref[...], preferred_element_type=_F32) + b_ref[:, na:]
    if relu:
        oa = jnp.maximum(oa, 0.0)
        ob = jnp.maximum(ob, 0.0)
    o_ref[:, :na] = oa.astype(o_ref.dtype)
    o_ref[:, na:] = ob.astype(o_ref.dtype)


def _cbr3_kernel(x12_ref, x3_ref, x4_ref, x02_ref, wa_ref, wb_ref, b_ref, o_ref):
    """Four 1x1 conv+BN+ReLU branches; column block i of the output equals
    cbr3_i(cat(x_i, x02)).  The shared-x02 contribution is one dot; each x_i
    contribution is a small per-branch dot."""
    c4 = x3_ref.shape[1]
    acc02 = jnp.dot(x02_ref[...], wb_ref[...], preferred_element_type=_F32)  # (tm, 4*c4)
    x12 = x12_ref[...]
    xs = (x12[:, :c4], x12[:, c4:], x3_ref[...], x4_ref[...])
    for i in range(4):
        a = jnp.dot(xs[i], wa_ref[i * c4:(i + 1) * c4, :],
                    preferred_element_type=_F32)
        o = a + acc02[:, i * c4:(i + 1) * c4] + b_ref[:, i * c4:(i + 1) * c4]
        o_ref[:, i * c4:(i + 1) * c4] = jnp.maximum(o, 0.0).astype(o_ref.dtype)


def _up_final_kernel(x_ref, wup_ref, w3_ref, bup_ref, b3_ref, o_ref):
    """Fused: 4-phase sub-pixel ConvTranspose(+BN+ReLU) followed by the 1x1
    conv3+bn3+relu3, one output-pixel parity (column group) at a time to keep
    the live intermediate small."""
    cup = w3_ref.shape[0]
    nf = w3_ref.shape[1]
    x = x_ref[...]
    w3 = w3_ref[...]
    b3 = b3_ref[...]
    for j in range(4):
        up = jnp.dot(x, wup_ref[:, j * cup:(j + 1) * cup],
                     preferred_element_type=_F32)
        up = jnp.maximum(up + bup_ref[:, j * cup:(j + 1) * cup], 0.0).astype(_BF16)
        out = jnp.dot(up, w3, preferred_element_type=_F32) + b3
        o_ref[:, j * nf:(j + 1) * nf] = jnp.maximum(out, 0.0).astype(o_ref.dtype)


# ----------------------------------------------------------------------------
# pallas_call wrappers
# ----------------------------------------------------------------------------
def fused_matmul(x2d, w, shift, relu, out_dtype=_BF16, target_tm=512):
    m, k = x2d.shape
    kw, nc = w.shape
    assert k == kw
    tm = _pick_tm(m, target_tm)
    return pl.pallas_call(
        functools.partial(_mm_bias_kernel, relu=relu),
        out_shape=jax.ShapeDtypeStruct((m, nc), out_dtype),
        grid=(pl.cdiv(m, tm),),
        in_specs=[_row_spec(tm, k), _const_spec((k, nc)), _const_spec((1, nc))],
        out_specs=_row_spec(tm, nc),
        compiler_params=_compiler_params(),
    )(x2d.astype(_BF16), w.astype(_BF16), shift.reshape(1, nc).astype(_F32))


def dual_matmul(xa, xb, wa, wb, shift, relu, out_dtype=_BF16, target_tm=512):
    m, ka = xa.shape
    mb, kb = xb.shape
    assert m == mb
    na, nb = wa.shape[1], wb.shape[1]
    tm = _pick_tm(m, target_tm)
    return pl.pallas_call(
        functools.partial(_dual_mm_kernel, relu=relu),
        out_shape=jax.ShapeDtypeStruct((m, na + nb), out_dtype),
        grid=(pl.cdiv(m, tm),),
        in_specs=[_row_spec(tm, ka), _row_spec(tm, kb),
                  _const_spec((ka, na)), _const_spec((kb, nb)),
                  _const_spec((1, na + nb))],
        out_specs=_row_spec(tm, na + nb),
        compiler_params=_compiler_params(),
    )(xa.astype(_BF16), xb.astype(_BF16), wa.astype(_BF16), wb.astype(_BF16),
      shift.reshape(1, na + nb).astype(_F32))


def cbr3_matmul(x12, x3, x4, x02, wa, wb, shift, out_dtype=_BF16, target_tm=512):
    m = x12.shape[0]
    c4 = x3.shape[1]
    c2 = x02.shape[1]
    tm = _pick_tm(m, target_tm)
    return pl.pallas_call(
        _cbr3_kernel,
        out_shape=jax.ShapeDtypeStruct((m, 4 * c4), out_dtype),
        grid=(pl.cdiv(m, tm),),
        in_specs=[_row_spec(tm, 2 * c4), _row_spec(tm, c4), _row_spec(tm, c4),
                  _row_spec(tm, c2),
                  _const_spec((4 * c4, c4)), _const_spec((c2, 4 * c4)),
                  _const_spec((1, 4 * c4))],
        out_specs=_row_spec(tm, 4 * c4),
        compiler_params=_compiler_params(),
    )(x12.astype(_BF16), x3.astype(_BF16), x4.astype(_BF16), x02.astype(_BF16),
      wa.astype(_BF16), wb.astype(_BF16), shift.reshape(1, 4 * c4).astype(_F32))


def upconv_final_matmul(cols_up, w_up, sh_up, w3, sh3, target_tm=256):
    m, k = cols_up.shape
    n_up = w_up.shape[1]                 # 4 * cup
    cup, nf = w3.shape
    tm = _pick_tm(m, target_tm)
    return pl.pallas_call(
        _up_final_kernel,
        out_shape=jax.ShapeDtypeStruct((m, 4 * nf), _F32),
        grid=(pl.cdiv(m, tm),),
        in_specs=[_row_spec(tm, k),
                  _const_spec((k, n_up)), _const_spec((cup, nf)),
                  _const_spec((1, n_up)), _const_spec((1, nf))],
        out_specs=_row_spec(tm, 4 * nf),
        compiler_params=_compiler_params(),
    )(cols_up.astype(_BF16), w_up.astype(_BF16), w3.astype(_BF16),
      sh_up.reshape(1, n_up).astype(_F32), sh3.reshape(1, nf).astype(_F32))


# ----------------------------------------------------------------------------
# Weight preparation (f32, traced once inside jit; tiny)
# ----------------------------------------------------------------------------
def _bn_scale_shift(bias, bn):
    gamma, beta, mean, var = bn
    s = gamma / jnp.sqrt(var + BN_EPS)
    return s, s * (bias - mean) + beta


def _fold_1x1(w, b, bn=None):
    # torch (Cout, Cin, 1, 1) -> (Cin, Cout) with BN scale folded; shift (Cout,)
    cout, cin = w.shape[0], w.shape[1]
    wm = w.reshape(cout, cin).T
    if bn is None:
        return wm, b
    s, shift = _bn_scale_shift(b, bn)
    return wm * s[None, :], shift


def _strip_w_mat(w):  # torch (Cout, Cin, 1, K) -> (K*Cin, Cout)
    cout, cin, _, k = w.shape
    return jnp.transpose(w[:, :, 0, :], (2, 1, 0)).reshape(k * cin, cout)


def _strip_h_mat(w):  # torch (Cout, Cin, K, 1) -> (K*Cin, Cout)
    cout, cin, k, _ = w.shape
    return jnp.transpose(w[:, :, :, 0], (2, 1, 0)).reshape(k * cin, cout)


def _cbr3_weights(p, c4, c2):
    """Per-branch weights split into the x_i part (wa) and the shared x02 part
    (wb), so the kernel never needs the concatenated feature tensor."""
    a_rows, b_cols, shifts = [], [], []
    for i in range(1, 5):
        w = p[f'cbr3_{i}_w'].reshape(c4, c4 + c2)            # (Cout, Cin)
        s, shift = _bn_scale_shift(p[f'cbr3_{i}_b'], p[f'cbr3_{i}_bn'])
        wm = w.T * s[None, :]                                # (c4+c2, c4), BN folded
        a_rows.append(wm[:c4])                               # acts on x_i
        b_cols.append(wm[c4:])                               # acts on x02
        shifts.append(shift)
    wa = jnp.concatenate(a_rows, axis=0)                     # (4*c4, c4)
    wb = jnp.concatenate(b_cols, axis=1)                     # (c2, 4*c4)
    return wa, wb, jnp.concatenate(shifts)


def _upconv_fused_weight(w_t, bias, bn):
    """4-phase sub-pixel weight for ConvTranspose2d(k=3, s=2, p=1, op=1).

    Input rows:   [x(p,q) | x(p,q+1) | x(p+1,q) | x(p+1,q+1)]   (each Cin)
    Output cols:  [out(2p,2q) | out(2p,2q+1) | out(2p+1,2q) | out(2p+1,2q+1)]
    """
    cin, cout = w_t.shape[0], w_t.shape[1]
    s, shift1 = _bn_scale_shift(bias, bn)

    def wk(kh, kw):
        return w_t[:, :, kh, kw] * s[None, :]                # BN scale folded

    z = jnp.zeros((cin, cout), _F32)
    w_up = jnp.concatenate([
        jnp.concatenate([wk(1, 1), wk(1, 2), wk(2, 1), wk(2, 2)], axis=1),
        jnp.concatenate([z,        wk(1, 0), z,        wk(2, 0)], axis=1),
        jnp.concatenate([z,        z,        wk(0, 1), wk(0, 2)], axis=1),
        jnp.concatenate([z,        z,        z,        wk(0, 0)], axis=1),
    ], axis=0)                                               # (4*Cin, 4*Cout)
    return w_up, jnp.tile(shift1, 4)


# ----------------------------------------------------------------------------
# im2col for the 9-tap strip convolutions (XLA side, bf16)
# ----------------------------------------------------------------------------
def _im2col_w(x, k):
    # (1,k) conv along W, 'same' padding. x: (N,H,W,C) -> (N*H*W, k*C)
    n, h, w, c = x.shape
    pad = k // 2
    xp = jnp.pad(x, ((0, 0), (0, 0), (pad, pad), (0, 0)))
    cols = jnp.concatenate([xp[:, :, t:t + w, :] for t in range(k)], axis=-1)
    return cols.reshape(n * h * w, k * c)


def _im2col_h(x, k):
    # (k,1) conv along H, 'same' padding. x: (N,H,W,C) -> (N*H*W, k*C)
    n, h, w, c = x.shape
    pad = k // 2
    xp = jnp.pad(x, ((0, 0), (pad, pad), (0, 0), (0, 0)))
    cols = jnp.concatenate([xp[:, t:t + h, :, :] for t in range(k)], axis=-1)
    return cols.reshape(n * h * w, k * c)


# ----------------------------------------------------------------------------
# h/v (inverse) transforms — exact NHWC equivalents of the PyTorch reshapes
# ----------------------------------------------------------------------------
def h_transform(x):
    n, h, w, c = x.shape
    xp = jnp.pad(x, ((0, 0), (0, 0), (0, w), (0, 0)))
    xf = xp.reshape(n, h * 2 * w, c)[:, :-w, :]
    return xf.reshape(n, h, 2 * w - 1, c)


def inv_h_transform(x):
    n, h, w2, c = x.shape            # w2 == 2H-1 (square input assumed)
    xf = x.reshape(n, h * w2, c)
    xf = jnp.pad(xf, ((0, 0), (0, h), (0, 0)))
    xr = xf.reshape(n, h, 2 * h, c)
    return xr[:, :, :h, :]


def v_transform(x):
    n, h, w, c = x.shape
    xt = jnp.transpose(x, (0, 2, 1, 3))                  # (N,W,H,C)
    xp = jnp.pad(xt, ((0, 0), (0, 0), (0, h), (0, 0)))
    xf = xp.reshape(n, w * 2 * h, c)[:, :-h, :]
    xr = xf.reshape(n, w, 2 * h - 1, c)
    return jnp.transpose(xr, (0, 2, 1, 3))               # (N,2H-1,W,C)


def inv_v_transform(x):
    n, h2, w, c = x.shape            # h2 == 2H-1 (square input assumed)
    xt = jnp.transpose(x, (0, 2, 1, 3))                  # (N,W,2H-1,C)
    xf = xt.reshape(n, w * h2, c)
    xf = jnp.pad(xf, ((0, 0), (0, w), (0, 0)))
    xr = xf.reshape(n, w, 2 * w, c)
    xr = xr[:, :, :w, :]
    return jnp.transpose(xr, (0, 2, 1, 3))


# ----------------------------------------------------------------------------
# Full DecoderBlock_v4 forward (in_p=True path: stride-2 upsample)
# ----------------------------------------------------------------------------
def decoder_block_v4_forward(x_nchw, p):
    x = jnp.transpose(x_nchw, (0, 2, 3, 1)).astype(_BF16)  # NCHW -> NHWC
    n, h, w, in_ch = x.shape
    if h != w:
        raise ValueError("DecoderBlock_v4 h/v transforms require H == W")
    c4 = p['cbr1_w'].shape[0]
    c2 = p['cbr2_w'].shape[0]
    m = n * h * w

    # --- stage 1: cbr1 + cbr2 fused (shared input, concatenated out channels)
    w1m, sh1 = _fold_1x1(p['cbr1_w'], p['cbr1_b'], p['cbr1_bn'])
    w2m, sh2 = _fold_1x1(p['cbr2_w'], p['cbr2_b'], p['cbr2_bn'])
    y12 = fused_matmul(x.reshape(m, in_ch),
                       jnp.concatenate([w1m, w2m], axis=1),
                       jnp.concatenate([sh1, sh2]), relu=True)
    x01 = y12[:, :c4].reshape(n, h, w, c4)
    x02 = y12[:, c4:]                                    # (m, c2)

    # --- stage 2a: deconv1 (1x9) || deconv2 (9x1) on x01, dual-dot kernel
    x12 = dual_matmul(_im2col_w(x01, 9), _im2col_h(x01, 9),
                      _strip_w_mat(p['deconv1_w']), _strip_h_mat(p['deconv2_w']),
                      jnp.concatenate([p['deconv1_b'], p['deconv2_b']]),
                      relu=False)                        # (m, 2*c4) = [x1|x2]

    # --- stage 2b: deconv3 on h_transform || deconv4 on v_transform
    x01h = h_transform(x01)                              # (n, h, 2w-1, c4)
    x01v = v_transform(x01)                              # (n, 2h-1, w, c4)
    y34 = dual_matmul(_im2col_h(x01h, 9), _im2col_w(x01v, 9),
                      _strip_h_mat(p['deconv3_w']), _strip_w_mat(p['deconv4_w']),
                      jnp.concatenate([p['deconv3_b'], p['deconv4_b']]),
                      relu=False)                        # (m', 2*c4)
    x3 = inv_h_transform(y34[:, :c4].reshape(n, h, 2 * w - 1, c4)).reshape(m, c4)
    x4 = inv_v_transform(y34[:, c4:].reshape(n, 2 * h - 1, w, c4)).reshape(m, c4)

    # --- stage 3: cbr3_1..4 fused; output directly equals cat((x1,x2,x3,x4),1)
    wa, wb, sh_c3 = _cbr3_weights(p, c4, c2)
    xc = cbr3_matmul(x12, x3, x4, x02, wa, wb, sh_c3)     # (m, 4*c4 == in_ch)

    # --- stage 4+5: ConvTranspose2d(3,s2,p1,op1)+BN+ReLU fused with conv3+bn3+relu3
    cup = p['deconvbr_w'].shape[1]
    nf = p['conv3_w'].shape[0]
    xc_img = xc.reshape(n, h, w, 4 * c4)
    xpad = jnp.pad(xc_img, ((0, 0), (0, 1), (0, 1), (0, 0)))
    cols_up = jnp.concatenate(
        [xpad[:, :h, :w, :], xpad[:, :h, 1:w + 1, :],
         xpad[:, 1:h + 1, :w, :], xpad[:, 1:h + 1, 1:w + 1, :]], axis=-1)
    w_up, sh_up = _upconv_fused_weight(p['deconvbr_w'], p['deconvbr_b'],
                                       p['deconvbr_bn'])
    w3m, sh3 = _fold_1x1(p['conv3_w'], p['conv3_b'], p['bn3'])
    out4 = upconv_final_matmul(cols_up.reshape(m, 4 * 4 * c4),
                               w_up, sh_up, w3m, sh3)     # (m, 4*nf) f32

    out = (out4.reshape(n, h, w, 2, 2, nf)
               .transpose(0, 1, 3, 2, 4, 5)
               .reshape(n, 2 * h, 2 * w, nf))
    return jnp.transpose(out, (0, 3, 1, 2))               # NHWC -> NCHW


# ----------------------------------------------------------------------------
# Deterministic parameter init (shapes from DecoderBlock_v4.__init__)
# ----------------------------------------------------------------------------
def init_params(key, in_ch, n_filters):
    c4, c2 = in_ch // 4, in_ch // 2
    keys = iter(jax.random.split(key, 64))

    def w(shape, s=0.1):
        return (s * jax.random.normal(next(keys), shape)).astype(_F32)

    def b(n):
        return (0.05 * jax.random.normal(next(keys), (n,))).astype(_F32)

    def bn(n):
        gamma = 1.0 + 0.1 * jax.random.normal(next(keys), (n,))
        beta = 0.1 * jax.random.normal(next(keys), (n,))
        mean = 0.1 * jax.random.normal(next(keys), (n,))
        var = 1.0 + 0.1 * jax.random.uniform(next(keys), (n,))
        return tuple(a.astype(_F32) for a in (gamma, beta, mean, var))

    p = {}
    p['cbr1_w'], p['cbr1_b'], p['cbr1_bn'] = w((c4, in_ch, 1, 1)), b(c4), bn(c4)
    p['cbr2_w'], p['cbr2_b'], p['cbr2_bn'] = w((c2, in_ch, 1, 1)), b(c2), bn(c2)
    p['deconv1_w'], p['deconv1_b'] = w((c4, c4, 1, 9)), b(c4)
    p['deconv2_w'], p['deconv2_b'] = w((c4, c4, 9, 1)), b(c4)
    p['deconv3_w'], p['deconv3_b'] = w((c4, c4, 9, 1)), b(c4)
    p['deconv4_w'], p['deconv4_b'] = w((c4, c4, 1, 9)), b(c4)
    for i in ('1', '2', '3', '4'):
        p[f'cbr3_{i}_w'] = w((c4, c4 + c2, 1, 1))
        p[f'cbr3_{i}_b'] = b(c4)
        p[f'cbr3_{i}_bn'] = bn(c4)
    p['deconvbr_w'] = w((in_ch, c4 + c4, 3, 3))   # ConvTranspose2d: (Cin,Cout,kh,kw)
    p['deconvbr_b'] = b(c4 + c4)
    p['deconvbr_bn'] = bn(c4 + c4)
    p['conv3_w'], p['conv3_b'], p['bn3'] = (w((n_filters, c4 + c4, 1, 1)),
                                            b(n_filters), bn(n_filters))
    return p


if __name__ == "__main__":
    key = jax.random.PRNGKey(0)
    kx, kp = jax.random.split(key)

    in_channels, n_filters = 16, 8
    N, H, W = 2, 16, 16                                   # square spatial required
    x = jax.random.normal(kx, (N, in_channels, H, W), _F32)
    params = init_params(kp, in_channels, n_filters)

    fwd = jax.jit(decoder_block_v4_forward)
    out = jax.block_until_ready(fwd(x, params))
    assert out.shape == (N, n_filters, 2 * H, 2 * W), out.shape
    assert bool(jnp.all(jnp.isfinite(out)))
    print("KERNEL_OK")
</pallas_src>

<mosaic_0001>
module attributes {stable_mosaic.version = 11 : i64} {
  func.func @_mm_bias_kernel(%arg0: i32, %arg1: memref<256x16xbf16, #tpu.memory_space<vmem>>, %arg2: memref<16x12xbf16, #tpu.memory_space<vmem>>, %arg3: memref<1x12xf32, #tpu.memory_space<vmem>>, %arg4: memref<256x12xbf16, #tpu.memory_space<vmem>>) attributes {dimension_semantics = [#tpu.dimension_semantics<parallel>], iteration_bounds = array<i64: 2>, scalar_prefetch = 0 : i64, scratch_operands = 0 : i64, tpu.core_type = #tpu.core_type<tc>, window_params = [{transform_indices = @transform_0, window_bounds = array<i64: 256, 16>}, {pipeline_mode = #tpu.pipeline_mode<synchronous>, transform_indices = @transform_1, window_bounds = array<i64: 16, 12>}, {pipeline_mode = #tpu.pipeline_mode<synchronous>, transform_indices = @transform_2, window_bounds = array<i64: 1, 12>}, {transform_indices = @transform_3, window_bounds = array<i64: 256, 12>}]} {
    %c0 = arith.constant 0 : index
    %c0_0 = arith.constant 0 : index
    %0 = vector.load %arg1[%c0, %c0_0] : memref<256x16xbf16, #tpu.memory_space<vmem>>, vector<256x16xbf16>
    %c0_1 = arith.constant 0 : index
    %c0_2 = arith.constant 0 : index
    %1 = vector.load %arg2[%c0_1, %c0_2] : memref<16x12xbf16, #tpu.memory_space<vmem>>, vector<16x12xbf16>
    %cst = arith.constant dense<0.000000e+00> : vector<256x12xf32>
    %2 = tpu.matmul %0, %1, %cst {dimension_numbers = #tpu.dot_dimension_numbers<[1], [0], [0], [1], [0, 0, 1, 1], [], []>} : vector<256x16xbf16>, vector<16x12xbf16>, vector<256x12xf32> -> vector<256x12xf32>
    %c0_3 = arith.constant 0 : index
    %c0_4 = arith.constant 0 : index
    %3 = vector.load %arg3[%c0_3, %c0_4] : memref<1x12xf32, #tpu.memory_space<vmem>>, vector<1x12xf32>
    %4 = vector.broadcast %3 : vector<1x12xf32> to vector<256x12xf32>
    %5 = arith.addf %2, %4 : vector<256x12xf32>
    %cst_5 = arith.constant 0.000000e+00 : f32
    %6 = vector.broadcast %cst_5 : f32 to vector<256x12xf32>
    %7 = arith.maximumf %5, %6 : vector<256x12xf32>
    %8 = arith.truncf %7 : vector<256x12xf32> to vector<256x12xbf16>
    %c0_6 = arith.constant 0 : index
    %c0_7 = arith.constant 0 : index
    %9 = vector.load %arg4[%c0_6, %c0_7] : memref<256x12xbf16, #tpu.memory_space<vmem>>, vector<256x12xbf16>
    tpu.vector_store %arg4[%c0_6, %c0_7], %8 {strides = array<i32>} : memref<256x12xbf16, #tpu.memory_space<vmem>>, vector<256x12xbf16>,
    return
  }
  func.func @transform_0(%arg0: i32) -> (i32, i32) {
    %c0_i32 = arith.constant 0 : i32
    %c0_i32_0 = arith.constant 0 : i32
    return %arg0, %c0_i32 : i32, i32
  }
  func.func @transform_1(%arg0: i32) -> (i32, i32) {
    %c0_i32 = arith.constant 0 : i32
    %c0_i32_0 = arith.constant 0 : i32
    %c0_i32_1 = arith.constant 0 : i32
    return %c0_i32, %c0_i32_0 : i32, i32
  }
  func.func @transform_2(%arg0: i32) -> (i32, i32) {
    %c0_i32 = arith.constant 0 : i32
    %c0_i32_0 = arith.constant 0 : i32
    %c0_i32_1 = arith.constant 0 : i32
    return %c0_i32, %c0_i32_0 : i32, i32
  }
  func.func @transform_3(%arg0: i32) -> (i32, i32) {
    %c0_i32 = arith.constant 0 : i32
    %c0_i32_0 = arith.constant 0 : i32
    return %arg0, %c0_i32 : i32, i32
  }
}

module attributes {stable_mosaic.version = 11 : i64} {
  func.func @_dual_mm_kernel(%arg0: i32, %arg1: memref<256x36xbf16, #tpu.memory_space<vmem>>, %arg2: memref<256x36xbf16, #tpu.memory_space<vmem>>, %arg3: memref<36x4xbf16, #tpu.memory_space<vmem>>, %arg4: memref<36x4xbf16, #tpu.memory_space<vmem>>, %arg5: memref<1x8xf32, #tpu.memory_space<vmem>>, %arg6: memref<256x8xbf16, #tpu.memory_space<vmem>>) attributes {dimension_semantics = [#tpu.dimension_semantics<parallel>], iteration_bounds = array<i64: 2>, scalar_prefetch = 0 : i64, scratch_operands = 0 : i64, tpu.core_type = #tpu.core_type<tc>, window_params = [{transform_indices = @transform_0, window_bounds = array<i64: 256, 36>}, {transform_indices = @transform_1, window_bounds = array<i64: 256, 36>}, {pipeline_mode = #tpu.pipeline_mode<synchronous>, transform_indices = @transform_2, window_bounds = array<i64: 36, 4>}, {pipeline_mode = #tpu.pipeline_mode<synchronous>, transform_indices = @transform_3, window_bounds = array<i64: 36, 4>}, {pipeline_mode = #tpu.pipeline_mode<synchronous>, transform_indices = @transform_4, window_bounds = array<i64: 1, 8>}, {transform_indices = @transform_5, window_bounds = array<i64: 256, 8>}]} {
    %c0 = arith.constant 0 : index
    %c0_0 = arith.constant 0 : index
    %0 = vector.load %arg1[%c0, %c0_0] : memref<256x36xbf16, #tpu.memory_space<vmem>>, vector<256x36xbf16>
    %c0_1 = arith.constant 0 : index
    %c0_2 = arith.constant 0 : index
    %1 = vector.load %arg3[%c0_1, %c0_2] : memref<36x4xbf16, #tpu.memory_space<vmem>>, vector<36x4xbf16>
    %cst = arith.constant dense<0.000000e+00> : vector<256x4xf32>
    %2 = tpu.matmul %0, %1, %cst {dimension_numbers = #tpu.dot_dimension_numbers<[1], [0], [0], [1], [0, 0, 1, 1], [], []>} : vector<256x36xbf16>, vector<36x4xbf16>, vector<256x4xf32> -> vector<256x4xf32>
    %c0_3 = arith.constant 0 : index
    %c0_4 = arith.constant 0 : index
    %3 = vector.load %arg5[%c0_3, %c0_4] : memref<1x8xf32, #tpu.memory_space<vmem>>, vector<1x4xf32>
    %4 = vector.broadcast %3 : vector<1x4xf32> to vector<256x4xf32>
    %5 = arith.addf %2, %4 : vector<256x4xf32>
    %c0_5 = arith.constant 0 : index
    %c0_6 = arith.constant 0 : index
    %6 = vector.load %arg2[%c0_5, %c0_6] : memref<256x36xbf16, #tpu.memory_space<vmem>>, vector<256x36xbf16>
    %c0_7 = arith.constant 0 : index
    %c0_8 = arith.constant 0 : index
    %7 = vector.load %arg4[%c0_7, %c0_8] : memref<36x4xbf16, #tpu.memory_space<vmem>>, vector<36x4xbf16>
    %cst_9 = arith.constant dense<0.000000e+00> : vector<256x4xf32>
    %8 = tpu.matmul %6, %7, %cst_9 {dimension_numbers = #tpu.dot_dimension_numbers<[1], [0], [0], [1], [0, 0, 1, 1], [], []>} : vector<256x36xbf16>, vector<36x4xbf16>, vector<256x4xf32> -> vector<256x4xf32>
    %c0_10 = arith.constant 0 : index
    %c4 = arith.constant 4 : index
    %9 = vector.load %arg5[%c0_10, %c4] : memref<1x8xf32, #tpu.memory_space<vmem>>, vector<1x4xf32>
    %10 = vector.broadcast %9 : vector<1x4xf32> to vector<256x4xf32>
    %11 = arith.addf %8, %10 : vector<256x4xf32>
    %12 = arith.truncf %5 : vector<256x4xf32> to vector<256x4xbf16>
    %c0_11 = arith.constant 0 : index
    %c0_12 = arith.constant 0 : index
    %13 = vector.load %arg6[%c0_11, %c0_12] : memref<256x8xbf16, #tpu.memory_space<vmem>>, vector<256x4xbf16>
    tpu.vector_store %arg6[%c0_11, %c0_12], %12 {strides = array<i32>} : memref<256x8xbf16, #tpu.memory_space<vmem>>, vector<256x4xbf16>,
    %14 = arith.truncf %11 : vector<256x4xf32> to vector<256x4xbf16>
    %c0_13 = arith.constant 0 : index
    %c4_14 = arith.constant 4 : index
    %15 = vector.load %arg6[%c0_13, %c4_14] : memref<256x8xbf16, #tpu.memory_space<vmem>>, vector<256x4xbf16>
    tpu.vector_store %arg6[%c0_13, %c4_14], %14 {strides = array<i32>} : memref<256x8xbf16, #tpu.memory_space<vmem>>, vector<256x4xbf16>,
    return
  }
  func.func @transform_0(%arg0: i32) -> (i32, i32) {
    %c0_i32 = arith.constant 0 : i32
    %c0_i32_0 = arith.constant 0 : i32
    return %arg0, %c0_i32 : i32, i32
  }
  func.func @transform_1(%arg0: i32) -> (i32, i32) {
    %c0_i32 = arith.constant 0 : i32
    %c0_i32_0 = arith.constant 0 : i32
    return %arg0, %c0_i32 : i32, i32
  }
  func.func @transform_2(%arg0: i32) -> (i32, i32) {
    %c0_i32 = arith.constant 0 : i32
    %c0_i32_0 = arith.constant 0 : i32
    %c0_i32_1 = arith.constant 0 : i32
    return %c0_i32, %c0_i32_0 : i32, i32
  }
  func.func @transform_3(%arg0: i32) -> (i32, i32) {
    %c0_i32 = arith.constant 0 : i32
    %c0_i32_0 = arith.constant 0 : i32
    %c0_i32_1 = arith.constant 0 : i32
    return %c0_i32, %c0_i32_0 : i32, i32
  }
  func.func @transform_4(%arg0: i32) -> (i32, i32) {
    %c0_i32 = arith.constant 0 : i32
    %c0_i32_0 = arith.constant 0 : i32
    %c0_i32_1 = arith.constant 0 : i32
    return %c0_i32, %c0_i32_0 : i32, i32
  }
  func.func @transform_5(%arg0: i32) -> (i32, i32) {
    %c0_i32 = arith.constant 0 : i32
    %c0_i32_0 = arith.constant 0 : i32
    return %arg0, %c0_i32 : i32, i32
  }
}

module attributes {stable_mosaic.version = 11 : i64} {
  func.func @_dual_mm_kernel(%arg0: i32, %arg1: memref<496x36xbf16, #tpu.memory_space<vmem>>, %arg2: memref<496x36xbf16, #tpu.memory_space<vmem>>, %arg3: memref<36x4xbf16, #tpu.memory_space<vmem>>, %arg4: memref<36x4xbf16, #tpu.memory_space<vmem>>, %arg5: memref<1x8xf32, #tpu.memory_space<vmem>>, %arg6: memref<496x8xbf16, #tpu.memory_space<vmem>>) attributes {dimension_semantics = [#tpu.dimension_semantics<parallel>], iteration_bounds = array<i64: 2>, scalar_prefetch = 0 : i64, scratch_operands = 0 : i64, tpu.core_type = #tpu.core_type<tc>, window_params = [{transform_indices = @transform_0, window_bounds = array<i64: 496, 36>}, {transform_indices = @transform_1, window_bounds = array<i64: 496, 36>}, {pipeline_mode = #tpu.pipeline_mode<synchronous>, transform_indices = @transform_2, window_bounds = array<i64: 36, 4>}, {pipeline_mode = #tpu.pipeline_mode<synchronous>, transform_indices = @transform_3, window_bounds = array<i64: 36, 4>}, {pipeline_mode = #tpu.pipeline_mode<synchronous>, transform_indices = @transform_4, window_bounds = array<i64: 1, 8>}, {transform_indices = @transform_5, window_bounds = array<i64: 496, 8>}]} {
    %c0 = arith.constant 0 : index
    %c0_0 = arith.constant 0 : index
    %0 = vector.load %arg1[%c0, %c0_0] : memref<496x36xbf16, #tpu.memory_space<vmem>>, vector<496x36xbf16>
    %c0_1 = arith.constant 0 : index
    %c0_2 = arith.constant 0 : index
    %1 = vector.load %arg3[%c0_1, %c0_2] : memref<36x4xbf16, #tpu.memory_space<vmem>>, vector<36x4xbf16>
    %cst = arith.constant dense<0.000000e+00> : vector<496x4xf32>
    %2 = tpu.matmul %0, %1, %cst {dimension_numbers = #tpu.dot_dimension_numbers<[1], [0], [0], [1], [0, 0, 1, 1], [], []>} : vector<496x36xbf16>, vector<36x4xbf16>, vector<496x4xf32> -> vector<496x4xf32>
    %c0_3 = arith.constant 0 : index
    %c0_4 = arith.constant 0 : index
    %3 = vector.load %arg5[%c0_3, %c0_4] : memref<1x8xf32, #tpu.memory_space<vmem>>, vector<1x4xf32>
    %4 = vector.broadcast %3 : vector<1x4xf32> to vector<496x4xf32>
    %5 = arith.addf %2, %4 : vector<496x4xf32>
    %c0_5 = arith.constant 0 : index
    %c0_6 = arith.constant 0 : index
    %6 = vector.load %arg2[%c0_5, %c0_6] : memref<496x36xbf16, #tpu.memory_space<vmem>>, vector<496x36xbf16>
    %c0_7 = arith.constant 0 : index
    %c0_8 = arith.constant 0 : index
    %7 = vector.load %arg4[%c0_7, %c0_8] : memref<36x4xbf16, #tpu.memory_space<vmem>>, vector<36x4xbf16>
    %cst_9 = arith.constant dense<0.000000e+00> : vector<496x4xf32>
    %8 = tpu.matmul %6, %7, %cst_9 {dimension_numbers = #tpu.dot_dimension_numbers<[1], [0], [0], [1], [0, 0, 1, 1], [], []>} : vector<496x36xbf16>, vector<36x4xbf16>, vector<496x4xf32> -> vector<496x4xf32>
    %c0_10 = arith.constant 0 : index
    %c4 = arith.constant 4 : index
    %9 = vector.load %arg5[%c0_10, %c4] : memref<1x8xf32, #tpu.memory_space<vmem>>, vector<1x4xf32>
    %10 = vector.broadcast %9 : vector<1x4xf32> to vector<496x4xf32>
    %11 = arith.addf %8, %10 : vector<496x4xf32>
    %12 = arith.truncf %5 : vector<496x4xf32> to vector<496x4xbf16>
    %c0_11 = arith.constant 0 : index
    %c0_12 = arith.constant 0 : index
    %13 = vector.load %arg6[%c0_11, %c0_12] : memref<496x8xbf16, #tpu.memory_space<vmem>>, vector<496x4xbf16>
    tpu.vector_store %arg6[%c0_11, %c0_12], %12 {strides = array<i32>} : memref<496x8xbf16, #tpu.memory_space<vmem>>, vector<496x4xbf16>,
    %14 = arith.truncf %11 : vector<496x4xf32> to vector<496x4xbf16>
    %c0_13 = arith.constant 0 : index
    %c4_14 = arith.constant 4 : index
    %15 = vector.load %arg6[%c0_13, %c4_14] : memref<496x8xbf16, #tpu.memory_space<vmem>>, vector<496x4xbf16>
    tpu.vector_store %arg6[%c0_13, %c4_14], %14 {strides = array<i32>} : memref<496x8xbf16, #tpu.memory_space<vmem>>, vector<496x4xbf16>,
    return
  }
  func.func @transform_0(%arg0: i32) -> (i32, i32) {
    %c0_i32 = arith.constant 0 : i32
    %c0_i32_0 = arith.constant 0 : i32
    return %arg0, %c0_i32 : i32, i32
  }
  func.func @transform_1(%arg0: i32) -> (i32, i32) {
    %c0_i32 = arith.constant 0 : i32
    %c0_i32_0 = arith.constant 0 : i32
    return %arg0, %c0_i32 : i32, i32
  }
  func.func @transform_2(%arg0: i32) -> (i32, i32) {
    %c0_i32 = arith.constant 0 : i32
    %c0_i32_0 = arith.constant 0 : i32
    %c0_i32_1 = arith.constant 0 : i32
    return %c0_i32, %c0_i32_0 : i32, i32
  }
  func.func @transform_3(%arg0: i32) -> (i32, i32) {
    %c0_i32 = arith.constant 0 : i32
    %c0_i32_0 = arith.constant 0 : i32
    %c0_i32_1 = arith.constant 0 : i32
    return %c0_i32, %c0_i32_0 : i32, i32
  }
  func.func @transform_4(%arg0: i32) -> (i32, i32) {
    %c0_i32 = arith.constant 0 : i32
    %c0_i32_0 = arith.constant 0 : i32
    %c0_i32_1 = arith.constant 0 : i32
    return %c0_i32, %c0_i32_0 : i32, i32
  }
  func.func @transform_5(%arg0: i32) -> (i32, i32) {
    %c0_i32 = arith.constant 0 : i32
    %c0_i32_0 = arith.constant 0 : i32
    return %arg0, %c0_i32 : i32, i32
  }
}

module attributes {stable_mosaic.version = 11 : i64} {
  func.func @_cbr3_kernel(%arg0: i32, %arg1: memref<256x8xbf16, #tpu.memory_space<vmem>>, %arg2: memref<256x4xbf16, #tpu.memory_space<vmem>>, %arg3: memref<256x4xbf16, #tpu.memory_space<vmem>>, %arg4: memref<256x8xbf16, #tpu.memory_space<vmem>>, %arg5: memref<16x4xbf16, #tpu.memory_space<vmem>>, %arg6: memref<8x16xbf16, #tpu.memory_space<vmem>>, %arg7: memref<1x16xf32, #tpu.memory_space<vmem>>, %arg8: memref<256x16xbf16, #tpu.memory_space<vmem>>) attributes {dimension_semantics = [#tpu.dimension_semantics<parallel>], iteration_bounds = array<i64: 2>, scalar_prefetch = 0 : i64, scratch_operands = 0 : i64, tpu.core_type = #tpu.core_type<tc>, window_params = [{transform_indices = @transform_0, window_bounds = array<i64: 256, 8>}, {transform_indices = @transform_1, window_bounds = array<i64: 256, 4>}, {transform_indices = @transform_2, window_bounds = array<i64: 256, 4>}, {transform_indices = @transform_3, window_bounds = array<i64: 256, 8>}, {pipeline_mode = #tpu.pipeline_mode<synchronous>, transform_indices = @transform_4, window_bounds = array<i64: 16, 4>}, {pipeline_mode = #tpu.pipeline_mode<synchronous>, transform_indices = @transform_5, window_bounds = array<i64: 8, 16>}, {pipeline_mode = #tpu.pipeline_mode<synchronous>, transform_indices = @transform_6, window_bounds = array<i64: 1, 16>}, {transform_indices = @transform_7, window_bounds = array<i64: 256, 16>}]} {
    %c0 = arith.constant 0 : index
    %c0_0 = arith.constant 0 : index
    %0 = vector.load %arg4[%c0, %c0_0] : memref<256x8xbf16, #tpu.memory_space<vmem>>, vector<256x8xbf16>
    %c0_1 = arith.constant 0 : index
    %c0_2 = arith.constant 0 : index
    %1 = vector.load %arg6[%c0_1, %c0_2] : memref<8x16xbf16, #tpu.memory_space<vmem>>, vector<8x16xbf16>
    %cst = arith.constant dense<0.000000e+00> : vector<256x16xf32>
    %2 = tpu.matmul %0, %1, %cst {dimension_numbers = #tpu.dot_dimension_numbers<[1], [0], [0], [1], [0, 0, 1, 1], [], []>} : vector<256x8xbf16>, vector<8x16xbf16>, vector<256x16xf32> -> vector<256x16xf32>
    %c0_3 = arith.constant 0 : index
    %c0_4 = arith.constant 0 : index
    %3 = vector.load %arg1[%c0_3, %c0_4] : memref<256x8xbf16, #tpu.memory_space<vmem>>, vector<256x8xbf16>
    %4 = vector.extract_strided_slice %3 {offsets = [0, 0], sizes = [256, 4], strides = [1, 1]} : vector<256x8xbf16> to vector<256x4xbf16>
    %5 = vector.extract_strided_slice %3 {offsets = [0, 4], sizes = [256, 4], strides = [1, 1]} : vector<256x8xbf16> to vector<256x4xbf16>
    %c0_5 = arith.constant 0 : index
    %c0_6 = arith.constant 0 : index
    %6 = vector.load %arg2[%c0_5, %c0_6] : memref<256x4xbf16, #tpu.memory_space<vmem>>, vector<256x4xbf16>
    %c0_7 = arith.constant 0 : index
    %c0_8 = arith.constant 0 : index
    %7 = vector.load %arg3[%c0_7, %c0_8] : memref<256x4xbf16, #tpu.memory_space<vmem>>, vector<256x4xbf16>
    %c0_9 = arith.constant 0 : index
    %c0_10 = arith.constant 0 : index
    %8 = vector.load %arg5[%c0_9, %c0_10] : memref<16x4xbf16, #tpu.memory_space<vmem>>, vector<4x4xbf16>
    %cst_11 = arith.constant dense<0.000000e+00> : vector<256x4xf32>
    %9 = tpu.matmul %4, %8, %cst_11 {dimension_numbers = #tpu.dot_dimension_numbers<[1], [0], [0], [1], [0, 0, 1, 1], [], []>} : vector<256x4xbf16>, vector<4x4xbf16>, vector<256x4xf32> -> vector<256x4xf32>
    %10 = vector.extract_strided_slice %2 {offsets = [0, 0], sizes = [256, 4], strides = [1, 1]} : vector<256x16xf32> to vector<256x4xf32>
    %11 = arith.addf %9, %10 : vector<256x4xf32>
    %c0_12 = arith.constant 0 : index
    %c0_13 = arith.constant 0 : index
    %12 = vector.load %arg7[%c0_12, %c0_13] : memref<1x16xf32, #tpu.memory_space<vmem>>, vector<1x4xf32>
    %13 = vector.broadcast %12 : vector<1x4xf32> to vector<256x4xf32>
    %14 = arith.addf %11, %13 : vector<256x4xf32>
    %cst_14 = arith.constant 0.000000e+00 : f32
    %15 = vector.broadcast %cst_14 : f32 to vector<256x4xf32>
    %16 = arith.maximumf %14, %15 : vector<256x4xf32>
    %17 = arith.truncf %16 : vector<256x4xf32> to vector<256x4xbf16>
    %c0_15 = arith.constant 0 : index
    %c0_16 = arith.constant 0 : index
    %18 = vector.load %arg8[%c0_15, %c0_16] : memref<256x16xbf16, #tpu.memory_space<vmem>>, vector<256x4xbf16>
    tpu.vector_store %arg8[%c0_15, %c0_16], %17 {strides = array<i32>} : memref<256x16xbf16, #tpu.memory_space<vmem>>, vector<256x4xbf16>,
    %c4 = arith.constant 4 : index
    %c0_17 = arith.constant 0 : index
    %19 = vector.load %arg5[%c4, %c0_17] : memref<16x4xbf16, #tpu.memory_space<vmem>>, vector<4x4xbf16>
    %cst_18 = arith.constant dense<0.000000e+00> : vector<256x4xf32>
    %20 = tpu.matmul %5, %19, %cst_18 {dimension_numbers = #tpu.dot_dimension_numbers<[1], [0], [0], [1], [0, 0, 1, 1], [], []>} : vector<256x4xbf16>, vector<4x4xbf16>, vector<256x4xf32> -> vector<256x4xf32>
    %21 = vector.extract_strided_slice %2 {offsets = [0, 4], sizes = [256, 4], strides = [1, 1]} : vector<256x16xf32> to vector<256x4xf32>
    %22 = arith.addf %20, %21 : vector<256x4xf32>
    %c0_19 = arith.constant 0 : index
    %c4_20 = arith.constant 4 : index
    %23 = vector.load %arg7[%c0_19, %c4_20] : memref<1x16xf32, #tpu.memory_space<vmem>>, vector<1x4xf32>
    %24 = vector.broadcast %23 : vector<1x4xf32> to vector<256x4xf32>
    %25 = arith.addf %22, %24 : vector<256x4xf32>
    %cst_21 = arith.constant 0.000000e+00 : f32
    %26 = vector.broadcast %cst_21 : f32 to vector<256x4xf32>
    %27 = arith.maximumf %25, %26 : vector<256x4xf32>
    %28 = arith.truncf %27 : vector<256x4xf32> to vector<256x4xbf16>
    %c0_22 = arith.constant 0 : index
    %c4_23 = arith.constant 4 : index
    %29 = vector.load %arg8[%c0_22, %c4_23] : memref<256x16xbf16, #tpu.memory_space<vmem>>, vector<256x4xbf16>
    tpu.vector_store %arg8[%c0_22, %c4_23], %28 {strides = array<i32>} : memref<256x16xbf16, #tpu.memory_space<vmem>>, vector<256x4xbf16>,
    %c8 = arith.constant 8 : index
    %c0_24 = arith.constant 0 : index
    %30 = vector.load %arg5[%c8, %c0_24] : memref<16x4xbf16, #tpu.memory_space<vmem>>, vector<4x4xbf16>
    %cst_25 = arith.constant dense<0.000000e+00> : vector<256x4xf32>
    %31 = tpu.matmul %6, %30, %cst_25 {dimension_numbers = #tpu.dot_dimension_numbers<[1], [0], [0], [1], [0, 0, 1, 1], [], []>} : vector<256x4xbf16>, vector<4x4xbf16>, vector<256x4xf32> -> vector<256x4xf32>
    %32 = vector.extract_strided_slice %2 {offsets = [0, 8], sizes = [256, 4], strides = [1, 1]} : vector<256x16xf32> to vector<256x4xf32>
    %33 = arith.addf %31, %32 : vector<256x4xf32>
    %c0_26 = arith.constant 0 : index
    %c8_27 = arith.constant 8 : index
    %34 = vector.load %arg7[%c0_26, %c8_27] : memref<1x16xf32, #tpu.memory_space<vmem>>, vector<1x4xf32>
    %35 = vector.broadcast %34 : vector<1x4xf32> to vector<256x4xf32>
    %36 = arith.addf %33, %35 : vector<256x4xf32>
    %cst_28 = arith.constant 0.000000e+00 : f32
    %37 = vector.broadcast %cst_28 : f32 to vector<256x4xf32>
    %38 = arith.maximumf %36, %37 : vector<256x4xf32>
    %39 = arith.truncf %38 : vector<256x4xf32> to vector<256x4xbf16>
    %c0_29 = arith.constant 0 : index
    %c8_30 = arith.constant 8 : index
    %40 = vector.load %arg8[%c0_29, %c8_30] : memref<256x16xbf16, #tpu.memory_space<vmem>>, vector<256x4xbf16>
    tpu.vector_store %arg8[%c0_29, %c8_30], %39 {strides = array<i32>} : memref<256x16xbf16, #tpu.memory_space<vmem>>, vector<256x4xbf16>,
    %c12 = arith.constant 12 : index
    %c0_31 = arith.constant 0 : index
    %41 = vector.load %arg5[%c12, %c0_31] : memref<16x4xbf16, #tpu.memory_space<vmem>>, vector<4x4xbf16>
    %cst_32 = arith.constant dense<0.000000e+00> : vector<256x4xf32>
    %42 = tpu.matmul %7, %41, %cst_32 {dimension_numbers = #tpu.dot_dimension_numbers<[1], [0], [0], [1], [0, 0, 1, 1], [], []>} : vector<256x4xbf16>, vector<4x4xbf16>, vector<256x4xf32> -> vector<256x4xf32>
    %43 = vector.extract_strided_slice %2 {offsets = [0, 12], sizes = [256, 4], strides = [1, 1]} : vector<256x16xf32> to vector<256x4xf32>
    %44 = arith.addf %42, %43 : vector<256x4xf32>
    %c0_33 = arith.constant 0 : index
    %c12_34 = arith.constant 12 : index
    %45 = vector.load %arg7[%c0_33, %c12_34] : memref<1x16xf32, #tpu.memory_space<vmem>>, vector<1x4xf32>
    %46 = vector.broadcast %45 : vector<1x4xf32> to vector<256x4xf32>
    %47 = arith.addf %44, %46 : vector<256x4xf32>
    %cst_35 = arith.constant 0.000000e+00 : f32
    %48 = vector.broadcast %cst_35 : f32 to vector<256x4xf32>
    %49 = arith.maximumf %47, %48 : vector<256x4xf32>
    %50 = arith.truncf %49 : vector<256x4xf32> to vector<256x4xbf16>
    %c0_36 = arith.constant 0 : index
    %c12_37 = arith.constant 12 : index
    %51 = vector.load %arg8[%c0_36, %c12_37] : memref<256x16xbf16, #tpu.memory_space<vmem>>, vector<256x4xbf16>
    tpu.vector_store %arg8[%c0_36, %c12_37], %50 {strides = array<i32>} : memref<256x16xbf16, #tpu.memory_space<vmem>>, vector<256x4xbf16>,
    return
  }
  func.func @transform_0(%arg0: i32) -> (i32, i32) {
    %c0_i32 = arith.constant 0 : i32
    %c0_i32_0 = arith.constant 0 : i32
    return %arg0, %c0_i32 : i32, i32
  }
  func.func @transform_1(%arg0: i32) -> (i32, i32) {
    %c0_i32 = arith.constant 0 : i32
    %c0_i32_0 = arith.constant 0 : i32
    return %arg0, %c0_i32 : i32, i32
  }
  func.func @transform_2(%arg0: i32) -> (i32, i32) {
    %c0_i32 = arith.constant 0 : i32
    %c0_i32_0 = arith.constant 0 : i32
    return %arg0, %c0_i32 : i32, i32
  }
  func.func @transform_3(%arg0: i32) -> (i32, i32) {
    %c0_i32 = arith.constant 0 : i32
    %c0_i32_0 = arith.constant 0 : i32
    return %arg0, %c0_i32 : i32, i32
  }
  func.func @transform_4(%arg0: i32) -> (i32, i32) {
    %c0_i32 = arith.constant 0 : i32
    %c0_i32_0 = arith.constant 0 : i32
    %c0_i32_1 = arith.constant 0 : i32
    return %c0_i32, %c0_i32_0 : i32, i32
  }
  func.func @transform_5(%arg0: i32) -> (i32, i32) {
    %c0_i32 = arith.constant 0 : i32
    %c0_i32_0 = arith.constant 0 : i32
    %c0_i32_1 = arith.constant 0 : i32
    return %c0_i32, %c0_i32_0 : i32, i32
  }
  func.func @transform_6(%arg0: i32) -> (i32, i32) {
    %c0_i32 = arith.constant 0 : i32
    %c0_i32_0 = arith.constant 0 : i32
    %c0_i32_1 = arith.constant 0 : i32
    return %c0_i32, %c0_i32_0 : i32, i32
  }
  func.func @transform_7(%arg0: i32) -> (i32, i32) {
    %c0_i32 = arith.constant 0 : i32
    %c0_i32_0 = arith.constant 0 : i32
    return %arg0, %c0_i32 : i32, i32
  }
}

module attributes {stable_mosaic.version = 11 : i64} {
  func.func @_up_final_kernel(%arg0: i32, %arg1: memref<256x64xbf16, #tpu.memory_space<vmem>>, %arg2: memref<64x32xbf16, #tpu.memory_space<vmem>>, %arg3: memref<8x8xbf16, #tpu.memory_space<vmem>>, %arg4: memref<1x32xf32, #tpu.memory_space<vmem>>, %arg5: memref<1x8xf32, #tpu.memory_space<vmem>>, %arg6: memref<256x32xf32, #tpu.memory_space<vmem>>) attributes {dimension_semantics = [#tpu.dimension_semantics<parallel>], iteration_bounds = array<i64: 2>, scalar_prefetch = 0 : i64, scratch_operands = 0 : i64, tpu.core_type = #tpu.core_type<tc>, window_params = [{transform_indices = @transform_0, window_bounds = array<i64: 256, 64>}, {pipeline_mode = #tpu.pipeline_mode<synchronous>, transform_indices = @transform_1, window_bounds = array<i64: 64, 32>}, {pipeline_mode = #tpu.pipeline_mode<synchronous>, transform_indices = @transform_2, window_bounds = array<i64: 8, 8>}, {pipeline_mode = #tpu.pipeline_mode<synchronous>, transform_indices = @transform_3, window_bounds = array<i64: 1, 32>}, {pipeline_mode = #tpu.pipeline_mode<synchronous>, transform_indices = @transform_4, window_bounds = array<i64: 1, 8>}, {transform_indices = @transform_5, window_bounds = array<i64: 256, 32>}]} {
    %c0 = arith.constant 0 : index
    %c0_0 = arith.constant 0 : index
    %0 = vector.load %arg1[%c0, %c0_0] : memref<256x64xbf16, #tpu.memory_space<vmem>>, vector<256x64xbf16>
    %c0_1 = arith.constant 0 : index
    %c0_2 = arith.constant 0 : index
    %1 = vector.load %arg3[%c0_1, %c0_2] : memref<8x8xbf16, #tpu.memory_space<vmem>>, vector<8x8xbf16>
    %c0_3 = arith.constant 0 : index
    %c0_4 = arith.constant 0 : index
    %2 = vector.load %arg5[%c0_3, %c0_4] : memref<1x8xf32, #tpu.memory_space<vmem>>, vector<1x8xf32>
    %c0_5 = arith.constant 0 : index
    %c0_6 = arith.constant 0 : index
    %3 = vector.load %arg2[%c0_5, %c0_6] : memref<64x32xbf16, #tpu.memory_space<vmem>>, vector<64x8xbf16>
    %cst = arith.constant dense<0.000000e+00> : vector<256x8xf32>
    %4 = tpu.matmul %0, %3, %cst {dimension_numbers = #tpu.dot_dimension_numbers<[1], [0], [0], [1], [0, 0, 1, 1], [], []>} : vector<256x64xbf16>, vector<64x8xbf16>, vector<256x8xf32> -> vector<256x8xf32>
    %c0_7 = arith.constant 0 : index
    %c0_8 = arith.constant 0 : index
    %5 = vector.load %arg4[%c0_7, %c0_8] : memref<1x32xf32, #tpu.memory_space<vmem>>, vector<1x8xf32>
    %6 = vector.broadcast %5 : vector<1x8xf32> to vector<256x8xf32>
    %7 = arith.addf %4, %6 : vector<256x8xf32>
    %cst_9 = arith.constant 0.000000e+00 : f32
    %8 = vector.broadcast %cst_9 : f32 to vector<256x8xf32>
    %9 = arith.maximumf %7, %8 : vector<256x8xf32>
    %10 = arith.truncf %9 : vector<256x8xf32> to vector<256x8xbf16>
    %cst_10 = arith.constant dense<0.000000e+00> : vector<256x8xf32>
    %11 = tpu.matmul %10, %1, %cst_10 {dimension_numbers = #tpu.dot_dimension_numbers<[1], [0], [0], [1], [0, 0, 1, 1], [], []>} : vector<256x8xbf16>, vector<8x8xbf16>, vector<256x8xf32> -> vector<256x8xf32>
    %12 = vector.broadcast %2 : vector<1x8xf32> to vector<256x8xf32>
    %13 = arith.addf %11, %12 : vector<256x8xf32>
    %cst_11 = arith.constant 0.000000e+00 : f32
    %14 = vector.broadcast %cst_11 : f32 to vector<256x8xf32>
    %15 = arith.maximumf %13, %14 : vector<256x8xf32>
    %c0_12 = arith.constant 0 : index
    %c0_13 = arith.constant 0 : index
    %16 = vector.load %arg6[%c0_12, %c0_13] : memref<256x32xf32, #tpu.memory_space<vmem>>, vector<256x8xf32>
    tpu.vector_store %arg6[%c0_12, %c0_13], %15 {strides = array<i32>} : memref<256x32xf32, #tpu.memory_space<vmem>>, vector<256x8xf32>,
    %c0_14 = arith.constant 0 : index
    %c8 = arith.constant 8 : index
    %17 = vector.load %arg2[%c0_14, %c8] : memref<64x32xbf16, #tpu.memory_space<vmem>>, vector<64x8xbf16>
    %cst_15 = arith.constant dense<0.000000e+00> : vector<256x8xf32>
    %18 = tpu.matmul %0, %17, %cst_15 {dimension_numbers = #tpu.dot_dimension_numbers<[1], [0], [0], [1], [0, 0, 1, 1], [], []>} : vector<256x64xbf16>, vector<64x8xbf16>, vector<256x8xf32> -> vector<256x8xf32>
    %c0_16 = arith.constant 0 : index
    %c8_17 = arith.constant 8 : index
    %19 = vector.load %arg4[%c0_16, %c8_17] : memref<1x32xf32, #tpu.memory_space<vmem>>, vector<1x8xf32>
    %20 = vector.broadcast %19 : vector<1x8xf32> to vector<256x8xf32>
    %21 = arith.addf %18, %20 : vector<256x8xf32>
    %cst_18 = arith.constant 0.000000e+00 : f32
    %22 = vector.broadcast %cst_18 : f32 to vector<256x8xf32>
    %23 = arith.maximumf %21, %22 : vector<256x8xf32>
    %24 = arith.truncf %23 : vector<256x8xf32> to vector<256x8xbf16>
    %cst_19 = arith.constant dense<0.000000e+00> : vector<256x8xf32>
    %25 = tpu.matmul %24, %1, %cst_19 {dimension_numbers = #tpu.dot_dimension_numbers<[1], [0], [0], [1], [0, 0, 1, 1], [], []>} : vector<256x8xbf16>, vector<8x8xbf16>, vector<256x8xf32> -> vector<256x8xf32>
    %26 = vector.broadcast %2 : vector<1x8xf32> to vector<256x8xf32>
    %27 = arith.addf %25, %26 : vector<256x8xf32>
    %cst_20 = arith.constant 0.000000e+00 : f32
    %28 = vector.broadcast %cst_20 : f32 to vector<256x8xf32>
    %29 = arith.maximumf %27, %28 : vector<256x8xf32>
    %c0_21 = arith.constant 0 : index
    %c8_22 = arith.constant 8 : index
    %30 = vector.load %arg6[%c0_21, %c8_22] : memref<256x32xf32, #tpu.memory_space<vmem>>, vector<256x8xf32>
    tpu.vector_store %arg6[%c0_21, %c8_22], %29 {strides = array<i32>} : memref<256x32xf32, #tpu.memory_space<vmem>>, vector<256x8xf32>,
    %c0_23 = arith.constant 0 : index
    %c16 = arith.constant 16 : index
    %31 = vector.load %arg2[%c0_23, %c16] : memref<64x32xbf16, #tpu.memory_space<vmem>>, vector<64x8xbf16>
    %cst_24 = arith.constant dense<0.000000e+00> : vector<256x8xf32>
    %32 = tpu.matmul %0, %31, %cst_24 {dimension_numbers = #tpu.dot_dimension_numbers<[1], [0], [0], [1], [0, 0, 1, 1], [], []>} : vector<256x64xbf16>, vector<64x8xbf16>, vector<256x8xf32> -> vector<256x8xf32>
    %c0_25 = arith.constant 0 : index
    %c16_26 = arith.constant 16 : index
    %33 = vector.load %arg4[%c0_25, %c16_26] : memref<1x32xf32, #tpu.memory_space<vmem>>, vector<1x8xf32>
    %34 = vector.broadcast %33 : vector<1x8xf32> to vector<256x8xf32>
    %35 = arith.addf %32, %34 : vector<256x8xf32>
    %cst_27 = arith.constant 0.000000e+00 : f32
    %36 = vector.broadcast %cst_27 : f32 to vector<256x8xf32>
    %37 = arith.maximumf %35, %36 : vector<256x8xf32>
    %38 = arith.truncf %37 : vector<256x8xf32> to vector<256x8xbf16>
    %cst_28 = arith.constant dense<0.000000e+00> : vector<256x8xf32>
    %39 = tpu.matmul %38, %1, %cst_28 {dimension_numbers = #tpu.dot_dimension_numbers<[1], [0], [0], [1], [0, 0, 1, 1], [], []>} : vector<256x8xbf16>, vector<8x8xbf16>, vector<256x8xf32> -> vector<256x8xf32>
    %40 = vector.broadcast %2 : vector<1x8xf32> to vector<256x8xf32>
    %41 = arith.addf %39, %40 : vector<256x8xf32>
    %cst_29 = arith.constant 0.000000e+00 : f32
    %42 = vector.broadcast %cst_29 : f32 to vector<256x8xf32>
    %43 = arith.maximumf %41, %42 : vector<256x8xf32>
    %c0_30 = arith.constant 0 : index
    %c16_31 = arith.constant 16 : index
    %44 = vector.load %arg6[%c0_30, %c16_31] : memref<256x32xf32, #tpu.memory_space<vmem>>, vector<256x8xf32>
    tpu.vector_store %arg6[%c0_30, %c16_31], %43 {strides = array<i32>} : memref<256x32xf32, #tpu.memory_space<vmem>>, vector<256x8xf32>,
    %c0_32 = arith.constant 0 : index
    %c24 = arith.constant 24 : index
    %45 = vector.load %arg2[%c0_32, %c24] : memref<64x32xbf16, #tpu.memory_space<vmem>>, vector<64x8xbf16>
    %cst_33 = arith.constant dense<0.000000e+00> : vector<256x8xf32>
    %46 = tpu.matmul %0, %45, %cst_33 {dimension_numbers = #tpu.dot_dimension_numbers<[1], [0], [0], [1], [0, 0, 1, 1], [], []>} : vector<256x64xbf16>, vector<64x8xbf16>, vector<256x8xf32> -> vector<256x8xf32>
    %c0_34 = arith.constant 0 : index
    %c24_35 = arith.constant 24 : index
    %47 = vector.load %arg4[%c0_34, %c24_35] : memref<1x32xf32, #tpu.memory_space<vmem>>, vector<1x8xf32>
    %48 = vector.broadcast %47 : vector<1x8xf32> to vector<256x8xf32>
    %49 = arith.addf %46, %48 : vector<256x8xf32>
    %cst_36 = arith.constant 0.000000e+00 : f32
    %50 = vector.broadcast %cst_36 : f32 to vector<256x8xf32>
    %51 = arith.maximumf %49, %50 : vector<256x8xf32>
    %52 = arith.truncf %51 : vector<256x8xf32> to vector<256x8xbf16>
    %cst_37 = arith.constant dense<0.000000e+00> : vector<256x8xf32>
    %53 = tpu.matmul %52, %1, %cst_37 {dimension_numbers = #tpu.dot_dimension_numbers<[1], [0], [0], [1], [0, 0, 1, 1], [], []>} : vector<256x8xbf16>, vector<8x8xbf16>, vector<256x8xf32> -> vector<256x8xf32>
    %54 = vector.broadcast %2 : vector<1x8xf32> to vector<256x8xf32>
    %55 = arith.addf %53, %54 : vector<256x8xf32>
    %cst_38 = arith.constant 0.000000e+00 : f32
    %56 = vector.broadcast %cst_38 : f32 to vector<256x8xf32>
    %57 = arith.maximumf %55, %56 : vector<256x8xf32>
    %c0_39 = arith.constant 0 : index
    %c24_40 = arith.constant 24 : index
    %58 = vector.load %arg6[%c0_39, %c24_40] : memref<256x32xf32, #tpu.memory_space<vmem>>, vector<256x8xf32>
    tpu.vector_store %arg6[%c0_39, %c24_40], %57 {strides = array<i32>} : memref<256x32xf32, #tpu.memory_space<vmem>>, vector<256x8xf32>,
    return
  }
  func.func @transform_0(%arg0: i32) -> (i32, i32) {
    %c0_i32 = arith.constant 0 : i32
    %c0_i32_0 = arith.constant 0 : i32
    return %arg0, %c0_i32 : i32, i32
  }
  func.func @transform_1(%arg0: i32) -> (i32, i32) {
    %c0_i32 = arith.constant 0 : i32
    %c0_i32_0 = arith.constant 0 : i32
    %c0_i32_1 = arith.constant 0 : i32
    return %c0_i32, %c0_i32_0 : i32, i32
  }
  func.func @transform_2(%arg0: i32) -> (i32, i32) {
    %c0_i32 = arith.constant 0 : i32
    %c0_i32_0 = arith.constant 0 : i32
    %c0_i32_1 = arith.constant 0 : i32
    return %c0_i32, %c0_i32_0 : i32, i32
  }
  func.func @transform_3(%arg0: i32) -> (i32, i32) {
    %c0_i32 = arith.constant 0 : i32
    %c0_i32_0 = arith.constant 0 : i32
    %c0_i32_1 = arith.constant 0 : i32
    return %c0_i32, %c0_i32_0 : i32, i32
  }
  func.func @transform_4(%arg0: i32) -> (i32, i32) {
    %c0_i32 = arith.constant 0 : i32
    %c0_i32_0 = arith.constant 0 : i32
    %c0_i32_1 = arith.constant 0 : i32
    return %c0_i32, %c0_i32_0 : i32, i32
  }
  func.func @transform_5(%arg0: i32) -> (i32, i32) {
    %c0_i32 = arith.constant 0 : i32
    %c0_i32_0 = arith.constant 0 : i32
    return %arg0, %c0_i32 : i32, i32
  }
}

</mosaic_0001>

<bundles_post_ra>
// kernel: decoder_block_v4_forward.5
= control target key start
LH: loop header
LB: loop body
LE: loop exit
PB: predicated region body
PF: predicated region fallthrough
CT: control target
= control target key end

     0   :  { %s742_s12 = smov 0   ;;  %s888_s0 = inlined_call_operand.vmem [shape: bf16[512,16], index: 0, kind: input, shape index: {}]   ;;  %s889_s1 = inlined_call_operand.vmem [shape: bf16[16,12], index: 1, kind: input, shape index: {}]   ;;  %s890_s2 = inlined_call_operand.vmem [shape: f32[1,12], index: 2, kind: input, shape index: {}]   ;;  %s891_s3 = inlined_call_operand.vmem [shape: bf16[512,12], index: 3, kind: output, shape index: {}]  }
   0x1 LB: > { %s590_s13 = sadd.s32 4294967295, %s720_s12   ;;  %p594_p0 = scmp.ge.s32.totalorder %s720_s12, 1  ;;  %s720_s12 = sphi %s742_s12, %s13_s12  }
   0x2   : > { %p138_p1 = scmp.lt.s32.totalorder %s720_s12, 3 }
   0x4   : > { %p139_p2 = pnand %p594_p0, %p138_p1 }
   0x5   : > { %s595_s16 = sshll.u32 (!%p139_p2), %s590_s13, 5 }
   0x6   : > { %142 = sbr.rel (%p139_p2) target bundleno = 213 (0xd5), region = 32  ;;  %p163_p3 = scmp.lt.s32.totalorder (!%p139_p2), %s595_s16, 63 }
   0xb   : > { %v701_v0 = vld [vmem:[%s889_s1] sm:$0xff]  ;;  %s893_s16 = smov (!%p163_p3, %s595_s16), 63  ;;  %vm299_vm0 = vcmask 130048   ;;  %vm501_vm1 = vcmask 93184  }
   0xc   : > { %355 = vmatpush.bf16.msra.mxu0 %v701_v0  ;;  %702 = vmatpush.bf16.msra.mxu1 %v701_v0  ;;  %s596_s17 = sshll.u32 %s893_s16, 2  ;;  %v780_v17 = vld [vmem:[%s890_s2] ss:$0 sm:$0xff] }
   0xd   : > { %703 = vmatpush.bf16.msra.mxu2 %v701_v0  ;;  %704 = vmatpush.bf16.msra.mxu3 %v701_v0  ;;  %s166_s20 = scalar_lea.vmem %s888_s0, %s596_s17  ;;  %s789_s25 = scalar_lea.vmem %s891_s3, %s596_s17 }
   0xe   : > { %v685_v1 = vld [vmem:[%s166_s20] sm:$0xff]  ;;  %v686_v5 = vld [vmem:[%s166_s20 + $0x8] sm:$0xff]  ;;  %v687_v9 = vld [vmem:[%s166_s20 + $0x10] sm:$0xff] }
   0xf   : > { %v689_v2 = vld [vmem:[%s166_s20 + $0x20] sm:$0xff]  ;;  %667 = vmatmul.msk.bf16.vlgmr.msra.gmra.mxu0 %vm299_vm0, %v685_v1  ;;  %v690_v6 = vld [vmem:[%s166_s20 + $0x28] sm:$0xff]  ;;  %v691_v10 = vld [vmem:[%s166_s20 + $0x30] sm:$0xff] }
  0x10   : > { %v693_v3 = vld [vmem:[%s166_s20 + $0x40] sm:$0xff]  ;;  %671 = vmatmul.msk.bf16.vlgmr.msra.gmra.mxu1 %vm299_vm0, %v689_v2  ;;  %v694_v7 = vld [vmem:[%s166_s20 + $0x48] sm:$0xff]  ;;  %v695_v11 = vld [vmem:[%s166_s20 + $0x50] sm:$0xff] }
  0x11   : > { %v697_v4 = vld [vmem:[%s166_s20 + $0x60] sm:$0xff]  ;;  %675 = vmatmul.msk.bf16.vlgmr.msra.gmra.mxu2 %vm299_vm0, %v693_v3  ;;  %v698_v8 = vld [vmem:[%s166_s20 + $0x68] sm:$0xff]  ;;  %v699_v12 = vld [vmem:[%s166_s20 + $0x70] sm:$0xff] }
  0x12   : > { %679 = vmatmul.msk.bf16.vlgmr.msra.gmra.mxu3 %vm299_vm0, %v697_v4  ;;  %v688_v13 = vld [vmem:[%s166_s20 + $0x18] sm:$0xff] }
  0x13   : > { %v692_v14 = vld [vmem:[%s166_s20 + $0x38] sm:$0xff] }
  0x14   : > { %v696_v15 = vld [vmem:[%s166_s20 + $0x58] sm:$0xff] }
  0x15   : > { %v700_v16 = vld [vmem:[%s166_s20 + $0x78] sm:$0xff] }
  0x1f   : > { %668 = vmatmul.msk.bf16.gmra.mxu0 %vm299_vm0, %v686_v5 }
  0x20   : > { %672 = vmatmul.msk.bf16.gmra.mxu1 %vm299_vm0, %v690_v6 }
  0x21   : > { %676 = vmatmul.msk.bf16.gmra.mxu2 %vm299_vm0, %v694_v7 }
  0x22   : > { %680 = vmatmul.msk.bf16.gmra.mxu3 %vm299_vm0, %v698_v8 }
  0x2f   : > { %669 = vmatmul.msk.bf16.gmra.mxu0 %vm299_vm0, %v687_v9 }
  0x30   : > { %673 = vmatmul.msk.bf16.gmra.mxu1 %vm299_vm0, %v691_v10 }
  0x31   : > { %677 = vmatmul.msk.bf16.gmra.mxu2 %vm299_vm0, %v695_v11 }
  0x32   : > { %681 = vmatmul.msk.bf16.gmra.mxu3 %vm299_vm0, %v699_v12 }
  0x3f   : > { %670 = vmatmul.msk.bf16.gmra.mxu0 %vm299_vm0, %v688_v13 }
  0x40   : > { %674 = vmatmul.msk.bf16.gmra.mxu1 %vm299_vm0, %v692_v14 }
  0x41   : > { %678 = vmatmul.msk.bf16.gmra.mxu2 %vm299_vm0, %v696_v15 }
  0x42   : > { %682 = vmatmul.msk.bf16.gmra.mxu3 %vm299_vm0, %v700_v16 }
  0x8c   : > { %v357_v18 = vpop.f32.mrf.mxu0 }
  0x8d   : > { %v377_v19 = vpop.f32.mrf.mxu1  ;;  %v358_v20 = vadd.f32 %v780_v17, %v357_v18 }
  0x8e   : > { %v378_v21 = vadd.f32 %v780_v17, %v377_v19 }
  0x8f   : > { %v437_v22 = vmax.f32 %v358_v20, 0.0 }
  0x90   : > { %v445_v23 = vmax.f32 %v378_v21, 0.0 }
  0x91   : > { %v469_v24 = vpack.c.bf16 %v437_v22, %v437_v22 }
  0x92   : > { %v477_v25 = vpack.c.bf16 %v445_v23, %v445_v23 }
  0x93   : > { %502 = vst.msk [vmem:[%s789_s25] sm:$0xf] %vm501_vm1, %v469_v24 }
  0x94   : > { %v397_v26 = vpop.f32.mrf.mxu2  ;;  %510 = vst.msk [vmem:[%s789_s25 + $0x20] sm:$0xf] %vm501_vm1, %v477_v25  ;;  %v359_v30 = vpop.f32.mrf.mxu0 }
  0x95   : > { %v417_v27 = vpop.f32.mrf.mxu3  ;;  %v398_v28 = vadd.f32 %v780_v17, %v397_v26  ;;  %v379_v31 = vpop.f32.mrf.mxu1  ;;  %v360_v32 = vadd.f32 %v780_v17, %v359_v30 }
  0x96   : > { %v418_v29 = vadd.f32 %v780_v17, %v417_v27  ;;  %v380_v33 = vadd.f32 %v780_v17, %v379_v31 }
  0x97   : > { %v453_v34 = vmax.f32 %v398_v28, 0.0  ;;  %v438_v36 = vmax.f32 %v360_v32, 0.0 }
  0x98   : > { %v461_v35 = vmax.f32 %v418_v29, 0.0  ;;  %v446_v37 = vmax.f32 %v380_v33, 0.0 }
  0x99   : > { %v485_v38 = vpack.c.bf16 %v453_v34, %v453_v34  ;;  %v470_v40 = vpack.c.bf16 %v438_v36, %v438_v36 }
  0x9a   : > { %v493_v39 = vpack.c.bf16 %v461_v35, %v461_v35  ;;  %v478_v41 = vpack.c.bf16 %v446_v37, %v446_v37 }
  0x9b   : > { %518 = vst.msk [vmem:[%s789_s25 + $0x40] sm:$0xf] %vm501_vm1, %v485_v38 }
  0x9c   : > { %526 = vst.msk [vmem:[%s789_s25 + $0x60] sm:$0xf] %vm501_vm1, %v493_v39  ;;  %v399_v42 = vpop.f32.mrf.mxu2  ;;  %v362_v46 = vpop.f32.mrf.mxu0 }
  0x9d   : > { %v419_v43 = vpop.f32.mrf.mxu3  ;;  %503 = vst.msk [vmem:[%s789_s25 + $0x4] sm:$0xf] %vm501_vm1, %v470_v40  ;;  %v400_v44 = vadd.f32 %v780_v17, %v399_v42  ;;  %v382_v47 = vpop.f32.mrf.mxu1  ;;  %v363_v48 = vadd.f32 %v780_v17, %v362_v46 }
  0x9e   : > { %v420_v45 = vadd.f32 %v780_v17, %v419_v43  ;;  %511 = vst.msk [vmem:[%s789_s25 + $0x24] sm:$0xf] %vm501_vm1, %v478_v41  ;;  %v383_v49 = vadd.f32 %v780_v17, %v382_v47 }
  0x9f   : > { %v454_v50 = vmax.f32 %v400_v44, 0.0  ;;  %v439_v52 = vmax.f32 %v363_v48, 0.0 }
  0xa0   : > { %v462_v51 = vmax.f32 %v420_v45, 0.0  ;;  %v447_v53 = vmax.f32 %v383_v49, 0.0 }
  0xa1   : > { %v486_v54 = vpack.c.bf16 %v454_v50, %v454_v50  ;;  %v471_v56 = vpack.c.bf16 %v439_v52, %v439_v52 }
  0xa2   : > { %v494_v55 = vpack.c.bf16 %v462_v51, %v462_v51  ;;  %v479_v57 = vpack.c.bf16 %v447_v53, %v447_v53 }
  0xa3   : > { %519 = vst.msk [vmem:[%s789_s25 + $0x44] sm:$0xf] %vm501_vm1, %v486_v54 }
  0xa4   : > { %527 = vst.msk [vmem:[%s789_s25 + $0x64] sm:$0xf] %vm501_vm1, %v494_v55  ;;  %v402_v58 = vpop.f32.mrf.mxu2  ;;  %v364_v62 = vpop.f32.mrf.mxu0 }
  0xa5   : > { %v422_v59 = vpop.f32.mrf.mxu3  ;;  %504 = vst.msk [vmem:[%s789_s25 + $0x8] sm:$0xf] %vm501_vm1, %v471_v56  ;;  %v403_v60 = vadd.f32 %v780_v17, %v402_v58  ;;  %v384_v63 = vpop.f32.mrf.mxu1  ;;  %v365_v0 = vadd.f32 %v780_v17, %v364_v62 }
  0xa6   : > { %v423_v61 = vadd.f32 %v780_v17, %v422_v59  ;;  %512 = vst.msk [vmem:[%s789_s25 + $0x28] sm:$0xf] %vm501_vm1, %v479_v57  ;;  %v385_v1 = vadd.f32 %v780_v17, %v384_v63 }
  0xa7   : > { %v455_v2 = vmax.f32 %v403_v60, 0.0  ;;  %v440_v4 = vmax.f32 %v365_v0, 0.0 }
  0xa8   : > { %v463_v3 = vmax.f32 %v423_v61, 0.0  ;;  %v448_v5 = vmax.f32 %v385_v1, 0.0 }
  0xa9   : > { %v487_v6 = vpack.c.bf16 %v455_v2, %v455_v2  ;;  %v472_v8 = vpack.c.bf16 %v440_v4, %v440_v4 }
  0xaa   : > { %v495_v7 = vpack.c.bf16 %v463_v3, %v463_v3  ;;  %v480_v9 = vpack.c.bf16 %v448_v5, %v448_v5 }
  0xab   : > { %520 = vst.msk [vmem:[%s789_s25 + $0x48] sm:$0xf] %vm501_vm1, %v487_v6 }
  0xac   : > { %528 = vst.msk [vmem:[%s789_s25 + $0x68] sm:$0xf] %vm501_vm1, %v495_v7  ;;  %v404_v10 = vpop.f32.mrf.mxu2  ;;  %v367_v14 = vpop.f32.mrf.mxu0 }
  0xad   : > { %v424_v11 = vpop.f32.mrf.mxu3  ;;  %505 = vst.msk [vmem:[%s789_s25 + $0xc] sm:$0xf] %vm501_vm1, %v472_v8  ;;  %v405_v12 = vadd.f32 %v780_v17, %v404_v10  ;;  %v387_v15 = vpop.f32.mrf.mxu1  ;;  %v368_v16 = vadd.f32 %v780_v17, %v367_v14 }
  0xae   : > { %v425_v13 = vadd.f32 %v780_v17, %v424_v11  ;;  %513 = vst.msk [vmem:[%s789_s25 + $0x2c] sm:$0xf] %vm501_vm1, %v480_v9  ;;  %v388_v18 = vadd.f32 %v780_v17, %v387_v15 }
  0xaf   : > { %v456_v19 = vmax.f32 %v405_v12, 0.0  ;;  %v441_v21 = vmax.f32 %v368_v16, 0.0 }
  0xb0   : > { %v464_v20 = vmax.f32 %v425_v13, 0.0  ;;  %v449_v22 = vmax.f32 %v388_v18, 0.0 }
  0xb1   : > { %v488_v23 = vpack.c.bf16 %v456_v19, %v456_v19  ;;  %v473_v25 = vpack.c.bf16 %v441_v21, %v441_v21 }
  0xb2   : > { %v496_v24 = vpack.c.bf16 %v464_v20, %v464_v20  ;;  %v481_v26 = vpack.c.bf16 %v449_v22, %v449_v22 }
  0xb3   : > { %521 = vst.msk [vmem:[%s789_s25 + $0x4c] sm:$0xf] %vm501_vm1, %v488_v23 }
  0xb4   : > { %529 = vst.msk [vmem:[%s789_s25 + $0x6c] sm:$0xf] %vm501_vm1, %v496_v24  ;;  %v407_v27 = vpop.f32.mrf.mxu2  ;;  %v369_v31 = vpop.f32.mrf.mxu0 }
  0xb5   : > { %v427_v28 = vpop.f32.mrf.mxu3  ;;  %506 = vst.msk [vmem:[%s789_s25 + $0x10] sm:$0xf] %vm501_vm1, %v473_v25  ;;  %v408_v29 = vadd.f32 %v780_v17, %v407_v27  ;;  %v389_v32 = vpop.f32.mrf.mxu1  ;;  %v370_v33 = vadd.f32 %v780_v17, %v369_v31 }
  0xb6   : > { %v428_v30 = vadd.f32 %v780_v17, %v427_v28  ;;  %514 = vst.msk [vmem:[%s789_s25 + $0x30] sm:$0xf] %vm501_vm1, %v481_v26  ;;  %v390_v34 = vadd.f32 %v780_v17, %v389_v32 }
  0xb7   : > { %v457_v35 = vmax.f32 %v408_v29, 0.0  ;;  %v442_v37 = vmax.f32 %v370_v33, 0.0 }
  0xb8   : > { %v465_v36 = vmax.f32 %v428_v30, 0.0  ;;  %v450_v38 = vmax.f32 %v390_v34, 0.0 }
  0xb9   : > { %v489_v39 = vpack.c.bf16 %v457_v35, %v457_v35  ;;  %v474_v41 = vpack.c.bf16 %v442_v37, %v442_v37 }
  0xba   : > { %v497_v40 = vpack.c.bf16 %v465_v36, %v465_v36  ;;  %v482_v42 = vpack.c.bf16 %v450_v38, %v450_v38 }
  0xbb   : > { %522 = vst.msk [vmem:[%s789_s25 + $0x50] sm:$0xf] %vm501_vm1, %v489_v39 }
  0xbc   : > { %530 = vst.msk [vmem:[%s789_s25 + $0x70] sm:$0xf] %vm501_vm1, %v497_v40  ;;  %v409_v43 = vpop.f32.mrf.mxu2  ;;  %v372_v47 = vpop.f32.mrf.mxu0 }
  0xbd   : > { %v429_v44 = vpop.f32.mrf.mxu3  ;;  %507 = vst.msk [vmem:[%s789_s25 + $0x14] sm:$0xf] %vm501_vm1, %v474_v41  ;;  %v410_v45 = vadd.f32 %v780_v17, %v409_v43  ;;  %v392_v48 = vpop.f32.mrf.mxu1  ;;  %v373_v49 = vadd.f32 %v780_v17, %v372_v47 }
  0xbe   : > { %v430_v46 = vadd.f32 %v780_v17, %v429_v44  ;;  %515 = vst.msk [vmem:[%s789_s25 + $0x34] sm:$0xf] %vm501_vm1, %v482_v42  ;;  %v393_v50 = vadd.f32 %v780_v17, %v392_v48 }
  0xbf   : > { %v458_v51 = vmax.f32 %v410_v45, 0.0  ;;  %v443_v53 = vmax.f32 %v373_v49, 0.0 }
  0xc0   : > { %v466_v52 = vmax.f32 %v430_v46, 0.0  ;;  %v451_v54 = vmax.f32 %v393_v50, 0.0 }
  0xc1   : > { %v490_v55 = vpack.c.bf16 %v458_v51, %v458_v51  ;;  %v475_v57 = vpack.c.bf16 %v443_v53, %v443_v53 }
  0xc2   : > { %v498_v56 = vpack.c.bf16 %v466_v52, %v466_v52  ;;  %v483_v58 = vpack.c.bf16 %v451_v54, %v451_v54 }
  0xc3   : > { %523 = vst.msk [vmem:[%s789_s25 + $0x54] sm:$0xf] %vm501_vm1, %v490_v55 }
  0xc4   : > { %531 = vst.msk [vmem:[%s789_s25 + $0x74] sm:$0xf] %vm501_vm1, %v498_v56  ;;  %v412_v59 = vpop.f32.mrf.mxu2  ;;  %v374_v63 = vpop.f32.mrf.mxu0 }
  0xc5   : > { %v432_v60 = vpop.f32.mrf.mxu3  ;;  %508 = vst.msk [vmem:[%s789_s25 + $0x18] sm:$0xf] %vm501_vm1, %v475_v57  ;;  %v413_v61 = vadd.f32 %v780_v17, %v412_v59  ;;  %v394_v0 = vpop.f32.mrf.mxu1  ;;  %v375_v1 = vadd.f32 %v780_v17, %v374_v63 }
  0xc6   : > { %v433_v62 = vadd.f32 %v780_v17, %v432_v60  ;;  %516 = vst.msk [vmem:[%s789_s25 + $0x38] sm:$0xf] %vm501_vm1, %v483_v58  ;;  %v395_v2 = vadd.f32 %v780_v17, %v394_v0 }
  0xc7   : > { %v459_v3 = vmax.f32 %v413_v61, 0.0  ;;  %v444_v5 = vmax.f32 %v375_v1, 0.0 }
  0xc8   : > { %v467_v4 = vmax.f32 %v433_v62, 0.0  ;;  %v452_v6 = vmax.f32 %v395_v2, 0.0 }
  0xc9   : > { %v491_v7 = vpack.c.bf16 %v459_v3, %v459_v3  ;;  %v476_v9 = vpack.c.bf16 %v444_v5, %v444_v5 }
  0xca   : > { %v499_v8 = vpack.c.bf16 %v467_v4, %v467_v4  ;;  %v484_v10 = vpack.c.bf16 %v452_v6, %v452_v6 }
  0xcb   : > { %524 = vst.msk [vmem:[%s789_s25 + $0x58] sm:$0xf] %vm501_vm1, %v491_v7 }
  0xcc   : > { %532 = vst.msk [vmem:[%s789_s25 + $0x78] sm:$0xf] %vm501_vm1, %v499_v8  ;;  %v414_v11 = vpop.f32.mrf.mxu2 }
  0xcd   : > { %v434_v12 = vpop.f32.mrf.mxu3  ;;  %509 = vst.msk [vmem:[%s789_s25 + $0x1c] sm:$0xf] %vm501_vm1, %v476_v9  ;;  %v415_v13 = vadd.f32 %v780_v17, %v414_v11 }
  0xce   : > { %v435_v14 = vadd.f32 %v780_v17, %v434_v12  ;;  %517 = vst.msk [vmem:[%s789_s25 + $0x3c] sm:$0xf] %vm501_vm1, %v484_v10 }
  0xcf   : > { %v460_v15 = vmax.f32 %v415_v13, 0.0 }
  0xd0   : > { %v468_v16 = vmax.f32 %v435_v14, 0.0 }
  0xd1   : > { %v492_v18 = vpack.c.bf16 %v460_v15, %v460_v15 }
  0xd2   : > { %v500_v19 = vpack.c.bf16 %v468_v16, %v468_v16 }
  0xd3   : > { %525 = vst.msk [vmem:[%s789_s25 + $0x5c] sm:$0xf] %vm501_vm1, %v492_v18 }
  0xd4   : > { %533 = vst.msk [vmem:[%s789_s25 + $0x7c] sm:$0xf] %vm501_vm1, %v500_v19 }
  0xd5 PF: > { %s13_s12 = sadd.s32 1, %s720_s12  }
  0xd6   : > { %p10_p4 = scmp.ge.s32.totalorder %s13_s12, 4  }
  0xd8   :  { %12 = sbr.rel (!%p10_p4) target bundleno = 1 (0x1), region = 62 }

// kernel: decoder_block_v4_forward.6
= control target key start
LH: loop header
LB: loop body
LE: loop exit
PB: predicated region body
PF: predicated region fallthrough
CT: control target
= control target key end

     0   :  { %s1412_s18 = smov 0   ;;  %s1759_s0 = inlined_call_operand.vmem [shape: bf16[512,36], index: 0, kind: input, shape index: {}]   ;;  %s1760_s1 = inlined_call_operand.vmem [shape: bf16[512,36], index: 1, kind: input, shape index: {}]   ;;  %s1761_s2 = inlined_call_operand.vmem [shape: bf16[36,4], index: 2, kind: input, shape index: {}]   ;;  %s1762_s3 = inlined_call_operand.vmem [shape: bf16[36,4], index: 3, kind: input, shape index: {}]   ;;  %s1763_s4 = inlined_call_operand.vmem [shape: f32[1,8], index: 4, kind: input, shape index: {}]   ;;  %s1764_s5 = inlined_call_operand.vmem [shape: bf16[512,8], index: 5, kind: output, shape index: {}]  }
   0x1 LB: > { %s1130_s19 = sadd.s32 4294967295, %s1378_s18   ;;  %p1134_p0 = scmp.ge.s32.totalorder %s1378_s18, 1  ;;  %s1378_s18 = sphi %s1412_s18, %s15_s18  }
   0x2   : > { %p199_p1 = scmp.lt.s32.totalorder %s1378_s18, 3 }
   0x4   : > { %p200_p2 = pnand %p1134_p0, %p199_p1 }
   0x5   : > { %s1135_s22 = sshll.u32 (!%p200_p2), %s1130_s19, 5  ;;  %s1380_s25 = smov (!%p200_p2), 124  }
   0x6   : > { %203 = sbr.rel (%p200_p2) target bundleno = 402 (0x192), region = 40  ;;  %p233_p3 = scmp.lt.s32.totalorder (!%p200_p2), %s1135_s22, 63 }
   0x7   : > { %s1381_s19 = smov (!%p200_p2), 4  }
   0xb   : > { %v565_v0 = vld [vmem:[%s1762_s3 + $0x10] sm:$0x3]  ;;  %v1426_v2 = vld [vmem:[%s1763_s4] ss:$0 sm:$0xff]  ;;  %vm436_vm0 = vcmask 1041408   ;;  %s1766_s22 = smov (!%p233_p3, %s1135_s22), 63 }
   0xc   : > { %v655_v1 = vunpack.c.l.b16 %v565_v0  ;;  %661 = vrot.lane.b32.xlu0 %v1426_v2, %s1380_s25  ;;  %v1354_v5 = vld [vmem:[%s1762_s3 + $0x8] sm:$0xff]  ;;  %s1433_s28 = sshll.u32 %s1766_s22, 2  ;;  %v1353_v6 = vld [vmem:[%s1762_s3] sm:$0xff]  ;;  %vm387_vm1 = vcmask 293888   ;;  %v287_v13 = vld [vmem:[%s1761_s2 + $0x10] sm:$0x3] }
   0xd   : > { %s1442_s8 = scalar_lea.vmem %s1760_s1, %s1433_s28  ;;  %v381_v14 = vunpack.c.l.b16 %v287_v13  ;;  %v1336_v19 = vld [vmem:[%s1761_s2 + $0x8] sm:$0xff]  ;;  %v1335_v20 = vld [vmem:[%s1761_s2] sm:$0xff]  ;;  %s1474_s17 = scalar_lea.vmem %s1759_s0, %s1433_s28  ;;  %vm836_vm2 = vcmask 27648   ;;  %vm1029_vm3 = vcmask 60448  }
   0xe   : > { %v658_v3 = vpack.c.b16 %v655_v1, %v655_v1  ;;  %v1337_v7 = vld [vmem:[%s1442_s8] sm:$0xff]  ;;  %v1338_v9 = vld [vmem:[%s1442_s8 + $0x8] sm:$0xff]  ;;  %v1339_v11 = vld [vmem:[%s1442_s8 + $0x10] sm:$0xff]  ;;  %s1558_s22 = scalar_lea.vmem %s1764_s5, %s1433_s28 }
   0xf   : > { %v1345_v8 = vld [vmem:[%s1442_s8 + $0x40] sm:$0xff]  ;;  %v1346_v10 = vld [vmem:[%s1442_s8 + $0x48] sm:$0xff]  ;;  %v1347_v12 = vld [vmem:[%s1442_s8 + $0x50] sm:$0xff]  ;;  %v384_v15 = vpack.c.b16 %v381_v14, %v381_v14 }
  0x10   : > { %v713_v4 = vsel %vm436_vm0, %v658_v3, 0  ;;  %v1340_v17 = vld [vmem:[%s1442_s8 + $0x18] sm:$0xff]  ;;  %v1319_v21 = vld [vmem:[%s1474_s17] sm:$0xff]  ;;  %v1320_v25 = vld [vmem:[%s1474_s17 + $0x8] sm:$0xff] }
  0x11   : > { %720 = vmatpush.bf16.msra.mxu1 %v713_v4  ;;  %1358 = vmatpush.bf16.msra.mxu3 %v713_v4  ;;  %v438_v16 = vsel %vm436_vm0, %v384_v15, 0  ;;  %v1348_v18 = vld [vmem:[%s1442_s8 + $0x58] sm:$0xff]  ;;  %v1327_v22 = vld [vmem:[%s1474_s17 + $0x40] sm:$0xff]  ;;  %v1328_v26 = vld [vmem:[%s1474_s17 + $0x48] sm:$0xff] }
  0x12   : > { %445 = vmatpush.bf16.msra.mxu0 %v438_v16  ;;  %1355 = vmatpush.bf16.msra.mxu2 %v438_v16  ;;  %v1341_v23 = vld [vmem:[%s1442_s8 + $0x20] sm:$0xff]  ;;  %v1342_v27 = vld [vmem:[%s1442_s8 + $0x28] sm:$0xff]  ;;  %v1329_v29 = vld [vmem:[%s1474_s17 + $0x50] sm:$0xff] }
  0x13   : > { %v1349_v24 = vld [vmem:[%s1442_s8 + $0x60] sm:$0xff]  ;;  %v1350_v28 = vld [vmem:[%s1442_s8 + $0x68] sm:$0xff]  ;;  %v1343_v30 = vld [vmem:[%s1442_s8 + $0x30] sm:$0xff] }
  0x14   : > { %v1351_v31 = vld [vmem:[%s1442_s8 + $0x70] sm:$0xff]  ;;  %v1330_v33 = vld [vmem:[%s1474_s17 + $0x58] sm:$0xff]  ;;  %v1331_v37 = vld [vmem:[%s1474_s17 + $0x60] sm:$0xff] }
  0x15   : > { %721 = vmatpush.bf16.msra.mxu1 %v1354_v5  ;;  %1359 = vmatpush.bf16.msra.mxu3 %v1354_v5  ;;  %v1321_v32 = vld [vmem:[%s1474_s17 + $0x10] sm:$0xff]  ;;  %v1344_v34 = vld [vmem:[%s1442_s8 + $0x38] sm:$0xff]  ;;  %v1323_v41 = vld [vmem:[%s1474_s17 + $0x20] sm:$0xff] }
  0x16   : > { %446 = vmatpush.bf16.msra.mxu0 %v1336_v19  ;;  %1356 = vmatpush.bf16.msra.mxu2 %v1336_v19  ;;  %v1352_v35 = vld [vmem:[%s1442_s8 + $0x78] sm:$0xff]  ;;  %v1332_v49 = vld [vmem:[%s1474_s17 + $0x68] sm:$0xff]  ;;  %v1333_v63 = vld [vmem:[%s1474_s17 + $0x70] sm:$0xff] }
  0x17   : > { %v1322_v36 = vld [vmem:[%s1474_s17 + $0x18] sm:$0xff]  ;;  %v1324_v55 = vld [vmem:[%s1474_s17 + $0x28] sm:$0xff]  ;;  %v1325_v5 = vld [vmem:[%s1474_s17 + $0x30] sm:$0xff] }
  0x19   : > { %722 = vmatpush.bf16.msra.mxu1 %v1353_v6  ;;  %1360 = vmatpush.bf16.msra.mxu3 %v1353_v6 }
  0x1a   : > { %447 = vmatpush.bf16.msra.mxu0 %v1335_v20  ;;  %1357 = vmatpush.bf16.msra.mxu2 %v1335_v20 }
  0x1c   : > { %1301 = vmatmul.msk.bf16.vlgmr.msra.gmra.mxu1 %vm387_vm1, %v1337_v7  ;;  %1309 = vmatmul.msk.bf16.vlgmr.msra.gmra.mxu3 %vm387_vm1, %v1345_v8 }
  0x1d   : > { %1213 = vmatmul.msk.bf16.vlgmr.msra.gmra.mxu0 %vm387_vm1, %v1319_v21  ;;  %1221 = vmatmul.msk.bf16.vlgmr.msra.gmra.mxu2 %vm387_vm1, %v1327_v22 }
  0x2c   : > { %1302 = vmatmul.msk.bf16.gmra.mxu1 %vm387_vm1, %v1338_v9  ;;  %1310 = vmatmul.msk.bf16.gmra.mxu3 %vm387_vm1, %v1346_v10 }
  0x2d   : > { %1214 = vmatmul.msk.bf16.gmra.mxu0 %vm387_vm1, %v1320_v25  ;;  %1222 = vmatmul.msk.bf16.gmra.mxu2 %vm387_vm1, %v1328_v26 }
  0x3c   : > { %1303 = vmatmul.msk.bf16.gmra.mxu1 %vm387_vm1, %v1339_v11  ;;  %1311 = vmatmul.msk.bf16.gmra.mxu3 %vm387_vm1, %v1347_v12  ;;  %v1334_v12 = vld [vmem:[%s1474_s17 + $0x78] sm:$0xff] }
  0x3d   : > { %1223 = vmatmul.msk.bf16.gmra.mxu2 %vm387_vm1, %v1329_v29  ;;  %1215 = vmatmul.msk.bf16.gmra.mxu0 %vm387_vm1, %v1321_v32 }
  0x4c   : > { %1304 = vmatmul.msk.bf16.gmra.mxu1 %vm387_vm1, %v1340_v17  ;;  %1312 = vmatmul.msk.bf16.gmra.mxu3 %vm387_vm1, %v1348_v18 }
  0x4d   : > { %1224 = vmatmul.msk.bf16.gmra.mxu2 %vm387_vm1, %v1330_v33  ;;  %1216 = vmatmul.msk.bf16.gmra.mxu0 %vm387_vm1, %v1322_v36 }
  0x5c   : > { %1305 = vmatmul.msk.bf16.gmra.mxu1 %vm387_vm1, %v1341_v23  ;;  %1313 = vmatmul.msk.bf16.gmra.mxu3 %vm387_vm1, %v1349_v24 }
  0x5d   : > { %1225 = vmatmul.msk.bf16.gmra.mxu2 %vm387_vm1, %v1331_v37  ;;  %1217 = vmatmul.msk.bf16.gmra.mxu0 %vm387_vm1, %v1323_v41 }
  0x6c   : > { %1306 = vmatmul.msk.bf16.gmra.mxu1 %vm387_vm1, %v1342_v27  ;;  %1314 = vmatmul.msk.bf16.gmra.mxu3 %vm387_vm1, %v1350_v28 }
  0x6d   : > { %1226 = vmatmul.msk.bf16.gmra.mxu2 %vm387_vm1, %v1332_v49  ;;  %1218 = vmatmul.msk.bf16.gmra.mxu0 %vm387_vm1, %v1324_v55 }
  0x7c   : > { %1307 = vmatmul.msk.bf16.gmra.mxu1 %vm387_vm1, %v1343_v30  ;;  %1315 = vmatmul.msk.bf16.gmra.mxu3 %vm387_vm1, %v1351_v31 }
  0x7d   : > { %1227 = vmatmul.msk.bf16.gmra.mxu2 %vm387_vm1, %v1333_v63  ;;  %1219 = vmatmul.msk.bf16.gmra.mxu0 %vm387_vm1, %v1325_v5 }
  0x7e   : > { %v1510_v38 = vpop.permute.xlu0 %661 }
  0x8c   : > { %1308 = vmatmul.msk.bf16.gmra.mxu1 %vm387_vm1, %v1344_v34  ;;  %1316 = vmatmul.msk.bf16.gmra.mxu3 %vm387_vm1, %v1352_v35 }
  0x8d   : > { %1228 = vmatmul.msk.bf16.gmra.mxu2 %vm387_vm1, %v1334_v12 }
  0x99   : > { %v724_v39 = vpop.f32.mrf.mxu1 }
  0x9a   : > { %v725_v40 = vadd.f32 %v724_v39, %v1510_v38  ;;  %v449_v25 = vpop.f32.mrf.mxu0 }
  0x9b   : > { %v450_v26 = vadd.f32 %v1426_v2, %v449_v25 }
  0x9c   : > { %v869_v42 = vpack.c.bf16 %v725_v40, %v725_v40  ;;  %v1326_v40 = vld [vmem:[%s1474_s17 + $0x38] sm:$0xff] }
  0x9d   : > { %v804_v28 = vpack.c.bf16 %v450_v26, %v450_v26  ;;  %1220 = vmatmul.msk.bf16.gmra.mxu0 %vm387_vm1, %v1326_v40 }
  0x9e   : > { %933 = vrot.lane.b32.xlu0 %v869_v42, %s1381_s19 }
  0x9f   : > { %v764_v43 = vpop.f32.mrf.mxu3  ;;  %837 = vst.msk [vmem:[%s1558_s22] sm:$0xf] %vm836_vm2, %v804_v28 }
  0xa0   : > { %v765_v44 = vadd.f32 %v764_v43, %v1510_v38  ;;  %v489_v32 = vpop.f32.mrf.mxu2 }
  0xa1   : > { %v726_v45 = vpop.f32.mrf.mxu1  ;;  %v490_v35 = vadd.f32 %v1426_v2, %v489_v32 }
  0xa2   : > { %v885_v46 = vpack.c.bf16 %v765_v44, %v765_v44  ;;  %v727_v47 = vadd.f32 %v726_v45, %v1510_v38  ;;  %v451_v36 = vpop.f32.mrf.mxu0 }
  0xa3   : > { %v820_v37 = vpack.c.bf16 %v490_v35, %v490_v35  ;;  %v452_v39 = vadd.f32 %v1426_v2, %v451_v36 }
  0xa4   : > { %v870_v48 = vpack.c.bf16 %v727_v47, %v727_v47  ;;  %965 = vrot.lane.b32.xlu2 %v885_v46, %s1381_s19 }
  0xa5   : > { %853 = vst.msk [vmem:[%s1558_s22 + $0x40] sm:$0xf] %vm836_vm2, %v820_v37  ;;  %v805_v42 = vpack.c.bf16 %v452_v39, %v452_v39 }
  0xa6   : > { %935 = vrot.lane.b32.xlu1 %v870_v48, %s1381_s19 }
  0xa7   : > { %v766_v50 = vpop.f32.mrf.mxu3  ;;  %838 = vst.msk [vmem:[%s1558_s22 + $0x4] sm:$0xf] %vm836_vm2, %v805_v42 }
  0xa8   : > { %v767_v51 = vadd.f32 %v766_v50, %v1510_v38  ;;  %v491_v46 = vpop.f32.mrf.mxu2 }
  0xa9   : > { %v729_v52 = vpop.f32.mrf.mxu1  ;;  %v492_v49 = vadd.f32 %v1426_v2, %v491_v46 }
  0xaa   : > { %v886_v53 = vpack.c.bf16 %v767_v51, %v767_v51  ;;  %v730_v54 = vadd.f32 %v729_v52, %v1510_v38  ;;  %v454_v50 = vpop.f32.mrf.mxu0 }
  0xab   : > { %v821_v51 = vpack.c.bf16 %v492_v49, %v492_v49  ;;  %v455_v52 = vadd.f32 %v1426_v2, %v454_v50 }
  0xac   : > { %v871_v56 = vpack.c.bf16 %v730_v54, %v730_v54  ;;  %967 = vrot.lane.b32.xlu0 %v886_v53, %s1381_s19 }
  0xad   : > { %854 = vst.msk [vmem:[%s1558_s22 + $0x44] sm:$0xf] %vm836_vm2, %v821_v51  ;;  %v806_v54 = vpack.c.bf16 %v455_v52, %v455_v52 }
  0xae   : > { %937 = vrot.lane.b32.xlu1 %v871_v56, %s1381_s19 }
  0xaf   : > { %v769_v57 = vpop.f32.mrf.mxu3  ;;  %839 = vst.msk [vmem:[%s1558_s22 + $0x8] sm:$0xf] %vm836_vm2, %v806_v54 }
  0xb0   : > { %v770_v58 = vadd.f32 %v769_v57, %v1510_v38 }
  0xb1   : > { %v731_v59 = vpop.f32.mrf.mxu1 }
  0xb2   : > { %v887_v60 = vpack.c.bf16 %v770_v58, %v770_v58  ;;  %v732_v61 = vadd.f32 %v731_v59, %v1510_v38  ;;  %v494_v58 = vpop.f32.mrf.mxu2 }
  0xb4   : > { %v872_v62 = vpack.c.bf16 %v732_v61, %v732_v61  ;;  %v495_v61 = vadd.f32 %v1426_v2, %v494_v58 }
  0xb6   : > { %939 = vrot.lane.b32.xlu2 %v872_v62, %s1381_s19  ;;  %969 = vrot.lane.b32.xlu1 %v887_v60, %s1381_s19  ;;  %v456_v62 = vpop.f32.mrf.mxu0  ;;  %v822_v63 = vpack.c.bf16 %v495_v61, %v495_v61 }
  0xb7   : > { %v771_v0 = vpop.f32.mrf.mxu3 }
  0xb8   : > { %v772_v1 = vadd.f32 %v771_v0, %v1510_v38  ;;  %v457_v0 = vadd.f32 %v1426_v2, %v456_v62  ;;  %855 = vst.msk [vmem:[%s1558_s22 + $0x48] sm:$0xf] %vm836_vm2, %v822_v63 }
  0xb9   : > { %v734_v3 = vpop.f32.mrf.mxu1 }
  0xba   : > { %v888_v4 = vpack.c.bf16 %v772_v1, %v772_v1  ;;  %v735_v7 = vadd.f32 %v734_v3, %v1510_v38  ;;  %v807_v3 = vpack.c.bf16 %v457_v0, %v457_v0 }
  0xbc   : > { %v873_v11 = vpack.c.bf16 %v735_v7, %v735_v7  ;;  %840 = vst.msk [vmem:[%s1558_s22 + $0xc] sm:$0xf] %vm836_vm2, %v807_v3 }
  0xbe   : > { %971 = vrot.lane.b32.xlu2 %v888_v4, %s1381_s19 }
  0xbf   : > { %v774_v6 = vpop.f32.mrf.mxu3 }
  0xc0   : > { %v775_v8 = vadd.f32 %v774_v6, %v1510_v38 }
  0xc1   : > { %v736_v9 = vpop.f32.mrf.mxu1 }
  0xc2   : > { %v889_v10 = vpack.c.bf16 %v775_v8, %v775_v8  ;;  %v737_v13 = vadd.f32 %v736_v9, %v1510_v38  ;;  %v496_v9 = vpop.f32.mrf.mxu2 }
  0xc4   : > { %973 = vrot.lane.b32.xlu0 %v889_v10, %s1381_s19  ;;  %v874_v17 = vpack.c.bf16 %v737_v13, %v737_v13  ;;  %v497_v10 = vadd.f32 %v1426_v2, %v496_v9 }
  0xc6   : > { %941 = vrot.lane.b32.xlu2 %v873_v11, %s1381_s19  ;;  %v823_v11 = vpack.c.bf16 %v497_v10, %v497_v10 }
  0xc7   : > { %v776_v14 = vpop.f32.mrf.mxu3 }
  0xc8   : > { %v777_v15 = vadd.f32 %v776_v14, %v1510_v38  ;;  %856 = vst.msk [vmem:[%s1558_s22 + $0x4c] sm:$0xf] %vm836_vm2, %v823_v11 }
  0xc9   : > { %v739_v16 = vpop.f32.mrf.mxu1 }
  0xca   : > { %v890_v18 = vpack.c.bf16 %v777_v15, %v777_v15  ;;  %v740_v19 = vadd.f32 %v739_v16, %v1510_v38 }
  0xcc   : > { %975 = vrot.lane.b32.xlu1 %v890_v18, %s1381_s19  ;;  %943 = vrot.lane.b32.xlu0 %v874_v17, %s1381_s19  ;;  %v875_v23 = vpack.c.bf16 %v740_v19, %v740_v19  ;;  %v459_v18 = vpop.f32.mrf.mxu0  ;;  %v499_v19 = vpop.f32.mrf.mxu2 }
  0xcf   : > { %v779_v20 = vpop.f32.mrf.mxu3 }
  0xd0   : > { %v780_v21 = vadd.f32 %v779_v20, %v1510_v38  ;;  %v460_v20 = vadd.f32 %v1426_v2, %v459_v18 }
  0xd1   : > { %v741_v22 = vpop.f32.mrf.mxu1 }
  0xd2   : > { %v891_v24 = vpack.c.bf16 %v780_v21, %v780_v21  ;;  %v742_v27 = vadd.f32 %v741_v22, %v1510_v38  ;;  %v500_v21 = vadd.f32 %v1426_v2, %v499_v19  ;;  %v808_v22 = vpack.c.bf16 %v460_v20, %v460_v20 }
  0xd4   : > { %977 = vrot.lane.b32.xlu2 %v891_v24, %s1381_s19  ;;  %945 = vrot.lane.b32.xlu1 %v875_v23, %s1381_s19  ;;  %v876_v33 = vpack.c.bf16 %v742_v27, %v742_v27  ;;  %v824_v23 = vpack.c.bf16 %v500_v21, %v500_v21  ;;  %841 = vst.msk [vmem:[%s1558_s22 + $0x10] sm:$0xf] %vm836_vm2, %v808_v22  ;;  %v501_v32 = vpop.f32.mrf.mxu2 }
  0xd6   : > { %857 = vst.msk [vmem:[%s1558_s22 + $0x50] sm:$0xf] %vm836_vm2, %v824_v23 }
  0xd7   : > { %v781_v29 = vpop.f32.mrf.mxu3 }
  0xd8   : > { %v782_v30 = vadd.f32 %v781_v29, %v1510_v38 }
  0xd9   : > { %v744_v31 = vpop.f32.mrf.mxu1 }
  0xda   : > { %v892_v34 = vpack.c.bf16 %v782_v30, %v782_v30  ;;  %v745_v41 = vadd.f32 %v744_v31, %v1510_v38  ;;  %v461_v31 = vpop.f32.mrf.mxu0 }
  0xdc   : > { %947 = vrot.lane.b32.xlu2 %v876_v33, %s1381_s19  ;;  %979 = vrot.lane.b32.xlu0 %v892_v34, %s1381_s19  ;;  %v877_v47 = vpack.c.bf16 %v745_v41, %v745_v41  ;;  %v462_v33 = vadd.f32 %v1426_v2, %v461_v31  ;;  %v502_v34 = vadd.f32 %v1426_v2, %v501_v32 }
  0xde   : > { %v809_v35 = vpack.c.bf16 %v462_v33, %v462_v33  ;;  %v825_v36 = vpack.c.bf16 %v502_v34, %v502_v34 }
  0xdf   : > { %v784_v43 = vpop.f32.mrf.mxu3 }
  0xe0   : > { %v785_v44 = vadd.f32 %v784_v43, %v1510_v38  ;;  %842 = vst.msk [vmem:[%s1558_s22 + $0x14] sm:$0xf] %vm836_vm2, %v809_v35 }
  0xe1   : > { %v746_v45 = vpop.f32.mrf.mxu1  ;;  %858 = vst.msk [vmem:[%s1558_s22 + $0x54] sm:$0xf] %vm836_vm2, %v825_v36 }
  0xe2   : > { %v893_v48 = vpack.c.bf16 %v785_v44, %v785_v44  ;;  %v747_v53 = vadd.f32 %v746_v45, %v1510_v38  ;;  %v464_v43 = vpop.f32.mrf.mxu0  ;;  %v504_v44 = vpop.f32.mrf.mxu2 }
  0xe3   : > { %v465_v45 = vadd.f32 %v1426_v2, %v464_v43  ;;  %v505_v46 = vadd.f32 %v1426_v2, %v504_v44 }
  0xe4   : > { %981 = vrot.lane.b32.xlu1 %v893_v48, %s1381_s19  ;;  %949 = vrot.lane.b32.xlu0 %v877_v47, %s1381_s19  ;;  %v878_v59 = vpack.c.bf16 %v747_v53, %v747_v53 }
  0xe5   : > { %v810_v48 = vpack.c.bf16 %v465_v45, %v465_v45  ;;  %v826_v49 = vpack.c.bf16 %v505_v46, %v505_v46 }
  0xe7   : > { %v786_v55 = vpop.f32.mrf.mxu3  ;;  %843 = vst.msk [vmem:[%s1558_s22 + $0x18] sm:$0xf] %vm836_vm2, %v810_v48 }
  0xe8   : > { %v787_v56 = vadd.f32 %v786_v55, %v1510_v38  ;;  %859 = vst.msk [vmem:[%s1558_s22 + $0x58] sm:$0xf] %vm836_vm2, %v826_v49 }
  0xe9   : > { %v749_v57 = vpop.f32.mrf.mxu1 }
  0xea   : > { %v894_v60 = vpack.c.bf16 %v787_v56, %v787_v56  ;;  %v750_v1 = vadd.f32 %v749_v57, %v1510_v38  ;;  %v466_v56 = vpop.f32.mrf.mxu0  ;;  %v506_v57 = vpop.f32.mrf.mxu2 }
  0xeb   : > { %v467_v58 = vadd.f32 %v1426_v2, %v466_v56 }
  0xec   : > { %983 = vrot.lane.b32.xlu2 %v894_v60, %s1381_s19  ;;  %951 = vrot.lane.b32.xlu1 %v878_v59, %s1381_s19  ;;  %v879_v7 = vpack.c.bf16 %v750_v1, %v750_v1  ;;  %v507_v59 = vadd.f32 %v1426_v2, %v506_v57 }
  0xed   : > { %v811_v62 = vpack.c.bf16 %v467_v58, %v467_v58 }
  0xee   : > { %v827_v63 = vpack.c.bf16 %v507_v59, %v507_v59 }
  0xef   : > { %v789_v4 = vpop.f32.mrf.mxu3  ;;  %844 = vst.msk [vmem:[%s1558_s22 + $0x1c] sm:$0xf] %vm836_vm2, %v811_v62 }
  0xf0   : > { %v790_v5 = vadd.f32 %v789_v4, %v1510_v38  ;;  %860 = vst.msk [vmem:[%s1558_s22 + $0x5c] sm:$0xf] %vm836_vm2, %v827_v63 }
  0xf1   : > { %v751_v6 = vpop.f32.mrf.mxu1 }
  0xf2   : > { %v895_v8 = vpack.c.bf16 %v790_v5, %v790_v5  ;;  %v752_v12 = vadd.f32 %v751_v6, %v1510_v38 }
  0xf4   : > { %953 = vrot.lane.b32.xlu2 %v879_v7, %s1381_s19  ;;  %985 = vrot.lane.b32.xlu0 %v895_v8, %s1381_s19  ;;  %v880_v16 = vpack.c.bf16 %v752_v12, %v752_v12  ;;  %v469_v7 = vpop.f32.mrf.mxu0  ;;  %v509_v8 = vpop.f32.mrf.mxu2 }
  0xf5   : > { %v470_v9 = vadd.f32 %v1426_v2, %v469_v7 }
  0xf7   : > { %v791_v13 = vpop.f32.mrf.mxu3  ;;  %v812_v11 = vpack.c.bf16 %v470_v9, %v470_v9 }
  0xf8   : > { %v792_v14 = vadd.f32 %v791_v13, %v1510_v38 }
  0xf9   : > { %v754_v15 = vpop.f32.mrf.mxu1  ;;  %845 = vst.msk [vmem:[%s1558_s22 + $0x20] sm:$0xf] %vm836_vm2, %v812_v11 }
  0xfa   : > { %v896_v17 = vpack.c.bf16 %v792_v14, %v792_v14  ;;  %v755_v24 = vadd.f32 %v754_v15, %v1510_v38 }
  0xfc   : > { %987 = vrot.lane.b32.xlu1 %v896_v17, %s1381_s19  ;;  %955 = vrot.lane.b32.xlu0 %v880_v16, %s1381_s19  ;;  %v881_v29 = vpack.c.bf16 %v755_v24, %v755_v24  ;;  %v471_v16 = vpop.f32.mrf.mxu0  ;;  %v511_v17 = vpop.f32.mrf.mxu2 }
  0xfd   : > { %v472_v18 = vadd.f32 %v1426_v2, %v471_v16  ;;  %v512_v19 = vadd.f32 %v1426_v2, %v511_v17 }
  0xfe   : > { %v966_v25 = vpop.permute.xlu2 %965 }
  0xff   : > { %v794_v26 = vpop.f32.mrf.mxu3  ;;  %1046 = vst.msk [vmem:[%s1558_s22 + $0x40] sm:$0xf] %vm1029_vm3, %v966_v25  ;;  %v813_v20 = vpack.c.bf16 %v472_v18, %v472_v18  ;;  %v829_v21 = vpack.c.bf16 %v512_v19, %v512_v19 }
 0x100   : > { %v795_v27 = vadd.f32 %v794_v26, %v1510_v38 }
 0x101   : > { %v756_v28 = vpop.f32.mrf.mxu1  ;;  %846 = vst.msk [vmem:[%s1558_s22 + $0x24] sm:$0xf] %vm836_vm2, %v813_v20 }
 0x102   : > { %v897_v30 = vpack.c.bf16 %v795_v27, %v795_v27  ;;  %v757_v37 = vadd.f32 %v756_v28, %v1510_v38  ;;  %862 = vst.msk [vmem:[%s1558_s22 + $0x64] sm:$0xf] %vm836_vm2, %v829_v21 }
 0x104   : > { %989 = vrot.lane.b32.xlu2 %v897_v30, %s1381_s19  ;;  %957 = vrot.lane.b32.xlu1 %v881_v29, %s1381_s19  ;;  %v882_v41 = vpack.c.bf16 %v757_v37, %v757_v37  ;;  %v474_v23 = vpop.f32.mrf.mxu0  ;;  %v514_v24 = vpop.f32.mrf.mxu2 }
 0x105   : > { %v475_v25 = vadd.f32 %v1426_v2, %v474_v23  ;;  %v515_v26 = vadd.f32 %v1426_v2, %v514_v24 }
 0x107   : > { %v796_v39 = vpop.f32.mrf.mxu3  ;;  %v814_v27 = vpack.c.bf16 %v475_v25, %v475_v25  ;;  %v830_v28 = vpack.c.bf16 %v515_v26, %v515_v26 }
 0x108   : > { %v797_v51 = vadd.f32 %v796_v39, %v1510_v38 }
 0x109   : > { %v759_v40 = vpop.f32.mrf.mxu1  ;;  %847 = vst.msk [vmem:[%s1558_s22 + $0x28] sm:$0xf] %vm836_vm2, %v814_v27 }
 0x10a   : > { %v760_v42 = vadd.f32 %v759_v40, %v1510_v38  ;;  %v898_v60 = vpack.c.bf16 %v797_v51, %v797_v51  ;;  %863 = vst.msk [vmem:[%s1558_s22 + $0x68] sm:$0xf] %vm836_vm2, %v830_v28 }
 0x10c   : > { %v883_v47 = vpack.c.bf16 %v760_v42, %v760_v42  ;;  %959 = vrot.lane.b32.xlu2 %v882_v41, %s1381_s19  ;;  %v476_v30 = vpop.f32.mrf.mxu0  ;;  %v516_v31 = vpop.f32.mrf.mxu2 }
 0x10d   : > { %v477_v32 = vadd.f32 %v1426_v2, %v476_v30  ;;  %v517_v33 = vadd.f32 %v1426_v2, %v516_v31 }
 0x10e   : > { %961 = vrot.lane.b32.xlu0 %v883_v47, %s1381_s19 }
 0x10f   : > { %v799_v50 = vpop.f32.mrf.mxu3  ;;  %v815_v34 = vpack.c.bf16 %v477_v32, %v477_v32  ;;  %v831_v37 = vpack.c.bf16 %v517_v33, %v517_v33 }
 0x110   : > { %v940_v52 = vpop.permute.xlu2 %939  ;;  %v934_v53 = vpop.permute.xlu0 %933  ;;  %v800_v1 = vadd.f32 %v799_v50, %v1510_v38 }
 0x111   : > { %1033 = vst.msk [vmem:[%s1558_s22 + $0xc] sm:$0xf] %vm1029_vm3, %v940_v52  ;;  %v761_v54 = vpop.f32.mrf.mxu1 }
 0x112   : > { %1030 = vst.msk [vmem:[%s1558_s22] sm:$0xf] %vm1029_vm3, %v934_v53  ;;  %v762_v55 = vadd.f32 %v761_v54, %v1510_v38  ;;  %v899_v10 = vpack.c.bf16 %v800_v1, %v800_v1 }
 0x113   : > { %848 = vst.msk [vmem:[%s1558_s22 + $0x2c] sm:$0xf] %vm836_vm2, %v815_v34 }
 0x114   : > { %v884_v61 = vpack.c.bf16 %v762_v55, %v762_v55  ;;  %864 = vst.msk [vmem:[%s1558_s22 + $0x6c] sm:$0xf] %vm836_vm2, %v831_v37  ;;  %v479_v39 = vpop.f32.mrf.mxu0  ;;  %v519_v40 = vpop.f32.mrf.mxu2 }
 0x115   : > { %v480_v41 = vadd.f32 %v1426_v2, %v479_v39  ;;  %v520_v42 = vadd.f32 %v1426_v2, %v519_v40 }
 0x116   : > { %963 = vrot.lane.b32.xlu1 %v884_v61, %s1381_s19  ;;  %991 = vrot.lane.b32.xlu0 %v898_v60, %s1381_s19 }
 0x117   : > { %v801_v0 = vpop.f32.mrf.mxu3  ;;  %v816_v43 = vpack.c.bf16 %v480_v41, %v480_v41  ;;  %v832_v46 = vpack.c.bf16 %v520_v42, %v520_v42 }
 0x118   : > { %v802_v3 = vadd.f32 %v801_v0, %v1510_v38  ;;  %v972_v4 = vpop.permute.xlu2 %971  ;;  %v936_v5 = vpop.permute.xlu1 %935  ;;  %v510_v38 = vadd.f32 %v1426_v2, %v509_v8 }
 0x119   : > { %1049 = vst.msk [vmem:[%s1558_s22 + $0x4c] sm:$0xf] %vm1029_vm3, %v972_v4 }
 0x11a   : > { %v900_v6 = vpack.c.bf16 %v802_v3, %v802_v3  ;;  %1031 = vst.msk [vmem:[%s1558_s22 + $0x4] sm:$0xf] %vm1029_vm3, %v936_v5  ;;  %v828_v13 = vpack.c.bf16 %v510_v38, %v510_v38 }
 0x11b   : > { %849 = vst.msk [vmem:[%s1558_s22 + $0x30] sm:$0xf] %vm836_vm2, %v816_v43 }
 0x11c   : > { %995 = vrot.lane.b32.xlu2 %v900_v6, %s1381_s19  ;;  %861 = vst.msk [vmem:[%s1558_s22 + $0x60] sm:$0xf] %vm836_vm2, %v828_v13  ;;  %v481_v47 = vpop.f32.mrf.mxu0  ;;  %v521_v48 = vpop.f32.mrf.mxu2 }
 0x11d   : > { %865 = vst.msk [vmem:[%s1558_s22 + $0x70] sm:$0xf] %vm836_vm2, %v832_v46  ;;  %v482_v49 = vadd.f32 %v1426_v2, %v481_v47  ;;  %v522_v50 = vadd.f32 %v1426_v2, %v521_v48 }
 0x11e   : > { %993 = vrot.lane.b32.xlu1 %v899_v10, %s1381_s19  ;;  %v968_v12 = vpop.permute.xlu0 %967 }
 0x11f   : > { %1047 = vst.msk [vmem:[%s1558_s22 + $0x44] sm:$0xf] %vm1029_vm3, %v968_v12  ;;  %v817_v51 = vpack.c.bf16 %v482_v49, %v482_v49  ;;  %v833_v54 = vpack.c.bf16 %v522_v50, %v522_v50 }
 0x120   : > { %v942_v14 = vpop.permute.xlu2 %941  ;;  %v938_v15 = vpop.permute.xlu1 %937 }
 0x121   : > { %1034 = vst.msk [vmem:[%s1558_s22 + $0x10] sm:$0xf] %vm1029_vm3, %v942_v14 }
 0x122   : > { %1032 = vst.msk [vmem:[%s1558_s22 + $0x8] sm:$0xf] %vm1029_vm3, %v938_v15 }
 0x123   : > { %850 = vst.msk [vmem:[%s1558_s22 + $0x34] sm:$0xf] %vm836_vm2, %v817_v51 }
 0x124   : > { %866 = vst.msk [vmem:[%s1558_s22 + $0x74] sm:$0xf] %vm836_vm2, %v833_v54  ;;  %v524_v55 = vpop.f32.mrf.mxu2  ;;  %v484_v1 = vpop.f32.mrf.mxu0 }
 0x125   : > { %v525_v56 = vadd.f32 %v1426_v2, %v524_v55  ;;  %v485_v3 = vadd.f32 %v1426_v2, %v484_v1 }
 0x127   : > { %v834_v57 = vpack.c.bf16 %v525_v56, %v525_v56  ;;  %v818_v6 = vpack.c.bf16 %v485_v3, %v485_v3 }
 0x128   : > { %v970_v22 = vpop.permute.xlu1 %969 }
 0x129   : > { %1048 = vst.msk [vmem:[%s1558_s22 + $0x48] sm:$0xf] %vm1029_vm3, %v970_v22 }
 0x12a   : > { %867 = vst.msk [vmem:[%s1558_s22 + $0x78] sm:$0xf] %vm836_vm2, %v834_v57 }
 0x12b   : > { %851 = vst.msk [vmem:[%s1558_s22 + $0x38] sm:$0xf] %vm836_vm2, %v818_v6 }
 0x12c   : > { %v526_v60 = vpop.f32.mrf.mxu2  ;;  %v486_v7 = vpop.f32.mrf.mxu0 }
 0x12d   : > { %v527_v61 = vadd.f32 %v1426_v2, %v526_v60  ;;  %v487_v8 = vadd.f32 %v1426_v2, %v486_v7 }
 0x12e   : > { %v978_v29 = vpop.permute.xlu2 %977 }
 0x12f   : > { %1052 = vst.msk [vmem:[%s1558_s22 + $0x58] sm:$0xf] %vm1029_vm3, %v978_v29  ;;  %v835_v62 = vpack.c.bf16 %v527_v61, %v527_v61  ;;  %v819_v10 = vpack.c.bf16 %v487_v8, %v487_v8 }
 0x131   : > { %868 = vst.msk [vmem:[%s1558_s22 + $0x7c] sm:$0xf] %vm836_vm2, %v835_v62 }
 0x132   : > { %852 = vst.msk [vmem:[%s1558_s22 + $0x3c] sm:$0xf] %vm836_vm2, %v819_v10 }
 0x136   : > { %v948_v35 = vpop.permute.xlu2 %947  ;;  %v974_v36 = vpop.permute.xlu0 %973 }
 0x137   : > { %1037 = vst.msk [vmem:[%s1558_s22 + $0x1c] sm:$0xf] %vm1029_vm3, %v948_v35 }
 0x138   : > { %1050 = vst.msk [vmem:[%s1558_s22 + $0x50] sm:$0xf] %vm1029_vm3, %v974_v36 }
 0x13e   : > { %v976_v44 = vpop.permute.xlu1 %975  ;;  %v944_v45 = vpop.permute.xlu0 %943 }
 0x13f   : > { %1051 = vst.msk [vmem:[%s1558_s22 + $0x54] sm:$0xf] %vm1029_vm3, %v976_v44 }
 0x140   : > { %1035 = vst.msk [vmem:[%s1558_s22 + $0x14] sm:$0xf] %vm1029_vm3, %v944_v45 }
 0x146   : > { %v984_v52 = vpop.permute.xlu2 %983  ;;  %v946_v53 = vpop.permute.xlu1 %945 }
 0x147   : > { %1055 = vst.msk [vmem:[%s1558_s22 + $0x64] sm:$0xf] %vm1029_vm3, %v984_v52 }
 0x148   : > { %1036 = vst.msk [vmem:[%s1558_s22 + $0x18] sm:$0xf] %vm1029_vm3, %v946_v53 }
 0x14e   : > { %v954_v58 = vpop.permute.xlu2 %953  ;;  %v980_v59 = vpop.permute.xlu0 %979 }
 0x14f   : > { %1040 = vst.msk [vmem:[%s1558_s22 + $0x28] sm:$0xf] %vm1029_vm3, %v954_v58 }
 0x150   : > { %1053 = vst.msk [vmem:[%s1558_s22 + $0x5c] sm:$0xf] %vm1029_vm3, %v980_v59 }
 0x156   : > { %v982_v63 = vpop.permute.xlu1 %981  ;;  %v950_v0 = vpop.permute.xlu0 %949 }
 0x157   : > { %1054 = vst.msk [vmem:[%s1558_s22 + $0x60] sm:$0xf] %vm1029_vm3, %v982_v63 }
 0x158   : > { %1038 = vst.msk [vmem:[%s1558_s22 + $0x20] sm:$0xf] %vm1029_vm3, %v950_v0 }
 0x15e   : > { %v990_v4 = vpop.permute.xlu2 %989  ;;  %v952_v5 = vpop.permute.xlu1 %951 }
 0x15f   : > { %1058 = vst.msk [vmem:[%s1558_s22 + $0x70] sm:$0xf] %vm1029_vm3, %v990_v4 }
 0x160   : > { %1039 = vst.msk [vmem:[%s1558_s22 + $0x24] sm:$0xf] %vm1029_vm3, %v952_v5 }
 0x166   : > { %v960_v9 = vpop.permute.xlu2 %959  ;;  %v986_v38 = vpop.permute.xlu0 %985 }
 0x167   : > { %1043 = vst.msk [vmem:[%s1558_s22 + $0x34] sm:$0xf] %vm1029_vm3, %v960_v9 }
 0x168   : > { %1056 = vst.msk [vmem:[%s1558_s22 + $0x68] sm:$0xf] %vm1029_vm3, %v986_v38 }
 0x16e   : > { %v988_v11 = vpop.permute.xlu1 %987  ;;  %v956_v12 = vpop.permute.xlu0 %955 }
 0x16f   : > { %1057 = vst.msk [vmem:[%s1558_s22 + $0x6c] sm:$0xf] %vm1029_vm3, %v988_v11 }
 0x170   : > { %1041 = vst.msk [vmem:[%s1558_s22 + $0x2c] sm:$0xf] %vm1029_vm3, %v956_v12 }
 0x176   : > { %v996_v2 = vpop.permute.xlu2 %995  ;;  %v958_v13 = vpop.permute.xlu1 %957 }
 0x177   : > { %1061 = vst.msk [vmem:[%s1558_s22 + $0x7c] sm:$0xf] %vm1029_vm3, %v996_v2 }
 0x178   : > { %1042 = vst.msk [vmem:[%s1558_s22 + $0x30] sm:$0xf] %vm1029_vm3, %v958_v13 }
 0x180   : > { %v962_v14 = vpop.permute.xlu0 %961 }
 0x181   : > { %1044 = vst.msk [vmem:[%s1558_s22 + $0x38] sm:$0xf] %vm1029_vm3, %v962_v14 }
 0x188   : > { %v964_v15 = vpop.permute.xlu1 %963  ;;  %v992_v16 = vpop.permute.xlu0 %991 }
 0x189   : > { %1045 = vst.msk [vmem:[%s1558_s22 + $0x3c] sm:$0xf] %vm1029_vm3, %v964_v15 }
 0x18a   : > { %1059 = vst.msk [vmem:[%s1558_s22 + $0x74] sm:$0xf] %vm1029_vm3, %v992_v16 }
 0x190   : > { %v994_v17 = vpop.permute.xlu1 %993 }
 0x191   : > { %1060 = vst.msk [vmem:[%s1558_s22 + $0x78] sm:$0xf] %vm1029_vm3, %v994_v17 }
 0x192 PF: > { %s15_s18 = sadd.s32 1, %s1378_s18  }
 0x193   : > { %p12_p4 = scmp.ge.s32.totalorder %s15_s18, 4  }
 0x195   :  { %14 = sbr.rel (!%p12_p4) target bundleno = 1 (0x1), region = 73 }

// kernel: decoder_block_v4_forward.7
= control target key start
LH: loop header
LB: loop body
LE: loop exit
PB: predicated region body
PF: predicated region fallthrough
CT: control target
= control target key end

     0   :  { %s2280_s18 = smov 0   ;;  %s2902_s0 = inlined_call_operand.vmem [shape: bf16[992,36], index: 0, kind: input, shape index: {}]   ;;  %s2903_s1 = inlined_call_operand.vmem [shape: bf16[992,36], index: 1, kind: input, shape index: {}]   ;;  %s2904_s2 = inlined_call_operand.vmem [shape: bf16[36,4], index: 2, kind: input, shape index: {}]   ;;  %s2905_s3 = inlined_call_operand.vmem [shape: bf16[36,4], index: 3, kind: input, shape index: {}]   ;;  %s2906_s4 = inlined_call_operand.vmem [shape: f32[1,8], index: 4, kind: input, shape index: {}]   ;;  %s2907_s5 = inlined_call_operand.vmem [shape: bf16[992,8], index: 5, kind: output, shape index: {}]  }
   0x1 LB: > { %s1820_s19 = sadd.s32 4294967295, %s2246_s18   ;;  %p1824_p0 = scmp.ge.s32.totalorder %s2246_s18, 1  ;;  %s2246_s18 = sphi %s2280_s18, %s15_s18  }
   0x2   : > { %p199_p1 = scmp.lt.s32.totalorder %s2246_s18, 3 }
   0x4   : > { %p200_p2 = pnand %p1824_p0, %p199_p1 }
   0x5   : > { %s232_s22 = smul.u32 (!%p200_p2), 62, %s1820_s19  ;;  %s2248_s25 = smov (!%p200_p2), 124  }
   0x6   : > { %203 = sbr.rel (%p200_p2) target bundleno = 522 (0x20a), region = 40  ;;  %s2249_s19 = smov (!%p200_p2), 4  }
   0x7   : > { %p233_p3 = scmp.lt.s32.totalorder (!%p200_p2), %s232_s22, 123 }
   0xb   : > { %v820_v0 = vld [vmem:[%s2905_s3 + $0x10] sm:$0x3]  ;;  %v2294_v2 = vld [vmem:[%s2906_s4] ss:$0 sm:$0xff]  ;;  %vm586_vm0 = vcmask 1041408   ;;  %s2909_s22 = smov (!%p233_p3, %s232_s22), 123 }
   0xc   : > { %v985_v1 = vunpack.c.l.b16 %v820_v0  ;;  %991 = vrot.lane.b32.xlu0 %v2294_v2, %s2248_s25  ;;  %v2221_v5 = vld [vmem:[%s2905_s3 + $0x8] sm:$0xff]  ;;  %s2301_s28 = sshll.u32 %s2909_s22, 2  ;;  %v2220_v6 = vld [vmem:[%s2905_s3] sm:$0xff]  ;;  %vm492_vm1 = vcmask 293888   ;;  %v317_v13 = vld [vmem:[%s2904_s2 + $0x10] sm:$0x3] }
   0xd   : > { %s2310_s8 = scalar_lea.vmem %s2903_s1, %s2301_s28  ;;  %v486_v14 = vunpack.c.l.b16 %v317_v13  ;;  %v2188_v19 = vld [vmem:[%s2904_s2 + $0x8] sm:$0xff]  ;;  %v2187_v20 = vld [vmem:[%s2904_s2] sm:$0xff]  ;;  %s2342_s17 = scalar_lea.vmem %s2902_s0, %s2301_s28  ;;  %vm1316_vm2 = vcmask 27648   ;;  %vm1689_vm3 = vcmask 60448  }
   0xe   : > { %v988_v3 = vpack.c.b16 %v985_v1, %v985_v1  ;;  %v2189_v7 = vld [vmem:[%s2310_s8] sm:$0xff]  ;;  %v2190_v9 = vld [vmem:[%s2310_s8 + $0x8] sm:$0xff]  ;;  %v2191_v11 = vld [vmem:[%s2310_s8 + $0x10] sm:$0xff]  ;;  %s2446_s22 = scalar_lea.vmem %s2907_s5, %s2301_s28 }
   0xf   : > { %v2205_v8 = vld [vmem:[%s2310_s8 + $0x80] sm:$0xff]  ;;  %v2206_v10 = vld [vmem:[%s2310_s8 + $0x88] sm:$0xff]  ;;  %v2207_v12 = vld [vmem:[%s2310_s8 + $0x90] sm:$0xff]  ;;  %v489_v15 = vpack.c.b16 %v486_v14, %v486_v14 }
  0x10   : > { %v1088_v4 = vsel %vm586_vm0, %v988_v3, 0  ;;  %v2192_v17 = vld [vmem:[%s2310_s8 + $0x18] sm:$0xff]  ;;  %v2156_v21 = vld [vmem:[%s2342_s17] sm:$0xff]  ;;  %v2157_v25 = vld [vmem:[%s2342_s17 + $0x8] sm:$0xff] }
  0x11   : > { %1095 = vmatpush.bf16.msra.mxu1 %v1088_v4  ;;  %2225 = vmatpush.bf16.msra.mxu3 %v1088_v4  ;;  %v588_v16 = vsel %vm586_vm0, %v489_v15, 0  ;;  %v2208_v18 = vld [vmem:[%s2310_s8 + $0x98] sm:$0xff]  ;;  %v2172_v22 = vld [vmem:[%s2342_s17 + $0x80] sm:$0xff]  ;;  %v2173_v26 = vld [vmem:[%s2342_s17 + $0x88] sm:$0xff] }
  0x12   : > { %595 = vmatpush.bf16.msra.mxu0 %v588_v16  ;;  %2222 = vmatpush.bf16.msra.mxu2 %v588_v16  ;;  %v2193_v23 = vld [vmem:[%s2310_s8 + $0x20] sm:$0xff]  ;;  %v2194_v27 = vld [vmem:[%s2310_s8 + $0x28] sm:$0xff]  ;;  %v2158_v29 = vld [vmem:[%s2342_s17 + $0x10] sm:$0xff] }
  0x13   : > { %v2209_v24 = vld [vmem:[%s2310_s8 + $0xa0] sm:$0xff]  ;;  %v2210_v28 = vld [vmem:[%s2310_s8 + $0xa8] sm:$0xff]  ;;  %v2174_v30 = vld [vmem:[%s2342_s17 + $0x90] sm:$0xff] }
  0x14   : > { %v2195_v31 = vld [vmem:[%s2310_s8 + $0x30] sm:$0xff]  ;;  %v2159_v33 = vld [vmem:[%s2342_s17 + $0x18] sm:$0xff]  ;;  %v2160_v37 = vld [vmem:[%s2342_s17 + $0x20] sm:$0xff] }
  0x15   : > { %1096 = vmatpush.bf16.msra.mxu1 %v2221_v5  ;;  %2226 = vmatpush.bf16.msra.mxu3 %v2221_v5  ;;  %v2211_v32 = vld [vmem:[%s2310_s8 + $0xb0] sm:$0xff]  ;;  %v2175_v34 = vld [vmem:[%s2342_s17 + $0x98] sm:$0xff]  ;;  %v2176_v38 = vld [vmem:[%s2342_s17 + $0xa0] sm:$0xff] }
  0x16   : > { %596 = vmatpush.bf16.msra.mxu0 %v2188_v19  ;;  %2223 = vmatpush.bf16.msra.mxu2 %v2188_v19  ;;  %v2196_v35 = vld [vmem:[%s2310_s8 + $0x38] sm:$0xff]  ;;  %v2197_v40 = vld [vmem:[%s2310_s8 + $0x40] sm:$0xff]  ;;  %v2161_v51 = vld [vmem:[%s2342_s17 + $0x28] sm:$0xff] }
  0x17   : > { %v2212_v36 = vld [vmem:[%s2310_s8 + $0xb8] sm:$0xff]  ;;  %v2213_v41 = vld [vmem:[%s2310_s8 + $0xc0] sm:$0xff]  ;;  %v2177_v52 = vld [vmem:[%s2342_s17 + $0xa8] sm:$0xff] }
  0x18   : > { %v2198_v55 = vld [vmem:[%s2310_s8 + $0x48] sm:$0xff]  ;;  %v2162_v1 = vld [vmem:[%s2342_s17 + $0x30] sm:$0xff] }
  0x19   : > { %1097 = vmatpush.bf16.msra.mxu1 %v2220_v6  ;;  %2227 = vmatpush.bf16.msra.mxu3 %v2220_v6  ;;  %v2214_v56 = vld [vmem:[%s2310_s8 + $0xc8] sm:$0xff]  ;;  %v2178_v3 = vld [vmem:[%s2342_s17 + $0xb0] sm:$0xff] }
  0x1a   : > { %597 = vmatpush.bf16.msra.mxu0 %v2187_v20  ;;  %2224 = vmatpush.bf16.msra.mxu2 %v2187_v20  ;;  %v2163_v20 = vld [vmem:[%s2342_s17 + $0x38] sm:$0xff] }
  0x1c   : > { %2123 = vmatmul.msk.bf16.vlgmr.msra.gmra.mxu1 %vm492_vm1, %v2189_v7  ;;  %2139 = vmatmul.msk.bf16.vlgmr.msra.gmra.mxu3 %vm492_vm1, %v2205_v8  ;;  %v2199_v7 = vld [vmem:[%s2310_s8 + $0x50] sm:$0xff] }
  0x1d   : > { %1960 = vmatmul.msk.bf16.vlgmr.msra.gmra.mxu0 %vm492_vm1, %v2156_v21  ;;  %1976 = vmatmul.msk.bf16.vlgmr.msra.gmra.mxu2 %vm492_vm1, %v2172_v22  ;;  %v2215_v8 = vld [vmem:[%s2310_s8 + $0xd0] sm:$0xff]  ;;  %v2179_v21 = vld [vmem:[%s2342_s17 + $0xb8] sm:$0xff] }
  0x2c   : > { %2124 = vmatmul.msk.bf16.gmra.mxu1 %vm492_vm1, %v2190_v9  ;;  %2140 = vmatmul.msk.bf16.gmra.mxu3 %vm492_vm1, %v2206_v10 }
  0x2d   : > { %1961 = vmatmul.msk.bf16.gmra.mxu0 %vm492_vm1, %v2157_v25  ;;  %1977 = vmatmul.msk.bf16.gmra.mxu2 %vm492_vm1, %v2173_v26  ;;  %v2216_v25 = vld [vmem:[%s2310_s8 + $0xd8] sm:$0xff] }
  0x3c   : > { %2125 = vmatmul.msk.bf16.gmra.mxu1 %vm492_vm1, %v2191_v11  ;;  %2141 = vmatmul.msk.bf16.gmra.mxu3 %vm492_vm1, %v2207_v12 }
  0x3d   : > { %1962 = vmatmul.msk.bf16.gmra.mxu0 %vm492_vm1, %v2158_v29  ;;  %1978 = vmatmul.msk.bf16.gmra.mxu2 %vm492_vm1, %v2174_v30 }
  0x4c   : > { %2126 = vmatmul.msk.bf16.gmra.mxu1 %vm492_vm1, %v2192_v17  ;;  %2142 = vmatmul.msk.bf16.gmra.mxu3 %vm492_vm1, %v2208_v18 }
  0x4d   : > { %1963 = vmatmul.msk.bf16.gmra.mxu0 %vm492_vm1, %v2159_v33  ;;  %1979 = vmatmul.msk.bf16.gmra.mxu2 %vm492_vm1, %v2175_v34 }
  0x5c   : > { %2127 = vmatmul.msk.bf16.gmra.mxu1 %vm492_vm1, %v2193_v23  ;;  %2143 = vmatmul.msk.bf16.gmra.mxu3 %vm492_vm1, %v2209_v24  ;;  %v2200_v24 = vld [vmem:[%s2310_s8 + $0x58] sm:$0xff] }
  0x5d   : > { %1964 = vmatmul.msk.bf16.gmra.mxu0 %vm492_vm1, %v2160_v37  ;;  %1980 = vmatmul.msk.bf16.gmra.mxu2 %vm492_vm1, %v2176_v38  ;;  %v2164_v38 = vld [vmem:[%s2342_s17 + $0x40] sm:$0xff] }
  0x6c   : > { %2128 = vmatmul.msk.bf16.gmra.mxu1 %vm492_vm1, %v2194_v27  ;;  %2144 = vmatmul.msk.bf16.gmra.mxu3 %vm492_vm1, %v2210_v28 }
  0x6d   : > { %1965 = vmatmul.msk.bf16.gmra.mxu0 %vm492_vm1, %v2161_v51  ;;  %1981 = vmatmul.msk.bf16.gmra.mxu2 %vm492_vm1, %v2177_v52 }
  0x7c   : > { %2129 = vmatmul.msk.bf16.gmra.mxu1 %vm492_vm1, %v2195_v31  ;;  %2145 = vmatmul.msk.bf16.gmra.mxu3 %vm492_vm1, %v2211_v32 }
  0x7d   : > { %1966 = vmatmul.msk.bf16.gmra.mxu0 %vm492_vm1, %v2162_v1  ;;  %1982 = vmatmul.msk.bf16.gmra.mxu2 %vm492_vm1, %v2178_v3 }
  0x7e   : > { %v2380_v39 = vpop.permute.xlu0 %991 }
  0x8c   : > { %2130 = vmatmul.msk.bf16.gmra.mxu1 %vm492_vm1, %v2196_v35  ;;  %2146 = vmatmul.msk.bf16.gmra.mxu3 %vm492_vm1, %v2212_v36 }
  0x8d   : > { %1967 = vmatmul.msk.bf16.gmra.mxu0 %vm492_vm1, %v2163_v20  ;;  %1983 = vmatmul.msk.bf16.gmra.mxu2 %vm492_vm1, %v2179_v21 }
  0x99   : > { %v1099_v42 = vpop.f32.mrf.mxu1 }
  0x9a   : > { %v1100_v43 = vadd.f32 %v1099_v42, %v2380_v39  ;;  %v599_v36 = vpop.f32.mrf.mxu0 }
  0x9b   : > { %v600_v37 = vadd.f32 %v2294_v2, %v599_v36 }
  0x9c   : > { %v1379_v44 = vpack.c.bf16 %v1100_v43, %v1100_v43  ;;  %2131 = vmatmul.msk.bf16.gmra.mxu1 %vm492_vm1, %v2197_v40  ;;  %2147 = vmatmul.msk.bf16.gmra.mxu3 %vm492_vm1, %v2213_v41  ;;  %v2180_v40 = vld [vmem:[%s2342_s17 + $0xc0] sm:$0xff] }
  0x9d   : > { %v1254_v42 = vpack.c.bf16 %v600_v37, %v600_v37  ;;  %1968 = vmatmul.msk.bf16.gmra.mxu0 %vm492_vm1, %v2164_v38  ;;  %1984 = vmatmul.msk.bf16.gmra.mxu2 %vm492_vm1, %v2180_v40  ;;  %v2203_v37 = vld [vmem:[%s2310_s8 + $0x70] sm:$0xff] }
  0x9e   : > { %1503 = vrot.lane.b32.xlu0 %v1379_v44, %s2249_s19  ;;  %v2201_v44 = vld [vmem:[%s2310_s8 + $0x60] sm:$0xff]  ;;  %v2219_v38 = vld [vmem:[%s2310_s8 + $0xf0] sm:$0xff] }
  0x9f   : > { %v1179_v45 = vpop.f32.mrf.mxu3  ;;  %1317 = vst.msk [vmem:[%s2446_s22] sm:$0xf] %vm1316_vm2, %v1254_v42 }
  0xa0   : > { %v1180_v46 = vadd.f32 %v1179_v45, %v2380_v39  ;;  %v2217_v45 = vld [vmem:[%s2310_s8 + $0xe0] sm:$0xff] }
  0xa1   : > { %v1101_v47 = vpop.f32.mrf.mxu1 }
  0xa2   : > { %v1411_v48 = vpack.c.bf16 %v1180_v46, %v1180_v46  ;;  %v1102_v49 = vadd.f32 %v1101_v47, %v2380_v39  ;;  %v601_v52 = vpop.f32.mrf.mxu0 }
  0xa4   : > { %v1380_v50 = vpack.c.bf16 %v1102_v49, %v1102_v49  ;;  %v679_v49 = vpop.f32.mrf.mxu2 }
  0xa6   : > { %1505 = vrot.lane.b32.xlu1 %v1380_v50, %s2249_s19  ;;  %1567 = vrot.lane.b32.xlu0 %v1411_v48, %s2249_s19  ;;  %v680_v50 = vadd.f32 %v2294_v2, %v679_v49 }
  0xa7   : > { %v1181_v53 = vpop.f32.mrf.mxu3 }
  0xa8   : > { %v1182_v54 = vadd.f32 %v1181_v53, %v2380_v39  ;;  %v1286_v53 = vpack.c.bf16 %v680_v50, %v680_v50 }
  0xa9   : > { %v1104_v57 = vpop.f32.mrf.mxu1 }
  0xaa   : > { %v1412_v58 = vpack.c.bf16 %v1182_v54, %v1182_v54  ;;  %v1105_v60 = vadd.f32 %v1104_v57, %v2380_v39  ;;  %v602_v54 = vadd.f32 %v2294_v2, %v601_v52  ;;  %1349 = vst.msk [vmem:[%s2446_s22 + $0x80] sm:$0xf] %vm1316_vm2, %v1286_v53 }
  0xac   : > { %2132 = vmatmul.msk.bf16.gmra.mxu1 %vm492_vm1, %v2198_v55  ;;  %2148 = vmatmul.msk.bf16.gmra.mxu3 %vm492_vm1, %v2214_v56  ;;  %v1381_v0 = vpack.c.bf16 %v1105_v60, %v1105_v60  ;;  %v1255_v56 = vpack.c.bf16 %v602_v54, %v602_v54 }
  0xae   : > { %1569 = vrot.lane.b32.xlu1 %v1412_v58, %s2249_s19  ;;  %1318 = vst.msk [vmem:[%s2446_s22 + $0x4] sm:$0xf] %vm1316_vm2, %v1255_v56 }
  0xaf   : > { %v1184_v59 = vpop.f32.mrf.mxu3 }
  0xb0   : > { %v1185_v61 = vadd.f32 %v1184_v59, %v2380_v39 }
  0xb1   : > { %v1106_v62 = vpop.f32.mrf.mxu1 }
  0xb2   : > { %v1413_v63 = vpack.c.bf16 %v1185_v61, %v1185_v61  ;;  %v1107_v4 = vadd.f32 %v1106_v62, %v2380_v39  ;;  %v681_v61 = vpop.f32.mrf.mxu2 }
  0xb3   : > { %v682_v62 = vadd.f32 %v2294_v2, %v681_v61  ;;  %v2167_v61 = vld [vmem:[%s2342_s17 + $0x58] sm:$0xff] }
  0xb4   : > { %1571 = vrot.lane.b32.xlu2 %v1413_v63, %s2249_s19  ;;  %v1382_v11 = vpack.c.bf16 %v1107_v4, %v1107_v4  ;;  %v2165_v4 = vld [vmem:[%s2342_s17 + $0x48] sm:$0xff] }
  0xb5   : > { %v1287_v1 = vpack.c.bf16 %v682_v62, %v682_v62  ;;  %1969 = vmatmul.msk.bf16.gmra.mxu0 %vm492_vm1, %v2165_v4  ;;  %v2183_v62 = vld [vmem:[%s2342_s17 + $0xd8] sm:$0xff] }
  0xb6   : > { %1507 = vrot.lane.b32.xlu1 %v1381_v0, %s2249_s19  ;;  %v604_v0 = vpop.f32.mrf.mxu0 }
  0xb7   : > { %v1186_v5 = vpop.f32.mrf.mxu3  ;;  %v605_v3 = vadd.f32 %v2294_v2, %v604_v0  ;;  %1350 = vst.msk [vmem:[%s2446_s22 + $0x84] sm:$0xf] %vm1316_vm2, %v1287_v1 }
  0xb8   : > { %v1187_v6 = vadd.f32 %v1186_v5, %v2380_v39  ;;  %v2181_v5 = vld [vmem:[%s2342_s17 + $0xc8] sm:$0xff] }
  0xb9   : > { %v1109_v9 = vpop.f32.mrf.mxu1  ;;  %1985 = vmatmul.msk.bf16.gmra.mxu2 %vm492_vm1, %v2181_v5 }
  0xba   : > { %v1414_v10 = vpack.c.bf16 %v1187_v6, %v1187_v6  ;;  %v1110_v12 = vadd.f32 %v1109_v9, %v2380_v39  ;;  %v2202_v9 = vld [vmem:[%s2310_s8 + $0x68] sm:$0xff] }
  0xbc   : > { %2133 = vmatmul.msk.bf16.gmra.mxu1 %vm492_vm1, %v2199_v7  ;;  %2149 = vmatmul.msk.bf16.gmra.mxu3 %vm492_vm1, %v2215_v8  ;;  %v1383_v18 = vpack.c.bf16 %v1110_v12, %v1110_v12  ;;  %v1256_v7 = vpack.c.bf16 %v605_v3, %v605_v3  ;;  %v2204_v3 = vld [vmem:[%s2310_s8 + $0x78] sm:$0xff] }
  0xbd   : > { %1509 = vrot.lane.b32.xlu2 %v1382_v11, %s2249_s19  ;;  %1573 = vrot.lane.b32.xlu0 %v1414_v10, %s2249_s19  ;;  %v2218_v10 = vld [vmem:[%s2310_s8 + $0xe8] sm:$0xff] }
  0xbe   : > { %1319 = vst.msk [vmem:[%s2446_s22 + $0x8] sm:$0xf] %vm1316_vm2, %v1256_v7 }
  0xbf   : > { %v1189_v13 = vpop.f32.mrf.mxu3 }
  0xc0   : > { %v1190_v14 = vadd.f32 %v1189_v13, %v2380_v39 }
  0xc1   : > { %v1111_v15 = vpop.f32.mrf.mxu1 }
  0xc2   : > { %v1415_v16 = vpack.c.bf16 %v1190_v14, %v1190_v14  ;;  %v1112_v17 = vadd.f32 %v1111_v15, %v2380_v39  ;;  %v684_v14 = vpop.f32.mrf.mxu2 }
  0xc3   : > { %v685_v15 = vadd.f32 %v2294_v2, %v684_v14 }
  0xc4   : > { %v1384_v19 = vpack.c.bf16 %v1112_v17, %v1112_v17  ;;  %1575 = vrot.lane.b32.xlu1 %v1415_v16, %s2249_s19  ;;  %v606_v17 = vpop.f32.mrf.mxu0 }
  0xc5   : > { %1511 = vrot.lane.b32.xlu2 %v1383_v18, %s2249_s19  ;;  %v1288_v18 = vpack.c.bf16 %v685_v15, %v685_v15 }
  0xc6   : > { %1513 = vrot.lane.b32.xlu0 %v1384_v19, %s2249_s19  ;;  %v607_v19 = vadd.f32 %v2294_v2, %v606_v17 }
  0xc7   : > { %v1191_v22 = vpop.f32.mrf.mxu3  ;;  %1351 = vst.msk [vmem:[%s2446_s22 + $0x88] sm:$0xf] %vm1316_vm2, %v1288_v18 }
  0xc8   : > { %v1192_v23 = vadd.f32 %v1191_v22, %v2380_v39  ;;  %v1257_v21 = vpack.c.bf16 %v607_v19, %v607_v19 }
  0xc9   : > { %v1114_v26 = vpop.f32.mrf.mxu1 }
  0xca   : > { %v1416_v27 = vpack.c.bf16 %v1192_v23, %v1192_v23  ;;  %v1115_v28 = vadd.f32 %v1114_v26, %v2380_v39  ;;  %1320 = vst.msk [vmem:[%s2446_s22 + $0xc] sm:$0xf] %vm1316_vm2, %v1257_v21  ;;  %v686_v26 = vpop.f32.mrf.mxu2 }
  0xcc   : > { %v1385_v29 = vpack.c.bf16 %v1115_v28, %v1115_v28  ;;  %2134 = vmatmul.msk.bf16.gmra.mxu1 %vm492_vm1, %v2200_v24  ;;  %2150 = vmatmul.msk.bf16.gmra.mxu3 %vm492_vm1, %v2216_v25 }
  0xcd   : > { %1577 = vrot.lane.b32.xlu2 %v1416_v27, %s2249_s19  ;;  %v687_v27 = vadd.f32 %v2294_v2, %v686_v26 }
  0xce   : > { %1515 = vrot.lane.b32.xlu1 %v1385_v29, %s2249_s19  ;;  %v609_v29 = vpop.f32.mrf.mxu0 }
  0xcf   : > { %v1194_v30 = vpop.f32.mrf.mxu3 }
  0xd0   : > { %v1195_v31 = vadd.f32 %v1194_v30, %v2380_v39  ;;  %v1289_v30 = vpack.c.bf16 %v687_v27, %v687_v27  ;;  %v2168_v27 = vld [vmem:[%s2342_s17 + $0x60] sm:$0xff] }
  0xd1   : > { %v1116_v32 = vpop.f32.mrf.mxu1 }
  0xd2   : > { %v1417_v33 = vpack.c.bf16 %v1195_v31, %v1195_v31  ;;  %v1117_v34 = vadd.f32 %v1116_v32, %v2380_v39  ;;  %v610_v31 = vadd.f32 %v2294_v2, %v609_v29  ;;  %v2166_v32 = vld [vmem:[%s2342_s17 + $0x50] sm:$0xff]  ;;  %1352 = vst.msk [vmem:[%s2446_s22 + $0x8c] sm:$0xf] %vm1316_vm2, %v1289_v30 }
  0xd3   : > { %1970 = vmatmul.msk.bf16.gmra.mxu0 %vm492_vm1, %v2166_v32 }
  0xd4   : > { %v1386_v35 = vpack.c.bf16 %v1117_v34, %v1117_v34  ;;  %1579 = vrot.lane.b32.xlu0 %v1417_v33, %s2249_s19  ;;  %v2182_v33 = vld [vmem:[%s2342_s17 + $0xd0] sm:$0xff] }
  0xd5   : > { %1986 = vmatmul.msk.bf16.gmra.mxu2 %vm492_vm1, %v2182_v33 }
  0xd6   : > { %1517 = vrot.lane.b32.xlu2 %v1386_v35, %s2249_s19  ;;  %v1258_v35 = vpack.c.bf16 %v610_v31, %v610_v31 }
  0xd7   : > { %v1196_v41 = vpop.f32.mrf.mxu3 }
  0xd8   : > { %v1197_v43 = vadd.f32 %v1196_v41, %v2380_v39  ;;  %1321 = vst.msk [vmem:[%s2446_s22 + $0x10] sm:$0xf] %vm1316_vm2, %v1258_v35 }
  0xd9   : > { %v1119_v46 = vpop.f32.mrf.mxu1 }
  0xda   : > { %v1418_v47 = vpack.c.bf16 %v1197_v43, %v1197_v43  ;;  %v1120_v48 = vadd.f32 %v1119_v46, %v2380_v39  ;;  %v689_v43 = vpop.f32.mrf.mxu2  ;;  %v611_v46 = vpop.f32.mrf.mxu0 }
  0xdc   : > { %v1387_v51 = vpack.c.bf16 %v1120_v48, %v1120_v48  ;;  %2135 = vmatmul.msk.bf16.gmra.mxu1 %vm492_vm1, %v2201_v44  ;;  %2151 = vmatmul.msk.bf16.gmra.mxu3 %vm492_vm1, %v2217_v45  ;;  %v690_v44 = vadd.f32 %v2294_v2, %v689_v43  ;;  %v612_v48 = vadd.f32 %v2294_v2, %v611_v46 }
  0xdd   : > { %1581 = vrot.lane.b32.xlu1 %v1418_v47, %s2249_s19 }
  0xde   : > { %1519 = vrot.lane.b32.xlu0 %v1387_v51, %s2249_s19  ;;  %v1290_v47 = vpack.c.bf16 %v690_v44, %v690_v44  ;;  %v1259_v50 = vpack.c.bf16 %v612_v48, %v612_v48 }
  0xdf   : > { %v1199_v55 = vpop.f32.mrf.mxu3 }
  0xe0   : > { %v1200_v57 = vadd.f32 %v1199_v55, %v2380_v39  ;;  %1353 = vst.msk [vmem:[%s2446_s22 + $0x90] sm:$0xf] %vm1316_vm2, %v1290_v47 }
  0xe1   : > { %v1121_v58 = vpop.f32.mrf.mxu1  ;;  %1322 = vst.msk [vmem:[%s2446_s22 + $0x14] sm:$0xf] %vm1316_vm2, %v1259_v50 }
  0xe2   : > { %v1419_v59 = vpack.c.bf16 %v1200_v57, %v1200_v57  ;;  %v1122_v60 = vadd.f32 %v1121_v58, %v2380_v39  ;;  %v691_v55 = vpop.f32.mrf.mxu2  ;;  %v614_v58 = vpop.f32.mrf.mxu0 }
  0xe3   : > { %v692_v56 = vadd.f32 %v2294_v2, %v691_v55  ;;  %1971 = vmatmul.msk.bf16.gmra.mxu0 %vm492_vm1, %v2167_v61 }
  0xe4   : > { %v1388_v63 = vpack.c.bf16 %v1122_v60, %v1122_v60  ;;  %1583 = vrot.lane.b32.xlu2 %v1419_v59, %s2249_s19  ;;  %v615_v60 = vadd.f32 %v2294_v2, %v614_v58 }
  0xe5   : > { %v1291_v59 = vpack.c.bf16 %v692_v56, %v692_v56  ;;  %1987 = vmatmul.msk.bf16.gmra.mxu2 %vm492_vm1, %v2183_v62 }
  0xe6   : > { %1521 = vrot.lane.b32.xlu1 %v1388_v63, %s2249_s19  ;;  %v1260_v0 = vpack.c.bf16 %v615_v60, %v615_v60  ;;  %v2185_v60 = vld [vmem:[%s2342_s17 + $0xe8] sm:$0xff] }
  0xe7   : > { %v1201_v6 = vpop.f32.mrf.mxu3  ;;  %1354 = vst.msk [vmem:[%s2446_s22 + $0x94] sm:$0xf] %vm1316_vm2, %v1291_v59  ;;  %v2169_v59 = vld [vmem:[%s2342_s17 + $0x68] sm:$0xff] }
  0xe8   : > { %v1202_v8 = vadd.f32 %v1201_v6, %v2380_v39  ;;  %1323 = vst.msk [vmem:[%s2446_s22 + $0x18] sm:$0xf] %vm1316_vm2, %v1260_v0 }
  0xe9   : > { %v1124_v11 = vpop.f32.mrf.mxu1 }
  0xea   : > { %v1420_v12 = vpack.c.bf16 %v1202_v8, %v1202_v8  ;;  %v1125_v13 = vadd.f32 %v1124_v11, %v2380_v39  ;;  %v694_v7 = vpop.f32.mrf.mxu2 }
  0xeb   : > { %v695_v8 = vadd.f32 %v2294_v2, %v694_v7 }
  0xec   : > { %v1389_v16 = vpack.c.bf16 %v1125_v13, %v1125_v13  ;;  %2136 = vmatmul.msk.bf16.gmra.mxu1 %vm492_vm1, %v2202_v9  ;;  %2152 = vmatmul.msk.bf16.gmra.mxu3 %vm492_vm1, %v2218_v10  ;;  %v616_v10 = vpop.f32.mrf.mxu0 }
  0xed   : > { %1585 = vrot.lane.b32.xlu0 %v1420_v12, %s2249_s19  ;;  %v1292_v11 = vpack.c.bf16 %v695_v8, %v695_v8  ;;  %v617_v12 = vadd.f32 %v2294_v2, %v616_v10 }
  0xee   : > { %1523 = vrot.lane.b32.xlu2 %v1389_v16, %s2249_s19 }
  0xef   : > { %v1204_v20 = vpop.f32.mrf.mxu3  ;;  %v1261_v15 = vpack.c.bf16 %v617_v12, %v617_v12  ;;  %1355 = vst.msk [vmem:[%s2446_s22 + $0x98] sm:$0xf] %vm1316_vm2, %v1292_v11 }
  0xf0   : > { %v1205_v22 = vadd.f32 %v1204_v20, %v2380_v39 }
  0xf1   : > { %v1126_v23 = vpop.f32.mrf.mxu1  ;;  %1324 = vst.msk [vmem:[%s2446_s22 + $0x1c] sm:$0xf] %vm1316_vm2, %v1261_v15 }
  0xf2   : > { %v1421_v24 = vpack.c.bf16 %v1205_v22, %v1205_v22  ;;  %v1127_v25 = vadd.f32 %v1126_v23, %v2380_v39  ;;  %v696_v21 = vpop.f32.mrf.mxu2 }
  0xf3   : > { %v697_v22 = vadd.f32 %v2294_v2, %v696_v21  ;;  %1972 = vmatmul.msk.bf16.gmra.mxu0 %vm492_vm1, %v2168_v27 }
  0xf4   : > { %v1390_v28 = vpack.c.bf16 %v1127_v25, %v1127_v25  ;;  %1587 = vrot.lane.b32.xlu1 %v1421_v24, %s2249_s19  ;;  %v619_v24 = vpop.f32.mrf.mxu0 }
  0xf5   : > { %v1293_v25 = vpack.c.bf16 %v697_v22, %v697_v22  ;;  %v620_v26 = vadd.f32 %v2294_v2, %v619_v24 }
  0xf6   : > { %1525 = vrot.lane.b32.xlu0 %v1390_v28, %s2249_s19  ;;  %v2184_v28 = vld [vmem:[%s2342_s17 + $0xe0] sm:$0xff] }
  0xf7   : > { %v1206_v34 = vpop.f32.mrf.mxu3  ;;  %1356 = vst.msk [vmem:[%s2446_s22 + $0x9c] sm:$0xf] %vm1316_vm2, %v1293_v25  ;;  %v1262_v31 = vpack.c.bf16 %v620_v26, %v620_v26  ;;  %1988 = vmatmul.msk.bf16.gmra.mxu2 %vm492_vm1, %v2184_v28  ;;  %v2170_v26 = vld [vmem:[%s2342_s17 + $0x70] sm:$0xff] }
  0xf8   : > { %v1207_v36 = vadd.f32 %v1206_v34, %v2380_v39 }
  0xf9   : > { %v1129_v40 = vpop.f32.mrf.mxu1  ;;  %1325 = vst.msk [vmem:[%s2446_s22 + $0x20] sm:$0xf] %vm1316_vm2, %v1262_v31 }
  0xfa   : > { %v1422_v41 = vpack.c.bf16 %v1207_v36, %v1207_v36  ;;  %v1130_v42 = vadd.f32 %v1129_v40, %v2380_v39 }
  0xfc   : > { %v1391_v45 = vpack.c.bf16 %v1130_v42, %v1130_v42  ;;  %2137 = vmatmul.msk.bf16.gmra.mxu1 %vm492_vm1, %v2203_v37  ;;  %2153 = vmatmul.msk.bf16.gmra.mxu3 %vm492_vm1, %v2219_v38  ;;  %v699_v38 = vpop.f32.mrf.mxu2  ;;  %v621_v42 = vpop.f32.mrf.mxu0 }
  0xfd   : > { %1589 = vrot.lane.b32.xlu2 %v1422_v41, %s2249_s19  ;;  %v700_v40 = vadd.f32 %v2294_v2, %v699_v38  ;;  %v622_v44 = vadd.f32 %v2294_v2, %v621_v42 }
  0xfe   : > { %1527 = vrot.lane.b32.xlu1 %v1391_v45, %s2249_s19 }
  0xff   : > { %v1209_v49 = vpop.f32.mrf.mxu3  ;;  %v1294_v43 = vpack.c.bf16 %v700_v40, %v700_v40  ;;  %v1263_v47 = vpack.c.bf16 %v622_v44, %v622_v44 }
 0x100   : > { %v1210_v51 = vadd.f32 %v1209_v49, %v2380_v39 }
 0x101   : > { %v1131_v52 = vpop.f32.mrf.mxu1  ;;  %1357 = vst.msk [vmem:[%s2446_s22 + $0xa0] sm:$0xf] %vm1316_vm2, %v1294_v43 }
 0x102   : > { %v1423_v53 = vpack.c.bf16 %v1210_v51, %v1210_v51  ;;  %v1132_v54 = vadd.f32 %v1131_v52, %v2380_v39  ;;  %1326 = vst.msk [vmem:[%s2446_s22 + $0x24] sm:$0xf] %vm1316_vm2, %v1263_v47 }
 0x103   : > { %1973 = vmatmul.msk.bf16.gmra.mxu0 %vm492_vm1, %v2169_v59 }
 0x104   : > { %v1392_v57 = vpack.c.bf16 %v1132_v54, %v1132_v54  ;;  %1591 = vrot.lane.b32.xlu0 %v1423_v53, %s2249_s19  ;;  %v701_v53 = vpop.f32.mrf.mxu2  ;;  %v624_v56 = vpop.f32.mrf.mxu0 }
 0x105   : > { %v702_v54 = vadd.f32 %v2294_v2, %v701_v53  ;;  %v625_v58 = vadd.f32 %v2294_v2, %v624_v56  ;;  %v2171_v56 = vld [vmem:[%s2342_s17 + $0x78] sm:$0xff] }
 0x106   : > { %1529 = vrot.lane.b32.xlu2 %v1392_v57, %s2249_s19 }
 0x107   : > { %v1211_v63 = vpop.f32.mrf.mxu3  ;;  %v1295_v57 = vpack.c.bf16 %v702_v54, %v702_v54  ;;  %1989 = vmatmul.msk.bf16.gmra.mxu2 %vm492_vm1, %v2185_v60  ;;  %v2186_v60 = vld [vmem:[%s2342_s17 + $0xf0] sm:$0xff] }
 0x108   : > { %v1212_v1 = vadd.f32 %v1211_v63, %v2380_v39  ;;  %v1264_v63 = vpack.c.bf16 %v625_v58, %v625_v58 }
 0x109   : > { %v1134_v4 = vpop.f32.mrf.mxu1  ;;  %1358 = vst.msk [vmem:[%s2446_s22 + $0xa4] sm:$0xf] %vm1316_vm2, %v1295_v57 }
 0x10a   : > { %v1424_v5 = vpack.c.bf16 %v1212_v1, %v1212_v1  ;;  %v1135_v6 = vadd.f32 %v1134_v4, %v2380_v39  ;;  %1327 = vst.msk [vmem:[%s2446_s22 + $0x28] sm:$0xf] %vm1316_vm2, %v1264_v63 }
 0x10c   : > { %v1393_v9 = vpack.c.bf16 %v1135_v6, %v1135_v6  ;;  %2138 = vmatmul.msk.bf16.gmra.mxu1 %vm492_vm1, %v2204_v3  ;;  %1593 = vrot.lane.b32.xlu1 %v1424_v5, %s2249_s19  ;;  %v704_v6 = vpop.f32.mrf.mxu2 }
 0x10d   : > { %v705_v7 = vadd.f32 %v2294_v2, %v704_v6 }
 0x10e   : > { %v1572_v13 = vpop.permute.xlu2 %1571  ;;  %1531 = vrot.lane.b32.xlu0 %v1393_v9, %s2249_s19  ;;  %v626_v9 = vpop.f32.mrf.mxu0 }
 0x10f   : > { %1724 = vst.msk [vmem:[%s2446_s22 + $0x88] sm:$0xf] %vm1689_vm3, %v1572_v13  ;;  %v1214_v14 = vpop.f32.mrf.mxu3  ;;  %v1296_v10 = vpack.c.bf16 %v705_v7, %v705_v7  ;;  %v627_v11 = vadd.f32 %v2294_v2, %v626_v9 }
 0x110   : > { %v1215_v16 = vadd.f32 %v1214_v14, %v2380_v39  ;;  %v1504_v17 = vpop.permute.xlu0 %1503 }
 0x111   : > { %1690 = vst.msk [vmem:[%s2446_s22] sm:$0xf] %vm1689_vm3, %v1504_v17  ;;  %v1136_v18 = vpop.f32.mrf.mxu1  ;;  %v1265_v14 = vpack.c.bf16 %v627_v11, %v627_v11 }
 0x112   : > { %v1425_v19 = vpack.c.bf16 %v1215_v16, %v1215_v16  ;;  %v1137_v20 = vadd.f32 %v1136_v18, %v2380_v39  ;;  %1359 = vst.msk [vmem:[%s2446_s22 + $0xa8] sm:$0xf] %vm1316_vm2, %v1296_v10 }
 0x113   : > { %1328 = vst.msk [vmem:[%s2446_s22 + $0x2c] sm:$0xf] %vm1316_vm2, %v1265_v14  ;;  %1974 = vmatmul.msk.bf16.gmra.mxu0 %vm492_vm1, %v2170_v26 }
 0x114   : > { %v1394_v23 = vpack.c.bf16 %v1137_v20, %v1137_v20  ;;  %1595 = vrot.lane.b32.xlu2 %v1425_v19, %s2249_s19  ;;  %v706_v20 = vpop.f32.mrf.mxu2 }
 0x115   : > { %v707_v21 = vadd.f32 %v2294_v2, %v706_v20 }
 0x116   : > { %1533 = vrot.lane.b32.xlu1 %v1394_v23, %s2249_s19  ;;  %v629_v23 = vpop.f32.mrf.mxu0 }
 0x117   : > { %v1510_v29 = vpop.permute.xlu2 %1509  ;;  %v1216_v30 = vpop.f32.mrf.mxu3  ;;  %v1297_v24 = vpack.c.bf16 %v707_v21, %v707_v21  ;;  %v630_v25 = vadd.f32 %v2294_v2, %v629_v23  ;;  %1990 = vmatmul.msk.bf16.gmra.mxu2 %vm492_vm1, %v2186_v60 }
 0x118   : > { %1693 = vst.msk [vmem:[%s2446_s22 + $0xc] sm:$0xf] %vm1689_vm3, %v1510_v29  ;;  %v1217_v32 = vadd.f32 %v1216_v30, %v2380_v39  ;;  %v1506_v33 = vpop.permute.xlu1 %1505  ;;  %v1568_v34 = vpop.permute.xlu0 %1567 }
 0x119   : > { %1691 = vst.msk [vmem:[%s2446_s22 + $0x4] sm:$0xf] %vm1689_vm3, %v1506_v33  ;;  %v1139_v35 = vpop.f32.mrf.mxu1  ;;  %v1266_v29 = vpack.c.bf16 %v630_v25, %v630_v25 }
 0x11a   : > { %v1426_v36 = vpack.c.bf16 %v1217_v32, %v1217_v32  ;;  %v1140_v37 = vadd.f32 %v1139_v35, %v2380_v39  ;;  %1722 = vst.msk [vmem:[%s2446_s22 + $0x80] sm:$0xf] %vm1689_vm3, %v1568_v34 }
 0x11b   : > { %1360 = vst.msk [vmem:[%s2446_s22 + $0xac] sm:$0xf] %vm1316_vm2, %v1297_v24 }
 0x11c   : > { %v1395_v41 = vpack.c.bf16 %v1140_v37, %v1140_v37  ;;  %1597 = vrot.lane.b32.xlu0 %v1426_v36, %s2249_s19  ;;  %1329 = vst.msk [vmem:[%s2446_s22 + $0x30] sm:$0xf] %vm1316_vm2, %v1266_v29  ;;  %v709_v35 = vpop.f32.mrf.mxu2 }
 0x11d   : > { %v710_v36 = vadd.f32 %v2294_v2, %v709_v35 }
 0x11e   : > { %1535 = vrot.lane.b32.xlu2 %v1395_v41, %s2249_s19  ;;  %v631_v38 = vpop.f32.mrf.mxu0 }
 0x11f   : > { %v1512_v45 = vpop.permute.xlu2 %1511  ;;  %v1219_v46 = vpop.f32.mrf.mxu3  ;;  %v1298_v40 = vpack.c.bf16 %v710_v36, %v710_v36  ;;  %v632_v41 = vadd.f32 %v2294_v2, %v631_v38 }
 0x120   : > { %1694 = vst.msk [vmem:[%s2446_s22 + $0x10] sm:$0xf] %vm1689_vm3, %v1512_v45  ;;  %v1220_v48 = vadd.f32 %v1219_v46, %v2380_v39  ;;  %v1570_v49 = vpop.permute.xlu1 %1569 }
 0x121   : > { %1723 = vst.msk [vmem:[%s2446_s22 + $0x84] sm:$0xf] %vm1689_vm3, %v1570_v49  ;;  %v1141_v50 = vpop.f32.mrf.mxu1  ;;  %v1267_v44 = vpack.c.bf16 %v632_v41, %v632_v41 }
 0x122   : > { %v1427_v51 = vpack.c.bf16 %v1220_v48, %v1220_v48  ;;  %v1142_v52 = vadd.f32 %v1141_v50, %v2380_v39  ;;  %1361 = vst.msk [vmem:[%s2446_s22 + $0xb0] sm:$0xf] %vm1316_vm2, %v1298_v40 }
 0x123   : > { %1330 = vst.msk [vmem:[%s2446_s22 + $0x34] sm:$0xf] %vm1316_vm2, %v1267_v44  ;;  %1975 = vmatmul.msk.bf16.gmra.mxu0 %vm492_vm1, %v2171_v56 }
 0x124   : > { %v1396_v55 = vpack.c.bf16 %v1142_v52, %v1142_v52  ;;  %1599 = vrot.lane.b32.xlu1 %v1427_v51, %s2249_s19  ;;  %v711_v50 = vpop.f32.mrf.mxu2 }
 0x125   : > { %v712_v51 = vadd.f32 %v2294_v2, %v711_v50 }
 0x126   : > { %1537 = vrot.lane.b32.xlu0 %v1396_v55, %s2249_s19  ;;  %v634_v53 = vpop.f32.mrf.mxu0 }
 0x127   : > { %v1221_v61 = vpop.f32.mrf.mxu3  ;;  %v1578_v62 = vpop.permute.xlu2 %1577  ;;  %v1299_v54 = vpack.c.bf16 %v712_v51, %v712_v51  ;;  %v635_v55 = vadd.f32 %v2294_v2, %v634_v53 }
 0x128   : > { %v1222_v0 = vadd.f32 %v1221_v61, %v2380_v39  ;;  %1727 = vst.msk [vmem:[%s2446_s22 + $0x94] sm:$0xf] %vm1689_vm3, %v1578_v62  ;;  %v1508_v1 = vpop.permute.xlu1 %1507 }
 0x129   : > { %1692 = vst.msk [vmem:[%s2446_s22 + $0x8] sm:$0xf] %vm1689_vm3, %v1508_v1  ;;  %v1144_v3 = vpop.f32.mrf.mxu1  ;;  %v1268_v59 = vpack.c.bf16 %v635_v55, %v635_v55 }
 0x12a   : > { %v1428_v4 = vpack.c.bf16 %v1222_v0, %v1222_v0  ;;  %v1145_v5 = vadd.f32 %v1144_v3, %v2380_v39  ;;  %1362 = vst.msk [vmem:[%s2446_s22 + $0xb4] sm:$0xf] %vm1316_vm2, %v1299_v54 }
 0x12b   : > { %1331 = vst.msk [vmem:[%s2446_s22 + $0x38] sm:$0xf] %vm1316_vm2, %v1268_v59 }
 0x12c   : > { %v1397_v8 = vpack.c.bf16 %v1145_v5, %v1145_v5  ;;  %1601 = vrot.lane.b32.xlu2 %v1428_v4, %s2249_s19  ;;  %v714_v3 = vpop.f32.mrf.mxu2 }
 0x12d   : > { %v715_v4 = vadd.f32 %v2294_v2, %v714_v3 }
 0x12e   : > { %1539 = vrot.lane.b32.xlu1 %v1397_v8, %s2249_s19  ;;  %v636_v6 = vpop.f32.mrf.mxu0 }
 0x12f   : > { %v1224_v12 = vpop.f32.mrf.mxu3  ;;  %v1574_v13 = vpop.permute.xlu0 %1573  ;;  %v1300_v7 = vpack.c.bf16 %v715_v4, %v715_v4  ;;  %v637_v8 = vadd.f32 %v2294_v2, %v636_v6 }
 0x130   : > { %v1225_v15 = vadd.f32 %v1224_v12, %v2380_v39  ;;  %v1518_v16 = vpop.permute.xlu2 %1517  ;;  %1725 = vst.msk [vmem:[%s2446_s22 + $0x8c] sm:$0xf] %vm1689_vm3, %v1574_v13 }
 0x131   : > { %1697 = vst.msk [vmem:[%s2446_s22 + $0x1c] sm:$0xf] %vm1689_vm3, %v1518_v16  ;;  %v1146_v17 = vpop.f32.mrf.mxu1  ;;  %v1269_v11 = vpack.c.bf16 %v637_v8, %v637_v8 }
 0x132   : > { %v1429_v18 = vpack.c.bf16 %v1225_v15, %v1225_v15  ;;  %v1147_v19 = vadd.f32 %v1146_v17, %v2380_v39  ;;  %1363 = vst.msk [vmem:[%s2446_s22 + $0xb8] sm:$0xf] %vm1316_vm2, %v1300_v7 }
 0x133   : > { %1332 = vst.msk [vmem:[%s2446_s22 + $0x3c] sm:$0xf] %vm1316_vm2, %v1269_v11 }
 0x134   : > { %v1398_v22 = vpack.c.bf16 %v1147_v19, %v1147_v19  ;;  %1603 = vrot.lane.b32.xlu0 %v1429_v18, %s2249_s19  ;;  %v716_v17 = vpop.f32.mrf.mxu2 }
 0x135   : > { %v717_v18 = vadd.f32 %v2294_v2, %v716_v17 }
 0x136   : > { %1541 = vrot.lane.b32.xlu2 %v1398_v22, %s2249_s19  ;;  %v1576_v27 = vpop.permute.xlu1 %1575  ;;  %v639_v20 = vpop.f32.mrf.mxu0  ;;  %v2688_v22 = vld [vmem:[%s2906_s4] ss:$0 sm:$0xff] }
 0x137   : > { %v1226_v28 = vpop.f32.mrf.mxu3  ;;  %1726 = vst.msk [vmem:[%s2446_s22 + $0x90] sm:$0xf] %vm1689_vm3, %v1576_v27  ;;  %v1301_v21 = vpack.c.bf16 %v717_v18, %v717_v18  ;;  %v640_v23 = vadd.f32 %v2688_v22, %v639_v20 }
 0x138   : > { %v1227_v30 = vadd.f32 %v1226_v28, %v2380_v39  ;;  %v1514_v31 = vpop.permute.xlu0 %1513 }
 0x139   : > { %1695 = vst.msk [vmem:[%s2446_s22 + $0x14] sm:$0xf] %vm1689_vm3, %v1514_v31  ;;  %v1149_v32 = vpop.f32.mrf.mxu1  ;;  %v1270_v2 = vpack.c.bf16 %v640_v23, %v640_v23 }
 0x13a   : > { %v1430_v33 = vpack.c.bf16 %v1227_v30, %v1227_v30  ;;  %v1150_v34 = vadd.f32 %v1149_v32, %v2380_v39  ;;  %1364 = vst.msk [vmem:[%s2446_s22 + $0xbc] sm:$0xf] %vm1316_vm2, %v1301_v21 }
 0x13b   : > { %1333 = vst.msk [vmem:[%s2446_s22 + $0x40] sm:$0xf] %vm1316_vm2, %v1270_v2 }
 0x13c   : > { %v1399_v37 = vpack.c.bf16 %v1150_v34, %v1150_v34  ;;  %1605 = vrot.lane.b32.xlu1 %v1430_v33, %s2249_s19  ;;  %v719_v31 = vpop.f32.mrf.mxu2 }
 0x13d   : > { %v720_v32 = vadd.f32 %v2688_v22, %v719_v31 }
 0x13e   : > { %1543 = vrot.lane.b32.xlu0 %v1399_v37, %s2249_s19  ;;  %v1584_v42 = vpop.permute.xlu2 %1583  ;;  %v641_v34 = vpop.f32.mrf.mxu0 }
 0x13f   : > { %v1229_v43 = vpop.f32.mrf.mxu3  ;;  %1730 = vst.msk [vmem:[%s2446_s22 + $0xa0] sm:$0xf] %vm1689_vm3, %v1584_v42  ;;  %v1302_v35 = vpack.c.bf16 %v720_v32, %v720_v32  ;;  %v642_v36 = vadd.f32 %v2688_v22, %v641_v34 }
 0x140   : > { %v1230_v45 = vadd.f32 %v1229_v43, %v2380_v39  ;;  %v1516_v46 = vpop.permute.xlu1 %1515 }
 0x141   : > { %1696 = vst.msk [vmem:[%s2446_s22 + $0x18] sm:$0xf] %vm1689_vm3, %v1516_v46  ;;  %v1151_v47 = vpop.f32.mrf.mxu1  ;;  %v1271_v40 = vpack.c.bf16 %v642_v36, %v642_v36 }
 0x142   : > { %v1431_v48 = vpack.c.bf16 %v1230_v45, %v1230_v45  ;;  %v1152_v49 = vadd.f32 %v1151_v47, %v2380_v39  ;;  %1365 = vst.msk [vmem:[%s2446_s22 + $0xc0] sm:$0xf] %vm1316_vm2, %v1302_v35 }
 0x143   : > { %1334 = vst.msk [vmem:[%s2446_s22 + $0x44] sm:$0xf] %vm1316_vm2, %v1271_v40 }
 0x144   : > { %v1400_v52 = vpack.c.bf16 %v1152_v49, %v1152_v49  ;;  %1607 = vrot.lane.b32.xlu2 %v1431_v48, %s2249_s19  ;;  %v721_v46 = vpop.f32.mrf.mxu2 }
 0x145   : > { %v722_v47 = vadd.f32 %v2688_v22, %v721_v46 }
 0x146   : > { %1545 = vrot.lane.b32.xlu1 %v1400_v52, %s2249_s19  ;;  %v1580_v57 = vpop.permute.xlu0 %1579  ;;  %v644_v49 = vpop.f32.mrf.mxu0 }
 0x147   : > { %v1231_v58 = vpop.f32.mrf.mxu3  ;;  %1728 = vst.msk [vmem:[%s2446_s22 + $0x98] sm:$0xf] %vm1689_vm3, %v1580_v57  ;;  %v1303_v50 = vpack.c.bf16 %v722_v47, %v722_v47  ;;  %v645_v51 = vadd.f32 %v2688_v22, %v644_v49 }
 0x148   : > { %v1232_v61 = vadd.f32 %v1231_v58, %v2380_v39  ;;  %v1524_v62 = vpop.permute.xlu2 %1523 }
 0x149   : > { %1700 = vst.msk [vmem:[%s2446_s22 + $0x28] sm:$0xf] %vm1689_vm3, %v1524_v62  ;;  %v1154_v63 = vpop.f32.mrf.mxu1  ;;  %v1272_v54 = vpack.c.bf16 %v645_v51, %v645_v51 }
 0x14a   : > { %v1432_v0 = vpack.c.bf16 %v1232_v61, %v1232_v61  ;;  %v1155_v1 = vadd.f32 %v1154_v63, %v2380_v39  ;;  %1366 = vst.msk [vmem:[%s2446_s22 + $0xc4] sm:$0xf] %vm1316_vm2, %v1303_v50 }
 0x14b   : > { %1335 = vst.msk [vmem:[%s2446_s22 + $0x48] sm:$0xf] %vm1316_vm2, %v1272_v54 }
 0x14c   : > { %v1401_v5 = vpack.c.bf16 %v1155_v1, %v1155_v1  ;;  %1609 = vrot.lane.b32.xlu0 %v1432_v0, %s2249_s19  ;;  %v724_v60 = vpop.f32.mrf.mxu2 }
 0x14d   : > { %v725_v61 = vadd.f32 %v2688_v22, %v724_v60 }
 0x14e   : > { %1547 = vrot.lane.b32.xlu2 %v1401_v5, %s2249_s19  ;;  %v646_v63 = vpop.f32.mrf.mxu0 }
 0x14f   : > { %v1234_v9 = vpop.f32.mrf.mxu3  ;;  %v1582_v10 = vpop.permute.xlu1 %1581  ;;  %v1304_v0 = vpack.c.bf16 %v725_v61, %v725_v61  ;;  %v647_v1 = vadd.f32 %v2688_v22, %v646_v63 }
 0x150   : > { %v1235_v12 = vadd.f32 %v1234_v9, %v2380_v39  ;;  %1729 = vst.msk [vmem:[%s2446_s22 + $0x9c] sm:$0xf] %vm1689_vm3, %v1582_v10  ;;  %v1520_v13 = vpop.permute.xlu0 %1519 }
 0x151   : > { %1698 = vst.msk [vmem:[%s2446_s22 + $0x20] sm:$0xf] %vm1689_vm3, %v1520_v13  ;;  %v1156_v14 = vpop.f32.mrf.mxu1  ;;  %v1273_v5 = vpack.c.bf16 %v647_v1, %v647_v1 }
 0x152   : > { %v1433_v15 = vpack.c.bf16 %v1235_v12, %v1235_v12  ;;  %v1157_v16 = vadd.f32 %v1156_v14, %v2380_v39  ;;  %1367 = vst.msk [vmem:[%s2446_s22 + $0xc8] sm:$0xf] %vm1316_vm2, %v1304_v0 }
 0x153   : > { %1336 = vst.msk [vmem:[%s2446_s22 + $0x4c] sm:$0xf] %vm1316_vm2, %v1273_v5 }
 0x154   : > { %v1402_v19 = vpack.c.bf16 %v1157_v16, %v1157_v16  ;;  %1611 = vrot.lane.b32.xlu1 %v1433_v15, %s2249_s19  ;;  %v726_v11 = vpop.f32.mrf.mxu2 }
 0x155   : > { %v727_v12 = vadd.f32 %v2688_v22, %v726_v11 }
 0x156   : > { %1549 = vrot.lane.b32.xlu0 %v1402_v19, %s2249_s19  ;;  %v649_v14 = vpop.f32.mrf.mxu0 }
 0x157   : > { %v1590_v24 = vpop.permute.xlu2 %1589  ;;  %v1236_v25 = vpop.f32.mrf.mxu3  ;;  %v1305_v15 = vpack.c.bf16 %v727_v12, %v727_v12  ;;  %v650_v16 = vadd.f32 %v2688_v22, %v649_v14 }
 0x158   : > { %1733 = vst.msk [vmem:[%s2446_s22 + $0xac] sm:$0xf] %vm1689_vm3, %v1590_v24  ;;  %v1237_v26 = vadd.f32 %v1236_v25, %v2380_v39  ;;  %v1522_v27 = vpop.permute.xlu1 %1521 }
 0x159   : > { %1699 = vst.msk [vmem:[%s2446_s22 + $0x24] sm:$0xf] %vm1689_vm3, %v1522_v27  ;;  %v1159_v28 = vpop.f32.mrf.mxu1  ;;  %v1274_v18 = vpack.c.bf16 %v650_v16, %v650_v16 }
 0x15a   : > { %v1434_v29 = vpack.c.bf16 %v1237_v26, %v1237_v26  ;;  %v1160_v30 = vadd.f32 %v1159_v28, %v2380_v39  ;;  %1368 = vst.msk [vmem:[%s2446_s22 + $0xcc] sm:$0xf] %vm1316_vm2, %v1305_v15 }
 0x15b   : > { %1337 = vst.msk [vmem:[%s2446_s22 + $0x50] sm:$0xf] %vm1316_vm2, %v1274_v18 }
 0x15c   : > { %v1403_v33 = vpack.c.bf16 %v1160_v30, %v1160_v30  ;;  %1613 = vrot.lane.b32.xlu2 %v1434_v29, %s2249_s19  ;;  %v729_v23 = vpop.f32.mrf.mxu2 }
 0x15d   : > { %v730_v24 = vadd.f32 %v2688_v22, %v729_v23 }
 0x15e   : > { %1551 = vrot.lane.b32.xlu1 %v1403_v33, %s2249_s19  ;;  %v651_v2 = vpop.f32.mrf.mxu0 }
 0x15f   : > { %v1239_v37 = vpop.f32.mrf.mxu3  ;;  %v1586_v38 = vpop.permute.xlu0 %1585  ;;  %v1306_v26 = vpack.c.bf16 %v730_v24, %v730_v24  ;;  %v652_v27 = vadd.f32 %v2688_v22, %v651_v2 }
 0x160   : > { %v1240_v41 = vadd.f32 %v1239_v37, %v2380_v39  ;;  %v1530_v42 = vpop.permute.xlu2 %1529  ;;  %1731 = vst.msk [vmem:[%s2446_s22 + $0xa4] sm:$0xf] %vm1689_vm3, %v1586_v38 }
 0x161   : > { %1703 = vst.msk [vmem:[%s2446_s22 + $0x34] sm:$0xf] %vm1689_vm3, %v1530_v42  ;;  %v1161_v43 = vpop.f32.mrf.mxu1  ;;  %v1275_v29 = vpack.c.bf16 %v652_v27, %v652_v27 }
 0x162   : > { %v1435_v44 = vpack.c.bf16 %v1240_v41, %v1240_v41  ;;  %v1162_v45 = vadd.f32 %v1161_v43, %v2380_v39  ;;  %1369 = vst.msk [vmem:[%s2446_s22 + $0xd0] sm:$0xf] %vm1316_vm2, %v1306_v26 }
 0x163   : > { %1338 = vst.msk [vmem:[%s2446_s22 + $0x54] sm:$0xf] %vm1316_vm2, %v1275_v29 }
 0x164   : > { %v1404_v48 = vpack.c.bf16 %v1162_v45, %v1162_v45  ;;  %1615 = vrot.lane.b32.xlu0 %v1435_v44, %s2249_s19  ;;  %v731_v34 = vpop.f32.mrf.mxu2 }
 0x165   : > { %v732_v35 = vadd.f32 %v2688_v22, %v731_v34 }
 0x166   : > { %1553 = vrot.lane.b32.xlu2 %v1404_v48, %s2249_s19  ;;  %v1588_v52 = vpop.permute.xlu1 %1587  ;;  %v654_v37 = vpop.f32.mrf.mxu0 }
 0x167   : > { %v1241_v53 = vpop.f32.mrf.mxu3  ;;  %1732 = vst.msk [vmem:[%s2446_s22 + $0xa8] sm:$0xf] %vm1689_vm3, %v1588_v52  ;;  %v1307_v38 = vpack.c.bf16 %v732_v35, %v732_v35  ;;  %v655_v40 = vadd.f32 %v2688_v22, %v654_v37 }
 0x168   : > { %v1242_v55 = vadd.f32 %v1241_v53, %v2380_v39  ;;  %v1526_v56 = vpop.permute.xlu0 %1525 }
 0x169   : > { %1701 = vst.msk [vmem:[%s2446_s22 + $0x2c] sm:$0xf] %vm1689_vm3, %v1526_v56  ;;  %v1164_v57 = vpop.f32.mrf.mxu1  ;;  %v1276_v42 = vpack.c.bf16 %v655_v40, %v655_v40 }
 0x16a   : > { %v1436_v58 = vpack.c.bf16 %v1242_v55, %v1242_v55  ;;  %v1165_v59 = vadd.f32 %v1164_v57, %v2380_v39  ;;  %1370 = vst.msk [vmem:[%s2446_s22 + $0xd4] sm:$0xf] %vm1316_vm2, %v1307_v38 }
 0x16b   : > { %1339 = vst.msk [vmem:[%s2446_s22 + $0x58] sm:$0xf] %vm1316_vm2, %v1276_v42 }
 0x16c   : > { %v1405_v62 = vpack.c.bf16 %v1165_v59, %v1165_v59  ;;  %1617 = vrot.lane.b32.xlu1 %v1436_v58, %s2249_s19  ;;  %v734_v47 = vpop.f32.mrf.mxu2 }
 0x16d   : > { %v735_v49 = vadd.f32 %v2688_v22, %v734_v47 }
 0x16e   : > { %v1596_v3 = vpop.permute.xlu2 %1595  ;;  %1555 = vrot.lane.b32.xlu0 %v1405_v62, %s2249_s19  ;;  %v656_v52 = vpop.f32.mrf.mxu0 }
 0x16f   : > { %1736 = vst.msk [vmem:[%s2446_s22 + $0xb8] sm:$0xf] %vm1689_vm3, %v1596_v3  ;;  %v1244_v4 = vpop.f32.mrf.mxu3  ;;  %v1308_v53 = vpack.c.bf16 %v735_v49, %v735_v49  ;;  %v657_v54 = vadd.f32 %v2688_v22, %v656_v52 }
 0x170   : > { %v1245_v6 = vadd.f32 %v1244_v4, %v2380_v39  ;;  %v1528_v7 = vpop.permute.xlu1 %1527 }
 0x171   : > { %1702 = vst.msk [vmem:[%s2446_s22 + $0x30] sm:$0xf] %vm1689_vm3, %v1528_v7  ;;  %v1166_v8 = vpop.f32.mrf.mxu1  ;;  %v1277_v56 = vpack.c.bf16 %v657_v54, %v657_v54 }
 0x172   : > { %v1437_v9 = vpack.c.bf16 %v1245_v6, %v1245_v6  ;;  %v1167_v10 = vadd.f32 %v1166_v8, %v2380_v39  ;;  %1371 = vst.msk [vmem:[%s2446_s22 + $0xd8] sm:$0xf] %vm1316_vm2, %v1308_v53 }
 0x173   : > { %1340 = vst.msk [vmem:[%s2446_s22 + $0x5c] sm:$0xf] %vm1316_vm2, %v1277_v56 }
 0x174   : > { %v1406_v13 = vpack.c.bf16 %v1167_v10, %v1167_v10  ;;  %1619 = vrot.lane.b32.xlu2 %v1437_v9, %s2249_s19  ;;  %v736_v61 = vpop.f32.mrf.mxu2 }
 0x175   : > { %v737_v62 = vadd.f32 %v2688_v22, %v736_v61 }
 0x176   : > { %1557 = vrot.lane.b32.xlu1 %v1406_v13, %s2249_s19  ;;  %v1592_v17 = vpop.permute.xlu0 %1591  ;;  %v659_v1 = vpop.f32.mrf.mxu0 }
 0x177   : > { %1734 = vst.msk [vmem:[%s2446_s22 + $0xb0] sm:$0xf] %vm1689_vm3, %v1592_v17  ;;  %v1246_v31 = vpop.f32.mrf.mxu3  ;;  %v1309_v4 = vpack.c.bf16 %v737_v62, %v737_v62  ;;  %v660_v5 = vadd.f32 %v2688_v22, %v659_v1 }
 0x178   : > { %v1536_v19 = vpop.permute.xlu2 %1535  ;;  %v1247_v43 = vadd.f32 %v1246_v31, %v2380_v39 }
 0x179   : > { %1706 = vst.msk [vmem:[%s2446_s22 + $0x40] sm:$0xf] %vm1689_vm3, %v1536_v19  ;;  %v1169_v20 = vpop.f32.mrf.mxu1  ;;  %v1278_v7 = vpack.c.bf16 %v660_v5, %v660_v5 }
 0x17a   : > { %v1170_v21 = vadd.f32 %v1169_v20, %v2380_v39  ;;  %v1438_v50 = vpack.c.bf16 %v1247_v43, %v1247_v43  ;;  %1372 = vst.msk [vmem:[%s2446_s22 + $0xdc] sm:$0xf] %vm1316_vm2, %v1309_v4 }
 0x17b   : > { %1341 = vst.msk [vmem:[%s2446_s22 + $0x60] sm:$0xf] %vm1316_vm2, %v1278_v7 }
 0x17c   : > { %v1407_v25 = vpack.c.bf16 %v1170_v21, %v1170_v21  ;;  %v739_v10 = vpop.f32.mrf.mxu2 }
 0x17d   : > { %v740_v11 = vadd.f32 %v2688_v22, %v739_v10 }
 0x17e   : > { %1559 = vrot.lane.b32.xlu2 %v1407_v25, %s2249_s19  ;;  %v1594_v28 = vpop.permute.xlu1 %1593  ;;  %v661_v13 = vpop.f32.mrf.mxu0 }
 0x17f   : > { %1735 = vst.msk [vmem:[%s2446_s22 + $0xb4] sm:$0xf] %vm1689_vm3, %v1594_v28  ;;  %v1249_v48 = vpop.f32.mrf.mxu3  ;;  %v1310_v14 = vpack.c.bf16 %v740_v11, %v740_v11  ;;  %v662_v15 = vadd.f32 %v2688_v22, %v661_v13 }
 0x180   : > { %v1532_v30 = vpop.permute.xlu0 %1531  ;;  %v1250_v57 = vadd.f32 %v1249_v48, %v2380_v39 }
 0x181   : > { %1704 = vst.msk [vmem:[%s2446_s22 + $0x38] sm:$0xf] %vm1689_vm3, %v1532_v30  ;;  %v1171_v32 = vpop.f32.mrf.mxu1  ;;  %v1279_v16 = vpack.c.bf16 %v662_v15, %v662_v15 }
 0x182   : > { %v1172_v33 = vadd.f32 %v1171_v32, %v2380_v39  ;;  %v1439_v63 = vpack.c.bf16 %v1250_v57, %v1250_v57  ;;  %1373 = vst.msk [vmem:[%s2446_s22 + $0xe0] sm:$0xf] %vm1316_vm2, %v1310_v14 }
 0x183   : > { %1342 = vst.msk [vmem:[%s2446_s22 + $0x64] sm:$0xf] %vm1316_vm2, %v1279_v16 }
 0x184   : > { %v1408_v36 = vpack.c.bf16 %v1172_v33, %v1172_v33  ;;  %v741_v18 = vpop.f32.mrf.mxu2 }
 0x185   : > { %v742_v19 = vadd.f32 %v2688_v22, %v741_v18 }
 0x186   : > { %v1602_v41 = vpop.permute.xlu2 %1601  ;;  %1561 = vrot.lane.b32.xlu0 %v1408_v36, %s2249_s19  ;;  %v664_v20 = vpop.f32.mrf.mxu0 }
 0x187   : > { %1739 = vst.msk [vmem:[%s2446_s22 + $0xc4] sm:$0xf] %vm1689_vm3, %v1602_v41  ;;  %v1251_v3 = vpop.f32.mrf.mxu3  ;;  %v1311_v21 = vpack.c.bf16 %v742_v19, %v742_v19  ;;  %v665_v23 = vadd.f32 %v2688_v22, %v664_v20 }
 0x188   : > { %v1534_v44 = vpop.permute.xlu1 %1533  ;;  %v1252_v8 = vadd.f32 %v1251_v3, %v2380_v39 }
 0x189   : > { %1705 = vst.msk [vmem:[%s2446_s22 + $0x3c] sm:$0xf] %vm1689_vm3, %v1534_v44  ;;  %v1174_v45 = vpop.f32.mrf.mxu1  ;;  %v1280_v25 = vpack.c.bf16 %v665_v23, %v665_v23 }
 0x18a   : > { %v1175_v46 = vadd.f32 %v1174_v45, %v2380_v39  ;;  %v1440_v12 = vpack.c.bf16 %v1252_v8, %v1252_v8  ;;  %1374 = vst.msk [vmem:[%s2446_s22 + $0xe4] sm:$0xf] %vm1316_vm2, %v1311_v21 }
 0x18b   : > { %1343 = vst.msk [vmem:[%s2446_s22 + $0x68] sm:$0xf] %vm1316_vm2, %v1280_v25 }
 0x18c   : > { %v1409_v51 = vpack.c.bf16 %v1175_v46, %v1175_v46  ;;  %v744_v26 = vpop.f32.mrf.mxu2 }
 0x18d   : > { %v745_v27 = vadd.f32 %v2688_v22, %v744_v26 }
 0x18e   : > { %1563 = vrot.lane.b32.xlu1 %v1409_v51, %s2249_s19  ;;  %1621 = vrot.lane.b32.xlu0 %v1438_v50, %s2249_s19  ;;  %v1598_v55 = vpop.permute.xlu0 %1597  ;;  %v666_v28 = vpop.f32.mrf.mxu0 }
 0x18f   : > { %1737 = vst.msk [vmem:[%s2446_s22 + $0xbc] sm:$0xf] %vm1689_vm3, %v1598_v55  ;;  %v1312_v29 = vpack.c.bf16 %v745_v27, %v745_v27  ;;  %v667_v30 = vadd.f32 %v2688_v22, %v666_v28 }
 0x190   : > { %v1542_v58 = vpop.permute.xlu2 %1541 }
 0x191   : > { %1709 = vst.msk [vmem:[%s2446_s22 + $0x4c] sm:$0xf] %vm1689_vm3, %v1542_v58  ;;  %v1176_v59 = vpop.f32.mrf.mxu1  ;;  %v1281_v32 = vpack.c.bf16 %v667_v30, %v667_v30 }
 0x192   : > { %v1177_v60 = vadd.f32 %v1176_v59, %v2380_v39  ;;  %1375 = vst.msk [vmem:[%s2446_s22 + $0xe8] sm:$0xf] %vm1316_vm2, %v1312_v29 }
 0x193   : > { %1344 = vst.msk [vmem:[%s2446_s22 + $0x6c] sm:$0xf] %vm1316_vm2, %v1281_v32 }
 0x194   : > { %v1410_v0 = vpack.c.bf16 %v1177_v60, %v1177_v60  ;;  %v746_v45 = vpop.f32.mrf.mxu2 }
 0x195   : > { %v747_v46 = vadd.f32 %v2688_v22, %v746_v45 }
 0x196   : > { %1565 = vrot.lane.b32.xlu2 %v1410_v0, %s2249_s19  ;;  %1623 = vrot.lane.b32.xlu1 %v1439_v63, %s2249_s19  ;;  %v1600_v6 = vpop.permute.xlu1 %1599  ;;  %v669_v34 = vpop.f32.mrf.mxu0 }
 0x197   : > { %1738 = vst.msk [vmem:[%s2446_s22 + $0xc0] sm:$0xf] %vm1689_vm3, %v1600_v6  ;;  %v670_v35 = vadd.f32 %v2688_v22, %v669_v34  ;;  %v1313_v48 = vpack.c.bf16 %v747_v46, %v747_v46 }
 0x198   : > { %v1538_v9 = vpop.permute.xlu0 %1537 }
 0x199   : > { %1707 = vst.msk [vmem:[%s2446_s22 + $0x44] sm:$0xf] %vm1689_vm3, %v1538_v9  ;;  %v1282_v37 = vpack.c.bf16 %v670_v35, %v670_v35 }
 0x19a   : > { %1376 = vst.msk [vmem:[%s2446_s22 + $0xec] sm:$0xf] %vm1316_vm2, %v1313_v48 }
 0x19b   : > { %1345 = vst.msk [vmem:[%s2446_s22 + $0x70] sm:$0xf] %vm1316_vm2, %v1282_v37 }
 0x19c   : > { %v749_v54 = vpop.f32.mrf.mxu2 }
 0x19d   : > { %v750_v56 = vadd.f32 %v2688_v22, %v749_v54 }
 0x19e   : > { %1625 = vrot.lane.b32.xlu2 %v1440_v12, %s2249_s19  ;;  %v1608_v39 = vpop.permute.xlu2 %1607  ;;  %v671_v40 = vpop.f32.mrf.mxu0 }
 0x19f   : > { %1742 = vst.msk [vmem:[%s2446_s22 + $0xd0] sm:$0xf] %vm1689_vm3, %v1608_v39  ;;  %v672_v41 = vadd.f32 %v2688_v22, %v671_v40  ;;  %v1314_v59 = vpack.c.bf16 %v750_v56, %v750_v56 }
 0x1a0   : > { %v1540_v17 = vpop.permute.xlu1 %1539 }
 0x1a1   : > { %1708 = vst.msk [vmem:[%s2446_s22 + $0x48] sm:$0xf] %vm1689_vm3, %v1540_v17  ;;  %v1283_v43 = vpack.c.bf16 %v672_v41, %v672_v41 }
 0x1a2   : > { %1377 = vst.msk [vmem:[%s2446_s22 + $0xf0] sm:$0xf] %vm1316_vm2, %v1314_v59 }
 0x1a3   : > { %1346 = vst.msk [vmem:[%s2446_s22 + $0x74] sm:$0xf] %vm1316_vm2, %v1283_v43 }
 0x1a4   : > { %v751_v61 = vpop.f32.mrf.mxu2 }
 0x1a5   : > { %v752_v62 = vadd.f32 %v2688_v22, %v751_v61 }
 0x1a6   : > { %v1604_v24 = vpop.permute.xlu0 %1603  ;;  %v674_v47 = vpop.f32.mrf.mxu0 }
 0x1a7   : > { %1740 = vst.msk [vmem:[%s2446_s22 + $0xc8] sm:$0xf] %vm1689_vm3, %v1604_v24  ;;  %v675_v49 = vadd.f32 %v2688_v22, %v674_v47  ;;  %v1315_v0 = vpack.c.bf16 %v752_v62, %v752_v62 }
 0x1a8   : > { %v1548_v2 = vpop.permute.xlu2 %1547 }
 0x1a9   : > { %1712 = vst.msk [vmem:[%s2446_s22 + $0x58] sm:$0xf] %vm1689_vm3, %v1548_v2  ;;  %v1284_v51 = vpack.c.bf16 %v675_v49, %v675_v49 }
 0x1aa   : > { %1378 = vst.msk [vmem:[%s2446_s22 + $0xf4] sm:$0xf] %vm1316_vm2, %v1315_v0 }
 0x1ab   : > { %1347 = vst.msk [vmem:[%s2446_s22 + $0x78] sm:$0xf] %vm1316_vm2, %v1284_v51 }
 0x1ae   : > { %v1606_v31 = vpop.permute.xlu1 %1605  ;;  %v676_v53 = vpop.f32.mrf.mxu0 }
 0x1af   : > { %1741 = vst.msk [vmem:[%s2446_s22 + $0xcc] sm:$0xf] %vm1689_vm3, %v1606_v31  ;;  %v677_v55 = vadd.f32 %v2688_v22, %v676_v53 }
 0x1b0   : > { %v1544_v33 = vpop.permute.xlu0 %1543 }
 0x1b1   : > { %1710 = vst.msk [vmem:[%s2446_s22 + $0x50] sm:$0xf] %vm1689_vm3, %v1544_v33  ;;  %v1285_v58 = vpack.c.bf16 %v677_v55, %v677_v55 }
 0x1b3   : > { %1348 = vst.msk [vmem:[%s2446_s22 + $0x7c] sm:$0xf] %vm1316_vm2, %v1285_v58 }
 0x1b6   : > { %v1614_v36 = vpop.permute.xlu2 %1613 }
 0x1b7   : > { %1745 = vst.msk [vmem:[%s2446_s22 + $0xdc] sm:$0xf] %vm1689_vm3, %v1614_v36 }
 0x1b8   : > { %v1546_v38 = vpop.permute.xlu1 %1545 }
 0x1b9   : > { %1711 = vst.msk [vmem:[%s2446_s22 + $0x54] sm:$0xf] %vm1689_vm3, %v1546_v38 }
 0x1be   : > { %v1610_v42 = vpop.permute.xlu0 %1609 }
 0x1bf   : > { %1743 = vst.msk [vmem:[%s2446_s22 + $0xd4] sm:$0xf] %vm1689_vm3, %v1610_v42 }
 0x1c0   : > { %v1554_v44 = vpop.permute.xlu2 %1553 }
 0x1c1   : > { %1715 = vst.msk [vmem:[%s2446_s22 + $0x64] sm:$0xf] %vm1689_vm3, %v1554_v44 }
 0x1c6   : > { %v1612_v50 = vpop.permute.xlu1 %1611 }
 0x1c7   : > { %1744 = vst.msk [vmem:[%s2446_s22 + $0xd8] sm:$0xf] %vm1689_vm3, %v1612_v50 }
 0x1c8   : > { %v1550_v52 = vpop.permute.xlu0 %1549 }
 0x1c9   : > { %1713 = vst.msk [vmem:[%s2446_s22 + $0x5c] sm:$0xf] %vm1689_vm3, %v1550_v52 }
 0x1ce   : > { %v1620_v57 = vpop.permute.xlu2 %1619 }
 0x1cf   : > { %1748 = vst.msk [vmem:[%s2446_s22 + $0xe8] sm:$0xf] %vm1689_vm3, %v1620_v57 }
 0x1d0   : > { %v1552_v60 = vpop.permute.xlu1 %1551 }
 0x1d1   : > { %1714 = vst.msk [vmem:[%s2446_s22 + $0x60] sm:$0xf] %vm1689_vm3, %v1552_v60 }
 0x1d6   : > { %v1616_v63 = vpop.permute.xlu0 %1615 }
 0x1d7   : > { %1746 = vst.msk [vmem:[%s2446_s22 + $0xe0] sm:$0xf] %vm1689_vm3, %v1616_v63 }
 0x1d8   : > { %v1560_v1 = vpop.permute.xlu2 %1559 }
 0x1d9   : > { %1718 = vst.msk [vmem:[%s2446_s22 + $0x70] sm:$0xf] %vm1689_vm3, %v1560_v1 }
 0x1de   : > { %v1618_v3 = vpop.permute.xlu1 %1617 }
 0x1df   : > { %1747 = vst.msk [vmem:[%s2446_s22 + $0xe4] sm:$0xf] %vm1689_vm3, %v1618_v3 }
 0x1e0   : > { %v1556_v4 = vpop.permute.xlu0 %1555 }
 0x1e1   : > { %1716 = vst.msk [vmem:[%s2446_s22 + $0x68] sm:$0xf] %vm1689_vm3, %v1556_v4 }
 0x1e8   : > { %v1558_v22 = vpop.permute.xlu1 %1557 }
 0x1e9   : > { %1717 = vst.msk [vmem:[%s2446_s22 + $0x6c] sm:$0xf] %vm1689_vm3, %v1558_v22 }
 0x1f0   : > { %v1566_v5 = vpop.permute.xlu2 %1565 }
 0x1f1   : > { %1721 = vst.msk [vmem:[%s2446_s22 + $0x7c] sm:$0xf] %vm1689_vm3, %v1566_v5 }
 0x1f8   : > { %v1626_v6 = vpop.permute.xlu2 %1625  ;;  %v1562_v7 = vpop.permute.xlu0 %1561 }
 0x1f9   : > { %1751 = vst.msk [vmem:[%s2446_s22 + $0xf4] sm:$0xf] %vm1689_vm3, %v1626_v6 }
 0x1fa   : > { %1719 = vst.msk [vmem:[%s2446_s22 + $0x74] sm:$0xf] %vm1689_vm3, %v1562_v7 }
 0x200   : > { %v1564_v8 = vpop.permute.xlu1 %1563  ;;  %v1622_v9 = vpop.permute.xlu0 %1621 }
 0x201   : > { %1720 = vst.msk [vmem:[%s2446_s22 + $0x78] sm:$0xf] %vm1689_vm3, %v1564_v8 }
 0x202   : > { %1749 = vst.msk [vmem:[%s2446_s22 + $0xec] sm:$0xf] %vm1689_vm3, %v1622_v9 }
 0x208   : > { %v1624_v10 = vpop.permute.xlu1 %1623 }
 0x209   : > { %1750 = vst.msk [vmem:[%s2446_s22 + $0xf0] sm:$0xf] %vm1689_vm3, %v1624_v10 }
 0x20a PF: > { %s15_s18 = sadd.s32 1, %s2246_s18  }
 0x20b   : > { %p12_p4 = scmp.ge.s32.totalorder %s15_s18, 4  }
 0x20d   :  { %14 = sbr.rel (!%p12_p4) target bundleno = 1 (0x1), region = 73 }

// kernel: tile.8
= control target key start
LH: loop header
LB: loop body
LE: loop exit
PB: predicated region body
PF: predicated region fallthrough
CT: control target
= control target key end

     0   :  { %s22_s0 = inlined_call_operand.vmem [shape: f32[8], index: 0, kind: input, shape index: {}]   ;;  %s23_s1 = inlined_call_operand.vmem [shape: f32[4,8], index: 1, kind: output, shape index: {}]  }
   0x1   :  { %v4_v0 = vld [vmem:[%s22_s0] ss:$0 sm:$0xff] }
   0x2   :  { %5 = vst [vmem:[%s23_s1] sm:$0xf] %v4_v0 }

// kernel: tile.9
= control target key start
LH: loop header
LB: loop body
LE: loop exit
PB: predicated region body
PF: predicated region fallthrough
CT: control target
= control target key end

     0   :  { %s37_s8 = smov 8   ;;  %s38_s9 = smov 16   ;;  %vm7_vm0 = vcmask 64512   ;;  %vm13_vm1 = vcmask 261312   ;;  %vm19_vm2 = vcmask 195712   ;;  %vm25_vm3 = vcmask 130112   ;;  %s55_s0 = inlined_call_operand.vmem [shape: f32[4,8], index: 0, kind: input, shape index: {}]   ;;  %s56_s1 = inlined_call_operand.vmem [shape: f32[1,32], index: 1, kind: output, shape index: {}]  }
   0x1   :  { %v4_v0 = vld [vmem:[%s55_s0] sm:$0xf]  ;;  %s36_s0 = smov 24  }
   0x2   :  { %5 = vst [vmem:[#allocation1] sm:$0xf] %v4_v0 }
   0x9   :  { %v10_v1 = vld [vmem:[#allocation1 + $0x3] sm:$0x1]   ;;  %v22_v2 = vld [vmem:[#allocation1 + $0x1] sm:$0x1]   ;;  %v16_v3 = vld [vmem:[#allocation1 + $0x2] sm:$0x1]  }
   0xa   :  { %11 = vrot.lane.b32.xlu0 %v10_v1, %s36_s0  ;;  %23 = vrot.lane.b32.xlu1 %v22_v2, %s37_s8  ;;  %v6_v4 = vld [vmem:[#allocation1] sm:$0x1]  }
   0xb   :  { %8 = vst.msk [vmem:[#allocation0] sm:$0x1] %vm7_vm0, %v6_v4  }
  0x12   :  { %17 = vrot.lane.b32.xlu0 %v16_v3, %s38_s9 }
  0x7c   :  { %v12_v5 = vpop.permute.xlu0 %11   ;;  %v24_v6 = vpop.permute.xlu1 %23  }
  0x7d   :  { %14 = vst.msk [vmem:[#allocation0] sm:$0x1] %vm13_vm1, %v12_v5  }
  0x84   :  { %v18_v7 = vpop.permute.xlu0 %17  }
  0x85   :  { %20 = vst.msk [vmem:[#allocation0] sm:$0x1] %vm19_vm2, %v18_v7  }
  0x86   :  { %26 = vst.msk [vmem:[#allocation0] sm:$0x1] %vm25_vm3, %v24_v6  }
  0x8d   :  { %v29_v8 = vld [vmem:[#allocation0] sm:$0x1] }
  0x8e   :  { %32 = vst [vmem:[%s56_s1] sm:$0x1] %v29_v8 }

// kernel: decoder_block_v4_forward.8
= control target key start
LH: loop header
LB: loop body
LE: loop exit
PB: predicated region body
PF: predicated region fallthrough
CT: control target
= control target key end

     0   :  { %s3373_s24 = smov 0   ;;  %s5033_s0 = inlined_call_operand.vmem [shape: bf16[512,8], index: 0, kind: input, shape index: {}]   ;;  %s5034_s1 = inlined_call_operand.vmem [shape: bf16[512,4], index: 1, kind: input, shape index: {}]   ;;  %s5035_s2 = inlined_call_operand.vmem [shape: bf16[512,4], index: 2, kind: input, shape index: {}]   ;;  %s5036_s3 = inlined_call_operand.vmem [shape: bf16[512,8], index: 3, kind: input, shape index: {}]   ;;  %s5037_s4 = inlined_call_operand.vmem [shape: bf16[16,4], index: 4, kind: input, shape index: {}]   ;;  %s5038_s5 = inlined_call_operand.vmem [shape: bf16[8,16], index: 5, kind: input, shape index: {}]   ;;  %s5039_s6 = inlined_call_operand.vmem [shape: f32[1,16], index: 6, kind: input, shape index: {}]   ;;  %s5040_s7 = inlined_call_operand.vmem [shape: bf16[512,16], index: 7, kind: output, shape index: {}]  }
   0x1 LB: > { %s2880_s25 = sadd.s32 4294967295, %s3325_s24   ;;  %p2884_p0 = scmp.ge.s32.totalorder %s3325_s24, 1  ;;  %s3325_s24 = sphi %s3373_s24, %s17_s24  }
   0x2   : > { %p271_p1 = scmp.lt.s32.totalorder %s3325_s24, 3 }
   0x4   : > { %p272_p2 = pnand %p2884_p0, %p271_p1 }
   0x6   : > { %275 = sbr.rel (%p272_p2) target bundleno = 928 (0x3a0), region = 48 }
   0xb   : > { %v381_v0 = vld [vmem:[%s5038_s5] sm:$0xf]  ;;  %vm511_vm0 = vcmask 1043456   ;;  %s2885_s28 = sshll.u32 %s2880_s25, 5  ;;  %vm462_vm1 = vcmask 64512   ;;  %s3327_s13 = smov 124  }
   0xc   : > { %v513_v1 = vsel %vm511_vm0, %v381_v0, 0  ;;  %p319_p3 = scmp.lt.s32.totalorder %s2885_s28, 63  ;;  %v700_v14 = vld [vmem:[%s5037_s4] sm:$0x3]  ;;  %vm830_vm2 = vcmask 1041408   ;;  %vm781_vm3 = vcmask 31744  }
   0xd   : > { %522 = vmatpush.bf16.msra.mxu0 %v513_v1  ;;  %3297 = vmatpush.bf16.msra.mxu1 %v513_v1  ;;  %v1624_v15 = vld [vmem:[%s5037_s4 + $0x4] sm:$0x3]  ;;  %v832_v16 = vsel %vm830_vm2, %v700_v14, 0  ;;  %v1056_v37 = vld [vmem:[%s5037_s4] sm:$0xc]  ;;  %s3328_s26 = smov 120  }
   0xe   : > { %3298 = vmatpush.bf16.msra.mxu2 %v513_v1  ;;  %3299 = vmatpush.bf16.msra.mxu3 %v513_v1  ;;  %s5192_s28 = smov (!%p319_p3, %s2885_s28), 63  ;;  %v1850_v17 = vsel %vm830_vm2, %v1624_v15, 0  ;;  %v1090_v38 = vunpack.c.l.b16 %v1056_v37  ;;  %v3314_v45 = vld [vmem:[%s5039_s6] ss:$0 sm:$0xff]  ;;  %vm1023_vm4 = vcmask 27648   ;;  %s3329_s16 = smov 116  }
   0xf   : > { %s3384_s29 = sshll.u32 %s5192_s28, 2  ;;  %s3330_s17 = smov 4   ;;  %vm1591_vm5 = vcmask 60448   ;;  %vm2171_vm6 = vcmask 93248   ;;  %vm2755_vm7 = vcmask 126048  }
  0x10   : > { %s3390_s9 = scalar_lea.vmem %s5036_s3, %s3384_s29  ;;  %s3399_s12 = scalar_lea.vmem %s5033_s0, %s3384_s29  ;;  %v1091_v40 = vpack.c.b16 %v1090_v38, %v1090_v38 }
  0x11   : > { %v3233_v2 = vld [vmem:[%s3390_s9] sm:$0xff]  ;;  %v3408_v7 = vld [vmem:[%s3399_s12 + $0x10] sm:$0xff]  ;;  %v3414_v8 = vld [vmem:[%s3399_s12 + $0x8] sm:$0xff]  ;;  %841 = vmatpush.bf16.msrb.mxu1 %v832_v16  ;;  %s3468_s20 = scalar_lea.vmem %s5034_s1, %s3384_s29  ;;  %s3694_s15 = scalar_lea.vmem %s5040_s7, %s3384_s29 }
  0x12   : > { %v3237_v3 = vld [vmem:[%s3390_s9 + $0x20] sm:$0xff]  ;;  %2959 = vmatmul.msk.bf16.vlgmr.msra.gmra.mxu0 %vm462_vm1, %v3233_v2  ;;  %1061 = vrot.lane.b32.xlu1 %v3408_v7, %s3327_s13  ;;  %v3238_v9 = vld [vmem:[%s3390_s9 + $0x28] sm:$0xff]  ;;  %v3425_v13 = vld [vmem:[%s3399_s12 + $0x18] sm:$0xff]  ;;  %v1092_v41 = vrot.slane %v1091_v40, 2  ;;  %s3331_s18 = smov 8   ;;  %s3332_s23 = smov 12  }
  0x13   : > { %v3241_v4 = vld [vmem:[%s3390_s9 + $0x40] sm:$0xff]  ;;  %2963 = vmatmul.msk.bf16.vlgmr.msra.gmra.mxu1 %vm462_vm1, %v3237_v3  ;;  %v3234_v10 = vld [vmem:[%s3390_s9 + $0x8] sm:$0xff]  ;;  %1859 = vmatpush.bf16.msrb.mxu3 %v1850_v17  ;;  %v3239_v18 = vld [vmem:[%s3390_s9 + $0x30] sm:$0xff] }
  0x14   : > { %v3245_v5 = vld [vmem:[%s3390_s9 + $0x60] sm:$0xff]  ;;  %2967 = vmatmul.msk.bf16.vlgmr.msra.gmra.mxu2 %vm462_vm1, %v3241_v4  ;;  %v3246_v11 = vld [vmem:[%s3390_s9 + $0x68] sm:$0xff]  ;;  %v3235_v19 = vld [vmem:[%s3390_s9 + $0x10] sm:$0xff]  ;;  %v1270_v42 = vsel %vm830_vm2, %v1092_v41, 0 }
  0x15   : > { %v3249_v6 = vld [vmem:[%s3399_s12] sm:$0xff]  ;;  %2971 = vmatmul.msk.bf16.vlgmr.msra.gmra.mxu3 %vm462_vm1, %v3245_v5  ;;  %v3242_v12 = vld [vmem:[%s3390_s9 + $0x48] sm:$0xff]  ;;  %v3247_v20 = vld [vmem:[%s3390_s9 + $0x70] sm:$0xff]  ;;  %1279 = vmatpush.bf16.msrb.mxu2 %v1270_v42 }
  0x16   : > { %1057 = vrot.lane.b32.xlu0 %v3249_v6, %s3327_s13  ;;  %v3243_v21 = vld [vmem:[%s3390_s9 + $0x50] sm:$0xff]  ;;  %v3240_v22 = vld [vmem:[%s3390_s9 + $0x38] sm:$0xff]  ;;  %v3253_v24 = vld [vmem:[%s3399_s12 + $0x20] sm:$0xff] }
  0x17   : > { %v3248_v23 = vld [vmem:[%s3390_s9 + $0x78] sm:$0xff]  ;;  %v3453_v25 = vld [vmem:[%s3399_s12 + $0x30] sm:$0xff]  ;;  %1065 = vrot.lane.b32.xlu2 %v3253_v24, %s3327_s13  ;;  %v3459_v26 = vld [vmem:[%s3399_s12 + $0x28] sm:$0xff] }
  0x18   : > { %v3462_v27 = vld [vmem:[%s3399_s12 + $0x48] sm:$0xff]  ;;  %v3265_v28 = vld [vmem:[%s3468_s20] sm:$0xff]  ;;  %v3244_v29 = vld [vmem:[%s3390_s9 + $0x58] sm:$0xff] }
  0x19   : > { %v3479_v30 = vld [vmem:[%s3399_s12 + $0x40] sm:$0xff]  ;;  %v3482_v31 = vld [vmem:[%s3399_s12 + $0x38] sm:$0xff]  ;;  %v3500_v35 = vld [vmem:[%s3399_s12 + $0x50] sm:$0xff] }
  0x1a   : > { %1063 = vrot.lane.b32.xlu1 %v3425_v13, %s3327_s13  ;;  %v3485_v32 = vld [vmem:[%s3399_s12 + $0x60] sm:$0xff]  ;;  %v3236_v33 = vld [vmem:[%s3390_s9 + $0x18] sm:$0xff]  ;;  %v3266_v39 = vld [vmem:[%s3468_s20 + $0x8] sm:$0xff]  ;;  %s3631_s9 = scalar_lea.vmem %s5035_s2, %s3384_s29 }
  0x1b   : > { %v3497_v34 = vld [vmem:[%s3399_s12 + $0x58] sm:$0xff]  ;;  %v3520_v43 = vld [vmem:[%s3399_s12 + $0x70] sm:$0xff]  ;;  %v3523_v44 = vld [vmem:[%s3399_s12 + $0x68] sm:$0xff] }
  0x1c   : > { %v3503_v36 = vld [vmem:[%s3399_s12 + $0x78] sm:$0xff]  ;;  %v3267_v46 = vld [vmem:[%s3468_s20 + $0x10] sm:$0xff]  ;;  %v3269_v51 = vld [vmem:[%s3468_s20 + $0x20] sm:$0xff] }
  0x1d   : > { %v3268_v47 = vld [vmem:[%s3468_s20 + $0x18] sm:$0xff]  ;;  %v3270_v59 = vld [vmem:[%s3468_s20 + $0x28] sm:$0xff]  ;;  %v3271_v3 = vld [vmem:[%s3468_s20 + $0x30] sm:$0xff] }
  0x1e   : > { %1059 = vrot.lane.b32.xlu0 %v3414_v8, %s3327_s13  ;;  %v2204_v5 = vld [vmem:[%s5037_s4 + $0x4] sm:$0xc]  ;;  %v3272_v17 = vld [vmem:[%s3468_s20 + $0x38] sm:$0xff] }
  0x1f   : > { %1067 = vrot.lane.b32.xlu2 %v3459_v26, %s3327_s13  ;;  %v3281_v14 = vld [vmem:[%s3631_s9] sm:$0xff] }
  0x22   : > { %2960 = vmatmul.msk.bf16.gmra.mxu0 %vm462_vm1, %v3234_v10  ;;  %1071 = vrot.lane.b32.xlu1 %v3482_v31, %s3327_s13 }
  0x23   : > { %2964 = vmatmul.msk.bf16.gmra.mxu1 %vm462_vm1, %v3238_v9 }
  0x24   : > { %2968 = vmatmul.msk.bf16.gmra.mxu2 %vm462_vm1, %v3242_v12 }
  0x25   : > { %2972 = vmatmul.msk.bf16.gmra.mxu3 %vm462_vm1, %v3246_v11 }
  0x26   : > { %1069 = vrot.lane.b32.xlu0 %v3453_v25, %s3327_s13 }
  0x27   : > { %1073 = vrot.lane.b32.xlu2 %v3479_v30, %s3327_s13 }
  0x2a   : > { %1077 = vrot.lane.b32.xlu1 %v3500_v35, %s3327_s13 }
  0x2e   : > { %1075 = vrot.lane.b32.xlu0 %v3462_v27, %s3327_s13 }
  0x2f   : > { %1079 = vrot.lane.b32.xlu2 %v3497_v34, %s3327_s13 }
  0x32   : > { %2961 = vmatmul.msk.bf16.gmra.mxu0 %vm462_vm1, %v3235_v19  ;;  %1083 = vrot.lane.b32.xlu1 %v3523_v44, %s3327_s13 }
  0x33   : > { %2965 = vmatmul.msk.bf16.gmra.mxu1 %vm462_vm1, %v3239_v18 }
  0x34   : > { %2969 = vmatmul.msk.bf16.gmra.mxu2 %vm462_vm1, %v3243_v21 }
  0x35   : > { %2973 = vmatmul.msk.bf16.gmra.mxu3 %vm462_vm1, %v3247_v20 }
  0x36   : > { %1081 = vrot.lane.b32.xlu0 %v3485_v32, %s3327_s13 }
  0x37   : > { %1085 = vrot.lane.b32.xlu2 %v3520_v43, %s3327_s13 }
  0x3e   : > { %1087 = vrot.lane.b32.xlu0 %v3503_v36, %s3327_s13 }
  0x42   : > { %2962 = vmatmul.msk.bf16.gmra.mxu0 %vm462_vm1, %v3236_v33 }
  0x43   : > { %2966 = vmatmul.msk.bf16.gmra.mxu1 %vm462_vm1, %v3240_v22 }
  0x44   : > { %2970 = vmatmul.msk.bf16.gmra.mxu2 %vm462_vm1, %v3244_v29  ;;  %v3273_v29 = vld [vmem:[%s3468_s20 + $0x40] sm:$0xff] }
  0x45   : > { %2974 = vmatmul.msk.bf16.gmra.mxu3 %vm462_vm1, %v3248_v23  ;;  %v3282_v23 = vld [vmem:[%s3631_s9 + $0x8] sm:$0xff] }
  0x46   : > { %1364 = vrot.lane.b32.xlu0 %v3314_v45, %s3327_s13 }
  0x53   : > { %3039 = vmatmul.msk.bf16.vlgmr.msrb.gmra.mxu1 %vm781_vm3, %v3249_v6  ;;  %v2286_v6 = vunpack.c.l.b16 %v2204_v5 }
  0x55   : > { %3135 = vmatmul.msk.bf16.vlgmr.msrb.gmra.mxu3 %vm781_vm3, %v3265_v28  ;;  %v2287_v9 = vpack.c.b16 %v2286_v6, %v2286_v6 }
  0x57   : > { %v2288_v11 = vrot.slane %v2287_v9, 2 }
  0x59   : > { %v2434_v12 = vsel %vm830_vm2, %v2288_v11, 0 }
  0x5a   : > { %2443 = vmatpush.bf16.msrb.mxu0 %v2434_v12 }
  0x5d   : > { %3215 = vmatmul.msk.bf16.vlgmr.msrb.gmra.mxu0 %vm781_vm3, %v3281_v14 }
  0x63   : > { %3040 = vmatmul.msk.bf16.gmra.mxu1 %vm781_vm3, %v3414_v8 }
  0x65   : > { %3136 = vmatmul.msk.bf16.gmra.mxu3 %vm781_vm3, %v3266_v39 }
  0x6d   : > { %3216 = vmatmul.msk.bf16.gmra.mxu0 %vm781_vm3, %v3282_v23 }
  0x71   : > { %v1066_v10 = vpop.permute.xlu2 %1065 }
  0x73   : > { %3041 = vmatmul.msk.bf16.gmra.mxu1 %vm781_vm3, %v3408_v7 }
  0x75   : > { %3137 = vmatmul.msk.bf16.gmra.mxu3 %vm781_vm3, %v3267_v46 }
  0x79   : > { %v1068_v18 = vpop.permute.xlu2 %1067 }
  0x81   : > { %v3665_v22 = vpop.permute.xlu2 %1073 }
  0x83   : > { %3042 = vmatmul.msk.bf16.gmra.mxu1 %vm781_vm3, %v3425_v13 }
  0x84   : > { %v1062_v60 = vpop.permute.xlu1 %1061 }
  0x85   : > { %3138 = vmatmul.msk.bf16.gmra.mxu3 %vm781_vm3, %v3268_v47 }
  0x88   : > { %v1058_v48 = vpop.permute.xlu0 %1057 }
  0x89   : > { %3055 = vmatmul.msk.bf16.vlgmr.msrb.gmra.mxu2 %vm781_vm3, %v1058_v48  ;;  %v3698_v41 = vpop.permute.xlu2 %1079 }
  0x8c   : > { %v1064_v4 = vpop.permute.xlu1 %1063 }
  0x8f   : > { %v3542_v49 = vpop.f32.mrf.mxu0 }
  0x90   : > { %v3544_v50 = vpop.f32.mrf.mxu1  ;;  %1125 = vrot.lane.b32.xlu1 %v3542_v49, %s3327_s13  ;;  %v1060_v52 = vpop.permute.xlu0 %1059 }
  0x91   : > { %1721 = vrot.lane.b32.xlu2 %v3544_v50, %s3328_s26  ;;  %1141 = vrot.lane.b32.xlu0 %v3544_v50, %s3327_s13  ;;  %v3727_v6 = vpop.permute.xlu2 %1085 }
  0x93   : > { %3043 = vmatmul.msk.bf16.gmra.mxu1 %vm781_vm3, %v3253_v24 }
  0x94   : > { %v1072_v11 = vpop.permute.xlu1 %1071 }
  0x95   : > { %3139 = vmatmul.msk.bf16.gmra.mxu3 %vm781_vm3, %v3269_v51  ;;  %v3283_v51 = vld [vmem:[%s3631_s9 + $0x10] sm:$0xff] }
  0x96   : > { %3217 = vmatmul.msk.bf16.gmra.mxu0 %vm781_vm3, %v3283_v51 }
  0x97   : > { %v3557_v54 = vpop.f32.mrf.mxu2  ;;  %v3570_v57 = vpop.f32.mrf.mxu0 }
  0x98   : > { %v3555_v53 = vpop.f32.mrf.mxu3  ;;  %5058 = vst [vmem:[#allocation3_spill] sm:$0xff] %v3557_v54  ;;  %v3560_v55 = vpop.f32.mrf.mxu1 }
  0x99   : > { %5057 = vst [vmem:[#allocation2_spill] sm:$0xff] %v3555_v53  ;;  %3056 = vmatmul.msk.bf16.gmra.mxu2 %vm781_vm3, %v1060_v52  ;;  %1157 = vrot.lane.b32.xlu2 %v3557_v54, %s3327_s13  ;;  %v1070_v33 = vpop.permute.xlu0 %1069 }
  0x9a   : > { %1173 = vrot.lane.b32.xlu1 %v3555_v53, %s3327_s13  ;;  %1705 = vrot.lane.b32.xlu0 %v3542_v49, %s3328_s26 }
  0x9f   : > { %v3589_v63 = vpop.f32.mrf.mxu2  ;;  %v3599_v1 = vpop.f32.mrf.mxu0 }
  0xa0   : > { %v3568_v56 = vpop.f32.mrf.mxu3  ;;  %v3572_v58 = vpop.f32.mrf.mxu1 }
  0xa1   : > { %1127 = vrot.lane.b32.xlu2 %v3570_v57, %s3327_s13  ;;  %v3713_v47 = vpop.permute.xlu0 %1075 }
  0xa2   : > { %1737 = vrot.lane.b32.xlu1 %v3557_v54, %s3328_s26  ;;  %1723 = vrot.lane.b32.xlu0 %v3560_v55, %s3328_s26 }
  0xa3   : > { %3044 = vmatmul.msk.bf16.gmra.mxu1 %vm781_vm3, %v3459_v26 }
  0xa5   : > { %3140 = vmatmul.msk.bf16.gmra.mxu3 %vm781_vm3, %v3270_v59 }
  0xa7   : > { %v3634_v13 = vpop.f32.mrf.mxu2  ;;  %v3654_v20 = vpop.f32.mrf.mxu0 }
  0xa8   : > { %v3584_v61 = vpop.f32.mrf.mxu3  ;;  %v3587_v62 = vpop.f32.mrf.mxu1 }
  0xa9   : > { %5059 = vst [vmem:[#allocation4_spill] sm:$0xff] %v3584_v61  ;;  %3057 = vmatmul.msk.bf16.gmra.mxu2 %vm781_vm3, %v1062_v60  ;;  %1175 = vrot.lane.b32.xlu2 %v3568_v56, %s3327_s13  ;;  %v3737_v12 = vpop.permute.xlu0 %1081 }
  0xaa   : > { %1143 = vrot.lane.b32.xlu1 %v3560_v55, %s3327_s13  ;;  %1159 = vrot.lane.b32.xlu0 %v3589_v63, %s3327_s13 }
  0xaf   : > { %v3675_v26 = vpop.f32.mrf.mxu2  ;;  %v3700_v42 = vpop.f32.mrf.mxu0 }
  0xb0   : > { %v3597_v0 = vpop.f32.mrf.mxu3  ;;  %v3601_v2 = vpop.f32.mrf.mxu1  ;;  %5064 = vst [vmem:[#allocation9_spill] sm:$0xff] %v3675_v26 }
  0xb1   : > { %1739 = vrot.lane.b32.xlu2 %v3589_v63, %s3328_s26 }
  0xb2   : > { %1707 = vrot.lane.b32.xlu1 %v3570_v57, %s3328_s26  ;;  %1129 = vrot.lane.b32.xlu0 %v3599_v1, %s3327_s13 }
  0xb3   : > { %3045 = vmatmul.msk.bf16.gmra.mxu1 %vm781_vm3, %v3453_v25  ;;  %v3673_v25 = vld [vmem:[%s5039_s6] ss:$0 sm:$0xff] }
  0xb5   : > { %3141 = vmatmul.msk.bf16.gmra.mxu3 %vm781_vm3, %v3271_v3 }
  0xb7   : > { %v3718_v60 = vpop.f32.mrf.mxu2  ;;  %v3742_v23 = vpop.f32.mrf.mxu0 }
  0xb8   : > { %v3616_v7 = vpop.f32.mrf.mxu3  ;;  %v3619_v8 = vpop.f32.mrf.mxu1  ;;  %5065 = vst [vmem:[#allocation10_spill] sm:$0xff] %v3718_v60 }
  0xb9   : > { %3058 = vmatmul.msk.bf16.gmra.mxu2 %vm781_vm3, %v1064_v4  ;;  %5060 = vst [vmem:[#allocation5_spill] sm:$0xff] %v3619_v8  ;;  %1145 = vrot.lane.b32.xlu2 %v3572_v58, %s3327_s13  ;;  %v3274_v4 = vld [vmem:[%s3468_s20 + $0x48] sm:$0xff] }
  0xba   : > { %1725 = vrot.lane.b32.xlu1 %v3572_v58, %s3328_s26  ;;  %1177 = vrot.lane.b32.xlu0 %v3584_v61, %s3327_s13 }
  0xc0   : > { %v3637_v15 = vpop.f32.mrf.mxu3  ;;  %v3639_v16 = vpop.f32.mrf.mxu1 }
  0xc1   : > { %5061 = vst [vmem:[#allocation6_spill] sm:$0xff] %v3637_v15  ;;  %1709 = vrot.lane.b32.xlu2 %v3599_v1, %s3328_s26 }
  0xc2   : > { %1161 = vrot.lane.b32.xlu1 %v3634_v13, %s3327_s13  ;;  %1741 = vrot.lane.b32.xlu0 %v3634_v13, %s3328_s26 }
  0xc3   : > { %3046 = vmatmul.msk.bf16.gmra.mxu1 %vm781_vm3, %v3482_v31 }
  0xc5   : > { %3142 = vmatmul.msk.bf16.gmra.mxu3 %vm781_vm3, %v3272_v17 }
  0xc8   : > { %v3652_v19 = vpop.f32.mrf.mxu3  ;;  %v3657_v21 = vpop.f32.mrf.mxu1 }
  0xc9   : > { %5062 = vst [vmem:[#allocation7_spill] sm:$0xff] %v3652_v19  ;;  %3059 = vmatmul.msk.bf16.gmra.mxu2 %vm781_vm3, %v1066_v10  ;;  %1727 = vrot.lane.b32.xlu2 %v3587_v62, %s3328_s26 }
  0xca   : > { %1131 = vrot.lane.b32.xlu1 %v3654_v20, %s3327_s13  ;;  %1147 = vrot.lane.b32.xlu0 %v3587_v62, %s3327_s13 }
  0xd0   : > { %v3668_v24 = vpop.f32.mrf.mxu3  ;;  %v843_v28 = vpop.f32.mrf.mxu1 }
  0xd1   : > { %5063 = vst [vmem:[#allocation8_spill] sm:$0xff] %v3668_v24  ;;  %v844_v31 = vadd.f32 %v843_v28, %v3542_v49  ;;  %1163 = vrot.lane.b32.xlu2 %v3675_v26, %s3327_s13 }
  0xd2   : > { %1179 = vrot.lane.b32.xlu1 %v3597_v0, %s3327_s13  ;;  %1711 = vrot.lane.b32.xlu0 %v3654_v20, %s3328_s26 }
  0xd3   : > { %v927_v37 = vadd.f32 %v3673_v25, %v844_v31  ;;  %3047 = vmatmul.msk.bf16.gmra.mxu1 %vm781_vm3, %v3479_v30 }
  0xd5   : > { %3143 = vmatmul.msk.bf16.gmra.mxu3 %vm781_vm3, %v3273_v29  ;;  %v959_v38 = vmax.f32 %v927_v37, 0.0 }
  0xd7   : > { %v991_v39 = vpack.c.bf16 %v959_v38, %v959_v38 }
  0xd8   : > { %v3696_v40 = vpop.f32.mrf.mxu3  ;;  %v845_v30 = vpop.f32.mrf.mxu1 }
  0xd9   : > { %3060 = vmatmul.msk.bf16.gmra.mxu2 %vm781_vm3, %v1068_v18  ;;  %v846_v45 = vadd.f32 %v845_v30, %v3570_v57  ;;  %1133 = vrot.lane.b32.xlu2 %v3700_v42, %s3327_s13  ;;  %1024 = vst.msk [vmem:[%s3694_s15] sm:$0xf] %vm1023_vm4, %v991_v39  ;;  %v3759_v39 = vpop.permute.xlu1 %1077 }
  0xda   : > { %1743 = vrot.lane.b32.xlu1 %v3675_v26, %s3328_s26  ;;  %1729 = vrot.lane.b32.xlu0 %v3601_v2, %s3328_s26 }
  0xdb   : > { %v928_v46 = vadd.f32 %v3673_v25, %v846_v45  ;;  %v3275_v45 = vld [vmem:[%s3468_s20 + $0x50] sm:$0xff] }
  0xdd   : > { %v960_v48 = vmax.f32 %v928_v46, 0.0  ;;  %v3762_v46 = vpop.permute.xlu0 %1087 }
  0xdf   : > { %v992_v52 = vpack.c.bf16 %v960_v48, %v960_v48 }
  0xe0   : > { %v3716_v59 = vpop.f32.mrf.mxu3  ;;  %v848_v3 = vpop.f32.mrf.mxu1 }
  0xe1   : > { %v849_v5 = vadd.f32 %v848_v3, %v3599_v1  ;;  %1181 = vrot.lane.b32.xlu2 %v3616_v7, %s3327_s13  ;;  %1025 = vst.msk [vmem:[%s3694_s15 + $0x4] sm:$0xf] %vm1023_vm4, %v992_v52 }
  0xe2   : > { %1149 = vrot.lane.b32.xlu1 %v3601_v2, %s3327_s13  ;;  %1165 = vrot.lane.b32.xlu0 %v3718_v60, %s3327_s13 }
  0xe3   : > { %v929_v9 = vadd.f32 %v3673_v25, %v849_v5  ;;  %3048 = vmatmul.msk.bf16.gmra.mxu1 %vm781_vm3, %v3462_v27 }
  0xe5   : > { %3144 = vmatmul.msk.bf16.gmra.mxu3 %vm781_vm3, %v3274_v4  ;;  %v961_v10 = vmax.f32 %v929_v9, 0.0  ;;  %v3782_v9 = vpop.f32.mrf.mxu2 }
  0xe6   : > { %5069 = vst [vmem:[#allocation14_spill] sm:$0xff] %v3782_v9 }
  0xe7   : > { %v993_v14 = vpack.c.bf16 %v961_v10, %v961_v10 }
  0xe8   : > { %v3739_v17 = vpop.f32.mrf.mxu3  ;;  %v850_v18 = vpop.f32.mrf.mxu1 }
  0xe9   : > { %3061 = vmatmul.msk.bf16.gmra.mxu2 %vm781_vm3, %v1070_v33  ;;  %v851_v28 = vadd.f32 %v850_v18, %v3654_v20  ;;  %1745 = vrot.lane.b32.xlu2 %v3718_v60, %s3328_s26  ;;  %1026 = vst.msk [vmem:[%s3694_s15 + $0x8] sm:$0xf] %vm1023_vm4, %v993_v14  ;;  %v3284_v33 = vld [vmem:[%s3631_s9 + $0x18] sm:$0xff]  ;;  %v3796_v18 = vpop.permute.xlu0 %1364 }
  0xea   : > { %1713 = vrot.lane.b32.xlu1 %v3700_v42, %s3328_s26  ;;  %1135 = vrot.lane.b32.xlu0 %v3742_v23, %s3327_s13 }
  0xeb   : > { %v930_v27 = vadd.f32 %v3673_v25, %v851_v28  ;;  %v3754_v29 = vpop.permute.xlu2 %1721  ;;  %3218 = vmatmul.msk.bf16.gmra.mxu0 %vm781_vm3, %v3284_v33  ;;  %v3285_v33 = vld [vmem:[%s3631_s9 + $0x20] sm:$0xff] }
  0xed   : > { %v962_v31 = vmax.f32 %v930_v27, 0.0  ;;  %v3801_v27 = vpop.f32.mrf.mxu0 }
  0xef   : > { %v994_v37 = vpack.c.bf16 %v962_v31, %v962_v31 }
  0xf0   : > { %v3757_v38 = vpop.f32.mrf.mxu3  ;;  %v853_v30 = vpop.f32.mrf.mxu1 }
  0xf1   : > { %5066 = vst [vmem:[#allocation11_spill] sm:$0xff] %v3757_v38  ;;  %v854_v48 = vadd.f32 %v853_v30, %v3700_v42  ;;  %1151 = vrot.lane.b32.xlu2 %v3619_v8, %s3327_s13 }
  0xf2   : > { %1731 = vrot.lane.b32.xlu1 %v3619_v8, %s3328_s26  ;;  %1027 = vst.msk [vmem:[%s3694_s15 + $0xc] sm:$0xf] %vm1023_vm4, %v994_v37  ;;  %1183 = vrot.lane.b32.xlu0 %v3637_v15, %s3327_s13 }
  0xf3   : > { %v931_v51 = vadd.f32 %v3673_v25, %v854_v48  ;;  %v3775_v52 = vpop.permute.xlu2 %1157  ;;  %3049 = vmatmul.msk.bf16.gmra.mxu1 %vm781_vm3, %v3500_v35  ;;  %v3790_v35 = vpop.permute.xlu1 %1083  ;;  %v3276_v48 = vld [vmem:[%s3468_s20 + $0x58] sm:$0xff] }
  0xf4   : > { %5067 = vst [vmem:[#allocation12_spill] sm:$0xff] %v3775_v52 }
  0xf5   : > { %3145 = vmatmul.msk.bf16.gmra.mxu3 %vm781_vm3, %v3275_v45  ;;  %v963_v3 = vmax.f32 %v931_v51, 0.0 }
  0xf7   : > { %v995_v4 = vpack.c.bf16 %v963_v3, %v963_v3 }
  0xf8   : > { %v3780_v5 = vpop.f32.mrf.mxu3  ;;  %v855_v10 = vpop.f32.mrf.mxu1 }
  0xf9   : > { %5068 = vst [vmem:[#allocation13_spill] sm:$0xff] %v3780_v5  ;;  %3062 = vmatmul.msk.bf16.gmra.mxu2 %vm781_vm3, %v1072_v11  ;;  %v856_v14 = vadd.f32 %v855_v10, %v3742_v23  ;;  %1715 = vrot.lane.b32.xlu2 %v3742_v23, %s3328_s26  ;;  %v3279_v5 = vld [vmem:[%s3468_s20 + $0x70] sm:$0xff] }
  0xfa   : > { %1167 = vrot.lane.b32.xlu1 %v3782_v9, %s3327_s13  ;;  %1028 = vst.msk [vmem:[%s3694_s15 + $0x10] sm:$0xf] %vm1023_vm4, %v995_v4  ;;  %1747 = vrot.lane.b32.xlu0 %v3782_v9, %s3328_s26 }
  0xfb   : > { %v932_v11 = vadd.f32 %v3673_v25, %v856_v14  ;;  %v3799_v28 = vpop.permute.xlu2 %1127  ;;  %3219 = vmatmul.msk.bf16.gmra.mxu0 %vm781_vm3, %v3285_v33 }
  0xfd   : > { %v964_v31 = vmax.f32 %v932_v11, 0.0 }
  0xff   : > { %v996_v37 = vpack.c.bf16 %v964_v31, %v964_v31  ;;  %v3827_v31 = vpop.f32.mrf.mxu0 }
 0x100   : > { %v3804_v30 = vpop.f32.mrf.mxu3  ;;  %v858_v45 = vpop.f32.mrf.mxu1 }
 0x101   : > { %5070 = vst [vmem:[#allocation15_spill] sm:$0xff] %v3804_v30  ;;  %v859_v51 = vadd.f32 %v858_v45, %v3801_v27  ;;  %1733 = vrot.lane.b32.xlu2 %v3639_v16, %s3328_s26  ;;  %v3831_v45 = vpop.f32.mrf.mxu2  ;;  %v3277_v30 = vld [vmem:[%s3468_s20 + $0x60] sm:$0xff] }
 0x102   : > { %1137 = vrot.lane.b32.xlu1 %v3801_v27, %s3327_s13  ;;  %1029 = vst.msk [vmem:[%s3694_s15 + $0x14] sm:$0xf] %vm1023_vm4, %v996_v37  ;;  %1153 = vrot.lane.b32.xlu0 %v3639_v16, %s3327_s13  ;;  %v3820_v10 = vpop.permute.xlu1 %1125 }
 0x103   : > { %v933_v3 = vadd.f32 %v3673_v25, %v859_v51  ;;  %v3818_v4 = vpop.permute.xlu2 %1175  ;;  %3050 = vmatmul.msk.bf16.gmra.mxu1 %vm781_vm3, %v3497_v34  ;;  %v3825_v14 = vpop.permute.xlu0 %1141  ;;  %5074 = vst [vmem:[#allocation19_spill] sm:$0xff] %v3831_v45 }
 0x104   : > { %5071 = vst [vmem:[#allocation16_spill] sm:$0xff] %v3818_v4  ;;  %v3286_v4 = vld [vmem:[%s3631_s9 + $0x28] sm:$0xff] }
 0x105   : > { %3146 = vmatmul.msk.bf16.gmra.mxu3 %vm781_vm3, %v3276_v48  ;;  %5072 = vst [vmem:[#allocation17_spill] sm:$0xff] %v3825_v14  ;;  %v965_v11 = vmax.f32 %v933_v3, 0.0 }
 0x107   : > { %v997_v33 = vpack.c.bf16 %v965_v11, %v965_v11 }
 0x108   : > { %v3829_v37 = vpop.f32.mrf.mxu3  ;;  %v860_v51 = vpop.f32.mrf.mxu1 }
 0x109   : > { %5073 = vst [vmem:[#allocation18_spill] sm:$0xff] %v3829_v37  ;;  %3063 = vmatmul.msk.bf16.gmra.mxu2 %vm781_vm3, %v3665_v22  ;;  %v861_v34 = vadd.f32 %v860_v51, %v3827_v31  ;;  %1169 = vrot.lane.b32.xlu2 %v3831_v45, %s3327_s13 }
 0x10a   : > { %1185 = vrot.lane.b32.xlu1 %v3652_v19, %s3327_s13  ;;  %1030 = vst.msk [vmem:[%s3694_s15 + $0x18] sm:$0xf] %vm1023_vm4, %v997_v33  ;;  %1717 = vrot.lane.b32.xlu0 %v3801_v27, %s3328_s26 }
 0x10b   : > { %v934_v48 = vadd.f32 %v3673_v25, %v861_v34  ;;  %v3845_v3 = vpop.permute.xlu2 %1739  ;;  %3220 = vmatmul.msk.bf16.gmra.mxu0 %vm781_vm3, %v3286_v4 }
 0x10c   : > { %5075 = vst [vmem:[#allocation20_spill] sm:$0xff] %v3845_v3  ;;  %v3847_v22 = vpop.permute.xlu1 %1173  ;;  %v3849_v11 = vpop.permute.xlu0 %1705 }
 0x10d   : > { %5076 = vst [vmem:[#allocation21_spill] sm:$0xff] %v3847_v22  ;;  %v966_v51 = vmax.f32 %v934_v48, 0.0  ;;  %v3879_v3 = vpop.f32.mrf.mxu2 }
 0x10e   : > { %5081 = vst [vmem:[#allocation26_spill] sm:$0xff] %v3879_v3 }
 0x10f   : > { %v998_v52 = vpack.c.bf16 %v966_v51, %v966_v51 }
 0x110   : > { %v3852_v14 = vpop.f32.mrf.mxu3  ;;  %v863_v37 = vpop.f32.mrf.mxu1 }
 0x111   : > { %5077 = vst [vmem:[#allocation22_spill] sm:$0xff] %v3852_v14  ;;  %v864_v33 = vadd.f32 %v863_v37, %v3544_v50  ;;  %1139 = vrot.lane.b32.xlu2 %v3827_v31, %s3327_s13 }
 0x112   : > { %1749 = vrot.lane.b32.xlu1 %v3831_v45, %s3328_s26  ;;  %1031 = vst.msk [vmem:[%s3694_s15 + $0x1c] sm:$0xf] %vm1023_vm4, %v998_v52  ;;  %1735 = vrot.lane.b32.xlu0 %v3657_v21, %s3328_s26 }
 0x113   : > { %v935_v34 = vadd.f32 %v3673_v25, %v864_v33  ;;  %v3866_v48 = vpop.permute.xlu2 %1145  ;;  %3051 = vmatmul.msk.bf16.gmra.mxu1 %vm781_vm3, %v3485_v32 }
 0x114   : > { %5078 = vst [vmem:[#allocation23_spill] sm:$0xff] %v3866_v48  ;;  %v3871_v4 = vpop.permute.xlu1 %1737  ;;  %v3873_v37 = vpop.permute.xlu0 %1723 }
 0x115   : > { %3147 = vmatmul.msk.bf16.gmra.mxu3 %vm781_vm3, %v3277_v30  ;;  %5079 = vst [vmem:[#allocation24_spill] sm:$0xff] %v3871_v4  ;;  %v967_v51 = vmax.f32 %v935_v34, 0.0  ;;  %v3287_v4 = vld [vmem:[%s3631_s9 + $0x30] sm:$0xff] }
 0x116   : > { %5080 = vst [vmem:[#allocation25_spill] sm:$0xff] %v3873_v37 }
 0x117   : > { %v999_v52 = vpack.c.bf16 %v967_v51, %v967_v51 }
 0x118   : > { %v3875_v22 = vpop.f32.mrf.mxu3  ;;  %v865_v33 = vpop.f32.mrf.mxu1 }
 0x119   : > { %3064 = vmatmul.msk.bf16.gmra.mxu2 %vm781_vm3, %v3713_v47  ;;  %v866_v32 = vadd.f32 %v865_v33, %v3560_v55  ;;  %1757 = vrot.lane.b32.xlu2 %v3584_v61, %s3328_s26  ;;  %1032 = vst.msk [vmem:[%s3694_s15 + $0x20] sm:$0xf] %vm1023_vm4, %v999_v52  ;;  %v3278_v61 = vld [vmem:[%s3468_s20 + $0x68] sm:$0xff] }
 0x11a   : > { %1155 = vrot.lane.b32.xlu1 %v3657_v21, %s3327_s13  ;;  %1171 = vrot.lane.b32.xlu0 %v3879_v3, %s3327_s13 }
 0x11b   : > { %v936_v47 = vadd.f32 %v3673_v25, %v866_v32  ;;  %v3891_v30 = vpop.permute.xlu2 %1709  ;;  %3221 = vmatmul.msk.bf16.gmra.mxu0 %vm781_vm3, %v3287_v4 }
 0x11c   : > { %v3893_v34 = vpop.permute.xlu1 %1143  ;;  %v3895_v51 = vpop.permute.xlu0 %1159 }
 0x11d   : > { %5082 = vst [vmem:[#allocation27_spill] sm:$0xff] %v3893_v34  ;;  %v968_v33 = vmax.f32 %v936_v47, 0.0 }
 0x11e   : > { %5083 = vst [vmem:[#allocation28_spill] sm:$0xff] %v3895_v51 }
 0x11f   : > { %v1000_v48 = vpack.c.bf16 %v968_v33, %v968_v33  ;;  %v3921_v33 = vpop.f32.mrf.mxu2 }
 0x120   : > { %v3898_v14 = vpop.f32.mrf.mxu3  ;;  %v868_v37 = vpop.f32.mrf.mxu1 }
 0x121   : > { %5084 = vst [vmem:[#allocation29_spill] sm:$0xff] %v3898_v14  ;;  %v869_v52 = vadd.f32 %v868_v37, %v3572_v58  ;;  %1187 = vrot.lane.b32.xlu2 %v3668_v24, %s3327_s13 }
 0x122   : > { %1719 = vrot.lane.b32.xlu1 %v3827_v31, %s3328_s26  ;;  %1033 = vst.msk [vmem:[%s3694_s15 + $0x24] sm:$0xf] %vm1023_vm4, %v1000_v48  ;;  %1753 = vrot.lane.b32.xlu0 %v3555_v53, %s3328_s26 }
 0x123   : > { %v937_v32 = vadd.f32 %v3673_v25, %v869_v52  ;;  %v3912_v47 = vpop.permute.xlu2 %1727  ;;  %3052 = vmatmul.msk.bf16.gmra.mxu1 %vm781_vm3, %v3523_v44 }
 0x124   : > { %5085 = vst [vmem:[#allocation30_spill] sm:$0xff] %v3912_v47  ;;  %v3917_v4 = vpop.permute.xlu1 %1707  ;;  %v3919_v37 = vpop.permute.xlu0 %1129 }
 0x125   : > { %3148 = vmatmul.msk.bf16.gmra.mxu3 %vm781_vm3, %v3278_v61  ;;  %v969_v48 = vmax.f32 %v937_v32, 0.0 }
 0x127   : > { %v1001_v51 = vpack.c.bf16 %v969_v48, %v969_v48 }
 0x128   : > { %v3923_v34 = vpop.f32.mrf.mxu3  ;;  %v870_v52 = vpop.f32.mrf.mxu1 }
 0x129   : > { %5086 = vst [vmem:[#allocation31_spill] sm:$0xff] %v3923_v34  ;;  %3065 = vmatmul.msk.bf16.gmra.mxu2 %vm781_vm3, %v3759_v39  ;;  %v871_v47 = vadd.f32 %v870_v52, %v3587_v62  ;;  %1751 = vrot.lane.b32.xlu2 %v3879_v3, %s3328_s26  ;;  %v3943_v52 = vpop.f32.mrf.mxu2 }
 0x12a   : > { %1755 = vrot.lane.b32.xlu1 %v3568_v56, %s3328_s26  ;;  %1034 = vst.msk [vmem:[%s3694_s15 + $0x28] sm:$0xf] %vm1023_vm4, %v1001_v51  ;;  %1759 = vrot.lane.b32.xlu0 %v3597_v0, %s3328_s26 }
 0x12b   : > { %v938_v44 = vadd.f32 %v3673_v25, %v871_v47  ;;  %v3937_v61 = vpop.permute.xlu2 %1163 }
 0x12c   : > { %5087 = vst [vmem:[#allocation32_spill] sm:$0xff] %v3937_v61  ;;  %v3939_v39 = vpop.permute.xlu1 %1725  ;;  %v3941_v32 = vpop.permute.xlu0 %1177 }
 0x12d   : > { %5088 = vst [vmem:[#allocation33_spill] sm:$0xff] %v3941_v32  ;;  %v970_v48 = vmax.f32 %v938_v44, 0.0 }
 0x12f   : > { %v1002_v14 = vpack.c.bf16 %v970_v48, %v970_v48 }
 0x130   : > { %v3945_v34 = vpop.f32.mrf.mxu3  ;;  %v873_v38 = vpop.f32.mrf.mxu1 }
 0x131   : > { %v874_v51 = vadd.f32 %v873_v38, %v3601_v2  ;;  %1763 = vrot.lane.b32.xlu2 %v3637_v15, %s3328_s26  ;;  %1035 = vst.msk [vmem:[%s3694_s15 + $0x2c] sm:$0xf] %vm1023_vm4, %v1002_v14  ;;  %v3316_v14 = vld [vmem:[%s5039_s6] ss:$0 sm:$0xff]  ;;  %v3974_v15 = vpop.f32.mrf.mxu2 }
 0x132   : > { %1761 = vrot.lane.b32.xlu1 %v3616_v7, %s3328_s26  ;;  %1765 = vrot.lane.b32.xlu0 %v3652_v19, %s3328_s26 }
 0x133   : > { %v939_v47 = vadd.f32 %v3673_v25, %v874_v51  ;;  %v3958_v44 = vpop.permute.xlu2 %1133  ;;  %3053 = vmatmul.msk.bf16.gmra.mxu1 %vm781_vm3, %v3520_v43 }
 0x134   : > { %v3963_v38 = vpop.permute.xlu1 %1161  ;;  %v3965_v48 = vpop.permute.xlu0 %1741 }
 0x135   : > { %3149 = vmatmul.msk.bf16.gmra.mxu3 %vm781_vm3, %v3279_v5  ;;  %5089 = vst [vmem:[#allocation34_spill] sm:$0xff] %v3963_v38  ;;  %v971_v32 = vmax.f32 %v939_v47, 0.0 }
 0x136   : > { %5090 = vst [vmem:[#allocation35_spill] sm:$0xff] %v3965_v48  ;;  %v3993_v48 = vpop.f32.mrf.mxu0 }
 0x137   : > { %v1003_v61 = vpack.c.bf16 %v971_v32, %v971_v32  ;;  %5093 = vst [vmem:[#allocation38_spill] sm:$0xff] %v3993_v48 }
 0x138   : > { %v3970_v19 = vpop.f32.mrf.mxu3  ;;  %v875_v51 = vpop.f32.mrf.mxu1 }
 0x139   : > { %3066 = vmatmul.msk.bf16.gmra.mxu2 %vm781_vm3, %v3698_v41  ;;  %v876_v43 = vadd.f32 %v875_v51, %v3619_v8  ;;  %1944 = vrot.lane.b32.xlu2 %v3316_v14, %s3328_s26  ;;  %1036 = vst.msk [vmem:[%s3694_s15 + $0x30] sm:$0xf] %vm1023_vm4, %v1003_v61  ;;  %v3280_v8 = vld [vmem:[%s3468_s20 + $0x78] sm:$0xff] }
 0x13a   : > { %1767 = vrot.lane.b32.xlu1 %v3668_v24, %s3328_s26  ;;  %2291 = vrot.lane.b32.xlu0 %v3570_v57, %s3329_s16  ;;  %v4005_v57 = vpop.f32.mrf.mxu2 }
 0x13b   : > { %v940_v41 = vadd.f32 %v3673_v25, %v876_v43  ;;  %v3985_v5 = vpop.permute.xlu2 %1181 }
 0x13c   : > { %5091 = vst [vmem:[#allocation36_spill] sm:$0xff] %v3985_v5  ;;  %v3987_v32 = vpop.permute.xlu1 %1131  ;;  %v3989_v47 = vpop.permute.xlu0 %1147 }
 0x13d   : > { %5092 = vst [vmem:[#allocation37_spill] sm:$0xff] %v3989_v47  ;;  %v972_v51 = vmax.f32 %v940_v41, 0.0 }
 0x13f   : > { %v1004_v14 = vpack.c.bf16 %v972_v51, %v972_v51 }
 0x140   : > { %v3991_v38 = vpop.f32.mrf.mxu3  ;;  %v878_v61 = vpop.f32.mrf.mxu1 }
 0x141   : > { %v879_v24 = vadd.f32 %v878_v61, %v3639_v16  ;;  %2289 = vrot.lane.b32.xlu2 %v3542_v49, %s3329_s16  ;;  %1037 = vst.msk [vmem:[%s3694_s15 + $0x34] sm:$0xf] %vm1023_vm4, %v1004_v14 }
 0x142   : > { %2293 = vrot.lane.b32.xlu1 %v3599_v1, %s3329_s16  ;;  %2297 = vrot.lane.b32.xlu0 %v3700_v42, %s3329_s16 }
 0x143   : > { %v941_v43 = vadd.f32 %v3673_v25, %v879_v24  ;;  %v4008_v41 = vpop.permute.xlu2 %1745  ;;  %3054 = vmatmul.msk.bf16.gmra.mxu1 %vm781_vm3, %v3503_v36  ;;  %v4026_v36 = vpop.f32.mrf.mxu0 }
 0x144   : > { %5094 = vst [vmem:[#allocation39_spill] sm:$0xff] %v4008_v41  ;;  %v4013_v49 = vpop.permute.xlu1 %1179  ;;  %v4015_v1 = vpop.permute.xlu0 %1711 }
 0x145   : > { %3150 = vmatmul.msk.bf16.gmra.mxu3 %vm781_vm3, %v3280_v8  ;;  %5095 = vst [vmem:[#allocation40_spill] sm:$0xff] %v4013_v49  ;;  %v973_v51 = vmax.f32 %v941_v43, 0.0 }
 0x146   : > { %5096 = vst [vmem:[#allocation41_spill] sm:$0xff] %v4026_v36 }
 0x147   : > { %v1005_v14 = vpack.c.bf16 %v973_v51, %v973_v51 }
 0x148   : > { %v4017_v61 = vpop.f32.mrf.mxu3  ;;  %v880_v42 = vpop.f32.mrf.mxu1 }
 0x149   : > { %3067 = vmatmul.msk.bf16.gmra.mxu2 %vm781_vm3, %v3737_v12  ;;  %v881_v24 = vadd.f32 %v880_v42, %v3657_v21  ;;  %2295 = vrot.lane.b32.xlu2 %v3654_v20, %s3329_s16  ;;  %1038 = vst.msk [vmem:[%s3694_s15 + $0x38] sm:$0xf] %vm1023_vm4, %v1005_v14  ;;  %v4039_v20 = vpop.f32.mrf.mxu2 }
 0x14a   : > { %2299 = vrot.lane.b32.xlu1 %v3742_v23, %s3329_s16  ;;  %2303 = vrot.lane.b32.xlu0 %v3827_v31, %s3329_s16  ;;  %v1282_v31 = vadd.f32 %v3921_v33, %v3820_v10 }
 0x14b   : > { %v942_v8 = vadd.f32 %v3673_v25, %v881_v24  ;;  %v4033_v12 = vpop.permute.xlu2 %1151 }
 0x14c   : > { %5097 = vst [vmem:[#allocation42_spill] sm:$0xff] %v4033_v12  ;;  %v4035_v43 = vpop.permute.xlu1 %1743  ;;  %v4037_v51 = vpop.permute.xlu0 %1729 }
 0x14d   : > { %5098 = vst [vmem:[#allocation43_spill] sm:$0xff] %v4035_v43  ;;  %v974_v42 = vmax.f32 %v942_v8, 0.0 }
 0x14f   : > { %v1006_v23 = vpack.c.bf16 %v974_v42, %v974_v42 }
 0x150   : > { %v4041_v5 = vpop.f32.mrf.mxu3  ;;  %v883_v49 = vpop.f32.mrf.mxu1 }
 0x151   : > { %v884_v14 = vadd.f32 %v883_v49, %v3557_v54  ;;  %2301 = vrot.lane.b32.xlu2 %v3801_v27, %s3329_s16  ;;  %1039 = vst.msk [vmem:[%s3694_s15 + $0x3c] sm:$0xf] %vm1023_vm4, %v1006_v23  ;;  %v4057_v49 = vpop.f32.mrf.mxu0  ;;  %v1367_v23 = vadd.f32 %v3796_v18, %v1282_v31  ;;  %v4064_v36 = vpop.f32.mrf.mxu2  ;;  %v1284_v31 = vadd.f32 %v3943_v52, %v3799_v28 }
 0x152   : > { %2305 = vrot.lane.b32.xlu1 %v3544_v50, %s3329_s16  ;;  %2309 = vrot.lane.b32.xlu0 %v3572_v58, %s3329_s16  ;;  %5099 = vst [vmem:[#allocation44_spill] sm:$0xff] %v4057_v49 }
 0x153   : > { %v943_v24 = vadd.f32 %v3673_v25, %v884_v14  ;;  %v4055_v8 = vpop.permute.xlu2 %1715  ;;  %v1399_v14 = vmax.f32 %v1367_v23, 0.0 }
 0x154   : > { %v4059_v42 = vpop.permute.xlu1 %1149  ;;  %v4061_v27 = vpop.permute.xlu0 %1165 }
 0x155   : > { %5100 = vst [vmem:[#allocation45_spill] sm:$0xff] %v4059_v42  ;;  %v975_v50 = vmax.f32 %v943_v24, 0.0 }
 0x156   : > { %5101 = vst [vmem:[#allocation46_spill] sm:$0xff] %v4061_v27  ;;  %v1431_v27 = vpack.c.bf16 %v1399_v14, %v1399_v14 }
 0x157   : > { %v1007_v58 = vpack.c.bf16 %v975_v50, %v975_v50 }
 0x158   : > { %v4066_v48 = vpop.f32.mrf.mxu3  ;;  %v885_v10 = vpop.f32.mrf.mxu1 }
 0x159   : > { %5102 = vst [vmem:[#allocation47_spill] sm:$0xff] %v4066_v48  ;;  %3068 = vmatmul.msk.bf16.gmra.mxu2 %vm781_vm3, %v3790_v35  ;;  %v886_v33 = vadd.f32 %v885_v10, %v3589_v63  ;;  %2307 = vrot.lane.b32.xlu2 %v3560_v55, %s3329_s16  ;;  %v4086_v55 = vpop.f32.mrf.mxu0  ;;  %v4091_v28 = vpop.f32.mrf.mxu2 }
 0x15a   : > { %2311 = vrot.lane.b32.xlu1 %v3587_v62, %s3329_s16  ;;  %1040 = vst.msk [vmem:[%s3694_s15 + $0x40] sm:$0xf] %vm1023_vm4, %v1007_v58  ;;  %v1368_v62 = vadd.f32 %v3796_v18, %v1284_v31 }
 0x15b   : > { %v944_v24 = vadd.f32 %v3673_v25, %v886_v33  ;;  %v4080_v50 = vpop.permute.xlu2 %1733  ;;  %5103 = vst [vmem:[#allocation48_spill] sm:$0xff] %v4086_v55 }
 0x15c   : > { %v4082_v35 = vpop.permute.xlu1 %1713  ;;  %v4084_v10 = vpop.permute.xlu0 %1135  ;;  %v1400_v33 = vmax.f32 %v1368_v62, 0.0 }
 0x15d   : > { %v976_v49 = vmax.f32 %v944_v24, 0.0 }
 0x15f   : > { %v1008_v58 = vpack.c.bf16 %v976_v49, %v976_v49 }
 0x160   : > { %v4089_v23 = vpop.f32.mrf.mxu3  ;;  %v888_v41 = vpop.f32.mrf.mxu1 }
 0x161   : > { %5104 = vst [vmem:[#allocation49_spill] sm:$0xff] %v4089_v23  ;;  %v889_v52 = vadd.f32 %v888_v41, %v3634_v13  ;;  %2313 = vrot.lane.b32.xlu2 %v3601_v2, %s3329_s16  ;;  %v1432_v2 = vpack.c.bf16 %v1400_v33, %v1400_v33  ;;  %v4108_v12 = vpop.f32.mrf.mxu0 }
 0x162   : > { %1495 = vrot.lane.b32.xlu1 %v1431_v27, %s3330_s17  ;;  %1041 = vst.msk [vmem:[%s3694_s15 + $0x44] sm:$0xf] %vm1023_vm4, %v1008_v58  ;;  %v1298_v58 = vpop.f32.mrf.mxu2 }
 0x163   : > { %v945_v14 = vadd.f32 %v3673_v25, %v889_v52  ;;  %v4100_v49 = vpop.permute.xlu2 %1169  ;;  %5108 = vst [vmem:[#allocation53_spill] sm:$0xff] %v4108_v12 }
 0x164   : > { %5105 = vst [vmem:[#allocation50_spill] sm:$0xff] %v4100_v49  ;;  %v4102_v31 = vpop.permute.xlu1 %1731  ;;  %v4104_v24 = vpop.permute.xlu0 %1183 }
 0x165   : > { %5106 = vst [vmem:[#allocation51_spill] sm:$0xff] %v4104_v24  ;;  %v977_v55 = vmax.f32 %v945_v14, 0.0 }
 0x167   : > { %v1009_v41 = vpack.c.bf16 %v977_v55, %v977_v55 }
 0x168   : > { %v4106_v43 = vpop.f32.mrf.mxu3  ;;  %v890_v27 = vpop.f32.mrf.mxu1 }
 0x169   : > { %5107 = vst [vmem:[#allocation52_spill] sm:$0xff] %v4106_v43  ;;  %3069 = vmatmul.msk.bf16.gmra.mxu2 %vm781_vm3, %v3727_v6  ;;  %v891_v62 = vadd.f32 %v890_v27, %v3675_v26  ;;  %1497 = vrot.lane.b32.xlu2 %v1432_v2, %s3330_s17  ;;  %v3288_v26 = vld [vmem:[%s3631_s9 + $0x38] sm:$0xff] }
 0x16a   : > { %1042 = vst.msk [vmem:[%s3694_s15 + $0x48] sm:$0xf] %vm1023_vm4, %v1009_v41  ;;  %v4126_v41 = vpop.f32.mrf.mxu0  ;;  %3222 = vmatmul.msk.bf16.gmra.mxu0 %vm781_vm3, %v3288_v26 }
 0x16b   : > { %v946_v52 = vadd.f32 %v3673_v25, %v891_v62  ;;  %v1140_v55 = vpop.permute.xlu2 %1139  ;;  %5112 = vst [vmem:[#allocation57_spill] sm:$0xff] %v4126_v41 }
 0x16c   : > { %v4117_v14 = vadd.f32 %v1298_v58, %v1140_v55  ;;  %v4119_v33 = vpop.permute.xlu1 %1167  ;;  %v4121_v24 = vpop.permute.xlu0 %1747 }
 0x16d   : > { %5109 = vst [vmem:[#allocation54_spill] sm:$0xff] %v4119_v33  ;;  %v978_v6 = vmax.f32 %v946_v52, 0.0 }
 0x16e   : > { %5110 = vst [vmem:[#allocation55_spill] sm:$0xff] %v4121_v24 }
 0x16f   : > { %v1010_v12 = vpack.c.bf16 %v978_v6, %v978_v6 }
 0x170   : > { %v4123_v49 = vpop.f32.mrf.mxu3  ;;  %v893_v27 = vpop.f32.mrf.mxu1 }
 0x171   : > { %5111 = vst [vmem:[#allocation56_spill] sm:$0xff] %v4123_v49  ;;  %v894_v2 = vadd.f32 %v893_v27, %v3718_v60 }
 0x172   : > { %1043 = vst.msk [vmem:[%s3694_s15 + $0x4c] sm:$0xf] %vm1023_vm4, %v1010_v12 }
 0x173   : > { %v947_v62 = vadd.f32 %v3673_v25, %v894_v2  ;;  %v4131_v58 = vpop.permute.xlu2 %1757 }
 0x174   : > { %v4133_v55 = vpop.permute.xlu1 %1137  ;;  %v4135_v33 = vpop.permute.xlu0 %1153 }
 0x175   : > { %5113 = vst [vmem:[#allocation58_spill] sm:$0xff] %v4135_v33  ;;  %v979_v52 = vmax.f32 %v947_v62, 0.0  ;;  %v4149_v62 = vpop.f32.mrf.mxu0 }
 0x177   : > { %v1011_v6 = vpack.c.bf16 %v979_v52, %v979_v52 }
 0x178   : > { %v4137_v24 = vpop.f32.mrf.mxu3  ;;  %v895_v27 = vpop.f32.mrf.mxu1 }
 0x179   : > { %5114 = vst [vmem:[#allocation59_spill] sm:$0xff] %v4137_v24  ;;  %3070 = vmatmul.msk.bf16.gmra.mxu2 %vm781_vm3, %v3762_v46  ;;  %v896_v12 = vadd.f32 %v895_v27, %v3782_v9 }
 0x17a   : > { %1044 = vst.msk [vmem:[%s3694_s15 + $0x50] sm:$0xf] %vm1023_vm4, %v1011_v6 }
 0x17b   : > { %v948_v2 = vadd.f32 %v3673_v25, %v896_v12  ;;  %v4147_v41 = vpop.permute.xlu2 %1187 }
 0x17c   : > { %5115 = vst [vmem:[#allocation60_spill] sm:$0xff] %v4147_v41  ;;  %v4151_v52 = vpop.permute.xlu1 %1185  ;;  %v4153_v33 = vpop.permute.xlu0 %1717 }
 0x17d   : > { %5116 = vst [vmem:[#allocation61_spill] sm:$0xff] %v4151_v52  ;;  %v980_v24 = vmax.f32 %v948_v2, 0.0  ;;  %v4167_v9 = vpop.f32.mrf.mxu0 }
 0x17e   : > { %5118 = vst [vmem:[#allocation63_spill] sm:$0xff] %v4167_v9 }
 0x17f   : > { %v1012_v46 = vpack.c.bf16 %v980_v24, %v980_v24 }
 0x180   : > { %v4155_v49 = vpop.f32.mrf.mxu3  ;;  %v898_v27 = vpop.f32.mrf.mxu1 }
 0x181   : > { %5117 = vst [vmem:[#allocation62_spill] sm:$0xff] %v4155_v49  ;;  %v899_v26 = vadd.f32 %v898_v27, %v3831_v45  ;;  %v3289_v49 = vld [vmem:[%s3631_s9 + $0x40] sm:$0xff] }
 0x182   : > { %1045 = vst.msk [vmem:[%s3694_s15 + $0x54] sm:$0xf] %vm1023_vm4, %v1012_v46  ;;  %3223 = vmatmul.msk.bf16.gmra.mxu0 %vm781_vm3, %v3289_v49  ;;  %v1862_v49 = vadd.f32 %v3696_v40, %v3849_v11 }
 0x183   : > { %v949_v6 = vadd.f32 %v3673_v25, %v899_v26  ;;  %v4161_v12 = vpop.permute.xlu2 %1751 }
 0x184   : > { %v4163_v41 = vpop.permute.xlu1 %1749  ;;  %v4165_v52 = vpop.permute.xlu0 %1735 }
 0x185   : > { %v981_v60 = vmax.f32 %v949_v6, 0.0  ;;  %v4185_v47 = vpop.f32.mrf.mxu0 }
 0x187   : > { %v1013_v24 = vpack.c.bf16 %v981_v60, %v981_v60 }
 0x188   : > { %v4169_v2 = vpop.f32.mrf.mxu3  ;;  %v900_v43 = vpop.f32.mrf.mxu1 }
 0x189   : > { %v901_v27 = vadd.f32 %v900_v43, %v3879_v3  ;;  %1046 = vst.msk [vmem:[%s3694_s15 + $0x58] sm:$0xf] %vm1023_vm4, %v1013_v24  ;;  %v1867_v24 = vadd.f32 %v3739_v17, %v3891_v30  ;;  %v1287_v17 = vadd.f32 %v3974_v15, %v3919_v37 }
 0x18b   : > { %v950_v46 = vadd.f32 %v3673_v25, %v901_v27  ;;  %v4177_v26 = vpop.permute.xlu2 %1763  ;;  %v1864_v27 = vadd.f32 %v3716_v59, %v3917_v4  ;;  %v1882_v59 = vadd.f32 %v3875_v22, %v3754_v29  ;;  %v1369_v15 = vadd.f32 %v3796_v18, %v1287_v17 }
 0x18c   : > { %v4179_v45 = vpop.permute.xlu1 %1155  ;;  %v4181_v9 = vpop.permute.xlu0 %1171 }
 0x18d   : > { %5119 = vst [vmem:[#allocation64_spill] sm:$0xff] %v4179_v45  ;;  %v982_v6 = vmax.f32 %v950_v46, 0.0  ;;  %v1289_v46 = vadd.f32 %v4005_v57, %v3987_v32  ;;  %v1401_v17 = vmax.f32 %v1369_v15, 0.0  ;;  %v5123_v15 = vld [vmem:[#allocation4_spill] sm:$0xff] }
 0x18e   : > { %5120 = vst [vmem:[#allocation65_spill] sm:$0xff] %v4181_v9 }
 0x18f   : > { %v1014_v60 = vpack.c.bf16 %v982_v6, %v982_v6  ;;  %v1370_v57 = vadd.f32 %v3796_v18, %v1289_v46  ;;  %v1292_v46 = vadd.f32 %v4039_v20, %v3958_v44  ;;  %v5122_v44 = vld [vmem:[#allocation11_spill] sm:$0xff] }
 0x190   : > { %v4183_v42 = vpop.f32.mrf.mxu3  ;;  %v903_v54 = vpop.f32.mrf.mxu1  ;;  %v1869_v20 = vadd.f32 %v5122_v44, %v4015_v1 }
 0x191   : > { %v904_v43 = vadd.f32 %v903_v54, %v3555_v53  ;;  %1047 = vst.msk [vmem:[%s3694_s15 + $0x5c] sm:$0xf] %vm1023_vm4, %v1014_v60 }
 0x193   : > { %v951_v6 = vadd.f32 %v3673_v25, %v904_v43  ;;  %v4199_v9 = vpop.permute.xlu2 %1944 }
 0x194   : > { %v4201_v3 = vpop.permute.xlu1 %1719  ;;  %v1949_v54 = vadd.f32 %v4199_v9, %v1867_v24  ;;  %v1948_v60 = vadd.f32 %v4199_v9, %v1864_v27  ;;  %v1947_v40 = vadd.f32 %v4199_v9, %v1862_v49  ;;  %v1754_v53 = vpop.permute.xlu0 %1753  ;;  %v1955_v48 = vadd.f32 %v4199_v9, %v1882_v59 }
 0x195   : > { %v983_v11 = vmax.f32 %v951_v6, 0.0 }
 0x196   : > { %v1981_v30 = vmax.f32 %v1949_v54, 0.0  ;;  %v1980_v4 = vmax.f32 %v1948_v60, 0.0  ;;  %v1979_v32 = vmax.f32 %v1947_v40, 0.0  ;;  %v1402_v60 = vmax.f32 %v1370_v57, 0.0 }
 0x197   : > { %v1015_v43 = vpack.c.bf16 %v983_v11, %v983_v11 }
 0x198   : > { %v1921_v24 = vpop.f32.mrf.mxu3  ;;  %v905_v27 = vpop.f32.mrf.mxu1  ;;  %v2013_v23 = vpack.c.bf16 %v1981_v30, %v1981_v30  ;;  %v2012_v49 = vpack.c.bf16 %v1980_v4, %v1980_v4  ;;  %v2011_v29 = vpack.c.bf16 %v1979_v32, %v1979_v32  ;;  %v3290_v30 = vld [vmem:[%s3631_s9 + $0x48] sm:$0xff]  ;;  %v1371_v4 = vadd.f32 %v3796_v18, %v1292_v46 }
 0x199   : > { %v1922_v45 = vadd.f32 %v1921_v24, %v1754_v53  ;;  %v906_v37 = vadd.f32 %v905_v27, %v3568_v56  ;;  %1048 = vst.msk [vmem:[%s3694_s15 + $0x60] sm:$0xf] %vm1023_vm4, %v1015_v43  ;;  %v4221_v53 = vpop.f32.mrf.mxu0  ;;  %v1434_v57 = vpack.c.bf16 %v1402_v60, %v1402_v60  ;;  %3224 = vmatmul.msk.bf16.gmra.mxu0 %vm781_vm3, %v3290_v30  ;;  %v5125_v30 = vld [vmem:[#allocation31_spill] sm:$0xff] }
 0x19a   : > { %2079 = vrot.lane.b32.xlu2 %v2013_v23, %s3331_s18  ;;  %2077 = vrot.lane.b32.xlu1 %v2012_v49, %s3331_s18  ;;  %v5121_v23 = vld [vmem:[#allocation13_spill] sm:$0xff]  ;;  %v1403_v1 = vmax.f32 %v1371_v4, 0.0  ;;  %v1887_v44 = vadd.f32 %v5125_v30, %v3939_v39  ;;  %v5126_v4 = vld [vmem:[#allocation15_spill] sm:$0xff] }
 0x19b   : > { %v4217_v22 = vadd.f32 %v4199_v9, %v1922_v45  ;;  %v952_v6 = vadd.f32 %v3673_v25, %v906_v37  ;;  %2075 = vrot.lane.b32.xlu0 %v2011_v29, %s3331_s18  ;;  %v4227_v54 = vpop.permute.xlu2 %2289  ;;  %v1987_v45 = vmax.f32 %v1955_v48, 0.0  ;;  %v1872_v59 = vadd.f32 %v5121_v23, %v4082_v35 }
 0x19c   : > { %v1756_v40 = vpop.permute.xlu1 %1755  ;;  %v1433_v29 = vpack.c.bf16 %v1401_v17, %v1401_v17  ;;  %v1950_v35 = vadd.f32 %v4199_v9, %v1869_v20  ;;  %v1874_v20 = vadd.f32 %v5126_v4, %v4055_v8 }
 0x19d   : > { %v984_v11 = vmax.f32 %v952_v6, 0.0  ;;  %v2019_v49 = vpack.c.bf16 %v1987_v45, %v1987_v45  ;;  %v1951_v48 = vadd.f32 %v4199_v9, %v1872_v59  ;;  %v4246_v6 = vpop.f32.mrf.mxu2 }
 0x19e   : > { %v1982_v59 = vmax.f32 %v1950_v35, 0.0  ;;  %v1957_v35 = vadd.f32 %v4199_v9, %v1887_v44 }
 0x19f   : > { %v1016_v32 = vpack.c.bf16 %v984_v11, %v984_v11  ;;  %v1983_v17 = vmax.f32 %v1951_v48, 0.0 }
 0x1a0   : > { %v1923_v43 = vpop.f32.mrf.mxu3  ;;  %v908_v27 = vpop.f32.mrf.mxu1  ;;  %v2014_v39 = vpack.c.bf16 %v1982_v59, %v1982_v59  ;;  %v1989_v4 = vmax.f32 %v1957_v35, 0.0 }
 0x1a1   : > { %v1924_v24 = vadd.f32 %v1923_v43, %v1756_v40  ;;  %v909_v37 = vadd.f32 %v908_v27, %v5123_v15  ;;  %1049 = vst.msk [vmem:[%s3694_s15 + $0x64] sm:$0xf] %vm1023_vm4, %v1016_v32  ;;  %v4254_v11 = vpop.f32.mrf.mxu0  ;;  %v5127_v32 = vld [vmem:[#allocation25_spill] sm:$0xff] }
 0x1a2   : > { %2091 = vrot.lane.b32.xlu2 %v2019_v49, %s3331_s18  ;;  %1501 = vrot.lane.b32.xlu1 %v1434_v57, %s3330_s17  ;;  %5124 = vst [vmem:[#allocation13_spill] sm:$0xff] %v4254_v11  ;;  %v5128_v43 = vld [vmem:[#allocation29_spill] sm:$0xff]  ;;  %v1435_v57 = vpack.c.bf16 %v1403_v1, %v1403_v1 }
 0x1a3   : > { %v4242_v46 = vadd.f32 %v4199_v9, %v1924_v24  ;;  %v953_v60 = vadd.f32 %v3673_v25, %v909_v37  ;;  %1499 = vrot.lane.b32.xlu0 %v1433_v29, %s3330_s17  ;;  %v4250_v40 = vpop.permute.xlu2 %2295  ;;  %v1884_v24 = vadd.f32 %v5128_v43, %v5127_v32  ;;  %v2015_v29 = vpack.c.bf16 %v1983_v17, %v1983_v17 }
 0x1a4   : > { %v4252_v45 = vpop.permute.xlu1 %1761  ;;  %v1294_v17 = vadd.f32 %v4064_v36, %v4084_v10  ;;  %v1919_v32 = vadd.f32 %v4183_v42, %v4161_v12  ;;  %v3291_v10 = vld [vmem:[%s3631_s9 + $0x50] sm:$0xff] }
 0x1a5   : > { %v985_v23 = vmax.f32 %v953_v60, 0.0  ;;  %v1952_v60 = vadd.f32 %v4199_v9, %v1874_v20  ;;  %v1956_v30 = vadd.f32 %v4199_v9, %v1884_v24  ;;  %v1917_v20 = vadd.f32 %v4169_v2, %v4163_v41  ;;  %v5129_v24 = vld [vmem:[#allocation30_spill] sm:$0xff] }
 0x1a7   : > { %v1017_v27 = vpack.c.bf16 %v985_v23, %v985_v23  ;;  %v1984_v44 = vmax.f32 %v1952_v60, 0.0  ;;  %v1988_v43 = vmax.f32 %v1956_v30, 0.0  ;;  %v4298_v41 = vadd.f32 %v4199_v9, %v1917_v20 }
 0x1a8   : > { %v1926_v49 = vpop.f32.mrf.mxu3  ;;  %v910_v48 = vpop.f32.mrf.mxu1  ;;  %v1372_v60 = vadd.f32 %v3796_v18, %v1294_v17  ;;  %v1297_v17 = vadd.f32 %v4091_v28, %v4133_v55 }
 0x1a9   : > { %v1927_v37 = vadd.f32 %v1926_v49, %v4131_v58  ;;  %v911_v11 = vadd.f32 %v910_v48, %v3597_v0  ;;  %1050 = vst.msk [vmem:[%s3694_s15 + $0x68] sm:$0xf] %vm1023_vm4, %v1017_v27  ;;  %v1889_v27 = vadd.f32 %v3945_v34, %v5129_v24  ;;  %v4289_v49 = vpop.f32.mrf.mxu2  ;;  %v4291_v36 = vpop.f32.mrf.mxu0  ;;  %v4295_v48 = vadd.f32 %v4199_v9, %v1919_v32 }
 0x1aa   : > { %1503 = vrot.lane.b32.xlu2 %v1435_v57, %s3330_s17  ;;  %2083 = vrot.lane.b32.xlu1 %v2015_v29, %s3331_s18  ;;  %v2016_v2 = vpack.c.bf16 %v1984_v44, %v1984_v44  ;;  %v2021_v29 = vpack.c.bf16 %v1989_v4, %v1989_v4  ;;  %v1404_v32 = vmax.f32 %v1372_v60, 0.0 }
 0x1ab   : > { %v4270_v8 = vadd.f32 %v4199_v9, %v1927_v37  ;;  %v954_v58 = vadd.f32 %v3673_v25, %v911_v11  ;;  %2081 = vrot.lane.b32.xlu0 %v2014_v39, %s3331_s18  ;;  %v2302_v1 = vpop.permute.xlu2 %2301  ;;  %v1958_v34 = vadd.f32 %v4199_v9, %v1889_v27  ;;  %3225 = vmatmul.msk.bf16.gmra.mxu0 %vm781_vm3, %v3291_v10 }
 0x1ac   : > { %v4279_v23 = vadd.f32 %v4149_v62, %v2302_v1  ;;  %v4281_v59 = vpop.permute.xlu1 %1767  ;;  %v1760_v62 = vpop.permute.xlu0 %1759  ;;  %v2020_v39 = vpack.c.bf16 %v1988_v43, %v1988_v43  ;;  %v5130_v43 = vld [vmem:[#allocation18_spill] sm:$0xff]  ;;  %v1373_v10 = vadd.f32 %v3796_v18, %v1297_v17  ;;  %v3292_v17 = vld [vmem:[%s3631_s9 + $0x58] sm:$0xff] }
 0x1ad   : > { %v986_v11 = vmax.f32 %v954_v58, 0.0  ;;  %v1990_v20 = vmax.f32 %v1958_v34, 0.0  ;;  %v1877_v24 = vadd.f32 %v5130_v43, %v4153_v33 }
 0x1ae   : > { %v1405_v60 = vmax.f32 %v1373_v10, 0.0 }
 0x1af   : > { %v1018_v57 = vpack.c.bf16 %v986_v11, %v986_v11  ;;  %v2022_v28 = vpack.c.bf16 %v1990_v20, %v1990_v20 }
 0x1b0   : > { %v1928_v37 = vpop.f32.mrf.mxu3  ;;  %v913_v12 = vpop.f32.mrf.mxu1  ;;  %v1437_v10 = vpack.c.bf16 %v1405_v60, %v1405_v60 }
 0x1b1   : > { %v1929_v42 = vadd.f32 %v1928_v37, %v1760_v62  ;;  %v914_v35 = vadd.f32 %v913_v12, %v3616_v7  ;;  %1051 = vst.msk [vmem:[%s3694_s15 + $0x6c] sm:$0xf] %vm1023_vm4, %v1018_v57  ;;  %v4324_v55 = vpop.f32.mrf.mxu2  ;;  %v2475_v12 = vpop.f32.mrf.mxu0 }
 0x1b2   : > { %2085 = vrot.lane.b32.xlu2 %v2016_v2, %s3331_s18  ;;  %2095 = vrot.lane.b32.xlu1 %v2021_v29, %s3331_s18  ;;  %v1953_v2 = vadd.f32 %v4199_v9, %v1877_v24 }
 0x1b3   : > { %v4307_v30 = vadd.f32 %v4199_v9, %v1929_v42  ;;  %v955_v58 = vadd.f32 %v3673_v25, %v914_v35  ;;  %2093 = vrot.lane.b32.xlu0 %v2020_v39, %s3331_s18  ;;  %v2308_v1 = vpop.permute.xlu2 %2307  ;;  %v1436_v42 = vpack.c.bf16 %v1404_v32, %v1404_v32  ;;  %v5132_v35 = vld [vmem:[#allocation22_spill] sm:$0xff]  ;;  %v1892_v32 = vadd.f32 %v3970_v19, %v4037_v51 }
 0x1b4   : > { %v4316_v44 = vadd.f32 %v4221_v53, %v2308_v1  ;;  %v4318_v4 = vpop.permute.xlu1 %2293  ;;  %v5131_v53 = vld [vmem:[#allocation6_spill] sm:$0xff]  ;;  %v1879_v39 = vadd.f32 %v5132_v35, %v4201_v3  ;;  %v1894_v35 = vadd.f32 %v3991_v38, %v4102_v31 }
 0x1b5   : > { %v987_v11 = vmax.f32 %v955_v58, 0.0  ;;  %v1959_v19 = vadd.f32 %v4199_v9, %v1892_v32 }
 0x1b7   : > { %v1019_v27 = vpack.c.bf16 %v987_v11, %v987_v11  ;;  %v1374_v11 = vadd.f32 %v3796_v18, %v4117_v14  ;;  %v1991_v60 = vmax.f32 %v1959_v19, 0.0 }
 0x1b8   : > { %v1931_v25 = vpop.f32.mrf.mxu3  ;;  %v915_v57 = vpop.f32.mrf.mxu1 }
 0x1b9   : > { %v1932_v62 = vadd.f32 %v1931_v25, %v4252_v45  ;;  %v916_v37 = vadd.f32 %v915_v57, %v5131_v53  ;;  %1052 = vst.msk [vmem:[%s3694_s15 + $0x70] sm:$0xf] %vm1023_vm4, %v1019_v27  ;;  %v3318_v45 = vld [vmem:[%s5039_s6] ss:$0 sm:$0xff]  ;;  %v1954_v27 = vadd.f32 %v4199_v9, %v1879_v39  ;;  %v4364_v14 = vpop.f32.mrf.mxu2 }
 0x1ba   : > { %2097 = vrot.lane.b32.xlu2 %v2022_v28, %s3331_s18  ;;  %2317 = vrot.lane.b32.xlu1 %v3639_v16, %s3329_s16  ;;  %v1985_v16 = vmax.f32 %v1953_v2, 0.0 }
 0x1bb   : > { %v4331_v33 = vadd.f32 %v4199_v9, %v1932_v62  ;;  %v956_v29 = vadd.f32 %v3318_v45, %v916_v37  ;;  %1505 = vrot.lane.b32.xlu0 %v1436_v42, %s3330_s17  ;;  %v2314_v34 = vpop.permute.xlu2 %2313  ;;  %3226 = vmatmul.msk.bf16.gmra.mxu0 %vm781_vm3, %v3292_v17  ;;  %v5133_v62 = vld [vmem:[#allocation7_spill] sm:$0xff]  ;;  %v1766_v17 = vpop.permute.xlu0 %1765 }
 0x1bc   : > { %v4342_v58 = vadd.f32 %v2475_v12, %v2314_v34  ;;  %v4344_v1 = vpop.permute.xlu1 %2299  ;;  %v2017_v28 = vpack.c.bf16 %v1985_v16, %v1985_v16  ;;  %v1986_v12 = vmax.f32 %v1954_v27, 0.0  ;;  %v5134_v27 = vld [vmem:[#allocation8_spill] sm:$0xff] }
 0x1bd   : > { %v988_v20 = vmax.f32 %v956_v29, 0.0 }
 0x1be   : > { %v2018_v32 = vpack.c.bf16 %v1986_v12, %v1986_v12 }
 0x1bf   : > { %v1020_v43 = vpack.c.bf16 %v988_v20, %v988_v20 }
 0x1c0   : > { %v1933_v24 = vpop.f32.mrf.mxu3  ;;  %v918_v25 = vpop.f32.mrf.mxu1 }
 0x1c1   : > { %v1934_v3 = vadd.f32 %v1933_v24, %v4177_v26  ;;  %v919_v57 = vadd.f32 %v918_v25, %v5133_v62  ;;  %1053 = vst.msk [vmem:[%s3694_s15 + $0x74] sm:$0xf] %vm1023_vm4, %v1020_v43  ;;  %v1406_v26 = vmax.f32 %v1374_v11, 0.0 }
 0x1c2   : > { %2319 = vrot.lane.b32.xlu2 %v3657_v21, %s3329_s16  ;;  %1507 = vrot.lane.b32.xlu1 %v1437_v10, %s3330_s17  ;;  %v1897_v21 = vadd.f32 %v4017_v61, %v4080_v50  ;;  %v2023_v61 = vpack.c.bf16 %v1991_v60, %v1991_v60 }
 0x1c3   : > { %v4359_v51 = vadd.f32 %v4199_v9, %v1934_v3  ;;  %v957_v37 = vadd.f32 %v3318_v45, %v919_v57  ;;  %2087 = vrot.lane.b32.xlu0 %v2017_v28, %s3331_s18  ;;  %v1498_v42 = vpop.permute.xlu2 %1497  ;;  %v1438_v39 = vpack.c.bf16 %v1406_v26, %v1406_v26  ;;  %v3293_v57 = vld [vmem:[%s3631_s9 + $0x60] sm:$0xff]  ;;  %v5135_v28 = vld [vmem:[#allocation17_spill] sm:$0xff]  ;;  %v1311_v26 = vpop.f32.mrf.mxu2 }
 0x1c4   : > { %v2306_v2 = vpop.permute.xlu1 %2305  ;;  %1593 = vst.msk [vmem:[%s3694_s15 + $0x4] sm:$0xf] %vm1591_vm5, %v1498_v42  ;;  %v1961_v24 = vadd.f32 %v4199_v9, %v1897_v21  ;;  %v1302_v19 = vadd.f32 %v4246_v6, %v5135_v28 }
 0x1c5   : > { %v989_v29 = vmax.f32 %v957_v37, 0.0  ;;  %v4370_v34 = vadd.f32 %v4185_v47, %v2306_v2  ;;  %v1960_v47 = vadd.f32 %v4199_v9, %v1894_v35  ;;  %v5137_v35 = vld [vmem:[#allocation27_spill] sm:$0xff] }
 0x1c6   : > { %v1993_v25 = vmax.f32 %v1961_v24, 0.0  ;;  %v1375_v21 = vadd.f32 %v3796_v18, %v1302_v19 }
 0x1c7   : > { %v1021_v20 = vpack.c.bf16 %v989_v29, %v989_v29  ;;  %v1992_v10 = vmax.f32 %v1960_v47, 0.0 }
 0x1c8   : > { %v1936_v16 = vpop.f32.mrf.mxu3  ;;  %v920_v43 = vpop.f32.mrf.mxu1  ;;  %v2025_v29 = vpack.c.bf16 %v1993_v25, %v1993_v25  ;;  %v5141_v25 = vld [vmem:[#allocation20_spill] sm:$0xff] }
 0x1c9   : > { %v1937_v11 = vadd.f32 %v1936_v16, %v1766_v17  ;;  %1054 = vst.msk [vmem:[%s3694_s15 + $0x78] sm:$0xf] %vm1023_vm4, %v1021_v20  ;;  %v921_v3 = vadd.f32 %v920_v43, %v5134_v27  ;;  %v2024_v60 = vpack.c.bf16 %v1992_v10, %v1992_v10  ;;  %v1407_v16 = vmax.f32 %v1375_v21, 0.0  ;;  %v5142_v10 = vld [vmem:[#allocation49_spill] sm:$0xff]  ;;  %v4434_v21 = vpop.permute.xlu0 %2291 }
 0x1ca   : > { %1509 = vrot.lane.b32.xlu2 %v1438_v39, %s3330_s17  ;;  %2089 = vrot.lane.b32.xlu1 %v2018_v32, %s3331_s18  ;;  %v5138_v39 = vld [vmem:[#allocation23_spill] sm:$0xff] }
 0x1cb   : > { %v4382_v50 = vadd.f32 %v4199_v9, %v1937_v11  ;;  %v958_v38 = vadd.f32 %v3318_v45, %v921_v3  ;;  %2099 = vrot.lane.b32.xlu0 %v2023_v61, %s3331_s18  ;;  %3227 = vmatmul.msk.bf16.gmra.mxu0 %vm781_vm3, %v3293_v57  ;;  %v1307_v17 = vadd.f32 %v4324_v55, %v5138_v39  ;;  %v1313_v32 = vpop.f32.mrf.mxu2  ;;  %v3294_v61 = vld [vmem:[%s3631_s9 + $0x68] sm:$0xff] }
 0x1cc   : > { %v2312_v31 = vpop.permute.xlu1 %2311  ;;  %v1899_v11 = vadd.f32 %v4041_v5, %v4165_v52  ;;  %v1439_v47 = vpack.c.bf16 %v1407_v16, %v1407_v16  ;;  %v5139_v5 = vld [vmem:[#allocation24_spill] sm:$0xff]  ;;  %v5140_v52 = vld [vmem:[#allocation47_spill] sm:$0xff]  ;;  %v1904_v57 = vadd.f32 %v5142_v10, %v5141_v25 }
 0x1cd   : > { %v990_v37 = vmax.f32 %v958_v38, 0.0  ;;  %v4391_v42 = vadd.f32 %v4291_v36, %v2312_v31  ;;  %v5136_v36 = vld [vmem:[#allocation5_spill] sm:$0xff]  ;;  %v1377_v24 = vadd.f32 %v3796_v18, %v1307_v17  ;;  %v1902_v31 = vadd.f32 %v5140_v52, %v5139_v5  ;;  %v5144_v17 = vld [vmem:[#allocation3_spill] sm:$0xff] }
 0x1ce   : > { %v1962_v3 = vadd.f32 %v4199_v9, %v1899_v11  ;;  %v5146_v11 = vld [vmem:[#allocation42_spill] sm:$0xff] }
 0x1cf   : > { %v1022_v12 = vpack.c.bf16 %v990_v37, %v990_v37  ;;  %v1409_v55 = vmax.f32 %v1377_v24, 0.0  ;;  %v1964_v37 = vadd.f32 %v4199_v9, %v1904_v57  ;;  %v3295_v24 = vld [vmem:[%s3631_s9 + $0x70] sm:$0xff] }
 0x1d0   : > { %v1938_v2 = vpop.f32.mrf.mxu3  ;;  %v1994_v38 = vmax.f32 %v1962_v3, 0.0  ;;  %v5148_v3 = vld [vmem:[#allocation52_spill] sm:$0xff] }
 0x1d1   : > { %v1939_v45 = vadd.f32 %v1938_v2, %v4281_v59  ;;  %1055 = vst.msk [vmem:[%s3694_s15 + $0x7c] sm:$0xf] %vm1023_vm4, %v1022_v12  ;;  %v1304_v59 = vadd.f32 %v4289_v49, %v5137_v35  ;;  %v1441_v19 = vpack.c.bf16 %v1409_v55, %v1409_v55  ;;  %v1996_v2 = vmax.f32 %v1964_v37, 0.0  ;;  %v4449_v5 = vpop.permute.xlu0 %2297  ;;  %v5152_v37 = vld [vmem:[#allocation56_spill] sm:$0xff] }
 0x1d2   : > { %2103 = vrot.lane.b32.xlu2 %v2025_v29, %s3331_s18  ;;  %2101 = vrot.lane.b32.xlu1 %v2024_v60, %s3331_s18  ;;  %v2026_v12 = vpack.c.bf16 %v1994_v38, %v1994_v38  ;;  %v5143_v29 = vld [vmem:[#allocation37_spill] sm:$0xff] }
 0x1d3   : > { %v4399_v6 = vadd.f32 %v4199_v9, %v1939_v45  ;;  %2315 = vrot.lane.b32.xlu0 %v5136_v36, %s3329_s16  ;;  %v1376_v43 = vadd.f32 %v3796_v18, %v1304_v59  ;;  %v1309_v60 = vadd.f32 %v4364_v14, %v5143_v29  ;;  %v2028_v36 = vpack.c.bf16 %v1996_v2, %v1996_v2  ;;  %v5154_v2 = vld [vmem:[#allocation59_spill] sm:$0xff] }
 0x1d4   : > { %v1496_v20 = vpop.permute.xlu1 %1495 }
 0x1d5   : > { %1592 = vst.msk [vmem:[%s3694_s15] sm:$0xf] %vm1591_vm5, %v1496_v20  ;;  %v1408_v49 = vmax.f32 %v1376_v43, 0.0  ;;  %v1378_v59 = vadd.f32 %v3796_v18, %v1309_v60  ;;  %v5145_v20 = vld [vmem:[#allocation45_spill] sm:$0xff]  ;;  %v1314_v43 = vadd.f32 %v1313_v32, %v5146_v11  ;;  %v5150_v32 = vld [vmem:[#allocation10_spill] sm:$0xff] }
 0x1d6   : > { %v1312_v16 = vadd.f32 %v1311_v26, %v5145_v20  ;;  %v5149_v26 = vld [vmem:[#allocation14_spill] sm:$0xff] }
 0x1d7   : > { %v1440_v28 = vpack.c.bf16 %v1408_v49, %v1408_v49  ;;  %v1410_v14 = vmax.f32 %v1378_v59, 0.0 }
 0x1d8   : > { %v1379_v55 = vadd.f32 %v3796_v18, %v1312_v16 }
 0x1d9   : > { %v1442_v38 = vpack.c.bf16 %v1410_v14, %v1410_v14 }
 0x1da   : > { %2325 = vrot.lane.b32.xlu2 %v3634_v13, %s3329_s16  ;;  %2323 = vrot.lane.b32.xlu1 %v3589_v63, %s3329_s16  ;;  %v1963_v13 = vadd.f32 %v4199_v9, %v1902_v31  ;;  %v1316_v63 = vpop.f32.mrf.mxu2  ;;  %v1411_v31 = vmax.f32 %v1379_v55, 0.0 }
 0x1db   : > { %1511 = vrot.lane.b32.xlu0 %v1439_v47, %s3330_s17  ;;  %3228 = vmatmul.msk.bf16.gmra.mxu0 %vm781_vm3, %v3294_v61  ;;  %v5147_v47 = vld [vmem:[#allocation35_spill] sm:$0xff]  ;;  %v1380_v61 = vadd.f32 %v3796_v18, %v1314_v43  ;;  %v3296_v43 = vld [vmem:[%s3631_s9 + $0x78] sm:$0xff] }
 0x1dc   : > { %v1995_v45 = vmax.f32 %v1963_v13, 0.0  ;;  %v1907_v49 = vadd.f32 %v5148_v3, %v5147_v47  ;;  %v1443_v29 = vpack.c.bf16 %v1411_v31, %v1411_v31  ;;  %v4474_v3 = vpop.f32.mrf.mxu0 }
 0x1dd   : > { %v1412_v25 = vmax.f32 %v1380_v61, 0.0 }
 0x1de   : > { %v2027_v35 = vpack.c.bf16 %v1995_v45, %v1995_v45  ;;  %v1965_v52 = vadd.f32 %v4199_v9, %v1907_v49 }
 0x1df   : > { %v1444_v60 = vpack.c.bf16 %v1412_v25, %v1412_v25 }
 0x1e2   : > { %1515 = vrot.lane.b32.xlu2 %v1441_v19, %s3330_s17  ;;  %1513 = vrot.lane.b32.xlu1 %v1440_v28, %s3330_s17  ;;  %v1318_v39 = vpop.f32.mrf.mxu2  ;;  %v1997_v28 = vmax.f32 %v1965_v52, 0.0  ;;  %v5151_v19 = vld [vmem:[#allocation43_spill] sm:$0xff]  ;;  %v5157_v52 = vld [vmem:[#allocation12_spill] sm:$0xff] }
 0x1e3   : > { %2105 = vrot.lane.b32.xlu0 %v2026_v12, %s3331_s18  ;;  %v1909_v13 = vadd.f32 %v5152_v37, %v5151_v19  ;;  %v5153_v12 = vld [vmem:[#allocation39_spill] sm:$0xff]  ;;  %v5160_v37 = vld [vmem:[#allocation62_spill] sm:$0xff] }
 0x1e4   : > { %v1912_v45 = vadd.f32 %v5154_v2, %v5153_v12  ;;  %v2029_v59 = vpack.c.bf16 %v1997_v28, %v1997_v28  ;;  %v5159_v19 = vld [vmem:[#allocation55_spill] sm:$0xff] }
 0x1ea   : > { %2109 = vrot.lane.b32.xlu2 %v2028_v36, %s3331_s18  ;;  %2107 = vrot.lane.b32.xlu1 %v2027_v35, %s3331_s18  ;;  %v1321_v57 = vpop.f32.mrf.mxu2  ;;  %v1967_v36 = vadd.f32 %v4199_v9, %v1912_v45  ;;  %v1966_v35 = vadd.f32 %v4199_v9, %v1909_v13  ;;  %v1914_v13 = vadd.f32 %v5160_v37, %v5159_v19 }
 0x1eb   : > { %2321 = vrot.lane.b32.xlu0 %v5144_v17, %s3329_s16  ;;  %3229 = vmatmul.msk.bf16.gmra.mxu0 %vm781_vm3, %v3295_v24  ;;  %v4467_v17 = vpop.permute.xlu0 %2303  ;;  %v5155_v24 = vld [vmem:[#allocation58_spill] sm:$0xff] }
 0x1ec   : > { %v1999_v16 = vmax.f32 %v1967_v36, 0.0  ;;  %v1998_v11 = vmax.f32 %v1966_v35, 0.0  ;;  %v1317_v14 = vadd.f32 %v1316_v63, %v5155_v24  ;;  %v5162_v36 = vld [vmem:[#allocation26_spill] sm:$0xff] }
 0x1ee   : > { %v2031_v49 = vpack.c.bf16 %v1999_v16, %v1999_v16  ;;  %v2030_v55 = vpack.c.bf16 %v1998_v11, %v1998_v11  ;;  %v1381_v61 = vadd.f32 %v3796_v18, %v1317_v14 }
 0x1f0   : > { %v1413_v25 = vmax.f32 %v1381_v61, 0.0 }
 0x1f2   : > { %2331 = vrot.lane.b32.xlu2 %v5149_v26, %s3329_s16  ;;  %2329 = vrot.lane.b32.xlu1 %v5150_v32, %s3329_s16  ;;  %v1323_v47 = vpop.f32.mrf.mxu2  ;;  %v1322_v26 = vadd.f32 %v1321_v57, %v5157_v52  ;;  %v5158_v32 = vld [vmem:[#allocation64_spill] sm:$0xff]  ;;  %v1445_v45 = vpack.c.bf16 %v1413_v25, %v1413_v25  ;;  %v1968_v57 = vadd.f32 %v4199_v9, %v1914_v13 }
 0x1f3   : > { %1517 = vrot.lane.b32.xlu0 %v1442_v38, %s3330_s17  ;;  %v5156_v38 = vld [vmem:[#allocation9_spill] sm:$0xff]  ;;  %v1319_v63 = vadd.f32 %v1318_v39, %v5158_v32  ;;  %v4484_v28 = vpop.permute.xlu0 %2309  ;;  %v4493_v39 = vpop.f32.mrf.mxu0  ;;  %v2001_v32 = vmax.f32 %v4298_v41, 0.0  ;;  %v5165_v41 = vld [vmem:[#allocation34_spill] sm:$0xff] }
 0x1f4   : > { %v4457_v10 = vpop.permute.xlu2 %2079  ;;  %v1383_v12 = vadd.f32 %v3796_v18, %v1322_v26  ;;  %v2000_v9 = vmax.f32 %v1968_v57, 0.0  ;;  %v2002_v26 = vmax.f32 %v4295_v48, 0.0  ;;  %v5164_v48 = vld [vmem:[#allocation19_spill] sm:$0xff] }
 0x1f5   : > { %v1382_v2 = vadd.f32 %v3796_v18, %v1319_v63  ;;  %v5163_v63 = vld [vmem:[#allocation28_spill] sm:$0xff]  ;;  %v2033_v37 = vpack.c.bf16 %v2001_v32, %v2001_v32 }
 0x1f6   : > { %v1415_v35 = vmax.f32 %v1383_v12, 0.0  ;;  %v2034_v19 = vpack.c.bf16 %v2002_v26, %v2002_v26  ;;  %v5166_v12 = vld [vmem:[#allocation32_spill] sm:$0xff] }
 0x1f8   : > { %v1447_v24 = vpack.c.bf16 %v1415_v35, %v1415_v35 }
 0x1fa   : > { %1521 = vrot.lane.b32.xlu2 %v1444_v60, %s3330_s17  ;;  %1519 = vrot.lane.b32.xlu1 %v1443_v29, %s3330_s17  ;;  %v1326_v29 = vpop.f32.mrf.mxu2  ;;  %v5161_v60 = vld [vmem:[#allocation2_spill] sm:$0xff] }
 0x1fb   : > { %2111 = vrot.lane.b32.xlu0 %v2029_v59, %s3331_s18  ;;  %3230 = vmatmul.msk.bf16.gmra.mxu0 %vm781_vm3, %v3296_v43  ;;  %v1414_v59 = vmax.f32 %v1382_v2, 0.0  ;;  %v2482_v61 = vpop.f32.mrf.mxu0 }
 0x1fc   : > { %v4470_v20 = vpop.permute.xlu2 %2091 }
 0x1fd   : > { %v1446_v14 = vpack.c.bf16 %v1414_v59, %v1414_v59 }
 0x202   : > { %2115 = vrot.lane.b32.xlu2 %v2031_v49, %s3331_s18  ;;  %2113 = vrot.lane.b32.xlu1 %v2030_v55, %s3331_s18  ;;  %v2032_v49 = vpack.c.bf16 %v2000_v9, %v2000_v9  ;;  %v1328_v55 = vpop.f32.mrf.mxu2 }
 0x203   : > { %2327 = vrot.lane.b32.xlu0 %v5156_v38, %s3329_s16  ;;  %v1329_v2 = vadd.f32 %v1328_v55, %v5166_v12  ;;  %v4534_v59 = vpop.f32.mrf.mxu0  ;;  %v2003_v55 = vmax.f32 %v4217_v22, 0.0  ;;  %v2004_v22 = vmax.f32 %v4242_v46, 0.0 }
 0x204   : > { %v1504_v31 = vpop.permute.xlu2 %1503 }
 0x205   : > { %1596 = vst.msk [vmem:[%s3694_s15 + $0x10] sm:$0xf] %vm1591_vm5, %v1504_v31  ;;  %v1324_v31 = vadd.f32 %v1323_v47, %v5163_v63  ;;  %v1327_v47 = vadd.f32 %v1326_v29, %v5165_v41  ;;  %v1386_v29 = vadd.f32 %v3796_v18, %v1329_v2  ;;  %v2005_v63 = vmax.f32 %v4270_v8, 0.0 }
 0x206   : > { %v2036_v41 = vpack.c.bf16 %v2004_v22, %v2004_v22  ;;  %v2008_v22 = vmax.f32 %v4359_v51, 0.0 }
 0x207   : > { %v1384_v13 = vadd.f32 %v3796_v18, %v1324_v31  ;;  %v2037_v46 = vpack.c.bf16 %v2005_v63, %v2005_v63 }
 0x20a   : > { %2337 = vrot.lane.b32.xlu2 %v5161_v60, %s3329_s16  ;;  %2335 = vrot.lane.b32.xlu1 %v5162_v36, %s3329_s16  ;;  %v1416_v60 = vmax.f32 %v1384_v13, 0.0 }
 0x20b   : > { %1523 = vrot.lane.b32.xlu0 %v1445_v45, %s3330_s17  ;;  %v4548_v32 = vpop.f32.mrf.mxu0 }
 0x20c   : > { %v4500_v16 = vpop.permute.xlu2 %2085  ;;  %v2078_v11 = vpop.permute.xlu1 %2077 }
 0x20d   : > { %2173 = vst.msk [vmem:[%s3694_s15 + $0x4] sm:$0xf] %vm2171_vm6, %v2078_v11  ;;  %v2076_v43 = vpop.permute.xlu0 %2075  ;;  %v1385_v11 = vadd.f32 %v3796_v18, %v1327_v47 }
 0x20e   : > { %2172 = vst.msk [vmem:[%s3694_s15] sm:$0xf] %vm2171_vm6, %v2076_v43  ;;  %v1448_v43 = vpack.c.bf16 %v1416_v60, %v1416_v60 }
 0x20f   : > { %v1417_v9 = vmax.f32 %v1385_v11, 0.0 }
 0x211   : > { %v1449_v26 = vpack.c.bf16 %v1417_v9, %v1417_v9 }
 0x212   : > { %1527 = vrot.lane.b32.xlu2 %v1447_v24, %s3330_s17  ;;  %1525 = vrot.lane.b32.xlu1 %v1446_v14, %s3330_s17  ;;  %v1418_v24 = vmax.f32 %v1386_v29, 0.0 }
 0x213   : > { %2117 = vrot.lane.b32.xlu0 %v2032_v49, %s3331_s18 }
 0x214   : > { %v4509_v38 = vpop.permute.xlu2 %2097  ;;  %v1502_v52 = vpop.permute.xlu1 %1501 }
 0x215   : > { %1595 = vst.msk [vmem:[%s3694_s15 + $0xc] sm:$0xf] %vm1591_vm5, %v1502_v52  ;;  %v1500_v25 = vpop.permute.xlu0 %1499 }
 0x216   : > { %1594 = vst.msk [vmem:[%s3694_s15 + $0x8] sm:$0xf] %vm1591_vm5, %v1500_v25  ;;  %v2490_v12 = vpop.f32.mrf.mxu0 }
 0x217   : > { %2174 = vst.msk [vmem:[%s3694_s15 + $0x8] sm:$0xf] %vm2171_vm6, %v4457_v10  ;;  %v1331_v10 = vpop.f32.mrf.mxu2 }
 0x21a   : > { %2121 = vrot.lane.b32.xlu2 %v2034_v19, %s3331_s18  ;;  %2119 = vrot.lane.b32.xlu1 %v2033_v37, %s3331_s18  ;;  %v5167_v19 = vld [vmem:[#allocation46_spill] sm:$0xff] }
 0x21b   : > { %2333 = vrot.lane.b32.xlu0 %v5164_v48, %s3329_s16  ;;  %v1332_v37 = vadd.f32 %v1331_v10, %v5167_v19 }
 0x21c   : > { %v2320_v45 = vpop.permute.xlu2 %2319  ;;  %v2084_v57 = vpop.permute.xlu1 %2083 }
 0x21d   : > { %v4528_v36 = vadd.f32 %v2482_v61, %v2320_v45  ;;  %2176 = vst.msk [vmem:[%s3694_s15 + $0x10] sm:$0xf] %vm2171_vm6, %v2084_v57  ;;  %v2082_v35 = vpop.permute.xlu0 %2081  ;;  %v1387_v8 = vadd.f32 %v3796_v18, %v1332_v37  ;;  %v5169_v45 = vld [vmem:[#allocation50_spill] sm:$0xff] }
 0x21e   : > { %2175 = vst.msk [vmem:[%s3694_s15 + $0xc] sm:$0xf] %vm2171_vm6, %v2082_v35 }
 0x21f   : > { %v1333_v52 = vpop.f32.mrf.mxu2  ;;  %v1419_v10 = vmax.f32 %v1387_v8, 0.0 }
 0x222   : > { %2343 = vrot.lane.b32.xlu2 %v3597_v0, %s3329_s16  ;;  %2341 = vrot.lane.b32.xlu1 %v5123_v15, %s3329_s16  ;;  %v1450_v0 = vpack.c.bf16 %v1418_v24, %v1418_v24  ;;  %v2035_v15 = vpack.c.bf16 %v2003_v55, %v2003_v55 }
 0x223   : > { %1529 = vrot.lane.b32.xlu0 %v1448_v43, %s3330_s17  ;;  %v1451_v43 = vpack.c.bf16 %v1419_v10, %v1419_v10 }
 0x224   : > { %v1510_v14 = vpop.permute.xlu2 %1509  ;;  %v2096_v49 = vpop.permute.xlu1 %2095 }
 0x225   : > { %1599 = vst.msk [vmem:[%s3694_s15 + $0x1c] sm:$0xf] %vm1591_vm5, %v1510_v14  ;;  %v4546_v61 = vpop.permute.xlu0 %2093 }
 0x227   : > { %v1336_v47 = vpop.f32.mrf.mxu2 }
 0x228   : > { %v1337_v57 = vadd.f32 %v1336_v47, %v5169_v45 }
 0x22a   : > { %1533 = vrot.lane.b32.xlu2 %v1450_v0, %s3330_s17  ;;  %1531 = vrot.lane.b32.xlu1 %v1449_v26, %s3330_s17 }
 0x22b   : > { %2123 = vrot.lane.b32.xlu0 %v2035_v15, %s3331_s18 }
 0x22c   : > { %v4555_v31 = vpop.permute.xlu2 %2103  ;;  %v2318_v25 = vpop.permute.xlu1 %2317 }
 0x22d   : > { %v4559_v13 = vadd.f32 %v4493_v39, %v2318_v25  ;;  %v1506_v48 = vpop.permute.xlu0 %1505  ;;  %v5168_v39 = vld [vmem:[#allocation54_spill] sm:$0xff] }
 0x22e   : > { %1597 = vst.msk [vmem:[%s3694_s15 + $0x14] sm:$0xf] %vm1591_vm5, %v1506_v48  ;;  %v1334_v2 = vadd.f32 %v1333_v52, %v5168_v39  ;;  %v2006_v52 = vmax.f32 %v4307_v30, 0.0  ;;  %v2007_v30 = vmax.f32 %v4331_v33, 0.0  ;;  %v5171_v33 = vld [vmem:[#allocation21_spill] sm:$0xff] }
 0x22f   : > { %2177 = vst.msk [vmem:[%s3694_s15 + $0x14] sm:$0xf] %vm2171_vm6, %v4500_v16  ;;  %v1338_v0 = vpop.f32.mrf.mxu2 }
 0x230   : > { %v1388_v29 = vadd.f32 %v3796_v18, %v1334_v2  ;;  %v2039_v48 = vpack.c.bf16 %v2007_v30, %v2007_v30 }
 0x232   : > { %2127 = vrot.lane.b32.xlu2 %v2037_v46, %s3331_s18  ;;  %2125 = vrot.lane.b32.xlu1 %v2036_v41, %s3331_s18  ;;  %v1420_v9 = vmax.f32 %v1388_v29, 0.0  ;;  %v2040_v41 = vpack.c.bf16 %v2008_v22, %v2008_v22 }
 0x233   : > { %2339 = vrot.lane.b32.xlu0 %v3568_v56, %s3329_s16  ;;  %v1389_v56 = vadd.f32 %v3796_v18, %v1337_v57 }
 0x234   : > { %v2326_v60 = vpop.permute.xlu2 %2325  ;;  %v1508_v16 = vpop.permute.xlu1 %1507 }
 0x235   : > { %v4573_v35 = vadd.f32 %v2490_v12, %v2326_v60  ;;  %1598 = vst.msk [vmem:[%s3694_s15 + $0x18] sm:$0xf] %vm1591_vm5, %v1508_v16  ;;  %v2088_v11 = vpop.permute.xlu0 %2087  ;;  %v1421_v24 = vmax.f32 %v1389_v56, 0.0 }
 0x236   : > { %2178 = vst.msk [vmem:[%s3694_s15 + $0x18] sm:$0xf] %vm2171_vm6, %v2088_v11  ;;  %v2009_v11 = vmax.f32 %v4382_v50, 0.0  ;;  %v2010_v50 = vmax.f32 %v4399_v6, 0.0 }
 0x237   : > { %v1453_v15 = vpack.c.bf16 %v1421_v24, %v1421_v24  ;;  %v1341_v8 = vpop.f32.mrf.mxu2 }
 0x238   : > { %v1342_v51 = vadd.f32 %v1341_v8, %v5171_v33  ;;  %v2041_v56 = vpack.c.bf16 %v2009_v11, %v2009_v11 }
 0x23a   : > { %2349 = vrot.lane.b32.xlu2 %v5133_v62, %s3329_s16  ;;  %2347 = vrot.lane.b32.xlu1 %v5131_v53, %s3329_s16  ;;  %v1452_v62 = vpack.c.bf16 %v1420_v9, %v1420_v9  ;;  %v2038_v53 = vpack.c.bf16 %v2006_v52, %v2006_v52  ;;  %v1391_v57 = vadd.f32 %v3796_v18, %v1342_v51  ;;  %v2492_v52 = vpop.f32.mrf.mxu0 }
 0x23b   : > { %1535 = vrot.lane.b32.xlu0 %v1451_v43, %s3330_s17 }
 0x23c   : > { %v1516_v14 = vpop.permute.xlu2 %1515  ;;  %v2090_v55 = vpop.permute.xlu1 %2089 }
 0x23d   : > { %1602 = vst.msk [vmem:[%s3694_s15 + $0x28] sm:$0xf] %vm1591_vm5, %v1516_v14  ;;  %v4589_v26 = vpop.permute.xlu0 %2099  ;;  %v2042_v14 = vpack.c.bf16 %v2010_v50, %v2010_v50 }
 0x23e   : > { %2182 = vst.msk [vmem:[%s3694_s15 + $0x28] sm:$0xf] %vm2171_vm6, %v2096_v49  ;;  %v5170_v49 = vld [vmem:[#allocation65_spill] sm:$0xff] }
 0x23f   : > { %2179 = vst.msk [vmem:[%s3694_s15 + $0x1c] sm:$0xf] %vm2171_vm6, %v2090_v55  ;;  %v1339_v19 = vadd.f32 %v1338_v0, %v5170_v49  ;;  %v1343_v50 = vpop.f32.mrf.mxu2 }
 0x241   : > { %v1390_v46 = vadd.f32 %v3796_v18, %v1339_v19 }
 0x242   : > { %1539 = vrot.lane.b32.xlu2 %v1453_v15, %s3330_s17  ;;  %1537 = vrot.lane.b32.xlu1 %v1452_v62, %s3330_s17 }
 0x243   : > { %2129 = vrot.lane.b32.xlu0 %v2038_v53, %s3331_s18  ;;  %v1422_v39 = vmax.f32 %v1390_v46, 0.0 }
 0x244   : > { %v4600_v63 = vpop.permute.xlu2 %2109  ;;  %v2102_v25 = vpop.permute.xlu1 %2101 }
 0x245   : > { %v4603_v37 = vpop.permute.xlu0 %2315  ;;  %v1454_v60 = vpack.c.bf16 %v1422_v39, %v1422_v39 }
 0x24a   : > { %2133 = vrot.lane.b32.xlu2 %v2040_v41, %s3331_s18  ;;  %2131 = vrot.lane.b32.xlu1 %v2039_v48, %s3331_s18 }
 0x24b   : > { %2345 = vrot.lane.b32.xlu0 %v3616_v7, %s3329_s16  ;;  %v3317_v7 = vld [vmem:[%s5039_s6] ss:$0 sm:$0xff] }
 0x24c   : > { %v4611_v47 = vpop.permute.xlu2 %2331  ;;  %v2324_v12 = vpop.permute.xlu1 %2323 }
 0x24d   : > { %v4614_v2 = vadd.f32 %v4548_v32, %v2324_v12  ;;  %v1512_v45 = vpop.permute.xlu0 %1511  ;;  %v1423_v32 = vmax.f32 %v1391_v57, 0.0 }
 0x24e   : > { %1600 = vst.msk [vmem:[%s3694_s15 + $0x20] sm:$0xf] %vm1591_vm5, %v1512_v45 }
 0x24f   : > { %2180 = vst.msk [vmem:[%s3694_s15 + $0x20] sm:$0xf] %vm2171_vm6, %v4470_v20  ;;  %v1455_v20 = vpack.c.bf16 %v1423_v32, %v1423_v32 }
 0x252   : > { %2528 = vrot.lane.b32.xlu1 %v3317_v7, %s3329_s16 }
 0x253   : > { %1541 = vrot.lane.b32.xlu0 %v1454_v60, %s3330_s17 }
 0x254   : > { %v1522_v16 = vpop.permute.xlu2 %1521  ;;  %v1514_v10 = vpop.permute.xlu1 %1513 }
 0x255   : > { %1605 = vst.msk [vmem:[%s3694_s15 + $0x34] sm:$0xf] %vm1591_vm5, %v1522_v16  ;;  %v2106_v29 = vpop.permute.xlu0 %2105 }
 0x256   : > { %2185 = vst.msk [vmem:[%s3694_s15 + $0x34] sm:$0xf] %vm2171_vm6, %v2102_v25 }
 0x257   : > { %1601 = vst.msk [vmem:[%s3694_s15 + $0x24] sm:$0xf] %vm1591_vm5, %v1514_v10 }
 0x258   : > { %2181 = vst.msk [vmem:[%s3694_s15 + $0x24] sm:$0xf] %vm2171_vm6, %v4546_v61 }
 0x25a   : > { %1543 = vrot.lane.b32.xlu1 %v1455_v20, %s3330_s17 }
 0x25b   : > { %2135 = vrot.lane.b32.xlu0 %v2041_v56, %s3331_s18 }
 0x25c   : > { %v2116_v43 = vpop.permute.xlu2 %2115  ;;  %v2108_v9 = vpop.permute.xlu1 %2107 }
 0x25d   : > { %v4640_v24 = vpop.permute.xlu0 %2321 }
 0x262   : > { %2137 = vrot.lane.b32.xlu1 %v2042_v14, %s3331_s18 }
 0x263   : > { %2351 = vrot.lane.b32.xlu0 %v5134_v27, %s3329_s16  ;;  %v4658_v27 = vpop.f32.mrf.mxu0 }
 0x264   : > { %v4645_v61 = vpop.permute.xlu2 %2337  ;;  %v4647_v55 = vpop.permute.xlu1 %2329 }
 0x265   : > { %v1518_v0 = vpop.permute.xlu0 %1517 }
 0x266   : > { %1603 = vst.msk [vmem:[%s3694_s15 + $0x2c] sm:$0xf] %vm1591_vm5, %v1518_v0  ;;  %v1346_v0 = vpop.f32.mrf.mxu2 }
 0x267   : > { %2183 = vst.msk [vmem:[%s3694_s15 + $0x2c] sm:$0xf] %vm2171_vm6, %v4509_v38 }
 0x26b   : > { %v4669_v25 = vpop.f32.mrf.mxu0 }
 0x26c   : > { %v1528_v6 = vpop.permute.xlu2 %1527  ;;  %v1520_v62 = vpop.permute.xlu1 %1519 }
 0x26d   : > { %1608 = vst.msk [vmem:[%s3694_s15 + $0x40] sm:$0xf] %vm1591_vm5, %v1528_v6  ;;  %v2112_v15 = vpop.permute.xlu0 %2111 }
 0x26e   : > { %2188 = vst.msk [vmem:[%s3694_s15 + $0x40] sm:$0xf] %vm2171_vm6, %v2108_v9 }
 0x26f   : > { %1604 = vst.msk [vmem:[%s3694_s15 + $0x30] sm:$0xf] %vm1591_vm5, %v1520_v62 }
 0x270   : > { %2184 = vst.msk [vmem:[%s3694_s15 + $0x30] sm:$0xf] %vm2171_vm6, %v4589_v26 }
 0x273   : > { %v4680_v26 = vpop.f32.mrf.mxu0 }
 0x274   : > { %v4665_v53 = vpop.permute.xlu2 %2121  ;;  %v2114_v38 = vpop.permute.xlu1 %2113 }
 0x275   : > { %v2328_v30 = vpop.permute.xlu0 %2327 }
 0x276   : > { %v4667_v22 = vadd.f32 %v2492_v52, %v2328_v30  ;;  %v5175_v30 = vld [vmem:[#allocation41_spill] sm:$0xff] }
 0x27b   : > { %v4694_v12 = vpop.f32.mrf.mxu0 }
 0x27c   : > { %v4671_v49 = vpop.permute.xlu2 %2343  ;;  %v4673_v19 = vpop.permute.xlu1 %2335 }
 0x27d   : > { %v1524_v48 = vpop.permute.xlu0 %1523 }
 0x27e   : > { %1606 = vst.msk [vmem:[%s3694_s15 + $0x38] sm:$0xf] %vm1591_vm5, %v1524_v48  ;;  %v2448_v48 = vadd.f32 %v5175_v30, %v4434_v21  ;;  %v5179_v21 = vld [vmem:[#allocation57_spill] sm:$0xff] }
 0x27f   : > { %2186 = vst.msk [vmem:[%s3694_s15 + $0x38] sm:$0xf] %vm2171_vm6, %v4555_v31  ;;  %v2458_v30 = vadd.f32 %v5179_v21, %v4344_v1 }
 0x283   : > { %v4705_v57 = vpop.f32.mrf.mxu0 }
 0x284   : > { %v1534_v41 = vpop.permute.xlu2 %1533  ;;  %v1526_v46 = vpop.permute.xlu1 %1525 }
 0x285   : > { %1611 = vst.msk [vmem:[%s3694_s15 + $0x4c] sm:$0xf] %vm1591_vm5, %v1534_v41  ;;  %v2118_v8 = vpop.permute.xlu0 %2117  ;;  %v5176_v41 = vld [vmem:[#allocation44_spill] sm:$0xff] }
 0x286   : > { %2191 = vst.msk [vmem:[%s3694_s15 + $0x4c] sm:$0xf] %vm2171_vm6, %v2114_v38 }
 0x287   : > { %1607 = vst.msk [vmem:[%s3694_s15 + $0x3c] sm:$0xf] %vm1591_vm5, %v1526_v46  ;;  %v2451_v46 = vadd.f32 %v5176_v41, %v4318_v4 }
 0x288   : > { %2187 = vst.msk [vmem:[%s3694_s15 + $0x3c] sm:$0xf] %vm2171_vm6, %v2106_v29 }
 0x28b   : > { %v4715_v10 = vpop.f32.mrf.mxu0 }
 0x28c   : > { %v4690_v33 = vpop.permute.xlu2 %2127  ;;  %v2120_v31 = vpop.permute.xlu1 %2119 }
 0x28d   : > { %v4692_v51 = vpop.permute.xlu0 %2333 }
 0x293   : > { %v2510_v29 = vpop.f32.mrf.mxu0 }
 0x294   : > { %v4696_v39 = vpop.permute.xlu2 %2349  ;;  %v4698_v45 = vpop.permute.xlu1 %2341 }
 0x295   : > { %v1530_v7 = vpop.permute.xlu0 %1529 }
 0x296   : > { %1609 = vst.msk [vmem:[%s3694_s15 + $0x44] sm:$0xf] %vm1591_vm5, %v1530_v7  ;;  %v1348_v7 = vpop.f32.mrf.mxu2 }
 0x297   : > { %2189 = vst.msk [vmem:[%s3694_s15 + $0x44] sm:$0xf] %vm2171_vm6, %v4600_v63 }
 0x29b   : > { %v4731_v52 = vpop.f32.mrf.mxu0 }
 0x29c   : > { %v1540_v60 = vpop.permute.xlu2 %1539  ;;  %v1532_v32 = vpop.permute.xlu1 %1531 }
 0x29d   : > { %1614 = vst.msk [vmem:[%s3694_s15 + $0x58] sm:$0xf] %vm1591_vm5, %v1540_v60  ;;  %v2124_v16 = vpop.permute.xlu0 %2123 }
 0x29e   : > { %2194 = vst.msk [vmem:[%s3694_s15 + $0x58] sm:$0xf] %vm2171_vm6, %v2120_v31  ;;  %v5177_v31 = vld [vmem:[#allocation33_spill] sm:$0xff]  ;;  %v4773_v21 = vpop.f32.mrf.mxu2 }
 0x29f   : > { %1610 = vst.msk [vmem:[%s3694_s15 + $0x48] sm:$0xf] %vm1591_vm5, %v1532_v32 }
 0x2a0   : > { %2190 = vst.msk [vmem:[%s3694_s15 + $0x48] sm:$0xf] %vm2171_vm6, %v2112_v15 }
 0x2a3   : > { %v4739_v15 = vpop.f32.mrf.mxu0 }
 0x2a4   : > { %v4717_v11 = vpop.permute.xlu1 %2125 }
 0x2a5   : > { %v4719_v63 = vpop.permute.xlu0 %2339 }
 0x2ac   : > { %v4721_v20 = vpop.permute.xlu1 %2347 }
 0x2ad   : > { %v1536_v56 = vpop.permute.xlu0 %1535 }
 0x2ae   : > { %1612 = vst.msk [vmem:[%s3694_s15 + $0x50] sm:$0xf] %vm1591_vm5, %v1536_v56 }
 0x2af   : > { %2192 = vst.msk [vmem:[%s3694_s15 + $0x50] sm:$0xf] %vm2171_vm6, %v2116_v43  ;;  %v5174_v43 = vld [vmem:[#allocation38_spill] sm:$0xff] }
 0x2b0   : > { %v2446_v38 = vadd.f32 %v5174_v43, %v4227_v54  ;;  %v5178_v54 = vld [vmem:[#allocation48_spill] sm:$0xff] }
 0x2b1   : > { %v2453_v43 = vadd.f32 %v5178_v54, %v4250_v40 }
 0x2b4   : > { %v1538_v9 = vpop.permute.xlu1 %1537 }
 0x2b5   : > { %1613 = vst.msk [vmem:[%s3694_s15 + $0x54] sm:$0xf] %vm1591_vm5, %v1538_v9  ;;  %v4729_v14 = vpop.permute.xlu0 %2129 }
 0x2b6   : > { %5172 = vst [vmem:[#allocation11_spill] sm:$0xff] %v4729_v14 }
 0x2b7   : > { %2193 = vst.msk [vmem:[%s3694_s15 + $0x54] sm:$0xf] %vm2171_vm6, %v2118_v8  ;;  %v1347_v8 = vadd.f32 %v1346_v0, %v5177_v31 }
 0x2b9   : > { %v1393_v0 = vadd.f32 %v3796_v18, %v1347_v8 }
 0x2bc   : > { %v4735_v6 = vpop.permute.xlu1 %2131 }
 0x2bd   : > { %5173 = vst [vmem:[#allocation4_spill] sm:$0xff] %v4735_v6  ;;  %v4737_v62 = vpop.permute.xlu0 %2345  ;;  %v5180_v6 = vld [vmem:[#allocation16_spill] sm:$0xff] }
 0x2be   : > { %v1344_v4 = vadd.f32 %v1343_v50, %v5180_v6  ;;  %v2517_v50 = vpop.f32.mrf.mxu0 }
 0x2c0   : > { %v1392_v6 = vadd.f32 %v3796_v18, %v1344_v4 }
 0x2c2   : > { %v1424_v4 = vmax.f32 %v1392_v6, 0.0  ;;  %v2506_v6 = vadd.f32 %v4705_v57, %v4645_v61 }
 0x2c4   : > { %v4748_v60 = vpop.permute.xlu1 %2528 }
 0x2c5   : > { %v1542_v32 = vpop.permute.xlu0 %1541  ;;  %v2533_v56 = vadd.f32 %v4748_v60, %v2451_v46  ;;  %v2531_v9 = vadd.f32 %v4748_v60, %v2446_v38  ;;  %v2532_v14 = vadd.f32 %v4748_v60, %v2448_v48  ;;  %v2536_v48 = vadd.f32 %v4748_v60, %v2458_v30 }
 0x2c6   : > { %1615 = vst.msk [vmem:[%s3694_s15 + $0x5c] sm:$0xf] %vm1591_vm5, %v1542_v32  ;;  %v2534_v1 = vadd.f32 %v4748_v60, %v2453_v43  ;;  %v1425_v32 = vmax.f32 %v1393_v0, 0.0  ;;  %v5182_v43 = vld [vmem:[#allocation53_spill] sm:$0xff]  ;;  %v4835_v57 = vadd.f32 %v4748_v60, %v2506_v6 }
 0x2c7   : > { %2195 = vst.msk [vmem:[%s3694_s15 + $0x5c] sm:$0xf] %vm2171_vm6, %v4665_v53  ;;  %v2565_v41 = vmax.f32 %v2533_v56, 0.0  ;;  %v2563_v46 = vmax.f32 %v2531_v9, 0.0  ;;  %v2564_v38 = vmax.f32 %v2532_v14, 0.0  ;;  %v5181_v53 = vld [vmem:[#allocation40_spill] sm:$0xff]  ;;  %v2456_v30 = vadd.f32 %v5182_v43, %v4449_v5 }
 0x2c8   : > { %v1349_v8 = vadd.f32 %v1348_v7, %v5181_v53  ;;  %v2568_v56 = vmax.f32 %v2536_v48, 0.0  ;;  %v2566_v9 = vmax.f32 %v2534_v1, 0.0  ;;  %v1457_v0 = vpack.c.bf16 %v1425_v32, %v1425_v32 }
 0x2c9   : > { %v2597_v31 = vpack.c.bf16 %v2565_v41, %v2565_v41  ;;  %v2595_v40 = vpack.c.bf16 %v2563_v46, %v2563_v46  ;;  %v2596_v54 = vpack.c.bf16 %v2564_v38, %v2564_v38  ;;  %v2496_v41 = vadd.f32 %v4658_v27, %v4647_v55 }
 0x2ca   : > { %v1394_v7 = vadd.f32 %v3796_v18, %v1349_v8  ;;  %v2503_v46 = vadd.f32 %v4694_v12, %v4673_v19  ;;  %v2501_v38 = vadd.f32 %v4680_v26, %v4692_v51  ;;  %v2511_v48 = vadd.f32 %v2510_v29, %v4698_v45  ;;  %v5183_v45 = vld [vmem:[#allocation63_spill] sm:$0xff] }
 0x2cb   : > { %2663 = vrot.lane.b32.xlu1 %v2597_v31, %s3332_s23  ;;  %2659 = vrot.lane.b32.xlu2 %v2595_v40, %s3332_s23  ;;  %v2600_v31 = vpack.c.bf16 %v2568_v56, %v2568_v56  ;;  %v2535_v40 = vadd.f32 %v4748_v60, %v2456_v30  ;;  %v4789_v5 = vadd.f32 %v4748_v60, %v2496_v41 }
 0x2cc   : > { %2661 = vrot.lane.b32.xlu0 %v2596_v54, %s3332_s23  ;;  %v1544_v14 = vpop.permute.xlu1 %1543  ;;  %v4793_v55 = vadd.f32 %v4748_v60, %v4667_v22  ;;  %v4796_v27 = vadd.f32 %v4748_v60, %v2503_v46  ;;  %v4800_v19 = vadd.f32 %v4748_v60, %v4573_v35  ;;  %v4803_v26 = vadd.f32 %v4748_v60, %v2501_v38  ;;  %v2520_v22 = vpop.f32.mrf.mxu0 }
 0x2cd   : > { %1616 = vst.msk [vmem:[%s3694_s15 + $0x60] sm:$0xf] %vm1591_vm5, %v1544_v14  ;;  %v4808_v51 = vadd.f32 %v4748_v60, %v2511_v48  ;;  %v1426_v12 = vmax.f32 %v1394_v7, 0.0  ;;  %v2463_v29 = vadd.f32 %v5183_v45, %v4467_v17  ;;  %v1456_v54 = vpack.c.bf16 %v1424_v4, %v1424_v4  ;;  %v5185_v48 = vld [vmem:[#allocation36_spill] sm:$0xff] }
 0x2ce   : > { %2196 = vst.msk [vmem:[%s3694_s15 + $0x60] sm:$0xf] %vm2171_vm6, %v2124_v16  ;;  %v2598_v16 = vpack.c.bf16 %v2566_v9, %v2566_v9  ;;  %v2498_v35 = vadd.f32 %v4669_v25, %v4611_v47  ;;  %v2508_v1 = vadd.f32 %v4715_v10, %v4719_v63  ;;  %v2518_v32 = vadd.f32 %v2517_v50, %v4721_v20  ;;  %v1353_v10 = vpop.f32.mrf.mxu2  ;;  %v5184_v9 = vld [vmem:[#allocation51_spill] sm:$0xff] }
 0x2cf   : > { %v2516_v53 = vadd.f32 %v4739_v15, %v4737_v62  ;;  %v2567_v8 = vmax.f32 %v2535_v40, 0.0  ;;  %v2513_v14 = vadd.f32 %v4731_v52, %v4671_v49  ;;  %v2521_v17 = vadd.f32 %v2520_v22, %v4696_v39 }
 0x2d0   : > { %v4826_v56 = vadd.f32 %v4748_v60, %v2498_v35  ;;  %v4829_v47 = vadd.f32 %v4748_v60, %v2508_v1  ;;  %v1458_v25 = vpack.c.bf16 %v1426_v12, %v1426_v12  ;;  %v4832_v61 = vadd.f32 %v4748_v60, %v2518_v32 }
 0x2d1   : > { %v4838_v63 = vadd.f32 %v4748_v60, %v2516_v53  ;;  %v2539_v49 = vadd.f32 %v4748_v60, %v4370_v34  ;;  %v2537_v39 = vadd.f32 %v4748_v60, %v4279_v23  ;;  %v4845_v20 = vadd.f32 %v4748_v60, %v2513_v14 }
 0x2d2   : > { %v4848_v52 = vadd.f32 %v4748_v60, %v2521_v17  ;;  %v2599_v62 = vpack.c.bf16 %v2567_v8, %v2567_v8  ;;  %v2538_v15 = vadd.f32 %v4748_v60, %v2463_v29  ;;  %v1354_v43 = vadd.f32 %v1353_v10, %v5184_v9 }
 0x2d3   : > { %2669 = vrot.lane.b32.xlu1 %v2600_v31, %s3332_s23  ;;  %2665 = vrot.lane.b32.xlu2 %v2598_v16, %s3332_s23  ;;  %v2571_v50 = vmax.f32 %v2539_v49, 0.0  ;;  %v2569_v34 = vmax.f32 %v2537_v39, 0.0  ;;  %v2540_v41 = vadd.f32 %v4748_v60, %v4316_v44  ;;  %v1352_v31 = vadd.f32 %v4773_v21, %v5185_v48  ;;  %v5186_v16 = vld [vmem:[#allocation61_spill] sm:$0xff] }
 0x2d4   : > { %1547 = vrot.lane.b32.xlu0 %v1457_v0, %s3330_s17  ;;  %v2570_v23 = vmax.f32 %v2538_v15, 0.0  ;;  %v2542_v0 = vadd.f32 %v4748_v60, %v4391_v42  ;;  %v1396_v7 = vadd.f32 %v3796_v18, %v1354_v43  ;;  %v5187_v44 = vld [vmem:[#allocation13_spill] sm:$0xff]  ;;  %v2543_v10 = vadd.f32 %v4748_v60, %v4342_v58 }
 0x2d5   : > { %v2603_v30 = vpack.c.bf16 %v2571_v50, %v2571_v50  ;;  %v2601_v4 = vpack.c.bf16 %v2569_v34, %v2569_v34  ;;  %v2572_v42 = vmax.f32 %v2540_v41, 0.0  ;;  %v2471_v45 = vadd.f32 %v5187_v44, %v4484_v28 }
 0x2d6   : > { %v1356_v46 = vpop.f32.mrf.mxu2  ;;  %v2602_v38 = vpack.c.bf16 %v2570_v23, %v2570_v23  ;;  %v2574_v12 = vmax.f32 %v2542_v0, 0.0  ;;  %v1428_v22 = vmax.f32 %v1396_v7, 0.0  ;;  %v1395_v29 = vadd.f32 %v3796_v18, %v1352_v31 }
 0x2d7   : > { %v1357_v40 = vadd.f32 %v1356_v46, %v5186_v16  ;;  %v2604_v1 = vpack.c.bf16 %v2572_v42, %v2572_v42  ;;  %v2541_v32 = vadd.f32 %v4748_v60, %v2471_v45  ;;  %v2478_v28 = vadd.f32 %v4474_v3, %v4603_v37 }
 0x2d8   : > { %v2606_v35 = vpack.c.bf16 %v2574_v12, %v2574_v12  ;;  %v1460_v6 = vpack.c.bf16 %v1428_v22, %v1428_v22  ;;  %v1427_v21 = vmax.f32 %v1395_v29, 0.0  ;;  %v2575_v15 = vmax.f32 %v2543_v10, 0.0  ;;  %v4907_v22 = vpop.permute.xlu0 %2135 }
 0x2d9   : > { %v2573_v8 = vmax.f32 %v2541_v32, 0.0  ;;  %v2544_v39 = vadd.f32 %v4748_v60, %v2478_v28  ;;  %v2486_v37 = vadd.f32 %v4534_v59, %v4640_v24  ;;  %v2548_v58 = vadd.f32 %v4748_v60, %v4614_v2 }
 0x2da   : > { %v1459_v14 = vpack.c.bf16 %v1427_v21, %v1427_v21  ;;  %v2546_v34 = vadd.f32 %v4748_v60, %v4528_v36  ;;  %v2582_v48 = vmax.f32 %v4793_v55, 0.0  ;;  %v2581_v12 = vmax.f32 %v4800_v19, 0.0 }
 0x2db   : > { %1549 = vrot.lane.b32.xlu1 %v1458_v25, %s3330_s17  ;;  %1545 = vrot.lane.b32.xlu2 %v1456_v54, %s3330_s17  ;;  %v1397_v54 = vadd.f32 %v3796_v18, %v1357_v40  ;;  %v2545_v25 = vadd.f32 %v4748_v60, %v4559_v13  ;;  %v2605_v49 = vpack.c.bf16 %v2573_v8, %v2573_v8  ;;  %v2576_v3 = vmax.f32 %v2544_v39, 0.0 }
 0x2dc   : > { %2667 = vrot.lane.b32.xlu0 %v2599_v62, %s3332_s23  ;;  %v2607_v13 = vpack.c.bf16 %v2575_v15, %v2575_v15  ;;  %v2547_v23 = vadd.f32 %v4748_v60, %v2486_v37  ;;  %v2580_v24 = vmax.f32 %v2548_v58, 0.0  ;;  %v2614_v40 = vpack.c.bf16 %v2582_v48, %v2582_v48  ;;  %v5189_v58 = vld [vmem:[#allocation4_spill] sm:$0xff] }
 0x2dd   : > { %v1429_v53 = vmax.f32 %v1397_v54, 0.0  ;;  %v2577_v62 = vmax.f32 %v2545_v25, 0.0  ;;  %v2608_v43 = vpack.c.bf16 %v2576_v3, %v2576_v3  ;;  %v2585_v42 = vmax.f32 %v4803_v26, 0.0 }
 0x2de   : > { %v1358_v9 = vpop.f32.mrf.mxu2  ;;  %v2579_v0 = vmax.f32 %v2547_v23, 0.0  ;;  %v2612_v41 = vpack.c.bf16 %v2580_v24, %v2580_v24  ;;  %v2613_v44 = vpack.c.bf16 %v2581_v12, %v2581_v12  ;;  %v2589_v45 = vmax.f32 %v4808_v51, 0.0 }
 0x2df   : > { %v1461_v17 = vpack.c.bf16 %v1429_v53, %v1429_v53  ;;  %v2609_v50 = vpack.c.bf16 %v2577_v62, %v2577_v62  ;;  %v2617_v55 = vpack.c.bf16 %v2585_v42, %v2585_v42  ;;  %v2584_v29 = vmax.f32 %v4826_v56, 0.0 }
 0x2e0   : > { %v2611_v36 = vpack.c.bf16 %v2579_v0, %v2579_v0  ;;  %v2621_v19 = vpack.c.bf16 %v2589_v45, %v2589_v45  ;;  %v2592_v51 = vmax.f32 %v4832_v61, 0.0  ;;  %v2587_v56 = vmax.f32 %v4835_v57, 0.0 }
 0x2e1   : > { %v2616_v54 = vpack.c.bf16 %v2584_v29, %v2584_v29  ;;  %v2590_v57 = vmax.f32 %v4845_v20, 0.0  ;;  %v2593_v25 = vmax.f32 %v4848_v52, 0.0  ;;  %v2138_v20 = vpop.permute.xlu1 %2137 }
 0x2e2   : > { %v2624_v21 = vpack.c.bf16 %v2592_v51, %v2592_v51  ;;  %v2619_v53 = vpack.c.bf16 %v2587_v56, %v2587_v56 }
 0x2e3   : > { %2675 = vrot.lane.b32.xlu1 %v2603_v30, %s3332_s23  ;;  %2671 = vrot.lane.b32.xlu2 %v2601_v4, %s3332_s23  ;;  %v5188_v30 = vld [vmem:[#allocation60_spill] sm:$0xff]  ;;  %v2578_v4 = vmax.f32 %v2546_v34, 0.0  ;;  %v2625_v10 = vpack.c.bf16 %v2593_v25, %v2593_v25  ;;  %v5190_v34 = vld [vmem:[#allocation11_spill] sm:$0xff] }
 0x2e4   : > { %2673 = vrot.lane.b32.xlu0 %v2602_v38, %s3332_s23  ;;  %v1359_v59 = vadd.f32 %v1358_v9, %v5188_v30  ;;  %v2583_v38 = vmax.f32 %v4789_v5, 0.0 }
 0x2e5   : > { %v2610_v7 = vpack.c.bf16 %v2578_v4, %v2578_v4 }
 0x2e6   : > { %v1398_v2 = vadd.f32 %v3796_v18, %v1359_v59  ;;  %v2615_v16 = vpack.c.bf16 %v2583_v38, %v2583_v38  ;;  %v2586_v18 = vmax.f32 %v4796_v27, 0.0  ;;  %v2588_v27 = vmax.f32 %v4829_v47, 0.0 }
 0x2e7   : > { %v2591_v47 = vmax.f32 %v4838_v63, 0.0  ;;  %v2622_v63 = vpack.c.bf16 %v2590_v57, %v2590_v57 }
 0x2e8   : > { %v1430_v46 = vmax.f32 %v1398_v2, 0.0  ;;  %v2618_v5 = vpack.c.bf16 %v2586_v18, %v2586_v18  ;;  %v2620_v26 = vpack.c.bf16 %v2588_v27, %v2588_v27 }
 0x2e9   : > { %v2623_v28 = vpack.c.bf16 %v2591_v47, %v2591_v47 }
 0x2ea   : > { %v1462_v31 = vpack.c.bf16 %v1430_v46, %v1430_v46 }
 0x2eb   : > { %2681 = vrot.lane.b32.xlu1 %v2606_v35, %s3332_s23  ;;  %2677 = vrot.lane.b32.xlu2 %v2604_v1, %s3332_s23  ;;  %v2522_v35 = vpop.f32.mrf.mxu0  ;;  %v2352_v1 = vpop.permute.xlu0 %2351 }
 0x2ec   : > { %1553 = vrot.lane.b32.xlu0 %v1460_v6, %s3330_s17  ;;  %v4918_v6 = vpop.permute.xlu2 %2133  ;;  %v2523_v32 = vadd.f32 %v2522_v35, %v2352_v1 }
 0x2ee   : > { %v2562_v8 = vadd.f32 %v4748_v60, %v2523_v32 }
 0x2f3   : > { %1555 = vrot.lane.b32.xlu1 %v1461_v17, %s3330_s17  ;;  %1551 = vrot.lane.b32.xlu2 %v1459_v14, %s3330_s17  ;;  %v2594_v14 = vmax.f32 %v2562_v8, 0.0 }
 0x2f4   : > { %2679 = vrot.lane.b32.xlu0 %v2605_v49, %s3332_s23 }
 0x2f5   : > { %v2626_v60 = vpack.c.bf16 %v2594_v14, %v2594_v14 }
 0x2fb   : > { %2687 = vrot.lane.b32.xlu1 %v2609_v50, %s3332_s23  ;;  %2683 = vrot.lane.b32.xlu2 %v2607_v13, %s3332_s23 }
 0x2fc   : > { %2685 = vrot.lane.b32.xlu0 %v2608_v43, %s3332_s23 }
 0x303   : > { %2693 = vrot.lane.b32.xlu1 %v2612_v41, %s3332_s23  ;;  %2689 = vrot.lane.b32.xlu2 %v2610_v7, %s3332_s23 }
 0x304   : > { %2691 = vrot.lane.b32.xlu0 %v2611_v36, %s3332_s23 }
 0x30b   : > { %2699 = vrot.lane.b32.xlu1 %v2615_v16, %s3332_s23  ;;  %1557 = vrot.lane.b32.xlu2 %v1462_v31, %s3330_s17 }
 0x30c   : > { %2697 = vrot.lane.b32.xlu0 %v2614_v40, %s3332_s23 }
 0x313   : > { %2705 = vrot.lane.b32.xlu1 %v2618_v5, %s3332_s23  ;;  %2695 = vrot.lane.b32.xlu2 %v2613_v44, %s3332_s23 }
 0x314   : > { %2703 = vrot.lane.b32.xlu0 %v2617_v55, %s3332_s23 }
 0x31b   : > { %2711 = vrot.lane.b32.xlu1 %v2621_v19, %s3332_s23  ;;  %2701 = vrot.lane.b32.xlu2 %v2616_v54, %s3332_s23 }
 0x31c   : > { %2709 = vrot.lane.b32.xlu0 %v2620_v26, %s3332_s23 }
 0x323   : > { %2717 = vrot.lane.b32.xlu1 %v2624_v21, %s3332_s23  ;;  %2707 = vrot.lane.b32.xlu2 %v2619_v53, %s3332_s23 }
 0x324   : > { %2715 = vrot.lane.b32.xlu0 %v2623_v28, %s3332_s23 }
 0x325   : > { %v2660_v61 = vpop.permute.xlu2 %2659 }
 0x326   : > { %2756 = vst.msk [vmem:[%s3694_s15] sm:$0xf] %vm2755_vm7, %v2660_v61 }
 0x32b   : > { %2713 = vrot.lane.b32.xlu2 %v2622_v63, %s3332_s23 }
 0x32c   : > { %2721 = vrot.lane.b32.xlu0 %v2626_v60, %s3332_s23 }
 0x32d   : > { %v2666_v17 = vpop.permute.xlu2 %2665 }
 0x32e   : > { %2759 = vst.msk [vmem:[%s3694_s15 + $0xc] sm:$0xf] %vm2755_vm7, %v2666_v17 }
 0x333   : > { %2719 = vrot.lane.b32.xlu2 %v2625_v10, %s3332_s23 }
 0x335   : > { %v1546_v49 = vpop.permute.xlu2 %1545 }
 0x336   : > { %1617 = vst.msk [vmem:[%s3694_s15 + $0x64] sm:$0xf] %vm1591_vm5, %v1546_v49 }
 0x337   : > { %2197 = vst.msk [vmem:[%s3694_s15 + $0x64] sm:$0xf] %vm2171_vm6, %v4717_v11 }
 0x33d   : > { %v2672_v39 = vpop.permute.xlu2 %2671  ;;  %v2664_v62 = vpop.permute.xlu1 %2663 }
 0x33e   : > { %2762 = vst.msk [vmem:[%s3694_s15 + $0x18] sm:$0xf] %vm2755_vm7, %v2672_v39  ;;  %v2662_v52 = vpop.permute.xlu0 %2661 }
 0x33f   : > { %2758 = vst.msk [vmem:[%s3694_s15 + $0x8] sm:$0xf] %vm2755_vm7, %v2664_v62 }
 0x340   : > { %2757 = vst.msk [vmem:[%s3694_s15 + $0x4] sm:$0xf] %vm2755_vm7, %v2662_v52 }
 0x345   : > { %v2678_v15 = vpop.permute.xlu2 %2677  ;;  %v2670_v3 = vpop.permute.xlu1 %2669 }
 0x346   : > { %2765 = vst.msk [vmem:[%s3694_s15 + $0x24] sm:$0xf] %vm2755_vm7, %v2678_v15  ;;  %v1548_v11 = vpop.permute.xlu0 %1547 }
 0x347   : > { %2761 = vst.msk [vmem:[%s3694_s15 + $0x14] sm:$0xf] %vm2755_vm7, %v2670_v3 }
 0x348   : > { %1618 = vst.msk [vmem:[%s3694_s15 + $0x68] sm:$0xf] %vm1591_vm5, %v1548_v11 }
 0x349   : > { %2198 = vst.msk [vmem:[%s3694_s15 + $0x68] sm:$0xf] %vm2171_vm6, %v4690_v33 }
 0x34d   : > { %v1552_v37 = vpop.permute.xlu2 %1551  ;;  %v1550_v50 = vpop.permute.xlu1 %1549 }
 0x34e   : > { %1620 = vst.msk [vmem:[%s3694_s15 + $0x70] sm:$0xf] %vm1591_vm5, %v1552_v37  ;;  %v2668_v13 = vpop.permute.xlu0 %2667 }
 0x34f   : > { %2200 = vst.msk [vmem:[%s3694_s15 + $0x70] sm:$0xf] %vm2171_vm6, %v5189_v58 }
 0x350   : > { %1619 = vst.msk [vmem:[%s3694_s15 + $0x6c] sm:$0xf] %vm1591_vm5, %v1550_v50 }
 0x351   : > { %2199 = vst.msk [vmem:[%s3694_s15 + $0x6c] sm:$0xf] %vm2171_vm6, %v5190_v34 }
 0x352   : > { %2760 = vst.msk [vmem:[%s3694_s15 + $0x10] sm:$0xf] %vm2755_vm7, %v2668_v13 }
 0x355   : > { %v2684_v33 = vpop.permute.xlu2 %2683  ;;  %v2676_v9 = vpop.permute.xlu1 %2675 }
 0x356   : > { %2768 = vst.msk [vmem:[%s3694_s15 + $0x30] sm:$0xf] %vm2755_vm7, %v2684_v33  ;;  %v2674_v43 = vpop.permute.xlu0 %2673 }
 0x357   : > { %2764 = vst.msk [vmem:[%s3694_s15 + $0x20] sm:$0xf] %vm2755_vm7, %v2676_v9 }
 0x358   : > { %2763 = vst.msk [vmem:[%s3694_s15 + $0x1c] sm:$0xf] %vm2755_vm7, %v2674_v43 }
 0x35d   : > { %v2690_v23 = vpop.permute.xlu2 %2689  ;;  %v2682_v30 = vpop.permute.xlu1 %2681 }
 0x35e   : > { %2771 = vst.msk [vmem:[%s3694_s15 + $0x3c] sm:$0xf] %vm2755_vm7, %v2690_v23  ;;  %v1554_v59 = vpop.permute.xlu0 %1553 }
 0x35f   : > { %2767 = vst.msk [vmem:[%s3694_s15 + $0x2c] sm:$0xf] %vm2755_vm7, %v2682_v30 }
 0x360   : > { %1621 = vst.msk [vmem:[%s3694_s15 + $0x74] sm:$0xf] %vm1591_vm5, %v1554_v59 }
 0x361   : > { %2201 = vst.msk [vmem:[%s3694_s15 + $0x74] sm:$0xf] %vm2171_vm6, %v4918_v6 }
 0x365   : > { %v1558_v24 = vpop.permute.xlu2 %1557  ;;  %v1556_v4 = vpop.permute.xlu1 %1555 }
 0x366   : > { %1623 = vst.msk [vmem:[%s3694_s15 + $0x7c] sm:$0xf] %vm1591_vm5, %v1558_v24  ;;  %v2680_v0 = vpop.permute.xlu0 %2679 }
 0x367   : > { %2203 = vst.msk [vmem:[%s3694_s15 + $0x7c] sm:$0xf] %vm2171_vm6, %v2138_v20 }
 0x368   : > { %1622 = vst.msk [vmem:[%s3694_s15 + $0x78] sm:$0xf] %vm1591_vm5, %v1556_v4 }
 0x369   : > { %2202 = vst.msk [vmem:[%s3694_s15 + $0x78] sm:$0xf] %vm2171_vm6, %v4907_v22 }
 0x36a   : > { %2766 = vst.msk [vmem:[%s3694_s15 + $0x28] sm:$0xf] %vm2755_vm7, %v2680_v0 }
 0x36d   : > { %v2696_v2 = vpop.permute.xlu2 %2695  ;;  %v2688_v41 = vpop.permute.xlu1 %2687 }
 0x36e   : > { %2774 = vst.msk [vmem:[%s3694_s15 + $0x48] sm:$0xf] %vm2755_vm7, %v2696_v2  ;;  %v2686_v7 = vpop.permute.xlu0 %2685 }
 0x36f   : > { %2770 = vst.msk [vmem:[%s3694_s15 + $0x38] sm:$0xf] %vm2755_vm7, %v2688_v41 }
 0x370   : > { %2769 = vst.msk [vmem:[%s3694_s15 + $0x34] sm:$0xf] %vm2755_vm7, %v2686_v7 }
 0x375   : > { %v2702_v36 = vpop.permute.xlu2 %2701  ;;  %v2694_v46 = vpop.permute.xlu1 %2693 }
 0x376   : > { %2777 = vst.msk [vmem:[%s3694_s15 + $0x54] sm:$0xf] %vm2755_vm7, %v2702_v36  ;;  %v2692_v38 = vpop.permute.xlu0 %2691 }
 0x377   : > { %2773 = vst.msk [vmem:[%s3694_s15 + $0x44] sm:$0xf] %vm2755_vm7, %v2694_v46 }
 0x378   : > { %2772 = vst.msk [vmem:[%s3694_s15 + $0x40] sm:$0xf] %vm2755_vm7, %v2692_v38 }
 0x37d   : > { %v2708_v48 = vpop.permute.xlu2 %2707  ;;  %v2700_v31 = vpop.permute.xlu1 %2699 }
 0x37e   : > { %2780 = vst.msk [vmem:[%s3694_s15 + $0x60] sm:$0xf] %vm2755_vm7, %v2708_v48  ;;  %v2698_v16 = vpop.permute.xlu0 %2697 }
 0x37f   : > { %2776 = vst.msk [vmem:[%s3694_s15 + $0x50] sm:$0xf] %vm2755_vm7, %v2700_v31 }
 0x380   : > { %2775 = vst.msk [vmem:[%s3694_s15 + $0x4c] sm:$0xf] %vm2755_vm7, %v2698_v16 }
 0x385   : > { %v2714_v40 = vpop.permute.xlu2 %2713  ;;  %v2706_v18 = vpop.permute.xlu1 %2705 }
 0x386   : > { %2783 = vst.msk [vmem:[%s3694_s15 + $0x6c] sm:$0xf] %vm2755_vm7, %v2714_v40  ;;  %v2704_v12 = vpop.permute.xlu0 %2703 }
 0x387   : > { %2779 = vst.msk [vmem:[%s3694_s15 + $0x5c] sm:$0xf] %vm2755_vm7, %v2706_v18 }
 0x388   : > { %2778 = vst.msk [vmem:[%s3694_s15 + $0x58] sm:$0xf] %vm2755_vm7, %v2704_v12 }
 0x38d   : > { %v2720_v42 = vpop.permute.xlu2 %2719  ;;  %v2712_v22 = vpop.permute.xlu1 %2711 }
 0x38e   : > { %2786 = vst.msk [vmem:[%s3694_s15 + $0x78] sm:$0xf] %vm2755_vm7, %v2720_v42  ;;  %v2710_v5 = vpop.permute.xlu0 %2709 }
 0x38f   : > { %2782 = vst.msk [vmem:[%s3694_s15 + $0x68] sm:$0xf] %vm2755_vm7, %v2712_v22 }
 0x390   : > { %2781 = vst.msk [vmem:[%s3694_s15 + $0x64] sm:$0xf] %vm2755_vm7, %v2710_v5 }
 0x395   : > { %v2718_v44 = vpop.permute.xlu1 %2717 }
 0x396   : > { %2785 = vst.msk [vmem:[%s3694_s15 + $0x74] sm:$0xf] %vm2755_vm7, %v2718_v44  ;;  %v2716_v55 = vpop.permute.xlu0 %2715 }
 0x397   : > { %2784 = vst.msk [vmem:[%s3694_s15 + $0x70] sm:$0xf] %vm2755_vm7, %v2716_v55 }
 0x39e   : > { %v2722_v45 = vpop.permute.xlu0 %2721 }
 0x39f   : > { %2787 = vst.msk [vmem:[%s3694_s15 + $0x7c] sm:$0xf] %vm2755_vm7, %v2722_v45 }
 0x3a0 PF: > { %s17_s24 = sadd.s32 1, %s3325_s24  }
 0x3a1   : > { %p14_p4 = scmp.ge.s32.totalorder %s17_s24, 4  }
 0x3a3   :  { %16 = sbr.rel (!%p14_p4) target bundleno = 1 (0x1), region = 87 }

// kernel: decoder_block_v4_forward.9
= control target key start
LH: loop header
LB: loop body
LE: loop exit
PB: predicated region body
PF: predicated region fallthrough
CT: control target
= control target key end

     0   :  { %s2745_s18 = smov 0   ;;  %s3801_s0 = inlined_call_operand.vmem [shape: bf16[512,64], index: 0, kind: input, shape index: {}]   ;;  %s3802_s1 = inlined_call_operand.vmem [shape: bf16[64,32], index: 1, kind: input, shape index: {}]   ;;  %s3803_s2 = inlined_call_operand.vmem [shape: bf16[8,8], index: 2, kind: input, shape index: {}]   ;;  %s3804_s3 = inlined_call_operand.vmem [shape: f32[1,32], index: 3, kind: input, shape index: {}]   ;;  %s3805_s4 = inlined_call_operand.vmem [shape: f32[1,8], index: 4, kind: input, shape index: {}]   ;;  %s3806_s5 = inlined_call_operand.vmem [shape: f32[512,32], index: 5, kind: output, shape index: {}]  }
   0x1 LB: > { %s2369_s19 = sadd.s32 4294967295, %s2707_s18   ;;  %p2373_p0 = scmp.ge.s32.totalorder %s2707_s18, 1  ;;  %s2707_s18 = sphi %s2745_s18, %s15_s18  }
   0x2   : > { %p188_p1 = scmp.lt.s32.totalorder %s2707_s18, 3 }
   0x4   : > { %p189_p2 = pnand %p2373_p0, %p188_p1 }
   0x5   : > { %s2374_s24 = sshll.u32 (!%p189_p2), %s2369_s19, 5  ;;  %s2709_s27 = smov (!%p189_p2), 120  }
   0x6   : > { %192 = sbr.rel (%p189_p2) target bundleno = 1072 (0x430), region = 40  ;;  %p217_p3 = scmp.lt.s32.totalorder (!%p189_p2), %s2374_s24, 63 }
   0x7   : > { %s2710_s22 = smov (!%p189_p2), 104   ;;  %s2711_s26 = smov (!%p189_p2), 112  }
   0x8   : > { %s2713_s8 = smov (!%p189_p2), 24  }
   0xb   : > { %v2659_v0 = vld [vmem:[%s3802_s1 + $0x18] sm:$0xff]  ;;  %v2657_v2 = vld [vmem:[%s3802_s1 + $0x8] sm:$0xff]  ;;  %v2654_v3 = vld [vmem:[%s3802_s1 + $0x10] sm:$0xff]  ;;  %s3808_s24 = smov (!%p217_p3, %s2374_s24), 63  ;;  %vm379_vm0 = vcmask 523264   ;;  %vm617_vm1 = vcmask 1043456  }
   0xc   : > { %v2655_v1 = vld [vmem:[%s3802_s1 + $0x18] sm:$0xff]  ;;  %811 = vrot.lane.b32.xlu0 %v2659_v0, %s2709_s27  ;;  %807 = vrot.lane.b32.xlu1 %v2657_v2, %s2709_s27  ;;  %v2658_v4 = vld [vmem:[%s3802_s1 + $0x10] sm:$0xff]  ;;  %s2375_s9 = sshll.u32 %s3808_s24, 2  ;;  %vm568_vm2 = vcmask 64512   ;;  %s2377_s23 = sshll.u32 %s3808_s24, 3  ;;  %vm1254_vm3 = vcmask 130112  }
   0xd   : > { %432 = vmatpush.bf16.msra.mxu0 %v2655_v1  ;;  %v2653_v5 = vld [vmem:[%s3802_s1 + $0x8] sm:$0xff]  ;;  %v2656_v6 = vld [vmem:[%s3802_s1] sm:$0xff]  ;;  %s2783_s16 = scalar_lea.vmem %s3801_s0, %s2375_s9  ;;  %v2667_v9 = vld [vmem:[%s3802_s1 + $0x18] sm:$0xff]  ;;  %s2974_s30 = scalar_lea.vmem %s3806_s5, %s2377_s23  ;;  %vm1767_vm4 = vcmask 195712   ;;  %vm2280_vm5 = vcmask 261312  }
   0xe   : > { %v2652_v7 = vld [vmem:[%s3802_s1] sm:$0xff]  ;;  %v2798_v11 = vld [vmem:[%s2783_s16 + $0x8] sm:$0xff]  ;;  %v2663_v12 = vld [vmem:[%s3802_s1 + $0x18] sm:$0xff] }
   0xf   : > { %v2786_v8 = vld [vmem:[%s2783_s16] sm:$0xff]  ;;  %v2807_v13 = vld [vmem:[%s2783_s16 + $0x10] sm:$0xff]  ;;  %v2812_v14 = vld [vmem:[%s2783_s16 + $0x18] sm:$0xff] }
  0x10   : > { %v2682_v10 = vld [vmem:[%s3804_s3] ss:$0 sm:$0xff]  ;;  %v2666_v15 = vld [vmem:[%s3802_s1 + $0x10] sm:$0xff]  ;;  %v2830_v18 = vld [vmem:[%s2783_s16 + $0x28] sm:$0xff] }
  0x11   : > { %433 = vmatpush.bf16.msra.mxu0 %v2654_v3  ;;  %817 = vrot.lane.b32.xlu2 %v2682_v10, %s2709_s27  ;;  %v2662_v16 = vld [vmem:[%s3802_s1 + $0x10] sm:$0xff]  ;;  %v2825_v17 = vld [vmem:[%s2783_s16 + $0x20] sm:$0xff]  ;;  %v2665_v20 = vld [vmem:[%s3802_s1 + $0x8] sm:$0xff] }
  0x12   : > { %v2835_v19 = vld [vmem:[%s2783_s16 + $0x30] sm:$0xff]  ;;  %v2661_v21 = vld [vmem:[%s3802_s1 + $0x8] sm:$0xff]  ;;  %v261_v25 = vld [vmem:[%s3803_s2] sm:$0xf] }
  0x13   : > { %v619_v26 = vsel %vm617_vm1, %v261_v25, 0  ;;  %v2664_v27 = vld [vmem:[%s3802_s1] sm:$0xff]  ;;  %v2857_v29 = vld [vmem:[%s2783_s16 + $0x38] sm:$0xff]  ;;  %v2879_v42 = vld [vmem:[%s2783_s16 + $0x48] sm:$0xff] }
  0x14   : > { %809 = vrot.lane.b32.xlu0 %v2658_v4, %s2709_s27  ;;  %805 = vrot.lane.b32.xlu1 %v2656_v6, %s2709_s27  ;;  %v2864_v33 = vld [vmem:[%s2783_s16 + $0x40] sm:$0xff]  ;;  %v2889_v51 = vld [vmem:[%s2783_s16 + $0x50] sm:$0xff] }
  0x15   : > { %434 = vmatpush.bf16.msra.mxu0 %v2653_v5  ;;  %628 = vmatpush.bf16.msra.mxu1 %v619_v26  ;;  %v2869_v35 = vld [vmem:[%s3804_s3] ss:$0 sm:$0xff]  ;;  %v2899_v60 = vld [vmem:[%s2783_s16 + $0x58] sm:$0xff] }
  0x16   : > { %1012 = vmatpush.bf16.msra.mxu3 %v619_v26  ;;  %v2909_v4 = vld [vmem:[%s2783_s16 + $0x60] sm:$0xff] }
  0x19   : > { %435 = vmatpush.bf16.msra.mxu0 %v2652_v7  ;;  %1324 = vrot.lane.b32.xlu2 %v2663_v12, %s2711_s26 }
  0x1a   : > { %1525 = vmatpush.bf16.msrb.mxu3 %v619_v26 }
  0x1c   : > { %2458 = vmatmul.msk.bf16.vlgmr.msra.gmra.mxu0 %vm379_vm0, %v2786_v8  ;;  %1837 = vrot.lane.b32.xlu0 %v2667_v9, %s2710_s22 }
  0x1d   : > { %1322 = vrot.lane.b32.xlu1 %v2662_v16, %s2711_s26  ;;  %v2919_v16 = vld [vmem:[%s2783_s16 + $0x68] sm:$0xff] }
  0x21   : > { %1835 = vrot.lane.b32.xlu2 %v2666_v15, %s2710_s22 }
  0x24   : > { %1320 = vrot.lane.b32.xlu0 %v2661_v21, %s2711_s26  ;;  %v2660_v21 = vld [vmem:[%s3802_s1] sm:$0xff] }
  0x25   : > { %1833 = vrot.lane.b32.xlu1 %v2665_v20, %s2710_s22 }
  0x29   : > { %1318 = vrot.lane.b32.xlu2 %v2660_v21, %s2711_s26 }
  0x2c   : > { %2459 = vmatmul.msk.bf16.gmra.mxu0 %vm379_vm0, %v2798_v11  ;;  %1831 = vrot.lane.b32.xlu0 %v2664_v27, %s2710_s22 }
  0x3c   : > { %2460 = vmatmul.msk.bf16.gmra.mxu0 %vm379_vm0, %v2807_v13 }
  0x4c   : > { %2461 = vmatmul.msk.bf16.gmra.mxu0 %vm379_vm0, %v2812_v14 }
  0x5c   : > { %2462 = vmatmul.msk.bf16.gmra.mxu0 %vm379_vm0, %v2825_v17 }
  0x6b   : > { %v2847_v22 = vpop.permute.xlu2 %817 }
  0x6c   : > { %2463 = vmatmul.msk.bf16.gmra.mxu0 %vm379_vm0, %v2830_v18 }
  0x73   : > { %v1325_v30 = vpop.permute.xlu2 %1324 }
  0x74   : > { %1337 = vmatpush.bf16.msrb.mxu1 %v1325_v30 }
  0x7b   : > { %v1836_v44 = vpop.permute.xlu2 %1835 }
  0x7c   : > { %2464 = vmatmul.msk.bf16.gmra.mxu0 %vm379_vm0, %v2835_v19 }
  0x7e   : > { %v812_v23 = vpop.permute.xlu0 %811  ;;  %v808_v24 = vpop.permute.xlu1 %807 }
  0x7f   : > { %824 = vmatpush.bf16.msra.mxu2 %v812_v23 }
  0x86   : > { %v810_v28 = vpop.permute.xlu0 %809  ;;  %v806_v31 = vpop.permute.xlu1 %805 }
  0x87   : > { %825 = vmatpush.bf16.msra.mxu2 %v810_v28 }
  0x8b   : > { %826 = vmatpush.bf16.msra.mxu2 %v808_v24 }
  0x8c   : > { %2465 = vmatmul.msk.bf16.gmra.mxu0 %vm379_vm0, %v2857_v29 }
  0x8e   : > { %v1838_v32 = vpop.permute.xlu0 %1837 }
  0x8f   : > { %827 = vmatpush.bf16.msra.mxu2 %v806_v31  ;;  %1850 = vmatpush.bf16.msrb.mxu0 %v1838_v32  ;;  %v1323_v58 = vpop.permute.xlu1 %1322  ;;  %v2933_v32 = vld [vmem:[%s2783_s16 + $0x70] sm:$0xff] }
  0x90   : > { %1338 = vmatpush.bf16.msrb.mxu1 %v1323_v58 }
  0x92   : > { %2506 = vmatmul.msk.bf16.vlgmr.msra.gmra.mxu2 %vm379_vm0, %v2786_v8 }
  0x93   : > { %2038 = vmatpush.bf16.msrb.mxu2 %v619_v26  ;;  %1851 = vmatpush.bf16.msrb.mxu0 %v1836_v44  ;;  %v2943_v44 = vld [vmem:[%s2783_s16 + $0x78] sm:$0xff] }
  0x96   : > { %v1321_v25 = vpop.permute.xlu0 %1320 }
  0x97   : > { %v1834_v24 = vpop.permute.xlu1 %1833  ;;  %1339 = vmatpush.bf16.msrb.mxu1 %v1321_v25 }
  0x98   : > { %1852 = vmatpush.bf16.msrb.mxu0 %v1834_v24 }
  0x99   : > { %v437_v34 = vpop.f32.mrf.mxu0 }
  0x9a   : > { %v438_v36 = vadd.f32 %v2869_v35, %v437_v34 }
  0x9c   : > { %2466 = vmatmul.msk.bf16.gmra.mxu0 %vm379_vm0, %v2864_v33  ;;  %v517_v39 = vmax.f32 %v438_v36, 0.0 }
  0x9e   : > { %v1832_v34 = vpop.permute.xlu0 %1831 }
  0x9f   : > { %1853 = vmatpush.bf16.msrb.mxu0 %v1832_v34 }
  0xa1   : > { %v439_v37 = vpop.f32.mrf.mxu0 }
  0xa2   : > { %v440_v38 = vadd.f32 %v2869_v35, %v439_v37  ;;  %2507 = vmatmul.msk.bf16.gmra.mxu2 %vm379_vm0, %v2798_v11 }
  0xa4   : > { %v518_v40 = vmax.f32 %v440_v38, 0.0 }
  0xa6   : > { %v549_v41 = vpack.c.bf16 %v518_v40, %v517_v39 }
  0xa8   : > { %2474 = vmatmul.msk.bf16.vlgmr.msra.gmra.mxu1 %vm568_vm2, %v549_v41 }
  0xa9   : > { %v442_v43 = vpop.f32.mrf.mxu0 }
  0xaa   : > { %v443_v45 = vadd.f32 %v2869_v35, %v442_v43 }
  0xac   : > { %2467 = vmatmul.msk.bf16.gmra.mxu0 %vm379_vm0, %v2879_v42  ;;  %v519_v48 = vmax.f32 %v443_v45, 0.0 }
  0xb1   : > { %v444_v46 = vpop.f32.mrf.mxu0 }
  0xb2   : > { %v445_v47 = vadd.f32 %v2869_v35, %v444_v46  ;;  %2508 = vmatmul.msk.bf16.gmra.mxu2 %vm379_vm0, %v2807_v13 }
  0xb4   : > { %v520_v49 = vmax.f32 %v445_v47, 0.0 }
  0xb6   : > { %v550_v50 = vpack.c.bf16 %v520_v49, %v519_v48 }
  0xb8   : > { %2475 = vmatmul.msk.bf16.gmra.mxu1 %vm568_vm2, %v550_v50 }
  0xb9   : > { %v447_v52 = vpop.f32.mrf.mxu0 }
  0xba   : > { %v448_v53 = vadd.f32 %v2869_v35, %v447_v52 }
  0xbc   : > { %2468 = vmatmul.msk.bf16.gmra.mxu0 %vm379_vm0, %v2889_v51  ;;  %v521_v56 = vmax.f32 %v448_v53, 0.0 }
  0xc1   : > { %v449_v54 = vpop.f32.mrf.mxu0 }
  0xc2   : > { %v450_v55 = vadd.f32 %v2869_v35, %v449_v54  ;;  %2509 = vmatmul.msk.bf16.gmra.mxu2 %vm379_vm0, %v2812_v14 }
  0xc4   : > { %v522_v57 = vmax.f32 %v450_v55, 0.0 }
  0xc6   : > { %v551_v59 = vpack.c.bf16 %v522_v57, %v521_v56 }
  0xc8   : > { %2476 = vmatmul.msk.bf16.gmra.mxu1 %vm568_vm2, %v551_v59 }
  0xc9   : > { %v452_v61 = vpop.f32.mrf.mxu0 }
  0xca   : > { %v453_v62 = vadd.f32 %v2869_v35, %v452_v61 }
  0xcc   : > { %2469 = vmatmul.msk.bf16.gmra.mxu0 %vm379_vm0, %v2899_v60  ;;  %v523_v1 = vmax.f32 %v453_v62, 0.0 }
  0xd1   : > { %v454_v63 = vpop.f32.mrf.mxu0 }
  0xd2   : > { %v455_v0 = vadd.f32 %v2869_v35, %v454_v63  ;;  %2510 = vmatmul.msk.bf16.gmra.mxu2 %vm379_vm0, %v2825_v17 }
  0xd4   : > { %v524_v2 = vmax.f32 %v455_v0, 0.0  ;;  %v2961_v0 = vld [vmem:[%s3805_s4] ss:$0 sm:$0xff] }
  0xd6   : > { %v552_v3 = vpack.c.bf16 %v524_v2, %v523_v1 }
  0xd8   : > { %2477 = vmatmul.msk.bf16.gmra.mxu1 %vm568_vm2, %v552_v3 }
  0xd9   : > { %v457_v5 = vpop.f32.mrf.mxu0 }
  0xda   : > { %v458_v6 = vadd.f32 %v2869_v35, %v457_v5 }
  0xdc   : > { %2470 = vmatmul.msk.bf16.gmra.mxu0 %vm379_vm0, %v2909_v4  ;;  %v525_v10 = vmax.f32 %v458_v6, 0.0  ;;  %v2685_v6 = vld [vmem:[%s3804_s3] ss:$0 sm:$0xff] }
  0xdd   : > { %1843 = vrot.lane.b32.xlu2 %v2685_v6, %s2710_s22 }
  0xe1   : > { %v459_v7 = vpop.f32.mrf.mxu0 }
  0xe2   : > { %v460_v9 = vadd.f32 %v2869_v35, %v459_v7  ;;  %2511 = vmatmul.msk.bf16.gmra.mxu2 %vm379_vm0, %v2830_v18 }
  0xe4   : > { %v526_v12 = vmax.f32 %v460_v9, 0.0 }
  0xe6   : > { %v553_v15 = vpack.c.bf16 %v526_v12, %v525_v10 }
  0xe8   : > { %2478 = vmatmul.msk.bf16.gmra.mxu1 %vm568_vm2, %v553_v15 }
  0xe9   : > { %v462_v20 = vpop.f32.mrf.mxu0 }
  0xea   : > { %v463_v23 = vadd.f32 %v2869_v35, %v462_v20 }
  0xec   : > { %2471 = vmatmul.msk.bf16.gmra.mxu0 %vm379_vm0, %v2919_v16  ;;  %v527_v28 = vmax.f32 %v463_v23, 0.0 }
  0xf1   : > { %v464_v26 = vpop.f32.mrf.mxu0 }
  0xf2   : > { %v465_v27 = vadd.f32 %v2869_v35, %v464_v26  ;;  %2512 = vmatmul.msk.bf16.gmra.mxu2 %vm379_vm0, %v2835_v19 }
  0xf4   : > { %v528_v30 = vmax.f32 %v465_v27, 0.0 }
  0xf6   : > { %v554_v31 = vpack.c.bf16 %v528_v30, %v527_v28 }
  0xf8   : > { %2479 = vmatmul.msk.bf16.gmra.mxu1 %vm568_vm2, %v554_v31 }
  0xf9   : > { %v467_v36 = vpop.f32.mrf.mxu0 }
  0xfa   : > { %v468_v37 = vadd.f32 %v2869_v35, %v467_v36 }
  0xfc   : > { %2472 = vmatmul.msk.bf16.gmra.mxu0 %vm379_vm0, %v2933_v32  ;;  %v529_v40 = vmax.f32 %v468_v37, 0.0 }
 0x101   : > { %v469_v38 = vpop.f32.mrf.mxu0 }
 0x102   : > { %v470_v39 = vadd.f32 %v2869_v35, %v469_v38  ;;  %2513 = vmatmul.msk.bf16.gmra.mxu2 %vm379_vm0, %v2857_v29 }
 0x104   : > { %v530_v41 = vmax.f32 %v470_v39, 0.0 }
 0x106   : > { %v555_v43 = vpack.c.bf16 %v530_v41, %v529_v40 }
 0x108   : > { %2480 = vmatmul.msk.bf16.gmra.mxu1 %vm568_vm2, %v555_v43 }
 0x109   : > { %v472_v45 = vpop.f32.mrf.mxu0 }
 0x10a   : > { %v473_v46 = vadd.f32 %v2869_v35, %v472_v45 }
 0x10c   : > { %2473 = vmatmul.msk.bf16.gmra.mxu0 %vm379_vm0, %v2943_v44  ;;  %v531_v49 = vmax.f32 %v473_v46, 0.0 }
 0x111   : > { %v474_v47 = vpop.f32.mrf.mxu0 }
 0x112   : > { %v475_v48 = vadd.f32 %v2869_v35, %v474_v47  ;;  %2514 = vmatmul.msk.bf16.gmra.mxu2 %vm379_vm0, %v2864_v33 }
 0x114   : > { %v532_v50 = vmax.f32 %v475_v48, 0.0 }
 0x115   : > { %v829_v52 = vpop.f32.mrf.mxu2 }
 0x116   : > { %v556_v53 = vpack.c.bf16 %v532_v50, %v531_v49  ;;  %v830_v55 = vadd.f32 %v829_v52, %v2847_v22 }
 0x118   : > { %2481 = vmatmul.msk.bf16.gmra.mxu1 %vm568_vm2, %v556_v53  ;;  %v909_v57 = vmax.f32 %v830_v55, 0.0 }
 0x119   : > { %v477_v54 = vpop.f32.mrf.mxu0 }
 0x11a   : > { %v478_v59 = vadd.f32 %v2869_v35, %v477_v54 }
 0x11c   : > { %2602 = vmatmul.msk.bf16.vlgmr.msrb.gmra.mxu0 %vm379_vm0, %v2786_v8  ;;  %v533_v2 = vmax.f32 %v478_v59, 0.0 }
 0x11d   : > { %v831_v56 = vpop.f32.mrf.mxu2 }
 0x11e   : > { %v832_v58 = vadd.f32 %v831_v56, %v2847_v22 }
 0x120   : > { %v910_v61 = vmax.f32 %v832_v58, 0.0 }
 0x121   : > { %v479_v62 = vpop.f32.mrf.mxu0 }
 0x122   : > { %v480_v63 = vadd.f32 %v2869_v35, %v479_v62  ;;  %2515 = vmatmul.msk.bf16.gmra.mxu2 %vm379_vm0, %v2879_v42  ;;  %v941_v1 = vpack.c.bf16 %v910_v61, %v909_v57 }
 0x124   : > { %v534_v3 = vmax.f32 %v480_v63, 0.0  ;;  %2522 = vmatmul.msk.bf16.vlgmr.msra.gmra.mxu3 %vm568_vm2, %v941_v1 }
 0x125   : > { %v630_v5 = vpop.f32.mrf.mxu1  ;;  %v834_v9 = vpop.f32.mrf.mxu2 }
 0x126   : > { %v631_v7 = vadd.f32 %v2961_v0, %v630_v5  ;;  %v557_v10 = vpack.c.bf16 %v534_v3, %v533_v2  ;;  %v835_v20 = vadd.f32 %v834_v9, %v2847_v22 }
 0x128   : > { %v710_v12 = vmax.f32 %v631_v7, 0.0  ;;  %2482 = vmatmul.msk.bf16.gmra.mxu1 %vm568_vm2, %v557_v10  ;;  %v911_v25 = vmax.f32 %v835_v20, 0.0  ;;  %v1319_v7 = vpop.permute.xlu2 %1318 }
 0x129   : > { %v482_v15 = vpop.f32.mrf.mxu0  ;;  %1340 = vmatpush.bf16.msrb.mxu1 %v1319_v7 }
 0x12a   : > { %742 = vst.msk [vmem:[%s2974_s30] sm:$0xff] %vm568_vm2, %v710_v12  ;;  %v483_v27 = vadd.f32 %v2869_v35, %v482_v15 }
 0x12c   : > { %2603 = vmatmul.msk.bf16.gmra.mxu0 %vm379_vm0, %v2798_v11  ;;  %v535_v37 = vmax.f32 %v483_v27, 0.0 }
 0x12d   : > { %v632_v21 = vpop.f32.mrf.mxu1  ;;  %v836_v24 = vpop.f32.mrf.mxu2 }
 0x12e   : > { %v633_v23 = vadd.f32 %v2961_v0, %v632_v21  ;;  %v837_v26 = vadd.f32 %v836_v24, %v2847_v22 }
 0x130   : > { %v711_v28 = vmax.f32 %v633_v23, 0.0  ;;  %v912_v30 = vmax.f32 %v837_v26, 0.0 }
 0x131   : > { %v484_v31 = vpop.f32.mrf.mxu0 }
 0x132   : > { %743 = vst.msk [vmem:[%s2974_s30 + $0x8] sm:$0xff] %vm568_vm2, %v711_v28  ;;  %v485_v34 = vadd.f32 %v2869_v35, %v484_v31  ;;  %2516 = vmatmul.msk.bf16.gmra.mxu2 %vm379_vm0, %v2889_v51  ;;  %v942_v36 = vpack.c.bf16 %v912_v30, %v911_v25 }
 0x134   : > { %v536_v38 = vmax.f32 %v485_v34, 0.0  ;;  %2523 = vmatmul.msk.bf16.gmra.mxu3 %vm568_vm2, %v942_v36 }
 0x135   : > { %v635_v39 = vpop.f32.mrf.mxu1  ;;  %v839_v41 = vpop.f32.mrf.mxu2 }
 0x136   : > { %v636_v40 = vadd.f32 %v2961_v0, %v635_v39  ;;  %v558_v43 = vpack.c.bf16 %v536_v38, %v535_v37  ;;  %v840_v47 = vadd.f32 %v839_v41, %v2847_v22 }
 0x138   : > { %v712_v45 = vmax.f32 %v636_v40, 0.0  ;;  %2483 = vmatmul.msk.bf16.gmra.mxu1 %vm568_vm2, %v558_v43  ;;  %v913_v55 = vmax.f32 %v840_v47, 0.0 }
 0x139   : > { %v487_v46 = vpop.f32.mrf.mxu0 }
 0x13a   : > { %744 = vst.msk [vmem:[%s2974_s30 + $0x10] sm:$0xff] %vm568_vm2, %v712_v45  ;;  %v488_v53 = vadd.f32 %v2869_v35, %v487_v46 }
 0x13c   : > { %2604 = vmatmul.msk.bf16.gmra.mxu0 %vm379_vm0, %v2807_v13  ;;  %v537_v61 = vmax.f32 %v488_v53, 0.0 }
 0x13d   : > { %v637_v48 = vpop.f32.mrf.mxu1  ;;  %v841_v50 = vpop.f32.mrf.mxu2 }
 0x13e   : > { %v638_v49 = vadd.f32 %v2961_v0, %v637_v48  ;;  %v842_v52 = vadd.f32 %v841_v50, %v2847_v22 }
 0x140   : > { %v713_v54 = vmax.f32 %v638_v49, 0.0  ;;  %v914_v56 = vmax.f32 %v842_v52, 0.0 }
 0x141   : > { %v489_v57 = vpop.f32.mrf.mxu0 }
 0x142   : > { %745 = vst.msk [vmem:[%s2974_s30 + $0x18] sm:$0xff] %vm568_vm2, %v713_v54  ;;  %v490_v58 = vadd.f32 %v2869_v35, %v489_v57  ;;  %2517 = vmatmul.msk.bf16.gmra.mxu2 %vm379_vm0, %v2899_v60  ;;  %v943_v59 = vpack.c.bf16 %v914_v56, %v913_v55 }
 0x144   : > { %v538_v62 = vmax.f32 %v490_v58, 0.0  ;;  %2524 = vmatmul.msk.bf16.gmra.mxu3 %vm568_vm2, %v943_v59 }
 0x145   : > { %v640_v63 = vpop.f32.mrf.mxu1  ;;  %v844_v2 = vpop.f32.mrf.mxu2 }
 0x146   : > { %v641_v1 = vadd.f32 %v2961_v0, %v640_v63  ;;  %v559_v3 = vpack.c.bf16 %v538_v62, %v537_v61  ;;  %v845_v9 = vadd.f32 %v844_v2, %v2847_v22 }
 0x148   : > { %v714_v5 = vmax.f32 %v641_v1, 0.0  ;;  %2484 = vmatmul.msk.bf16.gmra.mxu1 %vm568_vm2, %v559_v3  ;;  %v915_v24 = vmax.f32 %v845_v9, 0.0 }
 0x149   : > { %v492_v6 = vpop.f32.mrf.mxu0 }
 0x14a   : > { %746 = vst.msk [vmem:[%s2974_s30 + $0x20] sm:$0xff] %vm568_vm2, %v714_v5  ;;  %v493_v21 = vadd.f32 %v2869_v35, %v492_v6 }
 0x14c   : > { %2605 = vmatmul.msk.bf16.gmra.mxu0 %vm379_vm0, %v2812_v14  ;;  %v539_v30 = vmax.f32 %v493_v21, 0.0 }
 0x14d   : > { %v642_v10 = vpop.f32.mrf.mxu1  ;;  %v846_v15 = vpop.f32.mrf.mxu2 }
 0x14e   : > { %v643_v12 = vadd.f32 %v2961_v0, %v642_v10  ;;  %v847_v20 = vadd.f32 %v846_v15, %v2847_v22 }
 0x150   : > { %v715_v23 = vmax.f32 %v643_v12, 0.0  ;;  %v916_v25 = vmax.f32 %v847_v20, 0.0 }
 0x151   : > { %v494_v26 = vpop.f32.mrf.mxu0 }
 0x152   : > { %747 = vst.msk [vmem:[%s2974_s30 + $0x28] sm:$0xff] %vm568_vm2, %v715_v23  ;;  %v495_v27 = vadd.f32 %v2869_v35, %v494_v26  ;;  %2518 = vmatmul.msk.bf16.gmra.mxu2 %vm379_vm0, %v2909_v4  ;;  %v944_v28 = vpack.c.bf16 %v916_v25, %v915_v24 }
 0x154   : > { %v540_v31 = vmax.f32 %v495_v27, 0.0  ;;  %2525 = vmatmul.msk.bf16.gmra.mxu3 %vm568_vm2, %v944_v28 }
 0x155   : > { %v645_v34 = vpop.f32.mrf.mxu1  ;;  %v849_v37 = vpop.f32.mrf.mxu2 }
 0x156   : > { %v646_v36 = vadd.f32 %v2961_v0, %v645_v34  ;;  %v560_v38 = vpack.c.bf16 %v540_v31, %v539_v30  ;;  %v850_v41 = vadd.f32 %v849_v37, %v2847_v22 }
 0x158   : > { %v716_v39 = vmax.f32 %v646_v36, 0.0  ;;  %2485 = vmatmul.msk.bf16.gmra.mxu1 %vm568_vm2, %v560_v38  ;;  %v917_v50 = vmax.f32 %v850_v41, 0.0 }
 0x159   : > { %v497_v40 = vpop.f32.mrf.mxu0 }
 0x15a   : > { %748 = vst.msk [vmem:[%s2974_s30 + $0x30] sm:$0xff] %vm568_vm2, %v716_v39  ;;  %v498_v48 = vadd.f32 %v2869_v35, %v497_v40 }
 0x15c   : > { %2606 = vmatmul.msk.bf16.gmra.mxu0 %vm379_vm0, %v2825_v17  ;;  %v541_v55 = vmax.f32 %v498_v48, 0.0 }
 0x15d   : > { %v647_v43 = vpop.f32.mrf.mxu1  ;;  %v851_v46 = vpop.f32.mrf.mxu2 }
 0x15e   : > { %v648_v45 = vadd.f32 %v2961_v0, %v647_v43  ;;  %v852_v47 = vadd.f32 %v851_v46, %v2847_v22 }
 0x160   : > { %v717_v49 = vmax.f32 %v648_v45, 0.0  ;;  %v918_v52 = vmax.f32 %v852_v47, 0.0 }
 0x161   : > { %v499_v53 = vpop.f32.mrf.mxu0 }
 0x162   : > { %749 = vst.msk [vmem:[%s2974_s30 + $0x38] sm:$0xff] %vm568_vm2, %v717_v49  ;;  %v500_v54 = vadd.f32 %v2869_v35, %v499_v53  ;;  %2519 = vmatmul.msk.bf16.gmra.mxu2 %vm379_vm0, %v2919_v16  ;;  %v945_v17 = vpack.c.bf16 %v918_v52, %v917_v50 }
 0x164   : > { %v542_v56 = vmax.f32 %v500_v54, 0.0  ;;  %2526 = vmatmul.msk.bf16.gmra.mxu3 %vm568_vm2, %v945_v17 }
 0x165   : > { %v650_v57 = vpop.f32.mrf.mxu1  ;;  %v854_v61 = vpop.f32.mrf.mxu2 }
 0x166   : > { %v561_v58 = vpack.c.bf16 %v542_v56, %v541_v55  ;;  %v651_v59 = vadd.f32 %v2961_v0, %v650_v57  ;;  %v855_v1 = vadd.f32 %v854_v61, %v2847_v22  ;;  %v2686_v55 = vld [vmem:[%s3804_s3] ss:$0 sm:$0xff] }
 0x167   : > { %1330 = vrot.lane.b32.xlu1 %v2686_v55, %s2711_s26  ;;  %s2712_s26 = smov 8  }
 0x168   : > { %v718_v62 = vmax.f32 %v651_v59, 0.0  ;;  %2486 = vmatmul.msk.bf16.gmra.mxu1 %vm568_vm2, %v561_v58  ;;  %v919_v10 = vmax.f32 %v855_v1, 0.0 }
 0x169   : > { %v502_v63 = vpop.f32.mrf.mxu0 }
 0x16a   : > { %750 = vst.msk [vmem:[%s2974_s30 + $0x40] sm:$0xff] %vm568_vm2, %v718_v62  ;;  %v503_v7 = vadd.f32 %v2869_v35, %v502_v63 }
 0x16c   : > { %2607 = vmatmul.msk.bf16.gmra.mxu0 %vm379_vm0, %v2830_v18  ;;  %v543_v21 = vmax.f32 %v503_v7, 0.0 }
 0x16d   : > { %v652_v2 = vpop.f32.mrf.mxu1  ;;  %v856_v5 = vpop.f32.mrf.mxu2 }
 0x16e   : > { %v653_v3 = vadd.f32 %v2961_v0, %v652_v2  ;;  %v857_v6 = vadd.f32 %v856_v5, %v2847_v22 }
 0x170   : > { %v719_v9 = vmax.f32 %v653_v3, 0.0  ;;  %v920_v12 = vmax.f32 %v857_v6, 0.0 }
 0x171   : > { %v504_v15 = vpop.f32.mrf.mxu0 }
 0x172   : > { %751 = vst.msk [vmem:[%s2974_s30 + $0x48] sm:$0xff] %vm568_vm2, %v719_v9  ;;  %v505_v20 = vadd.f32 %v2869_v35, %v504_v15  ;;  %2520 = vmatmul.msk.bf16.gmra.mxu2 %vm379_vm0, %v2933_v32  ;;  %v946_v18 = vpack.c.bf16 %v920_v12, %v919_v10 }
 0x174   : > { %v544_v23 = vmax.f32 %v505_v20, 0.0  ;;  %2527 = vmatmul.msk.bf16.gmra.mxu3 %vm568_vm2, %v946_v18 }
 0x175   : > { %v655_v24 = vpop.f32.mrf.mxu1  ;;  %v859_v27 = vpop.f32.mrf.mxu2 }
 0x176   : > { %v562_v25 = vpack.c.bf16 %v544_v23, %v543_v21  ;;  %v656_v26 = vadd.f32 %v2961_v0, %v655_v24  ;;  %v860_v31 = vadd.f32 %v859_v27, %v2847_v22  ;;  %v3094_v21 = vpop.permute.xlu2 %1843 }
 0x178   : > { %v720_v28 = vmax.f32 %v656_v26, 0.0  ;;  %2487 = vmatmul.msk.bf16.gmra.mxu1 %vm568_vm2, %v562_v25  ;;  %v921_v41 = vmax.f32 %v860_v31, 0.0 }
 0x179   : > { %v507_v30 = vpop.f32.mrf.mxu0 }
 0x17a   : > { %752 = vst.msk [vmem:[%s2974_s30 + $0x50] sm:$0xff] %vm568_vm2, %v720_v28  ;;  %v508_v39 = vadd.f32 %v2869_v35, %v507_v30 }
 0x17c   : > { %2608 = vmatmul.msk.bf16.gmra.mxu0 %vm379_vm0, %v2835_v19  ;;  %v545_v47 = vmax.f32 %v508_v39, 0.0 }
 0x17d   : > { %v657_v34 = vpop.f32.mrf.mxu1  ;;  %v861_v37 = vpop.f32.mrf.mxu2 }
 0x17e   : > { %v658_v36 = vadd.f32 %v2961_v0, %v657_v34  ;;  %v862_v38 = vadd.f32 %v861_v37, %v2847_v22 }
 0x180   : > { %v721_v40 = vmax.f32 %v658_v36, 0.0  ;;  %v922_v43 = vmax.f32 %v862_v38, 0.0 }
 0x181   : > { %v509_v45 = vpop.f32.mrf.mxu0 }
 0x182   : > { %753 = vst.msk [vmem:[%s2974_s30 + $0x58] sm:$0xff] %vm568_vm2, %v721_v40  ;;  %v510_v46 = vadd.f32 %v2869_v35, %v509_v45  ;;  %2521 = vmatmul.msk.bf16.gmra.mxu2 %vm379_vm0, %v2943_v44  ;;  %v947_v19 = vpack.c.bf16 %v922_v43, %v921_v41 }
 0x184   : > { %v546_v48 = vmax.f32 %v510_v46, 0.0  ;;  %2528 = vmatmul.msk.bf16.gmra.mxu3 %vm568_vm2, %v947_v19 }
 0x185   : > { %v660_v49 = vpop.f32.mrf.mxu1  ;;  %v864_v53 = vpop.f32.mrf.mxu2 }
 0x186   : > { %v563_v50 = vpack.c.bf16 %v546_v48, %v545_v47  ;;  %v661_v52 = vadd.f32 %v2961_v0, %v660_v49  ;;  %v865_v56 = vadd.f32 %v864_v53, %v2847_v22 }
 0x188   : > { %v722_v54 = vmax.f32 %v661_v52, 0.0  ;;  %2488 = vmatmul.msk.bf16.gmra.mxu1 %vm568_vm2, %v563_v50  ;;  %v923_v1 = vmax.f32 %v865_v56, 0.0 }
 0x189   : > { %v512_v17 = vpop.f32.mrf.mxu0 }
 0x18a   : > { %754 = vst.msk [vmem:[%s2974_s30 + $0x60] sm:$0xff] %vm568_vm2, %v722_v54  ;;  %v513_v62 = vadd.f32 %v2869_v35, %v512_v17 }
 0x18c   : > { %2609 = vmatmul.msk.bf16.gmra.mxu0 %vm379_vm0, %v2857_v29  ;;  %v547_v6 = vmax.f32 %v513_v62, 0.0 }
 0x18d   : > { %v662_v57 = vpop.f32.mrf.mxu1  ;;  %v866_v59 = vpop.f32.mrf.mxu2 }
 0x18e   : > { %v663_v58 = vadd.f32 %v2961_v0, %v662_v57  ;;  %v867_v61 = vadd.f32 %v866_v59, %v2847_v22 }
 0x190   : > { %v723_v63 = vmax.f32 %v663_v58, 0.0  ;;  %v924_v2 = vmax.f32 %v867_v61, 0.0 }
 0x191   : > { %v514_v3 = vpop.f32.mrf.mxu0 }
 0x192   : > { %755 = vst.msk [vmem:[%s2974_s30 + $0x68] sm:$0xff] %vm568_vm2, %v723_v63  ;;  %v515_v29 = vadd.f32 %v2869_v35, %v514_v3  ;;  %v948_v5 = vpack.c.bf16 %v924_v2, %v923_v1 }
 0x194   : > { %v548_v7 = vmax.f32 %v515_v29, 0.0  ;;  %2529 = vmatmul.msk.bf16.gmra.mxu3 %vm568_vm2, %v948_v5 }
 0x195   : > { %v665_v9 = vpop.f32.mrf.mxu1  ;;  %v869_v15 = vpop.f32.mrf.mxu2 }
 0x196   : > { %v564_v10 = vpack.c.bf16 %v548_v7, %v547_v6  ;;  %v666_v12 = vadd.f32 %v2961_v0, %v665_v9  ;;  %v870_v35 = vadd.f32 %v869_v15, %v2847_v22 }
 0x198   : > { %v724_v20 = vmax.f32 %v666_v12, 0.0  ;;  %2489 = vmatmul.msk.bf16.gmra.mxu1 %vm568_vm2, %v564_v10  ;;  %v925_v30 = vmax.f32 %v870_v35, 0.0 }
 0x199   : > { %v1855_v18 = vpop.f32.mrf.mxu0 }
 0x19a   : > { %756 = vst.msk [vmem:[%s2974_s30 + $0x70] sm:$0xff] %vm568_vm2, %v724_v20  ;;  %v1856_v26 = vadd.f32 %v1855_v18, %v3094_v21 }
 0x19c   : > { %2610 = vmatmul.msk.bf16.gmra.mxu0 %vm379_vm0, %v2864_v33  ;;  %v1935_v33 = vmax.f32 %v1856_v26, 0.0 }
 0x19d   : > { %v667_v23 = vpop.f32.mrf.mxu1  ;;  %v871_v25 = vpop.f32.mrf.mxu2 }
 0x19e   : > { %v668_v24 = vadd.f32 %v2961_v0, %v667_v23  ;;  %v872_v27 = vadd.f32 %v871_v25, %v2847_v22 }
 0x1a0   : > { %v725_v28 = vmax.f32 %v668_v24, 0.0  ;;  %v926_v31 = vmax.f32 %v872_v27, 0.0 }
 0x1a1   : > { %v1857_v34 = vpop.f32.mrf.mxu0 }
 0x1a2   : > { %757 = vst.msk [vmem:[%s2974_s30 + $0x78] sm:$0xff] %vm568_vm2, %v725_v28  ;;  %v1858_v36 = vadd.f32 %v1857_v34, %v3094_v21  ;;  %v949_v37 = vpack.c.bf16 %v926_v31, %v925_v30 }
 0x1a4   : > { %v1936_v38 = vmax.f32 %v1858_v36, 0.0  ;;  %2530 = vmatmul.msk.bf16.gmra.mxu3 %vm568_vm2, %v949_v37 }
 0x1a5   : > { %v670_v39 = vpop.f32.mrf.mxu1  ;;  %v874_v43 = vpop.f32.mrf.mxu2 }
 0x1a6   : > { %v1967_v40 = vpack.c.bf16 %v1936_v38, %v1935_v33  ;;  %v671_v41 = vadd.f32 %v2961_v0, %v670_v39  ;;  %v875_v49 = vadd.f32 %v874_v43, %v2847_v22 }
 0x1a7   : > { %v1014_v46 = vpop.f32.mrf.mxu3 }
 0x1a8   : > { %v726_v45 = vmax.f32 %v671_v41, 0.0  ;;  %2554 = vmatmul.msk.bf16.vlgmr.msrb.gmra.mxu1 %vm379_vm0, %v2786_v8  ;;  %2618 = vmatmul.msk.bf16.vlgmr.msrb.gmra.mxu2 %vm568_vm2, %v1967_v40  ;;  %v1015_v19 = vadd.f32 %v2961_v0, %v1014_v46  ;;  %v927_v56 = vmax.f32 %v875_v49, 0.0 }
 0x1a9   : > { %v1860_v47 = vpop.f32.mrf.mxu0 }
 0x1aa   : > { %758 = vst.msk [vmem:[%s2974_s30 + $0x80] sm:$0xff] %vm568_vm2, %v726_v45  ;;  %v1094_v48 = vmax.f32 %v1015_v19, 0.0  ;;  %v1861_v8 = vadd.f32 %v1860_v47, %v3094_v21 }
 0x1ac   : > { %2611 = vmatmul.msk.bf16.gmra.mxu0 %vm379_vm0, %v2879_v42  ;;  %1158 = vrot.lane.b32.xlu0 %v1094_v48, %s2712_s26  ;;  %v1937_v59 = vmax.f32 %v1861_v8, 0.0 }
 0x1ad   : > { %v672_v50 = vpop.f32.mrf.mxu1  ;;  %v876_v53 = vpop.f32.mrf.mxu2 }
 0x1ae   : > { %v673_v52 = vadd.f32 %v2961_v0, %v672_v50  ;;  %v877_v54 = vadd.f32 %v876_v53, %v2847_v22 }
 0x1af   : > { %v1016_v55 = vpop.f32.mrf.mxu3 }
 0x1b0   : > { %v727_v17 = vmax.f32 %v673_v52, 0.0  ;;  %v928_v57 = vmax.f32 %v877_v54, 0.0  ;;  %v1017_v42 = vadd.f32 %v2961_v0, %v1016_v55 }
 0x1b1   : > { %v1862_v58 = vpop.f32.mrf.mxu0 }
 0x1b2   : > { %759 = vst.msk [vmem:[%s2974_s30 + $0x88] sm:$0xff] %vm568_vm2, %v727_v17  ;;  %v1863_v61 = vadd.f32 %v1862_v58, %v3094_v21  ;;  %v1095_v62 = vmax.f32 %v1017_v42, 0.0  ;;  %v950_v63 = vpack.c.bf16 %v928_v57, %v927_v56 }
 0x1b4   : > { %v1938_v1 = vmax.f32 %v1863_v61, 0.0  ;;  %2531 = vmatmul.msk.bf16.gmra.mxu3 %vm568_vm2, %v950_v63  ;;  %1160 = vrot.lane.b32.xlu1 %v1095_v62, %s2712_s26 }
 0x1b5   : > { %v675_v2 = vpop.f32.mrf.mxu1  ;;  %v879_v5 = vpop.f32.mrf.mxu2 }
 0x1b6   : > { %v1968_v3 = vpack.c.bf16 %v1938_v1, %v1937_v59  ;;  %v676_v29 = vadd.f32 %v2961_v0, %v675_v2  ;;  %v880_v15 = vadd.f32 %v879_v5, %v2847_v22 }
 0x1b7   : > { %v1019_v7 = vpop.f32.mrf.mxu3 }
 0x1b8   : > { %v728_v6 = vmax.f32 %v676_v29, 0.0  ;;  %2555 = vmatmul.msk.bf16.gmra.mxu1 %vm379_vm0, %v2798_v11  ;;  %2619 = vmatmul.msk.bf16.gmra.mxu2 %vm568_vm2, %v1968_v3  ;;  %v1020_v9 = vadd.f32 %v2961_v0, %v1019_v7  ;;  %v929_v26 = vmax.f32 %v880_v15, 0.0 }
 0x1b9   : > { %v1865_v10 = vpop.f32.mrf.mxu0 }
 0x1ba   : > { %760 = vst.msk [vmem:[%s2974_s30 + $0x90] sm:$0xff] %vm568_vm2, %v728_v6  ;;  %v1096_v12 = vmax.f32 %v1020_v9, 0.0  ;;  %v1866_v18 = vadd.f32 %v1865_v10, %v3094_v21 }
 0x1bc   : > { %2612 = vmatmul.msk.bf16.gmra.mxu0 %vm379_vm0, %v2889_v51  ;;  %1162 = vrot.lane.b32.xlu2 %v1096_v12, %s2712_s26  ;;  %v1939_v51 = vmax.f32 %v1866_v18, 0.0 }
 0x1bd   : > { %v677_v20 = vpop.f32.mrf.mxu1  ;;  %v881_v35 = vpop.f32.mrf.mxu2 }
 0x1be   : > { %v678_v11 = vadd.f32 %v2961_v0, %v677_v20  ;;  %v882_v23 = vadd.f32 %v881_v35, %v2847_v22 }
 0x1bf   : > { %v1021_v25 = vpop.f32.mrf.mxu3 }
 0x1c0   : > { %v729_v24 = vmax.f32 %v678_v11, 0.0  ;;  %v930_v27 = vmax.f32 %v882_v23, 0.0  ;;  %v1022_v28 = vadd.f32 %v2961_v0, %v1021_v25 }
 0x1c1   : > { %v1867_v30 = vpop.f32.mrf.mxu0 }
 0x1c2   : > { %761 = vst.msk [vmem:[%s2974_s30 + $0x98] sm:$0xff] %vm568_vm2, %v729_v24  ;;  %v1868_v31 = vadd.f32 %v1867_v30, %v3094_v21  ;;  %v1097_v34 = vmax.f32 %v1022_v28, 0.0  ;;  %v951_v36 = vpack.c.bf16 %v930_v27, %v929_v26 }
 0x1c4   : > { %v1940_v33 = vmax.f32 %v1868_v31, 0.0  ;;  %2532 = vmatmul.msk.bf16.gmra.mxu3 %vm568_vm2, %v951_v36  ;;  %1164 = vrot.lane.b32.xlu0 %v1097_v34, %s2712_s26 }
 0x1c5   : > { %v680_v37 = vpop.f32.mrf.mxu1  ;;  %v884_v40 = vpop.f32.mrf.mxu2 }
 0x1c6   : > { %v1969_v38 = vpack.c.bf16 %v1940_v33, %v1939_v51  ;;  %v681_v39 = vadd.f32 %v2961_v0, %v680_v37  ;;  %v885_v47 = vadd.f32 %v884_v40, %v2847_v22  ;;  %v2687_v37 = vld [vmem:[%s2783_s16 + $0x20] sm:$0xff] }
 0x1c7   : > { %v1024_v43 = vpop.f32.mrf.mxu3 }
 0x1c8   : > { %v730_v41 = vmax.f32 %v681_v39, 0.0  ;;  %2556 = vmatmul.msk.bf16.gmra.mxu1 %vm379_vm0, %v2807_v13  ;;  %2620 = vmatmul.msk.bf16.gmra.mxu2 %vm568_vm2, %v1969_v38  ;;  %v1025_v45 = vadd.f32 %v2961_v0, %v1024_v43  ;;  %v931_v54 = vmax.f32 %v885_v47, 0.0 }
 0x1c9   : > { %v1870_v46 = vpop.f32.mrf.mxu0 }
 0x1ca   : > { %762 = vst.msk [vmem:[%s2974_s30 + $0xa0] sm:$0xff] %vm568_vm2, %v730_v41  ;;  %v1098_v19 = vmax.f32 %v1025_v45, 0.0  ;;  %v1871_v49 = vadd.f32 %v1870_v46, %v3094_v21 }
 0x1cc   : > { %2613 = vmatmul.msk.bf16.gmra.mxu0 %vm379_vm0, %v2899_v60  ;;  %1166 = vrot.lane.b32.xlu1 %v1098_v19, %s2712_s26  ;;  %v1941_v60 = vmax.f32 %v1871_v49, 0.0 }
 0x1cd   : > { %v682_v48 = vpop.f32.mrf.mxu1  ;;  %v886_v50 = vpop.f32.mrf.mxu2 }
 0x1ce   : > { %v683_v13 = vadd.f32 %v2961_v0, %v682_v48  ;;  %v887_v8 = vadd.f32 %v886_v50, %v2847_v22 }
 0x1cf   : > { %v1026_v53 = vpop.f32.mrf.mxu3 }
 0x1d0   : > { %v731_v52 = vmax.f32 %v683_v13, 0.0  ;;  %v932_v17 = vmax.f32 %v887_v8, 0.0  ;;  %v1027_v55 = vadd.f32 %v2961_v0, %v1026_v53 }
 0x1d1   : > { %v1872_v56 = vpop.f32.mrf.mxu0 }
 0x1d2   : > { %763 = vst.msk [vmem:[%s2974_s30 + $0xa8] sm:$0xff] %vm568_vm2, %v731_v52  ;;  %v1873_v57 = vadd.f32 %v1872_v56, %v3094_v21  ;;  %v1099_v42 = vmax.f32 %v1027_v55, 0.0  ;;  %v952_v58 = vpack.c.bf16 %v932_v17, %v931_v54 }
 0x1d4   : > { %v1942_v59 = vmax.f32 %v1873_v57, 0.0  ;;  %2533 = vmatmul.msk.bf16.gmra.mxu3 %vm568_vm2, %v952_v58  ;;  %1168 = vrot.lane.b32.xlu2 %v1099_v42, %s2712_s26 }
 0x1d5   : > { %v685_v61 = vpop.f32.mrf.mxu1  ;;  %v889_v1 = vpop.f32.mrf.mxu2 }
 0x1d6   : > { %v1970_v62 = vpack.c.bf16 %v1942_v59, %v1941_v60  ;;  %v686_v63 = vadd.f32 %v2961_v0, %v685_v61  ;;  %v890_v7 = vadd.f32 %v889_v1, %v2847_v22  ;;  %v2688_v61 = vld [vmem:[%s2783_s16 + $0x28] sm:$0xff] }
 0x1d7   : > { %v1029_v3 = vpop.f32.mrf.mxu3 }
 0x1d8   : > { %v732_v2 = vmax.f32 %v686_v63, 0.0  ;;  %2557 = vmatmul.msk.bf16.gmra.mxu1 %vm379_vm0, %v2812_v14  ;;  %2621 = vmatmul.msk.bf16.gmra.mxu2 %vm568_vm2, %v1970_v62  ;;  %v1030_v29 = vadd.f32 %v2961_v0, %v1029_v3  ;;  %v933_v11 = vmax.f32 %v890_v7, 0.0 }
 0x1d9   : > { %v1875_v5 = vpop.f32.mrf.mxu0 }
 0x1da   : > { %764 = vst.msk [vmem:[%s2974_s30 + $0xb0] sm:$0xff] %vm568_vm2, %v732_v2  ;;  %v1100_v6 = vmax.f32 %v1030_v29, 0.0  ;;  %v1876_v10 = vadd.f32 %v1875_v5, %v3094_v21 }
 0x1dc   : > { %2614 = vmatmul.msk.bf16.gmra.mxu0 %vm379_vm0, %v2909_v4  ;;  %1170 = vrot.lane.b32.xlu0 %v1100_v6, %s2712_s26  ;;  %v1943_v24 = vmax.f32 %v1876_v10, 0.0 }
 0x1dd   : > { %v687_v9 = vpop.f32.mrf.mxu1  ;;  %v891_v12 = vpop.f32.mrf.mxu2 }
 0x1de   : > { %v688_v14 = vadd.f32 %v2961_v0, %v687_v9  ;;  %v892_v15 = vadd.f32 %v891_v12, %v2847_v22 }
 0x1df   : > { %v1031_v18 = vpop.f32.mrf.mxu3 }
 0x1e0   : > { %v733_v20 = vmax.f32 %v688_v14, 0.0  ;;  %v934_v35 = vmax.f32 %v892_v15, 0.0  ;;  %v1032_v23 = vadd.f32 %v2961_v0, %v1031_v18 }
 0x1e1   : > { %v1877_v4 = vpop.f32.mrf.mxu0 }
 0x1e2   : > { %765 = vst.msk [vmem:[%s2974_s30 + $0xb8] sm:$0xff] %vm568_vm2, %v733_v20  ;;  %v1878_v25 = vadd.f32 %v1877_v4, %v3094_v21  ;;  %v953_v26 = vpack.c.bf16 %v934_v35, %v933_v11  ;;  %v1101_v27 = vmax.f32 %v1032_v23, 0.0 }
 0x1e4   : > { %v1944_v28 = vmax.f32 %v1878_v25, 0.0  ;;  %2534 = vmatmul.msk.bf16.gmra.mxu3 %vm568_vm2, %v953_v26  ;;  %1172 = vrot.lane.b32.xlu1 %v1101_v27, %s2712_s26 }
 0x1e5   : > { %v690_v30 = vpop.f32.mrf.mxu1  ;;  %v894_v34 = vpop.f32.mrf.mxu2 }
 0x1e6   : > { %v1971_v51 = vpack.c.bf16 %v1944_v28, %v1943_v24  ;;  %v691_v31 = vadd.f32 %v2961_v0, %v690_v30  ;;  %v895_v41 = vadd.f32 %v894_v34, %v2847_v22  ;;  %v2689_v30 = vld [vmem:[%s2783_s16 + $0x30] sm:$0xff] }
 0x1e7   : > { %v1034_v33 = vpop.f32.mrf.mxu3 }
 0x1e8   : > { %v734_v36 = vmax.f32 %v691_v31, 0.0  ;;  %2558 = vmatmul.msk.bf16.gmra.mxu1 %vm379_vm0, %v2687_v37  ;;  %2622 = vmatmul.msk.bf16.gmra.mxu2 %vm568_vm2, %v1971_v51  ;;  %v1035_v38 = vadd.f32 %v2961_v0, %v1034_v33  ;;  %v935_v13 = vmax.f32 %v895_v41, 0.0 }
 0x1e9   : > { %v1880_v39 = vpop.f32.mrf.mxu0 }
 0x1ea   : > { %766 = vst.msk [vmem:[%s2974_s30 + $0xc0] sm:$0xff] %vm568_vm2, %v734_v36  ;;  %v1102_v40 = vmax.f32 %v1035_v38, 0.0  ;;  %v1881_v45 = vadd.f32 %v1880_v39, %v3094_v21 }
 0x1ec   : > { %2615 = vmatmul.msk.bf16.gmra.mxu0 %vm379_vm0, %v2919_v16  ;;  %1174 = vrot.lane.b32.xlu2 %v1102_v40, %s2712_s26  ;;  %v1945_v52 = vmax.f32 %v1881_v45, 0.0 }
 0x1ed   : > { %v692_v43 = vpop.f32.mrf.mxu1  ;;  %v896_v19 = vpop.f32.mrf.mxu2 }
 0x1ee   : > { %v693_v46 = vadd.f32 %v2961_v0, %v692_v43  ;;  %v897_v47 = vadd.f32 %v896_v19, %v2847_v22 }
 0x1ef   : > { %v1036_v49 = vpop.f32.mrf.mxu3 }
 0x1f0   : > { %v735_v48 = vmax.f32 %v693_v46, 0.0  ;;  %v936_v50 = vmax.f32 %v897_v47, 0.0  ;;  %v1037_v8 = vadd.f32 %v2961_v0, %v1036_v49 }
 0x1f1   : > { %v1882_v16 = vpop.f32.mrf.mxu0 }
 0x1f2   : > { %767 = vst.msk [vmem:[%s2974_s30 + $0xc8] sm:$0xff] %vm568_vm2, %v735_v48  ;;  %v1883_v53 = vadd.f32 %v1882_v16, %v3094_v21  ;;  %v954_v54 = vpack.c.bf16 %v936_v50, %v935_v13  ;;  %v1103_v17 = vmax.f32 %v1037_v8, 0.0 }
 0x1f4   : > { %v1946_v55 = vmax.f32 %v1883_v53, 0.0  ;;  %2535 = vmatmul.msk.bf16.gmra.mxu3 %vm568_vm2, %v954_v54  ;;  %1176 = vrot.lane.b32.xlu0 %v1103_v17, %s2712_s26  ;;  %v2690_v17 = vld [vmem:[%s2783_s16 + $0x38] sm:$0xff] }
 0x1f5   : > { %v695_v56 = vpop.f32.mrf.mxu1  ;;  %v899_v42 = vpop.f32.mrf.mxu2 }
 0x1f6   : > { %v1972_v60 = vpack.c.bf16 %v1946_v55, %v1945_v52  ;;  %v696_v57 = vadd.f32 %v2961_v0, %v695_v56  ;;  %v900_v2 = vadd.f32 %v899_v42, %v2847_v22  ;;  %v3256_v42 = vpop.permute.xlu1 %1330 }
 0x1f7   : > { %v1039_v59 = vpop.f32.mrf.mxu3 }
 0x1f8   : > { %v736_v58 = vmax.f32 %v696_v57, 0.0  ;;  %2559 = vmatmul.msk.bf16.gmra.mxu1 %vm379_vm0, %v2688_v61  ;;  %2623 = vmatmul.msk.bf16.gmra.mxu2 %vm568_vm2, %v1972_v60  ;;  %v1040_v62 = vadd.f32 %v2961_v0, %v1039_v59  ;;  %v937_v14 = vmax.f32 %v900_v2, 0.0 }
 0x1f9   : > { %v1885_v63 = vpop.f32.mrf.mxu0 }
 0x1fa   : > { %768 = vst.msk [vmem:[%s2974_s30 + $0xd0] sm:$0xff] %vm568_vm2, %v736_v58  ;;  %v1104_v1 = vmax.f32 %v1040_v62, 0.0  ;;  %v1886_v29 = vadd.f32 %v1885_v63, %v3094_v21 }
 0x1fc   : > { %2616 = vmatmul.msk.bf16.gmra.mxu0 %vm379_vm0, %v2933_v32  ;;  %1178 = vrot.lane.b32.xlu1 %v1104_v1, %s2712_s26  ;;  %v1947_v20 = vmax.f32 %v1886_v29, 0.0 }
 0x1fd   : > { %v697_v3 = vpop.f32.mrf.mxu1  ;;  %v901_v6 = vpop.f32.mrf.mxu2 }
 0x1fe   : > { %v698_v5 = vadd.f32 %v2961_v0, %v697_v3  ;;  %v902_v7 = vadd.f32 %v901_v6, %v2847_v22 }
 0x1ff   : > { %v1041_v10 = vpop.f32.mrf.mxu3 }
 0x200   : > { %v737_v9 = vmax.f32 %v698_v5, 0.0  ;;  %v938_v12 = vmax.f32 %v902_v7, 0.0  ;;  %v1042_v15 = vadd.f32 %v2961_v0, %v1041_v10 }
 0x201   : > { %v1887_v32 = vpop.f32.mrf.mxu0 }
 0x202   : > { %769 = vst.msk [vmem:[%s2974_s30 + $0xd8] sm:$0xff] %vm568_vm2, %v737_v9  ;;  %v1888_v18 = vadd.f32 %v1887_v32, %v3094_v21  ;;  %v955_v11 = vpack.c.bf16 %v938_v12, %v937_v14  ;;  %v1105_v35 = vmax.f32 %v1042_v15, 0.0  ;;  %v2691_v12 = vld [vmem:[%s2783_s16 + $0x40] sm:$0xff] }
 0x204   : > { %v1948_v23 = vmax.f32 %v1888_v18, 0.0  ;;  %2536 = vmatmul.msk.bf16.gmra.mxu3 %vm568_vm2, %v955_v11  ;;  %1180 = vrot.lane.b32.xlu2 %v1105_v35, %s2712_s26 }
 0x205   : > { %v700_v4 = vpop.f32.mrf.mxu1  ;;  %v904_v26 = vpop.f32.mrf.mxu2 }
 0x206   : > { %v1973_v24 = vpack.c.bf16 %v1948_v23, %v1947_v20  ;;  %v701_v25 = vadd.f32 %v2961_v0, %v700_v4  ;;  %v905_v36 = vadd.f32 %v904_v26, %v2847_v22 }
 0x207   : > { %v1044_v28 = vpop.f32.mrf.mxu3 }
 0x208   : > { %v738_v27 = vmax.f32 %v701_v25, 0.0  ;;  %2560 = vmatmul.msk.bf16.gmra.mxu1 %vm379_vm0, %v2689_v30  ;;  %2624 = vmatmul.msk.bf16.gmra.mxu2 %vm568_vm2, %v1973_v24  ;;  %v1045_v51 = vadd.f32 %v2961_v0, %v1044_v28  ;;  %v939_v45 = vmax.f32 %v905_v36, 0.0 }
 0x209   : > { %v1890_v31 = vpop.f32.mrf.mxu0 }
 0x20a   : > { %770 = vst.msk [vmem:[%s2974_s30 + $0xe0] sm:$0xff] %vm568_vm2, %v738_v27  ;;  %v1106_v34 = vmax.f32 %v1045_v51, 0.0  ;;  %v1891_v37 = vadd.f32 %v1890_v31, %v3094_v21  ;;  %v3283_v51 = vld [vmem:[%s3805_s4] ss:$0 sm:$0xff] }
 0x20c   : > { %2617 = vmatmul.msk.bf16.gmra.mxu0 %vm379_vm0, %v2943_v44  ;;  %1182 = vrot.lane.b32.xlu0 %v1106_v34, %s2712_s26  ;;  %v1949_v47 = vmax.f32 %v1891_v37, 0.0 }
 0x20d   : > { %v702_v33 = vpop.f32.mrf.mxu1  ;;  %v906_v39 = vpop.f32.mrf.mxu2 }
 0x20e   : > { %v703_v38 = vadd.f32 %v2961_v0, %v702_v33  ;;  %v907_v40 = vadd.f32 %v906_v39, %v2847_v22 }
 0x20f   : > { %v1046_v43 = vpop.f32.mrf.mxu3 }
 0x210   : > { %v739_v41 = vmax.f32 %v703_v38, 0.0  ;;  %v940_v46 = vmax.f32 %v907_v40, 0.0  ;;  %v1047_v19 = vadd.f32 %v2961_v0, %v1046_v43 }
 0x211   : > { %v1892_v44 = vpop.f32.mrf.mxu0 }
 0x212   : > { %771 = vst.msk [vmem:[%s2974_s30 + $0xe8] sm:$0xff] %vm568_vm2, %v739_v41  ;;  %v1893_v48 = vadd.f32 %v1892_v44, %v3094_v21  ;;  %v956_v49 = vpack.c.bf16 %v940_v46, %v939_v45  ;;  %v1107_v13 = vmax.f32 %v1047_v19, 0.0  ;;  %v2693_v19 = vld [vmem:[%s2783_s16 + $0x48] sm:$0xff] }
 0x214   : > { %v1950_v50 = vmax.f32 %v1893_v48, 0.0  ;;  %2537 = vmatmul.msk.bf16.gmra.mxu3 %vm568_vm2, %v956_v49  ;;  %1184 = vrot.lane.b32.xlu1 %v1107_v13, %s2712_s26 }
 0x215   : > { %v705_v22 = vpop.f32.mrf.mxu1 }
 0x216   : > { %v1974_v8 = vpack.c.bf16 %v1950_v50, %v1949_v47  ;;  %v706_v16 = vadd.f32 %v2961_v0, %v705_v22  ;;  %v1163_v52 = vpop.permute.xlu2 %1162 }
 0x217   : > { %1257 = vst.msk [vmem:[%s2974_s30 + $0x10] sm:$0xff] %vm1254_vm3, %v1163_v52  ;;  %v1049_v54 = vpop.f32.mrf.mxu3 }
 0x218   : > { %v740_v53 = vmax.f32 %v706_v16, 0.0  ;;  %2561 = vmatmul.msk.bf16.gmra.mxu1 %vm379_vm0, %v2690_v17  ;;  %2625 = vmatmul.msk.bf16.gmra.mxu2 %vm568_vm2, %v1974_v8  ;;  %v1050_v55 = vadd.f32 %v2961_v0, %v1049_v54 }
 0x219   : > { %v1895_v56 = vpop.f32.mrf.mxu0 }
 0x21a   : > { %772 = vst.msk [vmem:[%s2974_s30 + $0xf0] sm:$0xff] %vm568_vm2, %v740_v53  ;;  %v1108_v60 = vmax.f32 %v1050_v55, 0.0  ;;  %v1896_v61 = vadd.f32 %v1895_v56, %v3094_v21 }
 0x21c   : > { %1186 = vrot.lane.b32.xlu2 %v1108_v60, %s2712_s26  ;;  %v1951_v5 = vmax.f32 %v1896_v61, 0.0 }
 0x21d   : > { %v707_v57 = vpop.f32.mrf.mxu1 }
 0x21e   : > { %v708_v58 = vadd.f32 %v2961_v0, %v707_v57  ;;  %v1159_v59 = vpop.permute.xlu0 %1158 }
 0x21f   : > { %1255 = vst.msk [vmem:[%s2974_s30] sm:$0xff] %vm1254_vm3, %v1159_v59  ;;  %v1051_v63 = vpop.f32.mrf.mxu3 }
 0x220   : > { %v741_v62 = vmax.f32 %v708_v58, 0.0  ;;  %v1052_v1 = vadd.f32 %v2961_v0, %v1051_v63 }
 0x221   : > { %v1897_v2 = vpop.f32.mrf.mxu0 }
 0x222   : > { %773 = vst.msk [vmem:[%s2974_s30 + $0xf8] sm:$0xff] %vm568_vm2, %v741_v62  ;;  %v1898_v3 = vadd.f32 %v1897_v2, %v3094_v21  ;;  %v1109_v29 = vmax.f32 %v1052_v1, 0.0 }
 0x224   : > { %v1952_v6 = vmax.f32 %v1898_v3, 0.0  ;;  %1188 = vrot.lane.b32.xlu0 %v1109_v29, %s2712_s26 }
 0x225   : > { %v1342_v7 = vpop.f32.mrf.mxu1 }
 0x226   : > { %v1975_v9 = vpack.c.bf16 %v1952_v6, %v1951_v5  ;;  %v1161_v10 = vpop.permute.xlu1 %1160  ;;  %v1343_v11 = vadd.f32 %v1342_v7, %v3256_v42  ;;  %v2694_v7 = vld [vmem:[%s2783_s16 + $0x50] sm:$0xff] }
 0x227   : > { %1256 = vst.msk [vmem:[%s2974_s30 + $0x8] sm:$0xff] %vm1254_vm3, %v1161_v10  ;;  %v1054_v14 = vpop.f32.mrf.mxu3 }
 0x228   : > { %2562 = vmatmul.msk.bf16.gmra.mxu1 %vm379_vm0, %v2691_v12  ;;  %2626 = vmatmul.msk.bf16.gmra.mxu2 %vm568_vm2, %v1975_v9  ;;  %v1055_v15 = vadd.f32 %v2961_v0, %v1054_v14  ;;  %v1422_v25 = vmax.f32 %v1343_v11, 0.0 }
 0x229   : > { %v1900_v32 = vpop.f32.mrf.mxu0 }
 0x22a   : > { %v1110_v20 = vmax.f32 %v1055_v15, 0.0  ;;  %v1901_v26 = vadd.f32 %v1900_v32, %v3094_v21 }
 0x22b   : > { %v2040_v18 = vpop.f32.mrf.mxu2 }
 0x22c   : > { %v2041_v35 = vadd.f32 %v2961_v0, %v2040_v18  ;;  %1190 = vrot.lane.b32.xlu1 %v1110_v20, %s2712_s26  ;;  %v1953_v38 = vmax.f32 %v1901_v26, 0.0 }
 0x22d   : > { %v1344_v23 = vpop.f32.mrf.mxu1 }
 0x22e   : > { %v1345_v4 = vadd.f32 %v1344_v23, %v3256_v42  ;;  %v1169_v24 = vpop.permute.xlu2 %1168  ;;  %v2120_v30 = vmax.f32 %v2041_v35, 0.0 }
 0x22f   : > { %1260 = vst.msk [vmem:[%s2974_s30 + $0x28] sm:$0xff] %vm1254_vm3, %v1169_v24  ;;  %v1056_v28 = vpop.f32.mrf.mxu3 }
 0x230   : > { %v1423_v27 = vmax.f32 %v1345_v4, 0.0  ;;  %v1057_v0 = vadd.f32 %v3283_v51, %v1056_v28 }
 0x231   : > { %v1902_v31 = vpop.f32.mrf.mxu0 }
 0x232   : > { %v1454_v34 = vpack.c.bf16 %v1423_v27, %v1422_v25  ;;  %v1903_v36 = vadd.f32 %v1902_v31, %v3094_v21  ;;  %v1111_v33 = vmax.f32 %v1057_v0, 0.0 }
 0x233   : > { %v2042_v37 = vpop.f32.mrf.mxu2 }
 0x234   : > { %v1954_v39 = vmax.f32 %v1903_v36, 0.0  ;;  %2570 = vmatmul.msk.bf16.vlgmr.msrb.gmra.mxu3 %vm568_vm2, %v1454_v34  ;;  %v2043_v40 = vadd.f32 %v3283_v51, %v2042_v37  ;;  %1192 = vrot.lane.b32.xlu2 %v1111_v33, %s2712_s26 }
 0x235   : > { %v1347_v41 = vpop.f32.mrf.mxu1  ;;  %2184 = vrot.lane.b32.xlu1 %v2120_v30, %s2713_s8 }
 0x236   : > { %v1976_v43 = vpack.c.bf16 %v1954_v39, %v1953_v38  ;;  %v1165_v45 = vpop.permute.xlu0 %1164  ;;  %v2121_v44 = vmax.f32 %v2043_v40, 0.0  ;;  %v1348_v50 = vadd.f32 %v1347_v41, %v3256_v42 }
 0x237   : > { %1258 = vst.msk [vmem:[%s2974_s30 + $0x18] sm:$0xff] %vm1254_vm3, %v1165_v45  ;;  %v1059_v46 = vpop.f32.mrf.mxu3 }
 0x238   : > { %2563 = vmatmul.msk.bf16.gmra.mxu1 %vm379_vm0, %v2693_v19  ;;  %2627 = vmatmul.msk.bf16.gmra.mxu2 %vm568_vm2, %v1976_v43  ;;  %v1060_v47 = vadd.f32 %v3283_v51, %v1059_v46  ;;  %v1424_v53 = vmax.f32 %v1348_v50, 0.0  ;;  %v2695_v43 = vld [vmem:[%s2783_s16 + $0x58] sm:$0xff] }
 0x239   : > { %v1905_v48 = vpop.f32.mrf.mxu0 }
 0x23a   : > { %v1112_v49 = vmax.f32 %v1060_v47, 0.0  ;;  %v1906_v54 = vadd.f32 %v1905_v48, %v3094_v21 }
 0x23b   : > { %v2045_v13 = vpop.f32.mrf.mxu2 }
 0x23c   : > { %v2046_v22 = vadd.f32 %v3283_v51, %v2045_v13  ;;  %1194 = vrot.lane.b32.xlu0 %v1112_v49, %s2712_s26  ;;  %2186 = vrot.lane.b32.xlu2 %v2121_v44, %s2713_s8  ;;  %v1955_v63 = vmax.f32 %v1906_v54, 0.0 }
 0x23d   : > { %v1349_v8 = vpop.f32.mrf.mxu1 }
 0x23e   : > { %v1350_v16 = vadd.f32 %v1349_v8, %v3256_v42  ;;  %v1167_v52 = vpop.permute.xlu1 %1166  ;;  %v2122_v56 = vmax.f32 %v2046_v22, 0.0 }
 0x23f   : > { %1259 = vst.msk [vmem:[%s2974_s30 + $0x20] sm:$0xff] %vm1254_vm3, %v1167_v52  ;;  %v1061_v55 = vpop.f32.mrf.mxu3 }
 0x240   : > { %v1425_v17 = vmax.f32 %v1350_v16, 0.0  ;;  %v1062_v60 = vadd.f32 %v3283_v51, %v1061_v55 }
 0x241   : > { %v1907_v57 = vpop.f32.mrf.mxu0 }
 0x242   : > { %v1455_v58 = vpack.c.bf16 %v1425_v17, %v1424_v53  ;;  %v1908_v59 = vadd.f32 %v1907_v57, %v3094_v21  ;;  %v1113_v61 = vmax.f32 %v1062_v60, 0.0 }
 0x243   : > { %v2047_v62 = vpop.f32.mrf.mxu2 }
 0x244   : > { %v1956_v1 = vmax.f32 %v1908_v59, 0.0  ;;  %2571 = vmatmul.msk.bf16.gmra.mxu3 %vm568_vm2, %v1455_v58  ;;  %v2048_v2 = vadd.f32 %v3283_v51, %v2047_v62  ;;  %1196 = vrot.lane.b32.xlu1 %v1113_v61, %s2712_s26 }
 0x245   : > { %v1352_v3 = vpop.f32.mrf.mxu1  ;;  %2188 = vrot.lane.b32.xlu0 %v2122_v56, %s2713_s8 }
 0x246   : > { %v1977_v29 = vpack.c.bf16 %v1956_v1, %v1955_v63  ;;  %v1175_v5 = vpop.permute.xlu2 %1174  ;;  %v2123_v9 = vmax.f32 %v2048_v2, 0.0  ;;  %v1353_v32 = vadd.f32 %v1352_v3, %v3256_v42 }
 0x247   : > { %1263 = vst.msk [vmem:[%s2974_s30 + $0x40] sm:$0xff] %vm1254_vm3, %v1175_v5  ;;  %v1064_v6 = vpop.f32.mrf.mxu3 }
 0x248   : > { %2564 = vmatmul.msk.bf16.gmra.mxu1 %vm379_vm0, %v2694_v7  ;;  %2628 = vmatmul.msk.bf16.gmra.mxu2 %vm568_vm2, %v1977_v29  ;;  %v1065_v10 = vadd.f32 %v3283_v51, %v1064_v6  ;;  %v1426_v23 = vmax.f32 %v1353_v32, 0.0  ;;  %v2696_v29 = vld [vmem:[%s2783_s16 + $0x60] sm:$0xff] }
 0x249   : > { %v1910_v14 = vpop.f32.mrf.mxu0 }
 0x24a   : > { %v1114_v12 = vmax.f32 %v1065_v10, 0.0  ;;  %v1911_v4 = vadd.f32 %v1910_v14, %v3094_v21 }
 0x24b   : > { %v2050_v15 = vpop.f32.mrf.mxu2 }
 0x24c   : > { %v2051_v20 = vadd.f32 %v3283_v51, %v2050_v15  ;;  %1198 = vrot.lane.b32.xlu2 %v1114_v12, %s2712_s26  ;;  %2190 = vrot.lane.b32.xlu1 %v2123_v9, %s2713_s8  ;;  %v1957_v36 = vmax.f32 %v1911_v4, 0.0 }
 0x24d   : > { %v1354_v18 = vpop.f32.mrf.mxu1 }
 0x24e   : > { %v1355_v11 = vadd.f32 %v1354_v18, %v3256_v42  ;;  %v1171_v35 = vpop.permute.xlu0 %1170  ;;  %v2124_v26 = vmax.f32 %v2051_v20, 0.0 }
 0x24f   : > { %1261 = vst.msk [vmem:[%s2974_s30 + $0x30] sm:$0xff] %vm1254_vm3, %v1171_v35  ;;  %v1066_v25 = vpop.f32.mrf.mxu3 }
 0x250   : > { %v1427_v24 = vmax.f32 %v1355_v11, 0.0  ;;  %v1067_v27 = vadd.f32 %v3283_v51, %v1066_v25 }
 0x251   : > { %v1912_v28 = vpop.f32.mrf.mxu0 }
 0x252   : > { %v1456_v30 = vpack.c.bf16 %v1427_v24, %v1426_v23  ;;  %v1913_v0 = vadd.f32 %v1912_v28, %v3094_v21  ;;  %v1115_v31 = vmax.f32 %v1067_v27, 0.0 }
 0x253   : > { %v2052_v34 = vpop.f32.mrf.mxu2 }
 0x254   : > { %v1958_v33 = vmax.f32 %v1913_v0, 0.0  ;;  %2572 = vmatmul.msk.bf16.gmra.mxu3 %vm568_vm2, %v1456_v30  ;;  %v2053_v37 = vadd.f32 %v3283_v51, %v2052_v34  ;;  %1200 = vrot.lane.b32.xlu0 %v1115_v31, %s2712_s26 }
 0x255   : > { %v1357_v38 = vpop.f32.mrf.mxu1  ;;  %2192 = vrot.lane.b32.xlu2 %v2124_v26, %s2713_s8 }
 0x256   : > { %v1978_v39 = vpack.c.bf16 %v1958_v33, %v1957_v36  ;;  %v1173_v40 = vpop.permute.xlu1 %1172  ;;  %v2125_v45 = vmax.f32 %v2053_v37, 0.0  ;;  %v1358_v48 = vadd.f32 %v1357_v38, %v3256_v42 }
 0x257   : > { %1262 = vst.msk [vmem:[%s2974_s30 + $0x38] sm:$0xff] %vm1254_vm3, %v1173_v40  ;;  %v1069_v41 = vpop.f32.mrf.mxu3 }
 0x258   : > { %2565 = vmatmul.msk.bf16.gmra.mxu1 %vm379_vm0, %v2695_v43  ;;  %2629 = vmatmul.msk.bf16.gmra.mxu2 %vm568_vm2, %v1978_v39  ;;  %v1070_v46 = vadd.f32 %v3283_v51, %v1069_v41  ;;  %v1428_v8 = vmax.f32 %v1358_v48, 0.0  ;;  %v2697_v39 = vld [vmem:[%s2783_s16 + $0x68] sm:$0xff] }
 0x259   : > { %v1915_v19 = vpop.f32.mrf.mxu0 }
 0x25a   : > { %v1116_v44 = vmax.f32 %v1070_v46, 0.0  ;;  %v1916_v16 = vadd.f32 %v1915_v19, %v3094_v21 }
 0x25b   : > { %v2055_v47 = vpop.f32.mrf.mxu2 }
 0x25c   : > { %v2056_v49 = vadd.f32 %v3283_v51, %v2055_v47  ;;  %1202 = vrot.lane.b32.xlu1 %v1116_v44, %s2712_s26  ;;  %2194 = vrot.lane.b32.xlu0 %v2125_v45, %s2713_s8  ;;  %v1959_v59 = vmax.f32 %v1916_v16, 0.0 }
 0x25d   : > { %v1359_v13 = vpop.f32.mrf.mxu1 }
 0x25e   : > { %v1360_v50 = vadd.f32 %v1359_v13, %v3256_v42  ;;  %v1181_v22 = vpop.permute.xlu2 %1180  ;;  %v2126_v54 = vmax.f32 %v2056_v49, 0.0 }
 0x25f   : > { %1266 = vst.msk [vmem:[%s2974_s30 + $0x58] sm:$0xff] %vm1254_vm3, %v1181_v22  ;;  %v1071_v53 = vpop.f32.mrf.mxu3 }
 0x260   : > { %v1429_v52 = vmax.f32 %v1360_v50, 0.0  ;;  %v1072_v17 = vadd.f32 %v3283_v51, %v1071_v53 }
 0x261   : > { %v1917_v55 = vpop.f32.mrf.mxu0 }
 0x262   : > { %v1457_v56 = vpack.c.bf16 %v1429_v52, %v1428_v8  ;;  %v1918_v60 = vadd.f32 %v1917_v55, %v3094_v21  ;;  %v1117_v57 = vmax.f32 %v1072_v17, 0.0 }
 0x263   : > { %v2057_v58 = vpop.f32.mrf.mxu2 }
 0x264   : > { %v1960_v61 = vmax.f32 %v1918_v60, 0.0  ;;  %2573 = vmatmul.msk.bf16.gmra.mxu3 %vm568_vm2, %v1457_v56  ;;  %v2058_v62 = vadd.f32 %v3283_v51, %v2057_v58  ;;  %1204 = vrot.lane.b32.xlu2 %v1117_v57, %s2712_s26 }
 0x265   : > { %v1362_v63 = vpop.f32.mrf.mxu1  ;;  %2196 = vrot.lane.b32.xlu1 %v2126_v54, %s2713_s8 }
 0x266   : > { %v1979_v1 = vpack.c.bf16 %v1960_v61, %v1959_v59  ;;  %v1177_v2 = vpop.permute.xlu0 %1176  ;;  %v2127_v5 = vmax.f32 %v2058_v62, 0.0  ;;  %v1363_v14 = vadd.f32 %v1362_v63, %v3256_v42 }
 0x267   : > { %1264 = vst.msk [vmem:[%s2974_s30 + $0x48] sm:$0xff] %vm1254_vm3, %v1177_v2  ;;  %v1074_v3 = vpop.f32.mrf.mxu3 }
 0x268   : > { %2566 = vmatmul.msk.bf16.gmra.mxu1 %vm379_vm0, %v2696_v29  ;;  %2630 = vmatmul.msk.bf16.gmra.mxu2 %vm568_vm2, %v1979_v1  ;;  %v1075_v6 = vadd.f32 %v3283_v51, %v1074_v3  ;;  %v1430_v18 = vmax.f32 %v1363_v14, 0.0  ;;  %v2698_v1 = vld [vmem:[%s2783_s16 + $0x70] sm:$0xff] }
 0x269   : > { %v1920_v7 = vpop.f32.mrf.mxu0 }
 0x26a   : > { %v1118_v9 = vmax.f32 %v1075_v6, 0.0  ;;  %v1921_v11 = vadd.f32 %v1920_v7, %v3094_v21 }
 0x26b   : > { %v2060_v10 = vpop.f32.mrf.mxu2 }
 0x26c   : > { %v2061_v12 = vadd.f32 %v3283_v51, %v2060_v10  ;;  %1206 = vrot.lane.b32.xlu0 %v1118_v9, %s2712_s26  ;;  %2198 = vrot.lane.b32.xlu2 %v2127_v5, %s2713_s8  ;;  %v1961_v0 = vmax.f32 %v1921_v11, 0.0 }
 0x26d   : > { %v1364_v15 = vpop.f32.mrf.mxu1 }
 0x26e   : > { %v1365_v32 = vadd.f32 %v1364_v15, %v3256_v42  ;;  %v1179_v20 = vpop.permute.xlu1 %1178  ;;  %v2128_v4 = vmax.f32 %v2061_v12, 0.0 }
 0x26f   : > { %1265 = vst.msk [vmem:[%s2974_s30 + $0x50] sm:$0xff] %vm1254_vm3, %v1179_v20  ;;  %v1076_v23 = vpop.f32.mrf.mxu3 }
 0x270   : > { %v1431_v35 = vmax.f32 %v1365_v32, 0.0  ;;  %v1077_v24 = vadd.f32 %v3283_v51, %v1076_v23 }
 0x271   : > { %v1922_v25 = vpop.f32.mrf.mxu0 }
 0x272   : > { %v1458_v26 = vpack.c.bf16 %v1431_v35, %v1430_v18  ;;  %v1923_v27 = vadd.f32 %v1922_v25, %v3094_v21  ;;  %v1119_v28 = vmax.f32 %v1077_v24, 0.0 }
 0x273   : > { %v2062_v30 = vpop.f32.mrf.mxu2 }
 0x274   : > { %v1962_v31 = vmax.f32 %v1923_v27, 0.0  ;;  %2574 = vmatmul.msk.bf16.gmra.mxu3 %vm568_vm2, %v1458_v26  ;;  %v2063_v34 = vadd.f32 %v3283_v51, %v2062_v30  ;;  %1208 = vrot.lane.b32.xlu1 %v1119_v28, %s2712_s26 }
 0x275   : > { %v1367_v36 = vpop.f32.mrf.mxu1  ;;  %2200 = vrot.lane.b32.xlu0 %v2128_v4, %s2713_s8 }
 0x276   : > { %v1980_v33 = vpack.c.bf16 %v1962_v31, %v1961_v0  ;;  %v1187_v37 = vpop.permute.xlu2 %1186  ;;  %v2129_v40 = vmax.f32 %v2063_v34, 0.0  ;;  %v1368_v19 = vadd.f32 %v1367_v36, %v3256_v42 }
 0x277   : > { %1269 = vst.msk [vmem:[%s2974_s30 + $0x70] sm:$0xff] %vm1254_vm3, %v1187_v37  ;;  %v1079_v38 = vpop.f32.mrf.mxu3 }
 0x278   : > { %2567 = vmatmul.msk.bf16.gmra.mxu1 %vm379_vm0, %v2697_v39  ;;  %2631 = vmatmul.msk.bf16.gmra.mxu2 %vm568_vm2, %v1980_v33  ;;  %v1080_v41 = vadd.f32 %v3283_v51, %v1079_v38  ;;  %v1432_v13 = vmax.f32 %v1368_v19, 0.0  ;;  %v2699_v33 = vld [vmem:[%s2783_s16 + $0x78] sm:$0xff]  ;;  %s2714_s16 = smov 16  }
 0x279   : > { %v1925_v43 = vpop.f32.mrf.mxu0 }
 0x27a   : > { %v1120_v45 = vmax.f32 %v1080_v41, 0.0  ;;  %v1926_v50 = vadd.f32 %v1925_v43, %v3094_v21 }
 0x27b   : > { %v2065_v46 = vpop.f32.mrf.mxu2 }
 0x27c   : > { %v2066_v44 = vadd.f32 %v3283_v51, %v2065_v46  ;;  %1210 = vrot.lane.b32.xlu2 %v1120_v45, %s2712_s26  ;;  %2202 = vrot.lane.b32.xlu1 %v2129_v40, %s2713_s8  ;;  %v1963_v60 = vmax.f32 %v1926_v50, 0.0 }
 0x27d   : > { %v1369_v47 = vpop.f32.mrf.mxu1 }
 0x27e   : > { %v1370_v48 = vadd.f32 %v1369_v47, %v3256_v42  ;;  %v1183_v49 = vpop.permute.xlu0 %1182  ;;  %v2130_v16 = vmax.f32 %v2066_v44, 0.0 }
 0x27f   : > { %1267 = vst.msk [vmem:[%s2974_s30 + $0x60] sm:$0xff] %vm1254_vm3, %v1183_v49  ;;  %v1081_v8 = vpop.f32.mrf.mxu3 }
 0x280   : > { %v1433_v22 = vmax.f32 %v1370_v48, 0.0  ;;  %v1082_v52 = vadd.f32 %v3283_v51, %v1081_v8 }
 0x281   : > { %v1927_v53 = vpop.f32.mrf.mxu0 }
 0x282   : > { %v1459_v54 = vpack.c.bf16 %v1433_v22, %v1432_v13  ;;  %v1928_v17 = vadd.f32 %v1927_v53, %v3094_v21  ;;  %v1121_v55 = vmax.f32 %v1082_v52, 0.0 }
 0x283   : > { %v2067_v56 = vpop.f32.mrf.mxu2 }
 0x284   : > { %v1964_v57 = vmax.f32 %v1928_v17, 0.0  ;;  %2575 = vmatmul.msk.bf16.gmra.mxu3 %vm568_vm2, %v1459_v54  ;;  %v2068_v58 = vadd.f32 %v3283_v51, %v2067_v56  ;;  %1212 = vrot.lane.b32.xlu0 %v1121_v55, %s2712_s26 }
 0x285   : > { %v1372_v59 = vpop.f32.mrf.mxu1  ;;  %2204 = vrot.lane.b32.xlu2 %v2130_v16, %s2713_s8 }
 0x286   : > { %v1981_v61 = vpack.c.bf16 %v1964_v57, %v1963_v60  ;;  %v1185_v62 = vpop.permute.xlu1 %1184  ;;  %v2131_v2 = vmax.f32 %v2068_v58, 0.0  ;;  %v1373_v7 = vadd.f32 %v1372_v59, %v3256_v42 }
 0x287   : > { %1268 = vst.msk [vmem:[%s2974_s30 + $0x68] sm:$0xff] %vm1254_vm3, %v1185_v62  ;;  %v1084_v63 = vpop.f32.mrf.mxu3 }
 0x288   : > { %2568 = vmatmul.msk.bf16.gmra.mxu1 %vm379_vm0, %v2698_v1  ;;  %2632 = vmatmul.msk.bf16.gmra.mxu2 %vm568_vm2, %v1981_v61  ;;  %v1085_v3 = vadd.f32 %v3283_v51, %v1084_v63  ;;  %v1434_v15 = vmax.f32 %v1373_v7, 0.0 }
 0x289   : > { %v1930_v29 = vpop.f32.mrf.mxu0 }
 0x28a   : > { %v1122_v5 = vmax.f32 %v1085_v3, 0.0  ;;  %v1931_v32 = vadd.f32 %v1930_v29, %v3094_v21 }
 0x28b   : > { %v2070_v6 = vpop.f32.mrf.mxu2 }
 0x28c   : > { %v2071_v9 = vadd.f32 %v3283_v51, %v2070_v6  ;;  %1214 = vrot.lane.b32.xlu1 %v1122_v5, %s2712_s26  ;;  %2206 = vrot.lane.b32.xlu0 %v2131_v2, %s2713_s8  ;;  %v1965_v27 = vmax.f32 %v1931_v32, 0.0 }
 0x28d   : > { %v1374_v10 = vpop.f32.mrf.mxu1 }
 0x28e   : > { %v1375_v14 = vadd.f32 %v1374_v10, %v3256_v42  ;;  %v1193_v12 = vpop.permute.xlu2 %1192  ;;  %v2132_v11 = vmax.f32 %v2071_v9, 0.0 }
 0x28f   : > { %1272 = vst.msk [vmem:[%s2974_s30 + $0x88] sm:$0xff] %vm1254_vm3, %v1193_v12  ;;  %v1086_v18 = vpop.f32.mrf.mxu3 }
 0x290   : > { %v1435_v20 = vmax.f32 %v1375_v14, 0.0  ;;  %v1087_v35 = vadd.f32 %v3283_v51, %v1086_v18 }
 0x291   : > { %v1932_v23 = vpop.f32.mrf.mxu0 }
 0x292   : > { %v1460_v4 = vpack.c.bf16 %v1435_v20, %v1434_v15  ;;  %v1933_v24 = vadd.f32 %v1932_v23, %v3094_v21  ;;  %v1123_v25 = vmax.f32 %v1087_v35, 0.0 }
 0x293   : > { %v2072_v26 = vpop.f32.mrf.mxu2 }
 0x294   : > { %v1966_v28 = vmax.f32 %v1933_v24, 0.0  ;;  %2576 = vmatmul.msk.bf16.gmra.mxu3 %vm568_vm2, %v1460_v4  ;;  %v2073_v30 = vadd.f32 %v3283_v51, %v2072_v26  ;;  %1216 = vrot.lane.b32.xlu2 %v1123_v25, %s2712_s26 }
 0x295   : > { %v1377_v0 = vpop.f32.mrf.mxu1  ;;  %2208 = vrot.lane.b32.xlu1 %v2132_v11, %s2713_s8 }
 0x296   : > { %v1982_v31 = vpack.c.bf16 %v1966_v28, %v1965_v27  ;;  %v1189_v34 = vpop.permute.xlu0 %1188  ;;  %v2133_v21 = vmax.f32 %v2073_v30, 0.0  ;;  %v1378_v40 = vadd.f32 %v1377_v0, %v3256_v42  ;;  %v3420_v45 = vpop.permute.xlu2 %2186 }
 0x297   : > { %1270 = vst.msk [vmem:[%s2974_s30 + $0x78] sm:$0xff] %vm1254_vm3, %v1189_v34  ;;  %v1089_v36 = vpop.f32.mrf.mxu3 }
 0x298   : > { %2569 = vmatmul.msk.bf16.gmra.mxu1 %vm379_vm0, %v2699_v33  ;;  %2633 = vmatmul.msk.bf16.gmra.mxu2 %vm568_vm2, %v1982_v31  ;;  %v1090_v37 = vadd.f32 %v3283_v51, %v1089_v36  ;;  %v1436_v44 = vmax.f32 %v1378_v40, 0.0 }
 0x29a   : > { %v1124_v38 = vmax.f32 %v1090_v37, 0.0 }
 0x29b   : > { %v2075_v39 = vpop.f32.mrf.mxu2 }
 0x29c   : > { %v2076_v41 = vadd.f32 %v3283_v51, %v2075_v39  ;;  %1218 = vrot.lane.b32.xlu0 %v1124_v38, %s2712_s26  ;;  %2210 = vrot.lane.b32.xlu2 %v2133_v21, %s2713_s8 }
 0x29d   : > { %v1379_v43 = vpop.f32.mrf.mxu1 }
 0x29e   : > { %v1380_v46 = vadd.f32 %v1379_v43, %v3256_v42  ;;  %v1191_v19 = vpop.permute.xlu1 %1190  ;;  %v2134_v49 = vmax.f32 %v2076_v41, 0.0 }
 0x29f   : > { %1271 = vst.msk [vmem:[%s2974_s30 + $0x80] sm:$0xff] %vm1254_vm3, %v1191_v19  ;;  %v1091_v48 = vpop.f32.mrf.mxu3 }
 0x2a0   : > { %v1437_v47 = vmax.f32 %v1380_v46, 0.0  ;;  %v1092_v13 = vadd.f32 %v3283_v51, %v1091_v48 }
 0x2a2   : > { %v1461_v50 = vpack.c.bf16 %v1437_v47, %v1436_v44  ;;  %v1125_v22 = vmax.f32 %v1092_v13, 0.0 }
 0x2a3   : > { %v2077_v8 = vpop.f32.mrf.mxu2 }
 0x2a4   : > { %2577 = vmatmul.msk.bf16.gmra.mxu3 %vm568_vm2, %v1461_v50  ;;  %2212 = vrot.lane.b32.xlu0 %v2134_v49, %s2713_s8  ;;  %v2078_v52 = vadd.f32 %v3283_v51, %v2077_v8 }
 0x2a5   : > { %1220 = vrot.lane.b32.xlu1 %v1125_v22, %s2712_s26  ;;  %v1382_v16 = vpop.f32.mrf.mxu1 }
 0x2a6   : > { %v1199_v53 = vpop.permute.xlu2 %1198  ;;  %v2135_v54 = vmax.f32 %v2078_v52, 0.0  ;;  %v1383_v55 = vadd.f32 %v1382_v16, %v3256_v42 }
 0x2a7   : > { %1275 = vst.msk [vmem:[%s2974_s30 + $0xa0] sm:$0xff] %vm1254_vm3, %v1199_v53  ;;  %v3436_v57 = vpop.permute.xlu1 %2184 }
 0x2a8   : > { %v1438_v62 = vmax.f32 %v1383_v55, 0.0 }
 0x2ab   : > { %v2080_v17 = vpop.f32.mrf.mxu2 }
 0x2ac   : > { %v2081_v56 = vadd.f32 %v3283_v51, %v2080_v17 }
 0x2ad   : > { %2214 = vrot.lane.b32.xlu1 %v2135_v54, %s2713_s8  ;;  %v1384_v60 = vpop.f32.mrf.mxu1 }
 0x2ae   : > { %v2136_v58 = vmax.f32 %v2081_v56, 0.0  ;;  %v1385_v59 = vadd.f32 %v1384_v60, %v3256_v42  ;;  %v1195_v61 = vpop.permute.xlu0 %1194 }
 0x2af   : > { %1273 = vst.msk [vmem:[%s2974_s30 + $0x90] sm:$0xff] %vm1254_vm3, %v1195_v61  ;;  %v3444_v5 = vpop.permute.xlu2 %2192 }
 0x2b0   : > { %v1439_v63 = vmax.f32 %v1385_v59, 0.0  ;;  %2216 = vrot.lane.b32.xlu2 %v2136_v58, %s2713_s8 }
 0x2b2   : > { %v1462_v1 = vpack.c.bf16 %v1439_v63, %v1438_v62 }
 0x2b3   : > { %v2082_v2 = vpop.f32.mrf.mxu2 }
 0x2b4   : > { %v2083_v3 = vadd.f32 %v3283_v51, %v2082_v2  ;;  %2578 = vmatmul.msk.bf16.gmra.mxu3 %vm568_vm2, %v1462_v1 }
 0x2b5   : > { %v1387_v29 = vpop.f32.mrf.mxu1 }
 0x2b6   : > { %v2137_v6 = vmax.f32 %v2083_v3, 0.0  ;;  %v1197_v7 = vpop.permute.xlu1 %1196  ;;  %v1388_v15 = vadd.f32 %v1387_v29, %v3256_v42 }
 0x2b7   : > { %v1527_v9 = vpop.f32.mrf.mxu3  ;;  %1274 = vst.msk [vmem:[%s2974_s30 + $0x98] sm:$0xff] %vm1254_vm3, %v1197_v7  ;;  %v3453_v18 = vpop.permute.xlu0 %2188 }
 0x2b8   : > { %v1528_v10 = vadd.f32 %v3283_v51, %v1527_v9  ;;  %2218 = vrot.lane.b32.xlu0 %v2137_v6, %s2713_s8  ;;  %v1440_v24 = vmax.f32 %v1388_v15, 0.0 }
 0x2ba   : > { %v1607_v14 = vmax.f32 %v1528_v10, 0.0 }
 0x2bb   : > { %v2085_v12 = vpop.f32.mrf.mxu2 }
 0x2bc   : > { %v2086_v32 = vadd.f32 %v3283_v51, %v2085_v12  ;;  %1671 = vrot.lane.b32.xlu2 %v1607_v14, %s2714_s16 }
 0x2bd   : > { %v1389_v20 = vpop.f32.mrf.mxu1 }
 0x2be   : > { %v2138_v11 = vmax.f32 %v2086_v32, 0.0  ;;  %v1390_v35 = vadd.f32 %v1389_v20, %v3256_v42  ;;  %v1205_v23 = vpop.permute.xlu2 %1204  ;;  %v3463_v34 = vpop.permute.xlu1 %2190 }
 0x2bf   : > { %v1529_v4 = vpop.f32.mrf.mxu3  ;;  %1278 = vst.msk [vmem:[%s2974_s30 + $0xb8] sm:$0xff] %vm1254_vm3, %v1205_v23 }
 0x2c0   : > { %v1441_v25 = vmax.f32 %v1390_v35, 0.0  ;;  %v1530_v26 = vadd.f32 %v3283_v51, %v1529_v4  ;;  %2220 = vrot.lane.b32.xlu1 %v2138_v11, %s2713_s8 }
 0x2c2   : > { %v1463_v27 = vpack.c.bf16 %v1441_v25, %v1440_v24  ;;  %v1608_v28 = vmax.f32 %v1530_v26, 0.0 }
 0x2c3   : > { %v2087_v30 = vpop.f32.mrf.mxu2 }
 0x2c4   : > { %v2088_v0 = vadd.f32 %v3283_v51, %v2087_v30  ;;  %2579 = vmatmul.msk.bf16.gmra.mxu3 %vm568_vm2, %v1463_v27  ;;  %1673 = vrot.lane.b32.xlu0 %v1608_v28, %s2714_s16 }
 0x2c5   : > { %v1392_v31 = vpop.f32.mrf.mxu1 }
 0x2c6   : > { %v2139_v36 = vmax.f32 %v2088_v0, 0.0  ;;  %v1201_v33 = vpop.permute.xlu0 %1200  ;;  %v1393_v40 = vadd.f32 %v1392_v31, %v3256_v42  ;;  %v3472_v46 = vpop.permute.xlu2 %2198 }
 0x2c7   : > { %v1532_v21 = vpop.f32.mrf.mxu3  ;;  %1276 = vst.msk [vmem:[%s2974_s30 + $0xa8] sm:$0xff] %vm1254_vm3, %v1201_v33 }
 0x2c8   : > { %v1533_v37 = vadd.f32 %v3283_v51, %v1532_v21  ;;  %2222 = vrot.lane.b32.xlu2 %v2139_v36, %s2713_s8  ;;  %v1442_v49 = vmax.f32 %v1393_v40, 0.0 }
 0x2ca   : > { %v1609_v38 = vmax.f32 %v1533_v37, 0.0 }
 0x2cb   : > { %v2090_v39 = vpop.f32.mrf.mxu2 }
 0x2cc   : > { %v2091_v41 = vadd.f32 %v3283_v51, %v2090_v39  ;;  %1675 = vrot.lane.b32.xlu1 %v1609_v38, %s2714_s16 }
 0x2cd   : > { %v1394_v43 = vpop.f32.mrf.mxu1 }
 0x2ce   : > { %v2140_v19 = vmax.f32 %v2091_v41, 0.0  ;;  %v1395_v44 = vadd.f32 %v1394_v43, %v3256_v42  ;;  %v1203_v47 = vpop.permute.xlu1 %1202  ;;  %v3482_v54 = vpop.permute.xlu0 %2194 }
 0x2cf   : > { %v1534_v48 = vpop.f32.mrf.mxu3  ;;  %1277 = vst.msk [vmem:[%s2974_s30 + $0xb0] sm:$0xff] %vm1254_vm3, %v1203_v47 }
 0x2d0   : > { %v1443_v13 = vmax.f32 %v1395_v44, 0.0  ;;  %v1535_v50 = vadd.f32 %v3283_v51, %v1534_v48  ;;  %2224 = vrot.lane.b32.xlu0 %v2140_v19, %s2713_s8 }
 0x2d2   : > { %v1464_v22 = vpack.c.bf16 %v1443_v13, %v1442_v49  ;;  %v1610_v8 = vmax.f32 %v1535_v50, 0.0 }
 0x2d3   : > { %v2092_v16 = vpop.f32.mrf.mxu2 }
 0x2d4   : > { %v2093_v52 = vadd.f32 %v3283_v51, %v2092_v16  ;;  %2580 = vmatmul.msk.bf16.gmra.mxu3 %vm568_vm2, %v1464_v22  ;;  %1677 = vrot.lane.b32.xlu2 %v1610_v8, %s2714_s16 }
 0x2d5   : > { %v1397_v53 = vpop.f32.mrf.mxu1 }
 0x2d6   : > { %v2141_v17 = vmax.f32 %v2093_v52, 0.0  ;;  %v1211_v55 = vpop.permute.xlu2 %1210  ;;  %v1398_v61 = vadd.f32 %v1397_v53, %v3256_v42 }
 0x2d7   : > { %v1537_v56 = vpop.f32.mrf.mxu3  ;;  %1281 = vst.msk [vmem:[%s2974_s30 + $0xd0] sm:$0xff] %vm1254_vm3, %v1211_v55  ;;  %v3491_v1 = vpop.permute.xlu1 %2196 }
 0x2d8   : > { %v1538_v60 = vadd.f32 %v3283_v51, %v1537_v56  ;;  %2226 = vrot.lane.b32.xlu1 %v2141_v17, %s2713_s8  ;;  %v1444_v7 = vmax.f32 %v1398_v61, 0.0 }
 0x2da   : > { %v1611_v58 = vmax.f32 %v1538_v60, 0.0 }
 0x2db   : > { %v2095_v59 = vpop.f32.mrf.mxu2 }
 0x2dc   : > { %v2096_v62 = vadd.f32 %v3283_v51, %v2095_v59  ;;  %1679 = vrot.lane.b32.xlu0 %v1611_v58, %s2714_s16 }
 0x2dd   : > { %v1399_v63 = vpop.f32.mrf.mxu1 }
 0x2de   : > { %v2142_v2 = vmax.f32 %v2096_v62, 0.0  ;;  %v1400_v3 = vadd.f32 %v1399_v63, %v3256_v42  ;;  %v1207_v29 = vpop.permute.xlu0 %1206 }
 0x2df   : > { %v1539_v6 = vpop.f32.mrf.mxu3  ;;  %1279 = vst.msk [vmem:[%s2974_s30 + $0xc0] sm:$0xff] %vm1254_vm3, %v1207_v29  ;;  %v3501_v11 = vpop.permute.xlu2 %2204 }
 0x2e0   : > { %v1445_v9 = vmax.f32 %v1400_v3, 0.0  ;;  %v1540_v10 = vadd.f32 %v3283_v51, %v1539_v6  ;;  %2228 = vrot.lane.b32.xlu2 %v2142_v2, %s2713_s8 }
 0x2e2   : > { %v1465_v14 = vpack.c.bf16 %v1445_v9, %v1444_v7  ;;  %v1612_v12 = vmax.f32 %v1540_v10, 0.0 }
 0x2e3   : > { %v2097_v15 = vpop.f32.mrf.mxu2 }
 0x2e4   : > { %v2098_v32 = vadd.f32 %v3283_v51, %v2097_v15  ;;  %2581 = vmatmul.msk.bf16.gmra.mxu3 %vm568_vm2, %v1465_v14  ;;  %1681 = vrot.lane.b32.xlu1 %v1612_v12, %s2714_s16 }
 0x2e5   : > { %v1402_v20 = vpop.f32.mrf.mxu1 }
 0x2e6   : > { %v2143_v35 = vmax.f32 %v2098_v32, 0.0  ;;  %v1209_v23 = vpop.permute.xlu1 %1208  ;;  %v1403_v27 = vadd.f32 %v1402_v20, %v3256_v42 }
 0x2e7   : > { %v1542_v4 = vpop.f32.mrf.mxu3  ;;  %1280 = vst.msk [vmem:[%s2974_s30 + $0xc8] sm:$0xff] %vm1254_vm3, %v1209_v23  ;;  %v3510_v0 = vpop.permute.xlu0 %2200 }
 0x2e8   : > { %v1543_v24 = vadd.f32 %v3283_v51, %v1542_v4  ;;  %2230 = vrot.lane.b32.xlu0 %v2143_v35, %s2713_s8  ;;  %v1446_v37 = vmax.f32 %v1403_v27, 0.0 }
 0x2ea   : > { %v1613_v25 = vmax.f32 %v1543_v24, 0.0 }
 0x2eb   : > { %v2100_v26 = vpop.f32.mrf.mxu2 }
 0x2ec   : > { %v2101_v28 = vadd.f32 %v3283_v51, %v2100_v26  ;;  %1683 = vrot.lane.b32.xlu2 %v1613_v25, %s2714_s16 }
 0x2ed   : > { %v1404_v30 = vpop.f32.mrf.mxu1 }
 0x2ee   : > { %v2144_v31 = vmax.f32 %v2101_v28, 0.0  ;;  %v1405_v36 = vadd.f32 %v1404_v30, %v3256_v42  ;;  %v1217_v33 = vpop.permute.xlu2 %1216  ;;  %v3520_v47 = vpop.permute.xlu1 %2202 }
 0x2ef   : > { %v1544_v21 = vpop.f32.mrf.mxu3  ;;  %1284 = vst.msk [vmem:[%s2974_s30 + $0xe8] sm:$0xff] %vm1254_vm3, %v1217_v33 }
 0x2f0   : > { %v1447_v38 = vmax.f32 %v1405_v36, 0.0  ;;  %v1545_v39 = vadd.f32 %v3283_v51, %v1544_v21  ;;  %2232 = vrot.lane.b32.xlu1 %v2144_v31, %s2713_s8 }
 0x2f2   : > { %v1466_v40 = vpack.c.bf16 %v1447_v38, %v1446_v37  ;;  %v1614_v41 = vmax.f32 %v1545_v39, 0.0 }
 0x2f3   : > { %v2102_v43 = vpop.f32.mrf.mxu2 }
 0x2f4   : > { %v2103_v19 = vadd.f32 %v3283_v51, %v2102_v43  ;;  %2582 = vmatmul.msk.bf16.gmra.mxu3 %vm568_vm2, %v1466_v40  ;;  %1685 = vrot.lane.b32.xlu0 %v1614_v41, %s2714_s16 }
 0x2f5   : > { %v1407_v44 = vpop.f32.mrf.mxu1 }
 0x2f6   : > { %v2145_v48 = vmax.f32 %v2103_v19, 0.0  ;;  %v1213_v49 = vpop.permute.xlu0 %1212  ;;  %v1408_v16 = vadd.f32 %v1407_v44, %v3256_v42  ;;  %v3539_v7 = vpop.permute.xlu2 %2210 }
 0x2f7   : > { %v1547_v13 = vpop.f32.mrf.mxu3  ;;  %1282 = vst.msk [vmem:[%s2974_s30 + $0xd8] sm:$0xff] %vm1254_vm3, %v1213_v49 }
 0x2f8   : > { %v1548_v50 = vadd.f32 %v3283_v51, %v1547_v13  ;;  %2234 = vrot.lane.b32.xlu2 %v2145_v48, %s2713_s8  ;;  %v1448_v58 = vmax.f32 %v1408_v16, 0.0 }
 0x2fa   : > { %v1615_v22 = vmax.f32 %v1548_v50, 0.0 }
 0x2fb   : > { %v2105_v8 = vpop.f32.mrf.mxu2 }
 0x2fc   : > { %v2106_v52 = vadd.f32 %v3283_v51, %v2105_v8  ;;  %1687 = vrot.lane.b32.xlu1 %v1615_v22, %s2714_s16 }
 0x2fd   : > { %v1409_v53 = vpop.f32.mrf.mxu1 }
 0x2fe   : > { %v2146_v17 = vmax.f32 %v2106_v52, 0.0  ;;  %v1410_v55 = vadd.f32 %v1409_v53, %v3256_v42  ;;  %v1215_v56 = vpop.permute.xlu1 %1214  ;;  %v3537_v6 = vpop.permute.xlu0 %2206 }
 0x2ff   : > { %v1549_v60 = vpop.f32.mrf.mxu3  ;;  %1283 = vst.msk [vmem:[%s2974_s30 + $0xe0] sm:$0xff] %vm1254_vm3, %v1215_v56 }
 0x300   : > { %v1449_v59 = vmax.f32 %v1410_v55, 0.0  ;;  %v1550_v61 = vadd.f32 %v3283_v51, %v1549_v60  ;;  %2236 = vrot.lane.b32.xlu0 %v2146_v17, %s2713_s8 }
 0x302   : > { %v1467_v62 = vpack.c.bf16 %v1449_v59, %v1448_v58  ;;  %v1616_v63 = vmax.f32 %v1550_v61, 0.0 }
 0x303   : > { %v2107_v2 = vpop.f32.mrf.mxu2 }
 0x304   : > { %v2108_v3 = vadd.f32 %v3283_v51, %v2107_v2  ;;  %2583 = vmatmul.msk.bf16.gmra.mxu3 %vm568_vm2, %v1467_v62  ;;  %1689 = vrot.lane.b32.xlu2 %v1616_v63, %s2714_s16 }
 0x305   : > { %v1412_v29 = vpop.f32.mrf.mxu1 }
 0x306   : > { %v2147_v9 = vmax.f32 %v2108_v3, 0.0  ;;  %v1413_v32 = vadd.f32 %v1412_v29, %v3256_v42 }
 0x307   : > { %v1552_v10 = vpop.f32.mrf.mxu3  ;;  %v3546_v23 = vpop.permute.xlu1 %2208 }
 0x308   : > { %v1553_v14 = vadd.f32 %v3283_v51, %v1552_v10  ;;  %2238 = vrot.lane.b32.xlu1 %v2147_v9, %s2713_s8  ;;  %v1450_v28 = vmax.f32 %v1413_v32, 0.0 }
 0x30a   : > { %v1617_v12 = vmax.f32 %v1553_v14, 0.0  ;;  %v3548_v4 = vpop.permute.xlu2 %2216 }
 0x30b   : > { %v2110_v15 = vpop.f32.mrf.mxu2 }
 0x30c   : > { %v2111_v20 = vadd.f32 %v3283_v51, %v2110_v15  ;;  %1691 = vrot.lane.b32.xlu0 %v1617_v12, %s2714_s16 }
 0x30d   : > { %v1414_v35 = vpop.f32.mrf.mxu1 }
 0x30e   : > { %v2148_v24 = vmax.f32 %v2111_v20, 0.0  ;;  %v1415_v25 = vadd.f32 %v1414_v35, %v3256_v42  ;;  %v1219_v26 = vpop.permute.xlu0 %1218 }
 0x30f   : > { %v1554_v27 = vpop.f32.mrf.mxu3  ;;  %1285 = vst.msk [vmem:[%s2974_s30 + $0xf0] sm:$0xff] %vm1254_vm3, %v1219_v26 }
 0x310   : > { %v1451_v30 = vmax.f32 %v1415_v25, 0.0  ;;  %v1555_v31 = vadd.f32 %v3283_v51, %v1554_v27  ;;  %2240 = vrot.lane.b32.xlu2 %v2148_v24, %s2713_s8 }
 0x312   : > { %v1468_v36 = vpack.c.bf16 %v1451_v30, %v1450_v28  ;;  %v1618_v33 = vmax.f32 %v1555_v31, 0.0 }
 0x314   : > { %2584 = vmatmul.msk.bf16.gmra.mxu3 %vm568_vm2, %v1468_v36  ;;  %1693 = vrot.lane.b32.xlu1 %v1618_v33, %s2714_s16 }
 0x315   : > { %v1417_v21 = vpop.f32.mrf.mxu1 }
 0x316   : > { %v1672_v37 = vpop.permute.xlu2 %1671  ;;  %v1418_v43 = vadd.f32 %v1417_v21, %v3256_v42  ;;  %v3571_v8 = vpop.permute.xlu0 %2212 }
 0x317   : > { %1768 = vst.msk [vmem:[%s2974_s30] sm:$0xff] %vm1767_vm4, %v1672_v37  ;;  %v1221_v38 = vpop.permute.xlu1 %1220  ;;  %v1557_v39 = vpop.f32.mrf.mxu3 }
 0x318   : > { %2281 = vst.msk [vmem:[%s2974_s30] sm:$0xff] %vm2280_vm5, %v3436_v57  ;;  %v1558_v40 = vadd.f32 %v3283_v51, %v1557_v39  ;;  %v1452_v48 = vmax.f32 %v1418_v43, 0.0 }
 0x319   : > { %1286 = vst.msk [vmem:[%s2974_s30 + $0xf8] sm:$0xff] %vm1254_vm3, %v1221_v38 }
 0x31a   : > { %v1619_v41 = vmax.f32 %v1558_v40, 0.0 }
 0x31c   : > { %1695 = vrot.lane.b32.xlu2 %v1619_v41, %s2714_s16 }
 0x31d   : > { %v1419_v19 = vpop.f32.mrf.mxu1 }
 0x31e   : > { %v1420_v44 = vadd.f32 %v1419_v19, %v3256_v42 }
 0x31f   : > { %v1559_v13 = vpop.f32.mrf.mxu3  ;;  %v3576_v17 = vpop.permute.xlu1 %2214 }
 0x320   : > { %v1453_v49 = vmax.f32 %v1420_v44, 0.0  ;;  %v1560_v57 = vadd.f32 %v3283_v51, %v1559_v13 }
 0x322   : > { %v1469_v50 = vpack.c.bf16 %v1453_v49, %v1452_v48  ;;  %v1620_v22 = vmax.f32 %v1560_v57, 0.0  ;;  %v3573_v16 = vpop.permute.xlu2 %2222 }
 0x324   : > { %2585 = vmatmul.msk.bf16.gmra.mxu3 %vm568_vm2, %v1469_v50  ;;  %1697 = vrot.lane.b32.xlu0 %v1620_v22, %s2714_s16 }
 0x327   : > { %v1562_v52 = vpop.f32.mrf.mxu3 }
 0x328   : > { %v1563_v42 = vadd.f32 %v3283_v51, %v1562_v52 }
 0x32a   : > { %v1621_v53 = vmax.f32 %v1563_v42, 0.0  ;;  %v3579_v55 = vpop.permute.xlu0 %2218 }
 0x32c   : > { %1699 = vrot.lane.b32.xlu1 %v1621_v53, %s2714_s16 }
 0x32e   : > { %v1678_v56 = vpop.permute.xlu2 %1677 }
 0x32f   : > { %1771 = vst.msk [vmem:[%s2974_s30 + $0x18] sm:$0xff] %vm1767_vm4, %v1678_v56  ;;  %v1564_v60 = vpop.f32.mrf.mxu3 }
 0x330   : > { %2284 = vst.msk [vmem:[%s2974_s30 + $0x18] sm:$0xff] %vm2280_vm5, %v3463_v34  ;;  %v1565_v58 = vadd.f32 %v3283_v51, %v1564_v60 }
 0x332   : > { %v1622_v59 = vmax.f32 %v1565_v58, 0.0  ;;  %v3588_v61 = vpop.permute.xlu1 %2220 }
 0x334   : > { %1701 = vrot.lane.b32.xlu2 %v1622_v59, %s2714_s16 }
 0x336   : > { %v1674_v62 = vpop.permute.xlu0 %1673 }
 0x337   : > { %1769 = vst.msk [vmem:[%s2974_s30 + $0x8] sm:$0xff] %vm1767_vm4, %v1674_v62  ;;  %v1567_v63 = vpop.f32.mrf.mxu3 }
 0x338   : > { %2282 = vst.msk [vmem:[%s2974_s30 + $0x8] sm:$0xff] %vm2280_vm5, %v3420_v45  ;;  %v1568_v34 = vadd.f32 %v3283_v51, %v1567_v63  ;;  %v3607_v45 = vld [vmem:[%s3805_s4] ss:$0 sm:$0xff] }
 0x33a   : > { %v1623_v2 = vmax.f32 %v1568_v34, 0.0  ;;  %v3597_v3 = vpop.permute.xlu2 %2228  ;;  %v2112_v34 = vpop.f32.mrf.mxu2 }
 0x33c   : > { %1703 = vrot.lane.b32.xlu0 %v1623_v2, %s2714_s16 }
 0x33e   : > { %v1676_v29 = vpop.permute.xlu1 %1675 }
 0x33f   : > { %1770 = vst.msk [vmem:[%s2974_s30 + $0x10] sm:$0xff] %vm1767_vm4, %v1676_v29  ;;  %v1569_v9 = vpop.f32.mrf.mxu3 }
 0x340   : > { %2283 = vst.msk [vmem:[%s2974_s30 + $0x10] sm:$0xff] %vm2280_vm5, %v3453_v18  ;;  %v1570_v51 = vadd.f32 %v3607_v45, %v1569_v9 }
 0x342   : > { %v1624_v10 = vmax.f32 %v1570_v51, 0.0  ;;  %v3611_v14 = vpop.permute.xlu0 %2224 }
 0x344   : > { %1705 = vrot.lane.b32.xlu1 %v1624_v10, %s2714_s16 }
 0x346   : > { %v1684_v12 = vpop.permute.xlu2 %1683 }
 0x347   : > { %1774 = vst.msk [vmem:[%s2974_s30 + $0x30] sm:$0xff] %vm1767_vm4, %v1684_v12  ;;  %v1572_v18 = vpop.f32.mrf.mxu3  ;;  %v2115_v12 = vpop.f32.mrf.mxu2 }
 0x348   : > { %2287 = vst.msk [vmem:[%s2974_s30 + $0x30] sm:$0xff] %vm2280_vm5, %v3491_v1  ;;  %v1573_v15 = vadd.f32 %v3607_v45, %v1572_v18 }
 0x34a   : > { %v1625_v32 = vmax.f32 %v1573_v15, 0.0  ;;  %v3620_v20 = vpop.permute.xlu1 %2226 }
 0x34c   : > { %1707 = vrot.lane.b32.xlu2 %v1625_v32, %s2714_s16 }
 0x34e   : > { %v1680_v35 = vpop.permute.xlu0 %1679 }
 0x34f   : > { %1772 = vst.msk [vmem:[%s2974_s30 + $0x20] sm:$0xff] %vm1767_vm4, %v1680_v35  ;;  %v1574_v24 = vpop.f32.mrf.mxu3 }
 0x350   : > { %2285 = vst.msk [vmem:[%s2974_s30 + $0x20] sm:$0xff] %vm2280_vm5, %v3444_v5  ;;  %v1575_v1 = vadd.f32 %v3607_v45, %v1574_v24 }
 0x352   : > { %v1626_v25 = vmax.f32 %v1575_v1, 0.0  ;;  %v3629_v26 = vpop.permute.xlu2 %2234  ;;  %v2117_v1 = vpop.f32.mrf.mxu2 }
 0x354   : > { %1709 = vrot.lane.b32.xlu0 %v1626_v25, %s2714_s16  ;;  %v2118_v25 = vadd.f32 %v3607_v45, %v2117_v1 }
 0x356   : > { %v1682_v27 = vpop.permute.xlu1 %1681 }
 0x357   : > { %1773 = vst.msk [vmem:[%s2974_s30 + $0x28] sm:$0xff] %vm1767_vm4, %v1682_v27  ;;  %v1577_v28 = vpop.f32.mrf.mxu3 }
 0x358   : > { %2286 = vst.msk [vmem:[%s2974_s30 + $0x28] sm:$0xff] %vm2280_vm5, %v3482_v54  ;;  %v1578_v5 = vadd.f32 %v3607_v45, %v1577_v28 }
 0x35a   : > { %v1627_v30 = vmax.f32 %v1578_v5, 0.0  ;;  %v3638_v31 = vpop.permute.xlu0 %2230  ;;  %v2151_v5 = vmax.f32 %v2118_v25, 0.0 }
 0x35c   : > { %1711 = vrot.lane.b32.xlu1 %v1627_v30, %s2714_s16 }
 0x35e   : > { %v1690_v36 = vpop.permute.xlu2 %1689 }
 0x35f   : > { %1777 = vst.msk [vmem:[%s2974_s30 + $0x48] sm:$0xff] %vm1767_vm4, %v1690_v36  ;;  %v1579_v33 = vpop.f32.mrf.mxu3  ;;  %v2113_v36 = vadd.f32 %v3607_v45, %v2112_v34 }
 0x360   : > { %2290 = vst.msk [vmem:[%s2974_s30 + $0x48] sm:$0xff] %vm2280_vm5, %v3520_v47  ;;  %v1580_v54 = vadd.f32 %v3607_v45, %v1579_v33 }
 0x362   : > { %v1628_v21 = vmax.f32 %v1580_v54, 0.0  ;;  %v3647_v37 = vpop.permute.xlu1 %2232 }
 0x364   : > { %1713 = vrot.lane.b32.xlu2 %v1628_v21, %s2714_s16 }
 0x366   : > { %v1686_v38 = vpop.permute.xlu0 %1685 }
 0x367   : > { %1775 = vst.msk [vmem:[%s2974_s30 + $0x38] sm:$0xff] %vm1767_vm4, %v1686_v38  ;;  %v1582_v39 = vpop.f32.mrf.mxu3 }
 0x368   : > { %2288 = vst.msk [vmem:[%s2974_s30 + $0x38] sm:$0xff] %vm2280_vm5, %v3472_v46  ;;  %v1583_v47 = vadd.f32 %v3607_v45, %v1582_v39 }
 0x36a   : > { %v1629_v40 = vmax.f32 %v1583_v47, 0.0  ;;  %v3656_v43 = vpop.permute.xlu2 %2240 }
 0x36c   : > { %1715 = vrot.lane.b32.xlu0 %v1629_v40, %s2714_s16 }
 0x36e   : > { %v1688_v41 = vpop.permute.xlu1 %1687 }
 0x36f   : > { %1776 = vst.msk [vmem:[%s2974_s30 + $0x40] sm:$0xff] %vm1767_vm4, %v1688_v41  ;;  %v1584_v19 = vpop.f32.mrf.mxu3 }
 0x370   : > { %2289 = vst.msk [vmem:[%s2974_s30 + $0x40] sm:$0xff] %vm2280_vm5, %v3510_v0  ;;  %v1585_v46 = vadd.f32 %v3607_v45, %v1584_v19 }
 0x372   : > { %v1630_v44 = vmax.f32 %v1585_v46, 0.0  ;;  %v3665_v48 = vpop.permute.xlu0 %2236 }
 0x374   : > { %1717 = vrot.lane.b32.xlu1 %v1630_v44, %s2714_s16 }
 0x376   : > { %v1696_v49 = vpop.permute.xlu2 %1695 }
 0x377   : > { %1780 = vst.msk [vmem:[%s2974_s30 + $0x60] sm:$0xff] %vm1767_vm4, %v1696_v49  ;;  %v1587_v13 = vpop.f32.mrf.mxu3 }
 0x378   : > { %2293 = vst.msk [vmem:[%s2974_s30 + $0x60] sm:$0xff] %vm2280_vm5, %v3546_v23  ;;  %v1588_v0 = vadd.f32 %v3607_v45, %v1587_v13 }
 0x37a   : > { %v1631_v57 = vmax.f32 %v1588_v0, 0.0  ;;  %v3674_v50 = vpop.permute.xlu1 %2238 }
 0x37c   : > { %1719 = vrot.lane.b32.xlu2 %v1631_v57, %s2714_s16 }
 0x37e   : > { %v1692_v22 = vpop.permute.xlu0 %1691 }
 0x37f   : > { %1778 = vst.msk [vmem:[%s2974_s30 + $0x50] sm:$0xff] %vm1767_vm4, %v1692_v22  ;;  %v1589_v52 = vpop.f32.mrf.mxu3 }
 0x380   : > { %2291 = vst.msk [vmem:[%s2974_s30 + $0x50] sm:$0xff] %vm2280_vm5, %v3501_v11  ;;  %v1590_v42 = vadd.f32 %v3607_v45, %v1589_v52 }
 0x382   : > { %v1632_v53 = vmax.f32 %v1590_v42, 0.0 }
 0x384   : > { %1721 = vrot.lane.b32.xlu0 %v1632_v53, %s2714_s16 }
 0x386   : > { %v1694_v23 = vpop.permute.xlu1 %1693 }
 0x387   : > { %1779 = vst.msk [vmem:[%s2974_s30 + $0x58] sm:$0xff] %vm1767_vm4, %v1694_v23  ;;  %v1592_v56 = vpop.f32.mrf.mxu3 }
 0x388   : > { %2292 = vst.msk [vmem:[%s2974_s30 + $0x58] sm:$0xff] %vm2280_vm5, %v3537_v6  ;;  %v1593_v60 = vadd.f32 %v3607_v45, %v1592_v56 }
 0x38a   : > { %v1633_v58 = vmax.f32 %v1593_v60, 0.0 }
 0x38c   : > { %1723 = vrot.lane.b32.xlu1 %v1633_v58, %s2714_s16 }
 0x38e   : > { %v1702_v11 = vpop.permute.xlu2 %1701 }
 0x38f   : > { %1783 = vst.msk [vmem:[%s2974_s30 + $0x78] sm:$0xff] %vm1767_vm4, %v1702_v11  ;;  %v1594_v59 = vpop.f32.mrf.mxu3 }
 0x390   : > { %2296 = vst.msk [vmem:[%s2974_s30 + $0x78] sm:$0xff] %vm2280_vm5, %v3576_v17  ;;  %v1595_v62 = vadd.f32 %v3607_v45, %v1594_v59 }
 0x392   : > { %v1634_v63 = vmax.f32 %v1595_v62, 0.0 }
 0x394   : > { %1725 = vrot.lane.b32.xlu2 %v1634_v63, %s2714_s16 }
 0x396   : > { %v1698_v6 = vpop.permute.xlu0 %1697 }
 0x397   : > { %1781 = vst.msk [vmem:[%s2974_s30 + $0x68] sm:$0xff] %vm1767_vm4, %v1698_v6  ;;  %v1597_v2 = vpop.f32.mrf.mxu3 }
 0x398   : > { %2294 = vst.msk [vmem:[%s2974_s30 + $0x68] sm:$0xff] %vm2280_vm5, %v3539_v7  ;;  %v1598_v29 = vadd.f32 %v3607_v45, %v1597_v2  ;;  %v2116_v7 = vadd.f32 %v3607_v45, %v2115_v12 }
 0x39a   : > { %v1635_v9 = vmax.f32 %v1598_v29, 0.0 }
 0x39c   : > { %1727 = vrot.lane.b32.xlu0 %v1635_v9, %s2714_s16 }
 0x39e   : > { %v1700_v17 = vpop.permute.xlu1 %1699 }
 0x39f   : > { %1782 = vst.msk [vmem:[%s2974_s30 + $0x70] sm:$0xff] %vm1767_vm4, %v1700_v17  ;;  %v1599_v51 = vpop.f32.mrf.mxu3 }
 0x3a0   : > { %2295 = vst.msk [vmem:[%s2974_s30 + $0x70] sm:$0xff] %vm2280_vm5, %v3571_v8  ;;  %v1600_v10 = vadd.f32 %v3607_v45, %v1599_v51  ;;  %v2150_v8 = vmax.f32 %v2116_v7, 0.0 }
 0x3a2   : > { %v1636_v18 = vmax.f32 %v1600_v10, 0.0 }
 0x3a4   : > { %1729 = vrot.lane.b32.xlu1 %v1636_v18, %s2714_s16 }
 0x3a6   : > { %v1708_v15 = vpop.permute.xlu2 %1707 }
 0x3a7   : > { %1786 = vst.msk [vmem:[%s2974_s30 + $0x90] sm:$0xff] %vm1767_vm4, %v1708_v15  ;;  %v1602_v32 = vpop.f32.mrf.mxu3 }
 0x3a8   : > { %2299 = vst.msk [vmem:[%s2974_s30 + $0x90] sm:$0xff] %vm2280_vm5, %v3588_v61  ;;  %v1603_v35 = vadd.f32 %v3607_v45, %v1602_v32 }
 0x3aa   : > { %v1637_v24 = vmax.f32 %v1603_v35, 0.0 }
 0x3ac   : > { %2244 = vrot.lane.b32.xlu1 %v2150_v8, %s2713_s8  ;;  %1731 = vrot.lane.b32.xlu2 %v1637_v24, %s2714_s16 }
 0x3ae   : > { %v1704_v27 = vpop.permute.xlu0 %1703 }
 0x3af   : > { %1784 = vst.msk [vmem:[%s2974_s30 + $0x80] sm:$0xff] %vm1767_vm4, %v1704_v27  ;;  %v1604_v28 = vpop.f32.mrf.mxu3 }
 0x3b0   : > { %2297 = vst.msk [vmem:[%s2974_s30 + $0x80] sm:$0xff] %vm2280_vm5, %v3548_v4  ;;  %v1605_v61 = vadd.f32 %v3607_v45, %v1604_v28  ;;  %v2149_v4 = vmax.f32 %v2113_v36, 0.0 }
 0x3b2   : > { %v1638_v30 = vmax.f32 %v1605_v61, 0.0 }
 0x3b4   : > { %1733 = vrot.lane.b32.xlu0 %v1638_v30, %s2714_s16  ;;  %2246 = vrot.lane.b32.xlu2 %v2151_v5, %s2713_s8 }
 0x3b6   : > { %v1706_v33 = vpop.permute.xlu1 %1705 }
 0x3b7   : > { %1785 = vst.msk [vmem:[%s2974_s30 + $0x88] sm:$0xff] %vm1767_vm4, %v1706_v33 }
 0x3b8   : > { %2298 = vst.msk [vmem:[%s2974_s30 + $0x88] sm:$0xff] %vm2280_vm5, %v3579_v55 }
 0x3bc   : > { %2242 = vrot.lane.b32.xlu0 %v2149_v4, %s2713_s8 }
 0x3be   : > { %v1714_v54 = vpop.permute.xlu2 %1713 }
 0x3bf   : > { %1789 = vst.msk [vmem:[%s2974_s30 + $0xa8] sm:$0xff] %vm1767_vm4, %v1714_v54 }
 0x3c0   : > { %2302 = vst.msk [vmem:[%s2974_s30 + $0xa8] sm:$0xff] %vm2280_vm5, %v3620_v20 }
 0x3c6   : > { %v1710_v45 = vpop.permute.xlu0 %1709 }
 0x3c7   : > { %1787 = vst.msk [vmem:[%s2974_s30 + $0x98] sm:$0xff] %vm1767_vm4, %v1710_v45 }
 0x3c8   : > { %2300 = vst.msk [vmem:[%s2974_s30 + $0x98] sm:$0xff] %vm2280_vm5, %v3573_v16 }
 0x3ce   : > { %v1712_v55 = vpop.permute.xlu1 %1711 }
 0x3cf   : > { %1788 = vst.msk [vmem:[%s2974_s30 + $0xa0] sm:$0xff] %vm1767_vm4, %v1712_v55 }
 0x3d0   : > { %2301 = vst.msk [vmem:[%s2974_s30 + $0xa0] sm:$0xff] %vm2280_vm5, %v3611_v14 }
 0x3d6   : > { %v1720_v21 = vpop.permute.xlu2 %1719 }
 0x3d7   : > { %1792 = vst.msk [vmem:[%s2974_s30 + $0xc0] sm:$0xff] %vm1767_vm4, %v1720_v21 }
 0x3d8   : > { %2305 = vst.msk [vmem:[%s2974_s30 + $0xc0] sm:$0xff] %vm2280_vm5, %v3647_v37 }
 0x3de   : > { %v1716_v20 = vpop.permute.xlu0 %1715 }
 0x3df   : > { %1790 = vst.msk [vmem:[%s2974_s30 + $0xb0] sm:$0xff] %vm1767_vm4, %v1716_v20 }
 0x3e0   : > { %2303 = vst.msk [vmem:[%s2974_s30 + $0xb0] sm:$0xff] %vm2280_vm5, %v3597_v3 }
 0x3e6   : > { %v1718_v16 = vpop.permute.xlu1 %1717 }
 0x3e7   : > { %1791 = vst.msk [vmem:[%s2974_s30 + $0xb8] sm:$0xff] %vm1767_vm4, %v1718_v16 }
 0x3e8   : > { %2304 = vst.msk [vmem:[%s2974_s30 + $0xb8] sm:$0xff] %vm2280_vm5, %v3638_v31 }
 0x3ee   : > { %v1726_v14 = vpop.permute.xlu2 %1725 }
 0x3ef   : > { %1795 = vst.msk [vmem:[%s2974_s30 + $0xd8] sm:$0xff] %vm1767_vm4, %v1726_v14 }
 0x3f0   : > { %2308 = vst.msk [vmem:[%s2974_s30 + $0xd8] sm:$0xff] %vm2280_vm5, %v3674_v50 }
 0x3f6   : > { %v1722_v37 = vpop.permute.xlu0 %1721 }
 0x3f7   : > { %1793 = vst.msk [vmem:[%s2974_s30 + $0xc8] sm:$0xff] %vm1767_vm4, %v1722_v37 }
 0x3f8   : > { %2306 = vst.msk [vmem:[%s2974_s30 + $0xc8] sm:$0xff] %vm2280_vm5, %v3629_v26 }
 0x3fe   : > { %v1724_v3 = vpop.permute.xlu1 %1723 }
 0x3ff   : > { %1794 = vst.msk [vmem:[%s2974_s30 + $0xd0] sm:$0xff] %vm1767_vm4, %v1724_v3 }
 0x400   : > { %2307 = vst.msk [vmem:[%s2974_s30 + $0xd0] sm:$0xff] %vm2280_vm5, %v3665_v48 }
 0x406   : > { %v1732_v31 = vpop.permute.xlu2 %1731 }
 0x407   : > { %1798 = vst.msk [vmem:[%s2974_s30 + $0xf0] sm:$0xff] %vm1767_vm4, %v1732_v31 }
 0x40e   : > { %v1728_v38 = vpop.permute.xlu0 %1727  ;;  %v2247_v40 = vpop.permute.xlu2 %2246 }
 0x40f   : > { %1796 = vst.msk [vmem:[%s2974_s30 + $0xe0] sm:$0xff] %vm1767_vm4, %v1728_v38 }
 0x410   : > { %2309 = vst.msk [vmem:[%s2974_s30 + $0xe0] sm:$0xff] %vm2280_vm5, %v3656_v43 }
 0x416   : > { %v1730_v39 = vpop.permute.xlu1 %1729 }
 0x417   : > { %1797 = vst.msk [vmem:[%s2974_s30 + $0xe8] sm:$0xff] %vm1767_vm4, %v1730_v39 }
 0x41e   : > { %v2245_v26 = vpop.permute.xlu1 %2244 }
 0x41f   : > { %2311 = vst.msk [vmem:[%s2974_s30 + $0xf0] sm:$0xff] %vm2280_vm5, %v2245_v26 }
 0x426   : > { %v1734_v47 = vpop.permute.xlu0 %1733 }
 0x427   : > { %1799 = vst.msk [vmem:[%s2974_s30 + $0xf8] sm:$0xff] %vm1767_vm4, %v1734_v47 }
 0x428   : > { %2312 = vst.msk [vmem:[%s2974_s30 + $0xf8] sm:$0xff] %vm2280_vm5, %v2247_v40 }
 0x42e   : > { %v2243_v41 = vpop.permute.xlu0 %2242 }
 0x42f   : > { %2310 = vst.msk [vmem:[%s2974_s30 + $0xe8] sm:$0xff] %vm2280_vm5, %v2243_v41 }
 0x430 PF: > { %s15_s18 = sadd.s32 1, %s2707_s18  }
 0x431   : > { %p12_p4 = scmp.ge.s32.totalorder %s15_s18, 4  }
 0x433   :  { %14 = sbr.rel (!%p12_p4) target bundleno = 1 (0x1), region = 70 }

</bundles_post_ra>
